<compile_context>
chip_gen: v7x
topology: tpu7x:2x2x1
jax: 0.10.0
libtpu: 0.0.40
codegen_flags: <defaults>
</compile_context>

<pallas_src>
import jax
import jax.numpy as jnp
from jax import lax
from jax.experimental import pallas as pl
from jax.experimental.pallas import tpu as pltpu


def _round_up(x, m):
    return (x + m - 1) // m * m


def _rnn_predictor_kernel(x_ref,      # VMEM (T,  Bt)     inputs, batch-on-lanes
                          vecs_ref,   # VMEM (V,  Bt)     [w_ih | b_ih+b_hh | fc_w | h0 | fc_b]
                          w_hh_ref,   # VMEM (Hj, Hi, Bt) recurrent weights, contraction dim major
                          out_ref):   # VMEM (1,  Bt)
    H = w_hh_ref.shape[0]
    T = x_ref.shape[0]
    Hs = (H + 7) // 8 * 8            # sublane-aligned field stride inside vecs_ref

    w_ih = vecs_ref[0 * Hs:0 * Hs + H, :]        # (H, Bt)
    bias = vecs_ref[1 * Hs:1 * Hs + H, :]        # (H, Bt)  = b_ih + b_hh (pre-summed)
    fc_w = vecs_ref[2 * Hs:2 * Hs + H, :]        # (H, Bt)
    h    = vecs_ref[3 * Hs:3 * Hs + H, :]        # (H, Bt)  initial hidden state
    fc_b = vecs_ref[4 * Hs:4 * Hs + 1, :]        # (1, Bt)

    # Fully unrolled recurrence (T, H static & small).  Each j-step is one lane-dense
    # (H, Bt) plane load + VPU multiply-accumulate; hh lives entirely in vregs.
    for t in range(T):
        hh = x_ref[t:t + 1, :] * w_ih + bias      # (H, Bt): xb_t seeds the accumulator
        for j in range(H):
            # hh[i, b] += w_hh[b, i, j] * h[j, b]
            hh = hh + w_hh_ref[j] * h[j:j + 1, :]
        h = jnp.tanh(hh)                          # EUP

    # prediction[b] = sum_i h[i,b] * fc_w[i,b] + fc_b[b]   (one cheap sublane reduce)
    out_ref[...] = jnp.sum(h * fc_w, axis=0, keepdims=True) + fc_b


def _unpack_coefficients(coefficients, hidden_size):
    B = coefficients.shape[0]
    H = hidden_size
    total = H * 5 + 1 + H * H
    assert coefficients.shape[1] == total, (
        "Coefficients tensor size must match the total size needed")
    idx = 0
    w_ih = coefficients[:, idx:idx + H];                       idx += H
    w_hh = coefficients[:, idx:idx + H * H].reshape(B, H, H);  idx += H * H
    b_ih = coefficients[:, idx:idx + H];                       idx += H
    b_hh = coefficients[:, idx:idx + H];                       idx += H
    fc_w = coefficients[:, idx:idx + H];                       idx += H
    fc_b = coefficients[:, idx:idx + 1];                       idx += 1
    h0   = coefficients[:, idx:idx + H];                       idx += H
    return w_ih, w_hh, b_ih, b_hh, fc_w, fc_b, h0


def rnn_predictor(coefficients, last_n_inputs, hidden_size, *, b_tile=None):
    coefficients = coefficients.astype(jnp.float32)
    last_n_inputs = last_n_inputs.astype(jnp.float32)
    B = coefficients.shape[0]
    T = last_n_inputs.shape[1]
    H = hidden_size
    LANE = 128

    w_ih, w_hh, b_ih, b_hh, fc_w, fc_b, h0 = _unpack_coefficients(coefficients, H)

    # ---- batch-on-lanes operand prep ------------------------------------------------
    Hs = _round_up(H, 8)             # 8-row (sublane) aligned field stride

    def field(a):                    # (B, H) -> (Hs, B), zero-padded rows
        a = a.T
        if Hs != H:
            a = jnp.pad(a, ((0, Hs - H), (0, 0)))
        return a

    vecs_t = jnp.concatenate(
        [field(w_ih), field(b_ih + b_hh), field(fc_w), field(h0), fc_b.T], axis=0)
    V = 4 * Hs + 1                                    # (V, B)
    x_t = last_n_inputs.T                             # (T, B)
    w_hh_t = jnp.transpose(w_hh, (2, 1, 0))           # (Hj, Hi, B): j-slice is contiguous

    # ---- tile sizing: VMEM budget + >=2 grid programs when batch allows --------------
    per_lane_bytes = 2 * 4 * (H * H + T + V + 1)      # double-buffered f32 bytes / batch lane
    if b_tile is None:
        budget = 20 * 1024 * 1024                     # double-buffered block budget
        cap = max(LANE, (budget // per_lane_bytes) // LANE * LANE)
        cap = min(cap, 1024)                          # bound padding waste / per-step work
        B_ceil = _round_up(B, LANE)
        if B_ceil >= 2 * LANE:
            target = _round_up((B_ceil + 1) // 2, LANE)   # >=2 programs -> both TCs on v7x
        else:
            target = B_ceil
        b_tile = min(cap, target)
    else:
        b_tile = max(LANE, _round_up(b_tile, LANE))   # last block dim must be 128-aligned

    B_pad = _round_up(B, b_tile)
    if B_pad != B:
        pad = ((0, 0), (0, B_pad - B))
        x_in = jnp.pad(x_t, pad)
        vecs_in = jnp.pad(vecs_t, pad)
        w_hh_in = jnp.pad(w_hh_t, ((0, 0), (0, 0), (0, B_pad - B)))
    else:
        x_in, vecs_in, w_hh_in = x_t, vecs_t, w_hh_t

    est_bytes = per_lane_bytes * b_tile + 4 * b_tile * 4 * H     # blocks + in-kernel temps
    vmem_limit = int(min(32 * 1024 * 1024, max(16 * 1024 * 1024, est_bytes + 8 * 1024 * 1024)))

    out = pl.pallas_call(
        _rnn_predictor_kernel,
        out_shape=jax.ShapeDtypeStruct((1, B_pad), jnp.float32),
        grid=(B_pad // b_tile,),
        in_specs=[
            pl.BlockSpec((T, b_tile), lambda i: (0, i)),         # inputs
            pl.BlockSpec((V, b_tile), lambda i: (0, i)),         # packed small vectors
            pl.BlockSpec((H, H, b_tile), lambda i: (0, 0, i)),   # w_hh (j, i, b)
        ],
        out_specs=pl.BlockSpec((1, b_tile), lambda i: (0, i)),
        compiler_params=pltpu.CompilerParams(
            dimension_semantics=("parallel",),
            vmem_limit_bytes=vmem_limit),
    )(x_in, vecs_in, w_hh_in)

    return out[:, :B].T                                           # (B, 1)


def rnn_predictor_ref(coefficients, last_n_inputs, hidden_size):
    """Pure-JAX reference mirroring the PyTorch forward."""
    coefficients = coefficients.astype(jnp.float32)
    last_n_inputs = last_n_inputs.astype(jnp.float32)
    T = last_n_inputs.shape[1]
    w_ih, w_hh, b_ih, b_hh, fc_w, fc_b, h0 = _unpack_coefficients(
        coefficients, hidden_size)
    h = h0                                                        # (B, H)
    for t in range(T):
        x_t = last_n_inputs[:, t:t + 1]                           # (B, 1)
        hh = jnp.einsum("bj,bij->bi", h, w_hh,
                        precision=lax.Precision.HIGHEST)          # (B, H)
        h = jnp.tanh(x_t * w_ih + b_ih + hh + b_hh)
    return jnp.sum(h * fc_w, axis=1, keepdims=True) + fc_b        # (B, 1)


if __name__ == "__main__":
    # B=200 with the default b_tile=128 gives a 2-step grid and exercises batch padding.
    B, H, T = 200, 32, 8
    total = H * 5 + 1 + H * H

    key = jax.random.PRNGKey(0)
    k_coef, k_x = jax.random.split(key)
    # Small scale keeps tanh away from saturation so numerical comparison is meaningful.
    coefficients = 0.1 * jax.random.normal(k_coef, (B, total), dtype=jnp.float32)
    last_n_inputs = jax.random.normal(k_x, (B, T), dtype=jnp.float32)

    out = rnn_predictor(coefficients, last_n_inputs, H)
    out = jax.block_until_ready(out)

    ref = rnn_predictor_ref(coefficients, last_n_inputs, H)
    assert out.shape == (B, 1), out.shape
    assert jnp.allclose(out, ref, atol=1e-4, rtol=1e-4), (out, ref)

    print("KERNEL_OK")
</pallas_src>

<mosaic_0001>
module attributes {stable_mosaic.version = 11 : i64} {
  func.func @_rnn_predictor_kernel(%arg0: i32, %arg1: memref<8x128xf32, #tpu.memory_space<vmem>>, %arg2: memref<129x128xf32, #tpu.memory_space<vmem>>, %arg3: memref<32x32x128xf32, #tpu.memory_space<vmem>>, %arg4: memref<1x128xf32, #tpu.memory_space<vmem>>) attributes {dimension_semantics = [#tpu.dimension_semantics<parallel>], iteration_bounds = array<i64: 2>, scalar_prefetch = 0 : i64, scratch_operands = 0 : i64, tpu.core_type = #tpu.core_type<tc>, window_params = [{transform_indices = @transform_0, window_bounds = array<i64: 8, 128>}, {transform_indices = @transform_1, window_bounds = array<i64: 129, 128>}, {transform_indices = @transform_2, window_bounds = array<i64: 32, 32, 128>}, {transform_indices = @transform_3, window_bounds = array<i64: 1, 128>}]} {
    %c0 = arith.constant 0 : index
    %c0_0 = arith.constant 0 : index
    %0 = vector.load %arg2[%c0, %c0_0] : memref<129x128xf32, #tpu.memory_space<vmem>>, vector<32x128xf32>
    %c32 = arith.constant 32 : index
    %c0_1 = arith.constant 0 : index
    %1 = vector.load %arg2[%c32, %c0_1] : memref<129x128xf32, #tpu.memory_space<vmem>>, vector<32x128xf32>
    %c64 = arith.constant 64 : index
    %c0_2 = arith.constant 0 : index
    %2 = vector.load %arg2[%c64, %c0_2] : memref<129x128xf32, #tpu.memory_space<vmem>>, vector<32x128xf32>
    %c96 = arith.constant 96 : index
    %c0_3 = arith.constant 0 : index
    %3 = vector.load %arg2[%c96, %c0_3] : memref<129x128xf32, #tpu.memory_space<vmem>>, vector<32x128xf32>
    %c128 = arith.constant 128 : index
    %c0_4 = arith.constant 0 : index
    %4 = vector.load %arg2[%c128, %c0_4] : memref<129x128xf32, #tpu.memory_space<vmem>>, vector<1x128xf32>
    %c0_5 = arith.constant 0 : index
    %c0_6 = arith.constant 0 : index
    %5 = vector.load %arg1[%c0_5, %c0_6] : memref<8x128xf32, #tpu.memory_space<vmem>>, vector<1x128xf32>
    %6 = vector.broadcast %5 : vector<1x128xf32> to vector<32x128xf32>
    %7 = arith.mulf %6, %0 : vector<32x128xf32>
    %8 = arith.addf %7, %1 : vector<32x128xf32>
    %c0_7 = arith.constant 0 : index
    %c0_8 = arith.constant 0 : index
    %c0_9 = arith.constant 0 : index
    %9 = vector.load %arg3[%c0_7, %c0_8, %c0_9] : memref<32x32x128xf32, #tpu.memory_space<vmem>>, vector<1x32x128xf32>
    %10 = vector.shape_cast %9 : vector<1x32x128xf32> to vector<32x128xf32>
    %11 = vector.extract_strided_slice %3 {offsets = [0, 0], sizes = [1, 128], strides = [1, 1]} : vector<32x128xf32> to vector<1x128xf32>
    %12 = vector.broadcast %11 : vector<1x128xf32> to vector<32x128xf32>
    %13 = arith.mulf %10, %12 : vector<32x128xf32>
    %14 = arith.addf %8, %13 : vector<32x128xf32>
    %c1 = arith.constant 1 : index
    %c0_10 = arith.constant 0 : index
    %c0_11 = arith.constant 0 : index
    %15 = vector.load %arg3[%c1, %c0_10, %c0_11] : memref<32x32x128xf32, #tpu.memory_space<vmem>>, vector<1x32x128xf32>
    %16 = vector.shape_cast %15 : vector<1x32x128xf32> to vector<32x128xf32>
    %17 = vector.extract_strided_slice %3 {offsets = [1, 0], sizes = [1, 128], strides = [1, 1]} : vector<32x128xf32> to vector<1x128xf32>
    %18 = vector.broadcast %17 : vector<1x128xf32> to vector<32x128xf32>
    %19 = arith.mulf %16, %18 : vector<32x128xf32>
    %20 = arith.addf %14, %19 : vector<32x128xf32>
    %c2 = arith.constant 2 : index
    %c0_12 = arith.constant 0 : index
    %c0_13 = arith.constant 0 : index
    %21 = vector.load %arg3[%c2, %c0_12, %c0_13] : memref<32x32x128xf32, #tpu.memory_space<vmem>>, vector<1x32x128xf32>
    %22 = vector.shape_cast %21 : vector<1x32x128xf32> to vector<32x128xf32>
    %23 = vector.extract_strided_slice %3 {offsets = [2, 0], sizes = [1, 128], strides = [1, 1]} : vector<32x128xf32> to vector<1x128xf32>
    %24 = vector.broadcast %23 : vector<1x128xf32> to vector<32x128xf32>
    %25 = arith.mulf %22, %24 : vector<32x128xf32>
    %26 = arith.addf %20, %25 : vector<32x128xf32>
    %c3 = arith.constant 3 : index
    %c0_14 = arith.constant 0 : index
    %c0_15 = arith.constant 0 : index
    %27 = vector.load %arg3[%c3, %c0_14, %c0_15] : memref<32x32x128xf32, #tpu.memory_space<vmem>>, vector<1x32x128xf32>
    %28 = vector.shape_cast %27 : vector<1x32x128xf32> to vector<32x128xf32>
    %29 = vector.extract_strided_slice %3 {offsets = [3, 0], sizes = [1, 128], strides = [1, 1]} : vector<32x128xf32> to vector<1x128xf32>
    %30 = vector.broadcast %29 : vector<1x128xf32> to vector<32x128xf32>
    %31 = arith.mulf %28, %30 : vector<32x128xf32>
    %32 = arith.addf %26, %31 : vector<32x128xf32>
    %c4 = arith.constant 4 : index
    %c0_16 = arith.constant 0 : index
    %c0_17 = arith.constant 0 : index
    %33 = vector.load %arg3[%c4, %c0_16, %c0_17] : memref<32x32x128xf32, #tpu.memory_space<vmem>>, vector<1x32x128xf32>
    %34 = vector.shape_cast %33 : vector<1x32x128xf32> to vector<32x128xf32>
    %35 = vector.extract_strided_slice %3 {offsets = [4, 0], sizes = [1, 128], strides = [1, 1]} : vector<32x128xf32> to vector<1x128xf32>
    %36 = vector.broadcast %35 : vector<1x128xf32> to vector<32x128xf32>
    %37 = arith.mulf %34, %36 : vector<32x128xf32>
    %38 = arith.addf %32, %37 : vector<32x128xf32>
    %c5 = arith.constant 5 : index
    %c0_18 = arith.constant 0 : index
    %c0_19 = arith.constant 0 : index
    %39 = vector.load %arg3[%c5, %c0_18, %c0_19] : memref<32x32x128xf32, #tpu.memory_space<vmem>>, vector<1x32x128xf32>
    %40 = vector.shape_cast %39 : vector<1x32x128xf32> to vector<32x128xf32>
    %41 = vector.extract_strided_slice %3 {offsets = [5, 0], sizes = [1, 128], strides = [1, 1]} : vector<32x128xf32> to vector<1x128xf32>
    %42 = vector.broadcast %41 : vector<1x128xf32> to vector<32x128xf32>
    %43 = arith.mulf %40, %42 : vector<32x128xf32>
    %44 = arith.addf %38, %43 : vector<32x128xf32>
    %c6 = arith.constant 6 : index
    %c0_20 = arith.constant 0 : index
    %c0_21 = arith.constant 0 : index
    %45 = vector.load %arg3[%c6, %c0_20, %c0_21] : memref<32x32x128xf32, #tpu.memory_space<vmem>>, vector<1x32x128xf32>
    %46 = vector.shape_cast %45 : vector<1x32x128xf32> to vector<32x128xf32>
    %47 = vector.extract_strided_slice %3 {offsets = [6, 0], sizes = [1, 128], strides = [1, 1]} : vector<32x128xf32> to vector<1x128xf32>
    %48 = vector.broadcast %47 : vector<1x128xf32> to vector<32x128xf32>
    %49 = arith.mulf %46, %48 : vector<32x128xf32>
    %50 = arith.addf %44, %49 : vector<32x128xf32>
    %c7 = arith.constant 7 : index
    %c0_22 = arith.constant 0 : index
    %c0_23 = arith.constant 0 : index
    %51 = vector.load %arg3[%c7, %c0_22, %c0_23] : memref<32x32x128xf32, #tpu.memory_space<vmem>>, vector<1x32x128xf32>
    %52 = vector.shape_cast %51 : vector<1x32x128xf32> to vector<32x128xf32>
    %53 = vector.extract_strided_slice %3 {offsets = [7, 0], sizes = [1, 128], strides = [1, 1]} : vector<32x128xf32> to vector<1x128xf32>
    %54 = vector.broadcast %53 : vector<1x128xf32> to vector<32x128xf32>
    %55 = arith.mulf %52, %54 : vector<32x128xf32>
    %56 = arith.addf %50, %55 : vector<32x128xf32>
    %c8 = arith.constant 8 : index
    %c0_24 = arith.constant 0 : index
    %c0_25 = arith.constant 0 : index
    %57 = vector.load %arg3[%c8, %c0_24, %c0_25] : memref<32x32x128xf32, #tpu.memory_space<vmem>>, vector<1x32x128xf32>
    %58 = vector.shape_cast %57 : vector<1x32x128xf32> to vector<32x128xf32>
    %59 = vector.extract_strided_slice %3 {offsets = [8, 0], sizes = [1, 128], strides = [1, 1]} : vector<32x128xf32> to vector<1x128xf32>
    %60 = vector.broadcast %59 : vector<1x128xf32> to vector<32x128xf32>
    %61 = arith.mulf %58, %60 : vector<32x128xf32>
    %62 = arith.addf %56, %61 : vector<32x128xf32>
    %c9 = arith.constant 9 : index
    %c0_26 = arith.constant 0 : index
    %c0_27 = arith.constant 0 : index
    %63 = vector.load %arg3[%c9, %c0_26, %c0_27] : memref<32x32x128xf32, #tpu.memory_space<vmem>>, vector<1x32x128xf32>
    %64 = vector.shape_cast %63 : vector<1x32x128xf32> to vector<32x128xf32>
    %65 = vector.extract_strided_slice %3 {offsets = [9, 0], sizes = [1, 128], strides = [1, 1]} : vector<32x128xf32> to vector<1x128xf32>
    %66 = vector.broadcast %65 : vector<1x128xf32> to vector<32x128xf32>
    %67 = arith.mulf %64, %66 : vector<32x128xf32>
    %68 = arith.addf %62, %67 : vector<32x128xf32>
    %c10 = arith.constant 10 : index
    %c0_28 = arith.constant 0 : index
    %c0_29 = arith.constant 0 : index
    %69 = vector.load %arg3[%c10, %c0_28, %c0_29] : memref<32x32x128xf32, #tpu.memory_space<vmem>>, vector<1x32x128xf32>
    %70 = vector.shape_cast %69 : vector<1x32x128xf32> to vector<32x128xf32>
    %71 = vector.extract_strided_slice %3 {offsets = [10, 0], sizes = [1, 128], strides = [1, 1]} : vector<32x128xf32> to vector<1x128xf32>
    %72 = vector.broadcast %71 : vector<1x128xf32> to vector<32x128xf32>
    %73 = arith.mulf %70, %72 : vector<32x128xf32>
    %74 = arith.addf %68, %73 : vector<32x128xf32>
    %c11 = arith.constant 11 : index
    %c0_30 = arith.constant 0 : index
    %c0_31 = arith.constant 0 : index
    %75 = vector.load %arg3[%c11, %c0_30, %c0_31] : memref<32x32x128xf32, #tpu.memory_space<vmem>>, vector<1x32x128xf32>
    %76 = vector.shape_cast %75 : vector<1x32x128xf32> to vector<32x128xf32>
    %77 = vector.extract_strided_slice %3 {offsets = [11, 0], sizes = [1, 128], strides = [1, 1]} : vector<32x128xf32> to vector<1x128xf32>
    %78 = vector.broadcast %77 : vector<1x128xf32> to vector<32x128xf32>
    %79 = arith.mulf %76, %78 : vector<32x128xf32>
    %80 = arith.addf %74, %79 : vector<32x128xf32>
    %c12 = arith.constant 12 : index
    %c0_32 = arith.constant 0 : index
    %c0_33 = arith.constant 0 : index
    %81 = vector.load %arg3[%c12, %c0_32, %c0_33] : memref<32x32x128xf32, #tpu.memory_space<vmem>>, vector<1x32x128xf32>
    %82 = vector.shape_cast %81 : vector<1x32x128xf32> to vector<32x128xf32>
    %83 = vector.extract_strided_slice %3 {offsets = [12, 0], sizes = [1, 128], strides = [1, 1]} : vector<32x128xf32> to vector<1x128xf32>
    %84 = vector.broadcast %83 : vector<1x128xf32> to vector<32x128xf32>
    %85 = arith.mulf %82, %84 : vector<32x128xf32>
    %86 = arith.addf %80, %85 : vector<32x128xf32>
    %c13 = arith.constant 13 : index
    %c0_34 = arith.constant 0 : index
    %c0_35 = arith.constant 0 : index
    %87 = vector.load %arg3[%c13, %c0_34, %c0_35] : memref<32x32x128xf32, #tpu.memory_space<vmem>>, vector<1x32x128xf32>
    %88 = vector.shape_cast %87 : vector<1x32x128xf32> to vector<32x128xf32>
    %89 = vector.extract_strided_slice %3 {offsets = [13, 0], sizes = [1, 128], strides = [1, 1]} : vector<32x128xf32> to vector<1x128xf32>
    %90 = vector.broadcast %89 : vector<1x128xf32> to vector<32x128xf32>
    %91 = arith.mulf %88, %90 : vector<32x128xf32>
    %92 = arith.addf %86, %91 : vector<32x128xf32>
    %c14 = arith.constant 14 : index
    %c0_36 = arith.constant 0 : index
    %c0_37 = arith.constant 0 : index
    %93 = vector.load %arg3[%c14, %c0_36, %c0_37] : memref<32x32x128xf32, #tpu.memory_space<vmem>>, vector<1x32x128xf32>
    %94 = vector.shape_cast %93 : vector<1x32x128xf32> to vector<32x128xf32>
    %95 = vector.extract_strided_slice %3 {offsets = [14, 0], sizes = [1, 128], strides = [1, 1]} : vector<32x128xf32> to vector<1x128xf32>
    %96 = vector.broadcast %95 : vector<1x128xf32> to vector<32x128xf32>
    %97 = arith.mulf %94, %96 : vector<32x128xf32>
    %98 = arith.addf %92, %97 : vector<32x128xf32>
    %c15 = arith.constant 15 : index
    %c0_38 = arith.constant 0 : index
    %c0_39 = arith.constant 0 : index
    %99 = vector.load %arg3[%c15, %c0_38, %c0_39] : memref<32x32x128xf32, #tpu.memory_space<vmem>>, vector<1x32x128xf32>
    %100 = vector.shape_cast %99 : vector<1x32x128xf32> to vector<32x128xf32>
    %101 = vector.extract_strided_slice %3 {offsets = [15, 0], sizes = [1, 128], strides = [1, 1]} : vector<32x128xf32> to vector<1x128xf32>
    %102 = vector.broadcast %101 : vector<1x128xf32> to vector<32x128xf32>
    %103 = arith.mulf %100, %102 : vector<32x128xf32>
    %104 = arith.addf %98, %103 : vector<32x128xf32>
    %c16 = arith.constant 16 : index
    %c0_40 = arith.constant 0 : index
    %c0_41 = arith.constant 0 : index
    %105 = vector.load %arg3[%c16, %c0_40, %c0_41] : memref<32x32x128xf32, #tpu.memory_space<vmem>>, vector<1x32x128xf32>
    %106 = vector.shape_cast %105 : vector<1x32x128xf32> to vector<32x128xf32>
    %107 = vector.extract_strided_slice %3 {offsets = [16, 0], sizes = [1, 128], strides = [1, 1]} : vector<32x128xf32> to vector<1x128xf32>
    %108 = vector.broadcast %107 : vector<1x128xf32> to vector<32x128xf32>
    %109 = arith.mulf %106, %108 : vector<32x128xf32>
    %110 = arith.addf %104, %109 : vector<32x128xf32>
    %c17 = arith.constant 17 : index
    %c0_42 = arith.constant 0 : index
    %c0_43 = arith.constant 0 : index
    %111 = vector.load %arg3[%c17, %c0_42, %c0_43] : memref<32x32x128xf32, #tpu.memory_space<vmem>>, vector<1x32x128xf32>
    %112 = vector.shape_cast %111 : vector<1x32x128xf32> to vector<32x128xf32>
    %113 = vector.extract_strided_slice %3 {offsets = [17, 0], sizes = [1, 128], strides = [1, 1]} : vector<32x128xf32> to vector<1x128xf32>
    %114 = vector.broadcast %113 : vector<1x128xf32> to vector<32x128xf32>
    %115 = arith.mulf %112, %114 : vector<32x128xf32>
    %116 = arith.addf %110, %115 : vector<32x128xf32>
    %c18 = arith.constant 18 : index
    %c0_44 = arith.constant 0 : index
    %c0_45 = arith.constant 0 : index
    %117 = vector.load %arg3[%c18, %c0_44, %c0_45] : memref<32x32x128xf32, #tpu.memory_space<vmem>>, vector<1x32x128xf32>
    %118 = vector.shape_cast %117 : vector<1x32x128xf32> to vector<32x128xf32>
    %119 = vector.extract_strided_slice %3 {offsets = [18, 0], sizes = [1, 128], strides = [1, 1]} : vector<32x128xf32> to vector<1x128xf32>
    %120 = vector.broadcast %119 : vector<1x128xf32> to vector<32x128xf32>
    %121 = arith.mulf %118, %120 : vector<32x128xf32>
    %122 = arith.addf %116, %121 : vector<32x128xf32>
    %c19 = arith.constant 19 : index
    %c0_46 = arith.constant 0 : index
    %c0_47 = arith.constant 0 : index
    %123 = vector.load %arg3[%c19, %c0_46, %c0_47] : memref<32x32x128xf32, #tpu.memory_space<vmem>>, vector<1x32x128xf32>
    %124 = vector.shape_cast %123 : vector<1x32x128xf32> to vector<32x128xf32>
    %125 = vector.extract_strided_slice %3 {offsets = [19, 0], sizes = [1, 128], strides = [1, 1]} : vector<32x128xf32> to vector<1x128xf32>
    %126 = vector.broadcast %125 : vector<1x128xf32> to vector<32x128xf32>
    %127 = arith.mulf %124, %126 : vector<32x128xf32>
    %128 = arith.addf %122, %127 : vector<32x128xf32>
    %c20 = arith.constant 20 : index
    %c0_48 = arith.constant 0 : index
    %c0_49 = arith.constant 0 : index
    %129 = vector.load %arg3[%c20, %c0_48, %c0_49] : memref<32x32x128xf32, #tpu.memory_space<vmem>>, vector<1x32x128xf32>
    %130 = vector.shape_cast %129 : vector<1x32x128xf32> to vector<32x128xf32>
    %131 = vector.extract_strided_slice %3 {offsets = [20, 0], sizes = [1, 128], strides = [1, 1]} : vector<32x128xf32> to vector<1x128xf32>
    %132 = vector.broadcast %131 : vector<1x128xf32> to vector<32x128xf32>
    %133 = arith.mulf %130, %132 : vector<32x128xf32>
    %134 = arith.addf %128, %133 : vector<32x128xf32>
    %c21 = arith.constant 21 : index
    %c0_50 = arith.constant 0 : index
    %c0_51 = arith.constant 0 : index
    %135 = vector.load %arg3[%c21, %c0_50, %c0_51] : memref<32x32x128xf32, #tpu.memory_space<vmem>>, vector<1x32x128xf32>
    %136 = vector.shape_cast %135 : vector<1x32x128xf32> to vector<32x128xf32>
    %137 = vector.extract_strided_slice %3 {offsets = [21, 0], sizes = [1, 128], strides = [1, 1]} : vector<32x128xf32> to vector<1x128xf32>
    %138 = vector.broadcast %137 : vector<1x128xf32> to vector<32x128xf32>
    %139 = arith.mulf %136, %138 : vector<32x128xf32>
    %140 = arith.addf %134, %139 : vector<32x128xf32>
    %c22 = arith.constant 22 : index
    %c0_52 = arith.constant 0 : index
    %c0_53 = arith.constant 0 : index
    %141 = vector.load %arg3[%c22, %c0_52, %c0_53] : memref<32x32x128xf32, #tpu.memory_space<vmem>>, vector<1x32x128xf32>
    %142 = vector.shape_cast %141 : vector<1x32x128xf32> to vector<32x128xf32>
    %143 = vector.extract_strided_slice %3 {offsets = [22, 0], sizes = [1, 128], strides = [1, 1]} : vector<32x128xf32> to vector<1x128xf32>
    %144 = vector.broadcast %143 : vector<1x128xf32> to vector<32x128xf32>
    %145 = arith.mulf %142, %144 : vector<32x128xf32>
    %146 = arith.addf %140, %145 : vector<32x128xf32>
    %c23 = arith.constant 23 : index
    %c0_54 = arith.constant 0 : index
    %c0_55 = arith.constant 0 : index
    %147 = vector.load %arg3[%c23, %c0_54, %c0_55] : memref<32x32x128xf32, #tpu.memory_space<vmem>>, vector<1x32x128xf32>
    %148 = vector.shape_cast %147 : vector<1x32x128xf32> to vector<32x128xf32>
    %149 = vector.extract_strided_slice %3 {offsets = [23, 0], sizes = [1, 128], strides = [1, 1]} : vector<32x128xf32> to vector<1x128xf32>
    %150 = vector.broadcast %149 : vector<1x128xf32> to vector<32x128xf32>
    %151 = arith.mulf %148, %150 : vector<32x128xf32>
    %152 = arith.addf %146, %151 : vector<32x128xf32>
    %c24 = arith.constant 24 : index
    %c0_56 = arith.constant 0 : index
    %c0_57 = arith.constant 0 : index
    %153 = vector.load %arg3[%c24, %c0_56, %c0_57] : memref<32x32x128xf32, #tpu.memory_space<vmem>>, vector<1x32x128xf32>
    %154 = vector.shape_cast %153 : vector<1x32x128xf32> to vector<32x128xf32>
    %155 = vector.extract_strided_slice %3 {offsets = [24, 0], sizes = [1, 128], strides = [1, 1]} : vector<32x128xf32> to vector<1x128xf32>
    %156 = vector.broadcast %155 : vector<1x128xf32> to vector<32x128xf32>
    %157 = arith.mulf %154, %156 : vector<32x128xf32>
    %158 = arith.addf %152, %157 : vector<32x128xf32>
    %c25 = arith.constant 25 : index
    %c0_58 = arith.constant 0 : index
    %c0_59 = arith.constant 0 : index
    %159 = vector.load %arg3[%c25, %c0_58, %c0_59] : memref<32x32x128xf32, #tpu.memory_space<vmem>>, vector<1x32x128xf32>
    %160 = vector.shape_cast %159 : vector<1x32x128xf32> to vector<32x128xf32>
    %161 = vector.extract_strided_slice %3 {offsets = [25, 0], sizes = [1, 128], strides = [1, 1]} : vector<32x128xf32> to vector<1x128xf32>
    %162 = vector.broadcast %161 : vector<1x128xf32> to vector<32x128xf32>
    %163 = arith.mulf %160, %162 : vector<32x128xf32>
    %164 = arith.addf %158, %163 : vector<32x128xf32>
    %c26 = arith.constant 26 : index
    %c0_60 = arith.constant 0 : index
    %c0_61 = arith.constant 0 : index
    %165 = vector.load %arg3[%c26, %c0_60, %c0_61] : memref<32x32x128xf32, #tpu.memory_space<vmem>>, vector<1x32x128xf32>
    %166 = vector.shape_cast %165 : vector<1x32x128xf32> to vector<32x128xf32>
    %167 = vector.extract_strided_slice %3 {offsets = [26, 0], sizes = [1, 128], strides = [1, 1]} : vector<32x128xf32> to vector<1x128xf32>
    %168 = vector.broadcast %167 : vector<1x128xf32> to vector<32x128xf32>
    %169 = arith.mulf %166, %168 : vector<32x128xf32>
    %170 = arith.addf %164, %169 : vector<32x128xf32>
    %c27 = arith.constant 27 : index
    %c0_62 = arith.constant 0 : index
    %c0_63 = arith.constant 0 : index
    %171 = vector.load %arg3[%c27, %c0_62, %c0_63] : memref<32x32x128xf32, #tpu.memory_space<vmem>>, vector<1x32x128xf32>
    %172 = vector.shape_cast %171 : vector<1x32x128xf32> to vector<32x128xf32>
    %173 = vector.extract_strided_slice %3 {offsets = [27, 0], sizes = [1, 128], strides = [1, 1]} : vector<32x128xf32> to vector<1x128xf32>
    %174 = vector.broadcast %173 : vector<1x128xf32> to vector<32x128xf32>
    %175 = arith.mulf %172, %174 : vector<32x128xf32>
    %176 = arith.addf %170, %175 : vector<32x128xf32>
    %c28 = arith.constant 28 : index
    %c0_64 = arith.constant 0 : index
    %c0_65 = arith.constant 0 : index
    %177 = vector.load %arg3[%c28, %c0_64, %c0_65] : memref<32x32x128xf32, #tpu.memory_space<vmem>>, vector<1x32x128xf32>
    %178 = vector.shape_cast %177 : vector<1x32x128xf32> to vector<32x128xf32>
    %179 = vector.extract_strided_slice %3 {offsets = [28, 0], sizes = [1, 128], strides = [1, 1]} : vector<32x128xf32> to vector<1x128xf32>
    %180 = vector.broadcast %179 : vector<1x128xf32> to vector<32x128xf32>
    %181 = arith.mulf %178, %180 : vector<32x128xf32>
    %182 = arith.addf %176, %181 : vector<32x128xf32>
    %c29 = arith.constant 29 : index
    %c0_66 = arith.constant 0 : index
    %c0_67 = arith.constant 0 : index
    %183 = vector.load %arg3[%c29, %c0_66, %c0_67] : memref<32x32x128xf32, #tpu.memory_space<vmem>>, vector<1x32x128xf32>
    %184 = vector.shape_cast %183 : vector<1x32x128xf32> to vector<32x128xf32>
    %185 = vector.extract_strided_slice %3 {offsets = [29, 0], sizes = [1, 128], strides = [1, 1]} : vector<32x128xf32> to vector<1x128xf32>
    %186 = vector.broadcast %185 : vector<1x128xf32> to vector<32x128xf32>
    %187 = arith.mulf %184, %186 : vector<32x128xf32>
    %188 = arith.addf %182, %187 : vector<32x128xf32>
    %c30 = arith.constant 30 : index
    %c0_68 = arith.constant 0 : index
    %c0_69 = arith.constant 0 : index
    %189 = vector.load %arg3[%c30, %c0_68, %c0_69] : memref<32x32x128xf32, #tpu.memory_space<vmem>>, vector<1x32x128xf32>
    %190 = vector.shape_cast %189 : vector<1x32x128xf32> to vector<32x128xf32>
    %191 = vector.extract_strided_slice %3 {offsets = [30, 0], sizes = [1, 128], strides = [1, 1]} : vector<32x128xf32> to vector<1x128xf32>
    %192 = vector.broadcast %191 : vector<1x128xf32> to vector<32x128xf32>
    %193 = arith.mulf %190, %192 : vector<32x128xf32>
    %194 = arith.addf %188, %193 : vector<32x128xf32>
    %c31 = arith.constant 31 : index
    %c0_70 = arith.constant 0 : index
    %c0_71 = arith.constant 0 : index
    %195 = vector.load %arg3[%c31, %c0_70, %c0_71] : memref<32x32x128xf32, #tpu.memory_space<vmem>>, vector<1x32x128xf32>
    %196 = vector.shape_cast %195 : vector<1x32x128xf32> to vector<32x128xf32>
    %197 = vector.extract_strided_slice %3 {offsets = [31, 0], sizes = [1, 128], strides = [1, 1]} : vector<32x128xf32> to vector<1x128xf32>
    %198 = vector.broadcast %197 : vector<1x128xf32> to vector<32x128xf32>
    %199 = arith.mulf %196, %198 : vector<32x128xf32>
    %200 = arith.addf %194, %199 : vector<32x128xf32>
    %201 = math.tanh %200 : vector<32x128xf32>
    %c1_72 = arith.constant 1 : index
    %c0_73 = arith.constant 0 : index
    %202 = vector.load %arg1[%c1_72, %c0_73] : memref<8x128xf32, #tpu.memory_space<vmem>>, vector<1x128xf32>
    %203 = vector.broadcast %202 : vector<1x128xf32> to vector<32x128xf32>
    %204 = arith.mulf %203, %0 : vector<32x128xf32>
    %205 = arith.addf %204, %1 : vector<32x128xf32>
    %c0_74 = arith.constant 0 : index
    %c0_75 = arith.constant 0 : index
    %c0_76 = arith.constant 0 : index
    %206 = vector.load %arg3[%c0_74, %c0_75, %c0_76] : memref<32x32x128xf32, #tpu.memory_space<vmem>>, vector<1x32x128xf32>
    %207 = vector.shape_cast %206 : vector<1x32x128xf32> to vector<32x128xf32>
    %208 = vector.extract_strided_slice %201 {offsets = [0, 0], sizes = [1, 128], strides = [1, 1]} : vector<32x128xf32> to vector<1x128xf32>
    %209 = vector.broadcast %208 : vector<1x128xf32> to vector<32x128xf32>
    %210 = arith.mulf %207, %209 : vector<32x128xf32>
    %211 = arith.addf %205, %210 : vector<32x128xf32>
    %c1_77 = arith.constant 1 : index
    %c0_78 = arith.constant 0 : index
    %c0_79 = arith.constant 0 : index
    %212 = vector.load %arg3[%c1_77, %c0_78, %c0_79] : memref<32x32x128xf32, #tpu.memory_space<vmem>>, vector<1x32x128xf32>
    %213 = vector.shape_cast %212 : vector<1x32x128xf32> to vector<32x128xf32>
    %214 = vector.extract_strided_slice %201 {offsets = [1, 0], sizes = [1, 128], strides = [1, 1]} : vector<32x128xf32> to vector<1x128xf32>
    %215 = vector.broadcast %214 : vector<1x128xf32> to vector<32x128xf32>
    %216 = arith.mulf %213, %215 : vector<32x128xf32>
    %217 = arith.addf %211, %216 : vector<32x128xf32>
    %c2_80 = arith.constant 2 : index
    %c0_81 = arith.constant 0 : index
    %c0_82 = arith.constant 0 : index
    %218 = vector.load %arg3[%c2_80, %c0_81, %c0_82] : memref<32x32x128xf32, #tpu.memory_space<vmem>>, vector<1x32x128xf32>
    %219 = vector.shape_cast %218 : vector<1x32x128xf32> to vector<32x128xf32>
    %220 = vector.extract_strided_slice %201 {offsets = [2, 0], sizes = [1, 128], strides = [1, 1]} : vector<32x128xf32> to vector<1x128xf32>
    %221 = vector.broadcast %220 : vector<1x128xf32> to vector<32x128xf32>
    %222 = arith.mulf %219, %221 : vector<32x128xf32>
    %223 = arith.addf %217, %222 : vector<32x128xf32>
    %c3_83 = arith.constant 3 : index
    %c0_84 = arith.constant 0 : index
    %c0_85 = arith.constant 0 : index
    %224 = vector.load %arg3[%c3_83, %c0_84, %c0_85] : memref<32x32x128xf32, #tpu.memory_space<vmem>>, vector<1x32x128xf32>
    %225 = vector.shape_cast %224 : vector<1x32x128xf32> to vector<32x128xf32>
    %226 = vector.extract_strided_slice %201 {offsets = [3, 0], sizes = [1, 128], strides = [1, 1]} : vector<32x128xf32> to vector<1x128xf32>
    %227 = vector.broadcast %226 : vector<1x128xf32> to vector<32x128xf32>
    %228 = arith.mulf %225, %227 : vector<32x128xf32>
    %229 = arith.addf %223, %228 : vector<32x128xf32>
    %c4_86 = arith.constant 4 : index
    %c0_87 = arith.constant 0 : index
    %c0_88 = arith.constant 0 : index
    %230 = vector.load %arg3[%c4_86, %c0_87, %c0_88] : memref<32x32x128xf32, #tpu.memory_space<vmem>>, vector<1x32x128xf32>
    %231 = vector.shape_cast %230 : vector<1x32x128xf32> to vector<32x128xf32>
    %232 = vector.extract_strided_slice %201 {offsets = [4, 0], sizes = [1, 128], strides = [1, 1]} : vector<32x128xf32> to vector<1x128xf32>
    %233 = vector.broadcast %232 : vector<1x128xf32> to vector<32x128xf32>
    %234 = arith.mulf %231, %233 : vector<32x128xf32>
    %235 = arith.addf %229, %234 : vector<32x128xf32>
    %c5_89 = arith.constant 5 : index
    %c0_90 = arith.constant 0 : index
    %c0_91 = arith.constant 0 : index
    %236 = vector.load %arg3[%c5_89, %c0_90, %c0_91] : memref<32x32x128xf32, #tpu.memory_space<vmem>>, vector<1x32x128xf32>
    %237 = vector.shape_cast %236 : vector<1x32x128xf32> to vector<32x128xf32>
    %238 = vector.extract_strided_slice %201 {offsets = [5, 0], sizes = [1, 128], strides = [1, 1]} : vector<32x128xf32> to vector<1x128xf32>
    %239 = vector.broadcast %238 : vector<1x128xf32> to vector<32x128xf32>
    %240 = arith.mulf %237, %239 : vector<32x128xf32>
    %241 = arith.addf %235, %240 : vector<32x128xf32>
    %c6_92 = arith.constant 6 : index
    %c0_93 = arith.constant 0 : index
    %c0_94 = arith.constant 0 : index
    %242 = vector.load %arg3[%c6_92, %c0_93, %c0_94] : memref<32x32x128xf32, #tpu.memory_space<vmem>>, vector<1x32x128xf32>
    %243 = vector.shape_cast %242 : vector<1x32x128xf32> to vector<32x128xf32>
    %244 = vector.extract_strided_slice %201 {offsets = [6, 0], sizes = [1, 128], strides = [1, 1]} : vector<32x128xf32> to vector<1x128xf32>
    %245 = vector.broadcast %244 : vector<1x128xf32> to vector<32x128xf32>
    %246 = arith.mulf %243, %245 : vector<32x128xf32>
    %247 = arith.addf %241, %246 : vector<32x128xf32>
    %c7_95 = arith.constant 7 : index
    %c0_96 = arith.constant 0 : index
    %c0_97 = arith.constant 0 : index
    %248 = vector.load %arg3[%c7_95, %c0_96, %c0_97] : memref<32x32x128xf32, #tpu.memory_space<vmem>>, vector<1x32x128xf32>
    %249 = vector.shape_cast %248 : vector<1x32x128xf32> to vector<32x128xf32>
    %250 = vector.extract_strided_slice %201 {offsets = [7, 0], sizes = [1, 128], strides = [1, 1]} : vector<32x128xf32> to vector<1x128xf32>
    %251 = vector.broadcast %250 : vector<1x128xf32> to vector<32x128xf32>
    %252 = arith.mulf %249, %251 : vector<32x128xf32>
    %253 = arith.addf %247, %252 : vector<32x128xf32>
    %c8_98 = arith.constant 8 : index
    %c0_99 = arith.constant 0 : index
    %c0_100 = arith.constant 0 : index
    %254 = vector.load %arg3[%c8_98, %c0_99, %c0_100] : memref<32x32x128xf32, #tpu.memory_space<vmem>>, vector<1x32x128xf32>
    %255 = vector.shape_cast %254 : vector<1x32x128xf32> to vector<32x128xf32>
    %256 = vector.extract_strided_slice %201 {offsets = [8, 0], sizes = [1, 128], strides = [1, 1]} : vector<32x128xf32> to vector<1x128xf32>
    %257 = vector.broadcast %256 : vector<1x128xf32> to vector<32x128xf32>
    %258 = arith.mulf %255, %257 : vector<32x128xf32>
    %259 = arith.addf %253, %258 : vector<32x128xf32>
    %c9_101 = arith.constant 9 : index
    %c0_102 = arith.constant 0 : index
    %c0_103 = arith.constant 0 : index
    %260 = vector.load %arg3[%c9_101, %c0_102, %c0_103] : memref<32x32x128xf32, #tpu.memory_space<vmem>>, vector<1x32x128xf32>
    %261 = vector.shape_cast %260 : vector<1x32x128xf32> to vector<32x128xf32>
    %262 = vector.extract_strided_slice %201 {offsets = [9, 0], sizes = [1, 128], strides = [1, 1]} : vector<32x128xf32> to vector<1x128xf32>
    %263 = vector.broadcast %262 : vector<1x128xf32> to vector<32x128xf32>
    %264 = arith.mulf %261, %263 : vector<32x128xf32>
    %265 = arith.addf %259, %264 : vector<32x128xf32>
    %c10_104 = arith.constant 10 : index
    %c0_105 = arith.constant 0 : index
    %c0_106 = arith.constant 0 : index
    %266 = vector.load %arg3[%c10_104, %c0_105, %c0_106] : memref<32x32x128xf32, #tpu.memory_space<vmem>>, vector<1x32x128xf32>
    %267 = vector.shape_cast %266 : vector<1x32x128xf32> to vector<32x128xf32>
    %268 = vector.extract_strided_slice %201 {offsets = [10, 0], sizes = [1, 128], strides = [1, 1]} : vector<32x128xf32> to vector<1x128xf32>
    %269 = vector.broadcast %268 : vector<1x128xf32> to vector<32x128xf32>
    %270 = arith.mulf %267, %269 : vector<32x128xf32>
    %271 = arith.addf %265, %270 : vector<32x128xf32>
    %c11_107 = arith.constant 11 : index
    %c0_108 = arith.constant 0 : index
    %c0_109 = arith.constant 0 : index
    %272 = vector.load %arg3[%c11_107, %c0_108, %c0_109] : memref<32x32x128xf32, #tpu.memory_space<vmem>>, vector<1x32x128xf32>
    %273 = vector.shape_cast %272 : vector<1x32x128xf32> to vector<32x128xf32>
    %274 = vector.extract_strided_slice %201 {offsets = [11, 0], sizes = [1, 128], strides = [1, 1]} : vector<32x128xf32> to vector<1x128xf32>
    %275 = vector.broadcast %274 : vector<1x128xf32> to vector<32x128xf32>
    %276 = arith.mulf %273, %275 : vector<32x128xf32>
    %277 = arith.addf %271, %276 : vector<32x128xf32>
    %c12_110 = arith.constant 12 : index
    %c0_111 = arith.constant 0 : index
    %c0_112 = arith.constant 0 : index
    %278 = vector.load %arg3[%c12_110, %c0_111, %c0_112] : memref<32x32x128xf32, #tpu.memory_space<vmem>>, vector<1x32x128xf32>
    %279 = vector.shape_cast %278 : vector<1x32x128xf32> to vector<32x128xf32>
    %280 = vector.extract_strided_slice %201 {offsets = [12, 0], sizes = [1, 128], strides = [1, 1]} : vector<32x128xf32> to vector<1x128xf32>
    %281 = vector.broadcast %280 : vector<1x128xf32> to vector<32x128xf32>
    %282 = arith.mulf %279, %281 : vector<32x128xf32>
    %283 = arith.addf %277, %282 : vector<32x128xf32>
    %c13_113 = arith.constant 13 : index
    %c0_114 = arith.constant 0 : index
    %c0_115 = arith.constant 0 : index
    %284 = vector.load %arg3[%c13_113, %c0_114, %c0_115] : memref<32x32x128xf32, #tpu.memory_space<vmem>>, vector<1x32x128xf32>
    %285 = vector.shape_cast %284 : vector<1x32x128xf32> to vector<32x128xf32>
    %286 = vector.extract_strided_slice %201 {offsets = [13, 0], sizes = [1, 128], strides = [1, 1]} : vector<32x128xf32> to vector<1x128xf32>
    %287 = vector.broadcast %286 : vector<1x128xf32> to vector<32x128xf32>
    %288 = arith.mulf %285, %287 : vector<32x128xf32>
    %289 = arith.addf %283, %288 : vector<32x128xf32>
    %c14_116 = arith.constant 14 : index
    %c0_117 = arith.constant 0 : index
    %c0_118 = arith.constant 0 : index
    %290 = vector.load %arg3[%c14_116, %c0_117, %c0_118] : memref<32x32x128xf32, #tpu.memory_space<vmem>>, vector<1x32x128xf32>
    %291 = vector.shape_cast %290 : vector<1x32x128xf32> to vector<32x128xf32>
    %292 = vector.extract_strided_slice %201 {offsets = [14, 0], sizes = [1, 128], strides = [1, 1]} : vector<32x128xf32> to vector<1x128xf32>
    %293 = vector.broadcast %292 : vector<1x128xf32> to vector<32x128xf32>
    %294 = arith.mulf %291, %293 : vector<32x128xf32>
    %295 = arith.addf %289, %294 : vector<32x128xf32>
    %c15_119 = arith.constant 15 : index
    %c0_120 = arith.constant 0 : index
    %c0_121 = arith.constant 0 : index
    %296 = vector.load %arg3[%c15_119, %c0_120, %c0_121] : memref<32x32x128xf32, #tpu.memory_space<vmem>>, vector<1x32x128xf32>
    %297 = vector.shape_cast %296 : vector<1x32x128xf32> to vector<32x128xf32>
    %298 = vector.extract_strided_slice %201 {offsets = [15, 0], sizes = [1, 128], strides = [1, 1]} : vector<32x128xf32> to vector<1x128xf32>
    %299 = vector.broadcast %298 : vector<1x128xf32> to vector<32x128xf32>
    %300 = arith.mulf %297, %299 : vector<32x128xf32>
    %301 = arith.addf %295, %300 : vector<32x128xf32>
    %c16_122 = arith.constant 16 : index
    %c0_123 = arith.constant 0 : index
    %c0_124 = arith.constant 0 : index
    %302 = vector.load %arg3[%c16_122, %c0_123, %c0_124] : memref<32x32x128xf32, #tpu.memory_space<vmem>>, vector<1x32x128xf32>
    %303 = vector.shape_cast %302 : vector<1x32x128xf32> to vector<32x128xf32>
    %304 = vector.extract_strided_slice %201 {offsets = [16, 0], sizes = [1, 128], strides = [1, 1]} : vector<32x128xf32> to vector<1x128xf32>
    %305 = vector.broadcast %304 : vector<1x128xf32> to vector<32x128xf32>
    %306 = arith.mulf %303, %305 : vector<32x128xf32>
    %307 = arith.addf %301, %306 : vector<32x128xf32>
    %c17_125 = arith.constant 17 : index
    %c0_126 = arith.constant 0 : index
    %c0_127 = arith.constant 0 : index
    %308 = vector.load %arg3[%c17_125, %c0_126, %c0_127] : memref<32x32x128xf32, #tpu.memory_space<vmem>>, vector<1x32x128xf32>
    %309 = vector.shape_cast %308 : vector<1x32x128xf32> to vector<32x128xf32>
    %310 = vector.extract_strided_slice %201 {offsets = [17, 0], sizes = [1, 128], strides = [1, 1]} : vector<32x128xf32> to vector<1x128xf32>
    %311 = vector.broadcast %310 : vector<1x128xf32> to vector<32x128xf32>
    %312 = arith.mulf %309, %311 : vector<32x128xf32>
    %313 = arith.addf %307, %312 : vector<32x128xf32>
    %c18_128 = arith.constant 18 : index
    %c0_129 = arith.constant 0 : index
    %c0_130 = arith.constant 0 : index
    %314 = vector.load %arg3[%c18_128, %c0_129, %c0_130] : memref<32x32x128xf32, #tpu.memory_space<vmem>>, vector<1x32x128xf32>
    %315 = vector.shape_cast %314 : vector<1x32x128xf32> to vector<32x128xf32>
    %316 = vector.extract_strided_slice %201 {offsets = [18, 0], sizes = [1, 128], strides = [1, 1]} : vector<32x128xf32> to vector<1x128xf32>
    %317 = vector.broadcast %316 : vector<1x128xf32> to vector<32x128xf32>
    %318 = arith.mulf %315, %317 : vector<32x128xf32>
    %319 = arith.addf %313, %318 : vector<32x128xf32>
    %c19_131 = arith.constant 19 : index
    %c0_132 = arith.constant 0 : index
    %c0_133 = arith.constant 0 : index
    %320 = vector.load %arg3[%c19_131, %c0_132, %c0_133] : memref<32x32x128xf32, #tpu.memory_space<vmem>>, vector<1x32x128xf32>
    %321 = vector.shape_cast %320 : vector<1x32x128xf32> to vector<32x128xf32>
    %322 = vector.extract_strided_slice %201 {offsets = [19, 0], sizes = [1, 128], strides = [1, 1]} : vector<32x128xf32> to vector<1x128xf32>
    %323 = vector.broadcast %322 : vector<1x128xf32> to vector<32x128xf32>
    %324 = arith.mulf %321, %323 : vector<32x128xf32>
    %325 = arith.addf %319, %324 : vector<32x128xf32>
    %c20_134 = arith.constant 20 : index
    %c0_135 = arith.constant 0 : index
    %c0_136 = arith.constant 0 : index
    %326 = vector.load %arg3[%c20_134, %c0_135, %c0_136] : memref<32x32x128xf32, #tpu.memory_space<vmem>>, vector<1x32x128xf32>
    %327 = vector.shape_cast %326 : vector<1x32x128xf32> to vector<32x128xf32>
    %328 = vector.extract_strided_slice %201 {offsets = [20, 0], sizes = [1, 128], strides = [1, 1]} : vector<32x128xf32> to vector<1x128xf32>
    %329 = vector.broadcast %328 : vector<1x128xf32> to vector<32x128xf32>
    %330 = arith.mulf %327, %329 : vector<32x128xf32>
    %331 = arith.addf %325, %330 : vector<32x128xf32>
    %c21_137 = arith.constant 21 : index
    %c0_138 = arith.constant 0 : index
    %c0_139 = arith.constant 0 : index
    %332 = vector.load %arg3[%c21_137, %c0_138, %c0_139] : memref<32x32x128xf32, #tpu.memory_space<vmem>>, vector<1x32x128xf32>
    %333 = vector.shape_cast %332 : vector<1x32x128xf32> to vector<32x128xf32>
    %334 = vector.extract_strided_slice %201 {offsets = [21, 0], sizes = [1, 128], strides = [1, 1]} : vector<32x128xf32> to vector<1x128xf32>
    %335 = vector.broadcast %334 : vector<1x128xf32> to vector<32x128xf32>
    %336 = arith.mulf %333, %335 : vector<32x128xf32>
    %337 = arith.addf %331, %336 : vector<32x128xf32>
    %c22_140 = arith.constant 22 : index
    %c0_141 = arith.constant 0 : index
    %c0_142 = arith.constant 0 : index
    %338 = vector.load %arg3[%c22_140, %c0_141, %c0_142] : memref<32x32x128xf32, #tpu.memory_space<vmem>>, vector<1x32x128xf32>
    %339 = vector.shape_cast %338 : vector<1x32x128xf32> to vector<32x128xf32>
    %340 = vector.extract_strided_slice %201 {offsets = [22, 0], sizes = [1, 128], strides = [1, 1]} : vector<32x128xf32> to vector<1x128xf32>
    %341 = vector.broadcast %340 : vector<1x128xf32> to vector<32x128xf32>
    %342 = arith.mulf %339, %341 : vector<32x128xf32>
    %343 = arith.addf %337, %342 : vector<32x128xf32>
    %c23_143 = arith.constant 23 : index
    %c0_144 = arith.constant 0 : index
    %c0_145 = arith.constant 0 : index
    %344 = vector.load %arg3[%c23_143, %c0_144, %c0_145] : memref<32x32x128xf32, #tpu.memory_space<vmem>>, vector<1x32x128xf32>
    %345 = vector.shape_cast %344 : vector<1x32x128xf32> to vector<32x128xf32>
    %346 = vector.extract_strided_slice %201 {offsets = [23, 0], sizes = [1, 128], strides = [1, 1]} : vector<32x128xf32> to vector<1x128xf32>
    %347 = vector.broadcast %346 : vector<1x128xf32> to vector<32x128xf32>
    %348 = arith.mulf %345, %347 : vector<32x128xf32>
    %349 = arith.addf %343, %348 : vector<32x128xf32>
    %c24_146 = arith.constant 24 : index
    %c0_147 = arith.constant 0 : index
    %c0_148 = arith.constant 0 : index
    %350 = vector.load %arg3[%c24_146, %c0_147, %c0_148] : memref<32x32x128xf32, #tpu.memory_space<vmem>>, vector<1x32x128xf32>
    %351 = vector.shape_cast %350 : vector<1x32x128xf32> to vector<32x128xf32>
    %352 = vector.extract_strided_slice %201 {offsets = [24, 0], sizes = [1, 128], strides = [1, 1]} : vector<32x128xf32> to vector<1x128xf32>
    %353 = vector.broadcast %352 : vector<1x128xf32> to vector<32x128xf32>
    %354 = arith.mulf %351, %353 : vector<32x128xf32>
    %355 = arith.addf %349, %354 : vector<32x128xf32>
    %c25_149 = arith.constant 25 : index
    %c0_150 = arith.constant 0 : index
    %c0_151 = arith.constant 0 : index
    %356 = vector.load %arg3[%c25_149, %c0_150, %c0_151] : memref<32x32x128xf32, #tpu.memory_space<vmem>>, vector<1x32x128xf32>
    %357 = vector.shape_cast %356 : vector<1x32x128xf32> to vector<32x128xf32>
    %358 = vector.extract_strided_slice %201 {offsets = [25, 0], sizes = [1, 128], strides = [1, 1]} : vector<32x128xf32> to vector<1x128xf32>
    %359 = vector.broadcast %358 : vector<1x128xf32> to vector<32x128xf32>
    %360 = arith.mulf %357, %359 : vector<32x128xf32>
    %361 = arith.addf %355, %360 : vector<32x128xf32>
    %c26_152 = arith.constant 26 : index
    %c0_153 = arith.constant 0 : index
    %c0_154 = arith.constant 0 : index
    %362 = vector.load %arg3[%c26_152, %c0_153, %c0_154] : memref<32x32x128xf32, #tpu.memory_space<vmem>>, vector<1x32x128xf32>
    %363 = vector.shape_cast %362 : vector<1x32x128xf32> to vector<32x128xf32>
    %364 = vector.extract_strided_slice %201 {offsets = [26, 0], sizes = [1, 128], strides = [1, 1]} : vector<32x128xf32> to vector<1x128xf32>
    %365 = vector.broadcast %364 : vector<1x128xf32> to vector<32x128xf32>
    %366 = arith.mulf %363, %365 : vector<32x128xf32>
    %367 = arith.addf %361, %366 : vector<32x128xf32>
    %c27_155 = arith.constant 27 : index
    %c0_156 = arith.constant 0 : index
    %c0_157 = arith.constant 0 : index
    %368 = vector.load %arg3[%c27_155, %c0_156, %c0_157] : memref<32x32x128xf32, #tpu.memory_space<vmem>>, vector<1x32x128xf32>
    %369 = vector.shape_cast %368 : vector<1x32x128xf32> to vector<32x128xf32>
    %370 = vector.extract_strided_slice %201 {offsets = [27, 0], sizes = [1, 128], strides = [1, 1]} : vector<32x128xf32> to vector<1x128xf32>
    %371 = vector.broadcast %370 : vector<1x128xf32> to vector<32x128xf32>
    %372 = arith.mulf %369, %371 : vector<32x128xf32>
    %373 = arith.addf %367, %372 : vector<32x128xf32>
    %c28_158 = arith.constant 28 : index
    %c0_159 = arith.constant 0 : index
    %c0_160 = arith.constant 0 : index
    %374 = vector.load %arg3[%c28_158, %c0_159, %c0_160] : memref<32x32x128xf32, #tpu.memory_space<vmem>>, vector<1x32x128xf32>
    %375 = vector.shape_cast %374 : vector<1x32x128xf32> to vector<32x128xf32>
    %376 = vector.extract_strided_slice %201 {offsets = [28, 0], sizes = [1, 128], strides = [1, 1]} : vector<32x128xf32> to vector<1x128xf32>
    %377 = vector.broadcast %376 : vector<1x128xf32> to vector<32x128xf32>
    %378 = arith.mulf %375, %377 : vector<32x128xf32>
    %379 = arith.addf %373, %378 : vector<32x128xf32>
    %c29_161 = arith.constant 29 : index
    %c0_162 = arith.constant 0 : index
    %c0_163 = arith.constant 0 : index
    %380 = vector.load %arg3[%c29_161, %c0_162, %c0_163] : memref<32x32x128xf32, #tpu.memory_space<vmem>>, vector<1x32x128xf32>
    %381 = vector.shape_cast %380 : vector<1x32x128xf32> to vector<32x128xf32>
    %382 = vector.extract_strided_slice %201 {offsets = [29, 0], sizes = [1, 128], strides = [1, 1]} : vector<32x128xf32> to vector<1x128xf32>
    %383 = vector.broadcast %382 : vector<1x128xf32> to vector<32x128xf32>
    %384 = arith.mulf %381, %383 : vector<32x128xf32>
    %385 = arith.addf %379, %384 : vector<32x128xf32>
    %c30_164 = arith.constant 30 : index
    %c0_165 = arith.constant 0 : index
    %c0_166 = arith.constant 0 : index
    %386 = vector.load %arg3[%c30_164, %c0_165, %c0_166] : memref<32x32x128xf32, #tpu.memory_space<vmem>>, vector<1x32x128xf32>
    %387 = vector.shape_cast %386 : vector<1x32x128xf32> to vector<32x128xf32>
    %388 = vector.extract_strided_slice %201 {offsets = [30, 0], sizes = [1, 128], strides = [1, 1]} : vector<32x128xf32> to vector<1x128xf32>
    %389 = vector.broadcast %388 : vector<1x128xf32> to vector<32x128xf32>
    %390 = arith.mulf %387, %389 : vector<32x128xf32>
    %391 = arith.addf %385, %390 : vector<32x128xf32>
    %c31_167 = arith.constant 31 : index
    %c0_168 = arith.constant 0 : index
    %c0_169 = arith.constant 0 : index
    %392 = vector.load %arg3[%c31_167, %c0_168, %c0_169] : memref<32x32x128xf32, #tpu.memory_space<vmem>>, vector<1x32x128xf32>
    %393 = vector.shape_cast %392 : vector<1x32x128xf32> to vector<32x128xf32>
    %394 = vector.extract_strided_slice %201 {offsets = [31, 0], sizes = [1, 128], strides = [1, 1]} : vector<32x128xf32> to vector<1x128xf32>
    %395 = vector.broadcast %394 : vector<1x128xf32> to vector<32x128xf32>
    %396 = arith.mulf %393, %395 : vector<32x128xf32>
    %397 = arith.addf %391, %396 : vector<32x128xf32>
    %398 = math.tanh %397 : vector<32x128xf32>
    %c2_170 = arith.constant 2 : index
    %c0_171 = arith.constant 0 : index
    %399 = vector.load %arg1[%c2_170, %c0_171] : memref<8x128xf32, #tpu.memory_space<vmem>>, vector<1x128xf32>
    %400 = vector.broadcast %399 : vector<1x128xf32> to vector<32x128xf32>
    %401 = arith.mulf %400, %0 : vector<32x128xf32>
    %402 = arith.addf %401, %1 : vector<32x128xf32>
    %c0_172 = arith.constant 0 : index
    %c0_173 = arith.constant 0 : index
    %c0_174 = arith.constant 0 : index
    %403 = vector.load %arg3[%c0_172, %c0_173, %c0_174] : memref<32x32x128xf32, #tpu.memory_space<vmem>>, vector<1x32x128xf32>
    %404 = vector.shape_cast %403 : vector<1x32x128xf32> to vector<32x128xf32>
    %405 = vector.extract_strided_slice %398 {offsets = [0, 0], sizes = [1, 128], strides = [1, 1]} : vector<32x128xf32> to vector<1x128xf32>
    %406 = vector.broadcast %405 : vector<1x128xf32> to vector<32x128xf32>
    %407 = arith.mulf %404, %406 : vector<32x128xf32>
    %408 = arith.addf %402, %407 : vector<32x128xf32>
    %c1_175 = arith.constant 1 : index
    %c0_176 = arith.constant 0 : index
    %c0_177 = arith.constant 0 : index
    %409 = vector.load %arg3[%c1_175, %c0_176, %c0_177] : memref<32x32x128xf32, #tpu.memory_space<vmem>>, vector<1x32x128xf32>
    %410 = vector.shape_cast %409 : vector<1x32x128xf32> to vector<32x128xf32>
    %411 = vector.extract_strided_slice %398 {offsets = [1, 0], sizes = [1, 128], strides = [1, 1]} : vector<32x128xf32> to vector<1x128xf32>
    %412 = vector.broadcast %411 : vector<1x128xf32> to vector<32x128xf32>
    %413 = arith.mulf %410, %412 : vector<32x128xf32>
    %414 = arith.addf %408, %413 : vector<32x128xf32>
    %c2_178 = arith.constant 2 : index
    %c0_179 = arith.constant 0 : index
    %c0_180 = arith.constant 0 : index
    %415 = vector.load %arg3[%c2_178, %c0_179, %c0_180] : memref<32x32x128xf32, #tpu.memory_space<vmem>>, vector<1x32x128xf32>
    %416 = vector.shape_cast %415 : vector<1x32x128xf32> to vector<32x128xf32>
    %417 = vector.extract_strided_slice %398 {offsets = [2, 0], sizes = [1, 128], strides = [1, 1]} : vector<32x128xf32> to vector<1x128xf32>
    %418 = vector.broadcast %417 : vector<1x128xf32> to vector<32x128xf32>
    %419 = arith.mulf %416, %418 : vector<32x128xf32>
    %420 = arith.addf %414, %419 : vector<32x128xf32>
    %c3_181 = arith.constant 3 : index
    %c0_182 = arith.constant 0 : index
    %c0_183 = arith.constant 0 : index
    %421 = vector.load %arg3[%c3_181, %c0_182, %c0_183] : memref<32x32x128xf32, #tpu.memory_space<vmem>>, vector<1x32x128xf32>
    %422 = vector.shape_cast %421 : vector<1x32x128xf32> to vector<32x128xf32>
    %423 = vector.extract_strided_slice %398 {offsets = [3, 0], sizes = [1, 128], strides = [1, 1]} : vector<32x128xf32> to vector<1x128xf32>
    %424 = vector.broadcast %423 : vector<1x128xf32> to vector<32x128xf32>
    %425 = arith.mulf %422, %424 : vector<32x128xf32>
    %426 = arith.addf %420, %425 : vector<32x128xf32>
    %c4_184 = arith.constant 4 : index
    %c0_185 = arith.constant 0 : index
    %c0_186 = arith.constant 0 : index
    %427 = vector.load %arg3[%c4_184, %c0_185, %c0_186] : memref<32x32x128xf32, #tpu.memory_space<vmem>>, vector<1x32x128xf32>
    %428 = vector.shape_cast %427 : vector<1x32x128xf32> to vector<32x128xf32>
    %429 = vector.extract_strided_slice %398 {offsets = [4, 0], sizes = [1, 128], strides = [1, 1]} : vector<32x128xf32> to vector<1x128xf32>
    %430 = vector.broadcast %429 : vector<1x128xf32> to vector<32x128xf32>
    %431 = arith.mulf %428, %430 : vector<32x128xf32>
    %432 = arith.addf %426, %431 : vector<32x128xf32>
    %c5_187 = arith.constant 5 : index
    %c0_188 = arith.constant 0 : index
    %c0_189 = arith.constant 0 : index
    %433 = vector.load %arg3[%c5_187, %c0_188, %c0_189] : memref<32x32x128xf32, #tpu.memory_space<vmem>>, vector<1x32x128xf32>
    %434 = vector.shape_cast %433 : vector<1x32x128xf32> to vector<32x128xf32>
    %435 = vector.extract_strided_slice %398 {offsets = [5, 0], sizes = [1, 128], strides = [1, 1]} : vector<32x128xf32> to vector<1x128xf32>
    %436 = vector.broadcast %435 : vector<1x128xf32> to vector<32x128xf32>
    %437 = arith.mulf %434, %436 : vector<32x128xf32>
    %438 = arith.addf %432, %437 : vector<32x128xf32>
    %c6_190 = arith.constant 6 : index
    %c0_191 = arith.constant 0 : index
    %c0_192 = arith.constant 0 : index
    %439 = vector.load %arg3[%c6_190, %c0_191, %c0_192] : memref<32x32x128xf32, #tpu.memory_space<vmem>>, vector<1x32x128xf32>
    %440 = vector.shape_cast %439 : vector<1x32x128xf32> to vector<32x128xf32>
    %441 = vector.extract_strided_slice %398 {offsets = [6, 0], sizes = [1, 128], strides = [1, 1]} : vector<32x128xf32> to vector<1x128xf32>
    %442 = vector.broadcast %441 : vector<1x128xf32> to vector<32x128xf32>
    %443 = arith.mulf %440, %442 : vector<32x128xf32>
    %444 = arith.addf %438, %443 : vector<32x128xf32>
    %c7_193 = arith.constant 7 : index
    %c0_194 = arith.constant 0 : index
    %c0_195 = arith.constant 0 : index
    %445 = vector.load %arg3[%c7_193, %c0_194, %c0_195] : memref<32x32x128xf32, #tpu.memory_space<vmem>>, vector<1x32x128xf32>
    %446 = vector.shape_cast %445 : vector<1x32x128xf32> to vector<32x128xf32>
    %447 = vector.extract_strided_slice %398 {offsets = [7, 0], sizes = [1, 128], strides = [1, 1]} : vector<32x128xf32> to vector<1x128xf32>
    %448 = vector.broadcast %447 : vector<1x128xf32> to vector<32x128xf32>
    %449 = arith.mulf %446, %448 : vector<32x128xf32>
    %450 = arith.addf %444, %449 : vector<32x128xf32>
    %c8_196 = arith.constant 8 : index
    %c0_197 = arith.constant 0 : index
    %c0_198 = arith.constant 0 : index
    %451 = vector.load %arg3[%c8_196, %c0_197, %c0_198] : memref<32x32x128xf32, #tpu.memory_space<vmem>>, vector<1x32x128xf32>
    %452 = vector.shape_cast %451 : vector<1x32x128xf32> to vector<32x128xf32>
    %453 = vector.extract_strided_slice %398 {offsets = [8, 0], sizes = [1, 128], strides = [1, 1]} : vector<32x128xf32> to vector<1x128xf32>
    %454 = vector.broadcast %453 : vector<1x128xf32> to vector<32x128xf32>
    %455 = arith.mulf %452, %454 : vector<32x128xf32>
    %456 = arith.addf %450, %455 : vector<32x128xf32>
    %c9_199 = arith.constant 9 : index
    %c0_200 = arith.constant 0 : index
    %c0_201 = arith.constant 0 : index
    %457 = vector.load %arg3[%c9_199, %c0_200, %c0_201] : memref<32x32x128xf32, #tpu.memory_space<vmem>>, vector<1x32x128xf32>
    %458 = vector.shape_cast %457 : vector<1x32x128xf32> to vector<32x128xf32>
    %459 = vector.extract_strided_slice %398 {offsets = [9, 0], sizes = [1, 128], strides = [1, 1]} : vector<32x128xf32> to vector<1x128xf32>
    %460 = vector.broadcast %459 : vector<1x128xf32> to vector<32x128xf32>
    %461 = arith.mulf %458, %460 : vector<32x128xf32>
    %462 = arith.addf %456, %461 : vector<32x128xf32>
    %c10_202 = arith.constant 10 : index
    %c0_203 = arith.constant 0 : index
    %c0_204 = arith.constant 0 : index
    %463 = vector.load %arg3[%c10_202, %c0_203, %c0_204] : memref<32x32x128xf32, #tpu.memory_space<vmem>>, vector<1x32x128xf32>
    %464 = vector.shape_cast %463 : vector<1x32x128xf32> to vector<32x128xf32>
    %465 = vector.extract_strided_slice %398 {offsets = [10, 0], sizes = [1, 128], strides = [1, 1]} : vector<32x128xf32> to vector<1x128xf32>
    %466 = vector.broadcast %465 : vector<1x128xf32> to vector<32x128xf32>
    %467 = arith.mulf %464, %466 : vector<32x128xf32>
    %468 = arith.addf %462, %467 : vector<32x128xf32>
    %c11_205 = arith.constant 11 : index
    %c0_206 = arith.constant 0 : index
    %c0_207 = arith.constant 0 : index
    %469 = vector.load %arg3[%c11_205, %c0_206, %c0_207] : memref<32x32x128xf32, #tpu.memory_space<vmem>>, vector<1x32x128xf32>
    %470 = vector.shape_cast %469 : vector<1x32x128xf32> to vector<32x128xf32>
    %471 = vector.extract_strided_slice %398 {offsets = [11, 0], sizes = [1, 128], strides = [1, 1]} : vector<32x128xf32> to vector<1x128xf32>
    %472 = vector.broadcast %471 : vector<1x128xf32> to vector<32x128xf32>
    %473 = arith.mulf %470, %472 : vector<32x128xf32>
    %474 = arith.addf %468, %473 : vector<32x128xf32>
    %c12_208 = arith.constant 12 : index
    %c0_209 = arith.constant 0 : index
    %c0_210 = arith.constant 0 : index
    %475 = vector.load %arg3[%c12_208, %c0_209, %c0_210] : memref<32x32x128xf32, #tpu.memory_space<vmem>>, vector<1x32x128xf32>
    %476 = vector.shape_cast %475 : vector<1x32x128xf32> to vector<32x128xf32>
    %477 = vector.extract_strided_slice %398 {offsets = [12, 0], sizes = [1, 128], strides = [1, 1]} : vector<32x128xf32> to vector<1x128xf32>
    %478 = vector.broadcast %477 : vector<1x128xf32> to vector<32x128xf32>
    %479 = arith.mulf %476, %478 : vector<32x128xf32>
    %480 = arith.addf %474, %479 : vector<32x128xf32>
    %c13_211 = arith.constant 13 : index
    %c0_212 = arith.constant 0 : index
    %c0_213 = arith.constant 0 : index
    %481 = vector.load %arg3[%c13_211, %c0_212, %c0_213] : memref<32x32x128xf32, #tpu.memory_space<vmem>>, vector<1x32x128xf32>
    %482 = vector.shape_cast %481 : vector<1x32x128xf32> to vector<32x128xf32>
    %483 = vector.extract_strided_slice %398 {offsets = [13, 0], sizes = [1, 128], strides = [1, 1]} : vector<32x128xf32> to vector<1x128xf32>
    %484 = vector.broadcast %483 : vector<1x128xf32> to vector<32x128xf32>
    %485 = arith.mulf %482, %484 : vector<32x128xf32>
    %486 = arith.addf %480, %485 : vector<32x128xf32>
    %c14_214 = arith.constant 14 : index
    %c0_215 = arith.constant 0 : index
    %c0_216 = arith.constant 0 : index
    %487 = vector.load %arg3[%c14_214, %c0_215, %c0_216] : memref<32x32x128xf32, #tpu.memory_space<vmem>>, vector<1x32x128xf32>
    %488 = vector.shape_cast %487 : vector<1x32x128xf32> to vector<32x128xf32>
    %489 = vector.extract_strided_slice %398 {offsets = [14, 0], sizes = [1, 128], strides = [1, 1]} : vector<32x128xf32> to vector<1x128xf32>
    %490 = vector.broadcast %489 : vector<1x128xf32> to vector<32x128xf32>
    %491 = arith.mulf %488, %490 : vector<32x128xf32>
    %492 = arith.addf %486, %491 : vector<32x128xf32>
    %c15_217 = arith.constant 15 : index
    %c0_218 = arith.constant 0 : index
    %c0_219 = arith.constant 0 : index
    %493 = vector.load %arg3[%c15_217, %c0_218, %c0_219] : memref<32x32x128xf32, #tpu.memory_space<vmem>>, vector<1x32x128xf32>
    %494 = vector.shape_cast %493 : vector<1x32x128xf32> to vector<32x128xf32>
    %495 = vector.extract_strided_slice %398 {offsets = [15, 0], sizes = [1, 128], strides = [1, 1]} : vector<32x128xf32> to vector<1x128xf32>
    %496 = vector.broadcast %495 : vector<1x128xf32> to vector<32x128xf32>
    %497 = arith.mulf %494, %496 : vector<32x128xf32>
    %498 = arith.addf %492, %497 : vector<32x128xf32>
    %c16_220 = arith.constant 16 : index
    %c0_221 = arith.constant 0 : index
    %c0_222 = arith.constant 0 : index
    %499 = vector.load %arg3[%c16_220, %c0_221, %c0_222] : memref<32x32x128xf32, #tpu.memory_space<vmem>>, vector<1x32x128xf32>
    %500 = vector.shape_cast %499 : vector<1x32x128xf32> to vector<32x128xf32>
    %501 = vector.extract_strided_slice %398 {offsets = [16, 0], sizes = [1, 128], strides = [1, 1]} : vector<32x128xf32> to vector<1x128xf32>
    %502 = vector.broadcast %501 : vector<1x128xf32> to vector<32x128xf32>
    %503 = arith.mulf %500, %502 : vector<32x128xf32>
    %504 = arith.addf %498, %503 : vector<32x128xf32>
    %c17_223 = arith.constant 17 : index
    %c0_224 = arith.constant 0 : index
    %c0_225 = arith.constant 0 : index
    %505 = vector.load %arg3[%c17_223, %c0_224, %c0_225] : memref<32x32x128xf32, #tpu.memory_space<vmem>>, vector<1x32x128xf32>
    %506 = vector.shape_cast %505 : vector<1x32x128xf32> to vector<32x128xf32>
    %507 = vector.extract_strided_slice %398 {offsets = [17, 0], sizes = [1, 128], strides = [1, 1]} : vector<32x128xf32> to vector<1x128xf32>
    %508 = vector.broadcast %507 : vector<1x128xf32> to vector<32x128xf32>
    %509 = arith.mulf %506, %508 : vector<32x128xf32>
    %510 = arith.addf %504, %509 : vector<32x128xf32>
    %c18_226 = arith.constant 18 : index
    %c0_227 = arith.constant 0 : index
    %c0_228 = arith.constant 0 : index
    %511 = vector.load %arg3[%c18_226, %c0_227, %c0_228] : memref<32x32x128xf32, #tpu.memory_space<vmem>>, vector<1x32x128xf32>
    %512 = vector.shape_cast %511 : vector<1x32x128xf32> to vector<32x128xf32>
    %513 = vector.extract_strided_slice %398 {offsets = [18, 0], sizes = [1, 128], strides = [1, 1]} : vector<32x128xf32> to vector<1x128xf32>
    %514 = vector.broadcast %513 : vector<1x128xf32> to vector<32x128xf32>
    %515 = arith.mulf %512, %514 : vector<32x128xf32>
    %516 = arith.addf %510, %515 : vector<32x128xf32>
    %c19_229 = arith.constant 19 : index
    %c0_230 = arith.constant 0 : index
    %c0_231 = arith.constant 0 : index
    %517 = vector.load %arg3[%c19_229, %c0_230, %c0_231] : memref<32x32x128xf32, #tpu.memory_space<vmem>>, vector<1x32x128xf32>
    %518 = vector.shape_cast %517 : vector<1x32x128xf32> to vector<32x128xf32>
    %519 = vector.extract_strided_slice %398 {offsets = [19, 0], sizes = [1, 128], strides = [1, 1]} : vector<32x128xf32> to vector<1x128xf32>
    %520 = vector.broadcast %519 : vector<1x128xf32> to vector<32x128xf32>
    %521 = arith.mulf %518, %520 : vector<32x128xf32>
    %522 = arith.addf %516, %521 : vector<32x128xf32>
    %c20_232 = arith.constant 20 : index
    %c0_233 = arith.constant 0 : index
    %c0_234 = arith.constant 0 : index
    %523 = vector.load %arg3[%c20_232, %c0_233, %c0_234] : memref<32x32x128xf32, #tpu.memory_space<vmem>>, vector<1x32x128xf32>
    %524 = vector.shape_cast %523 : vector<1x32x128xf32> to vector<32x128xf32>
    %525 = vector.extract_strided_slice %398 {offsets = [20, 0], sizes = [1, 128], strides = [1, 1]} : vector<32x128xf32> to vector<1x128xf32>
    %526 = vector.broadcast %525 : vector<1x128xf32> to vector<32x128xf32>
    %527 = arith.mulf %524, %526 : vector<32x128xf32>
    %528 = arith.addf %522, %527 : vector<32x128xf32>
    %c21_235 = arith.constant 21 : index
    %c0_236 = arith.constant 0 : index
    %c0_237 = arith.constant 0 : index
    %529 = vector.load %arg3[%c21_235, %c0_236, %c0_237] : memref<32x32x128xf32, #tpu.memory_space<vmem>>, vector<1x32x128xf32>
    %530 = vector.shape_cast %529 : vector<1x32x128xf32> to vector<32x128xf32>
    %531 = vector.extract_strided_slice %398 {offsets = [21, 0], sizes = [1, 128], strides = [1, 1]} : vector<32x128xf32> to vector<1x128xf32>
    %532 = vector.broadcast %531 : vector<1x128xf32> to vector<32x128xf32>
    %533 = arith.mulf %530, %532 : vector<32x128xf32>
    %534 = arith.addf %528, %533 : vector<32x128xf32>
    %c22_238 = arith.constant 22 : index
    %c0_239 = arith.constant 0 : index
    %c0_240 = arith.constant 0 : index
    %535 = vector.load %arg3[%c22_238, %c0_239, %c0_240] : memref<32x32x128xf32, #tpu.memory_space<vmem>>, vector<1x32x128xf32>
    %536 = vector.shape_cast %535 : vector<1x32x128xf32> to vector<32x128xf32>
    %537 = vector.extract_strided_slice %398 {offsets = [22, 0], sizes = [1, 128], strides = [1, 1]} : vector<32x128xf32> to vector<1x128xf32>
    %538 = vector.broadcast %537 : vector<1x128xf32> to vector<32x128xf32>
    %539 = arith.mulf %536, %538 : vector<32x128xf32>
    %540 = arith.addf %534, %539 : vector<32x128xf32>
    %c23_241 = arith.constant 23 : index
    %c0_242 = arith.constant 0 : index
    %c0_243 = arith.constant 0 : index
    %541 = vector.load %arg3[%c23_241, %c0_242, %c0_243] : memref<32x32x128xf32, #tpu.memory_space<vmem>>, vector<1x32x128xf32>
    %542 = vector.shape_cast %541 : vector<1x32x128xf32> to vector<32x128xf32>
    %543 = vector.extract_strided_slice %398 {offsets = [23, 0], sizes = [1, 128], strides = [1, 1]} : vector<32x128xf32> to vector<1x128xf32>
    %544 = vector.broadcast %543 : vector<1x128xf32> to vector<32x128xf32>
    %545 = arith.mulf %542, %544 : vector<32x128xf32>
    %546 = arith.addf %540, %545 : vector<32x128xf32>
    %c24_244 = arith.constant 24 : index
    %c0_245 = arith.constant 0 : index
    %c0_246 = arith.constant 0 : index
    %547 = vector.load %arg3[%c24_244, %c0_245, %c0_246] : memref<32x32x128xf32, #tpu.memory_space<vmem>>, vector<1x32x128xf32>
    %548 = vector.shape_cast %547 : vector<1x32x128xf32> to vector<32x128xf32>
    %549 = vector.extract_strided_slice %398 {offsets = [24, 0], sizes = [1, 128], strides = [1, 1]} : vector<32x128xf32> to vector<1x128xf32>
    %550 = vector.broadcast %549 : vector<1x128xf32> to vector<32x128xf32>
    %551 = arith.mulf %548, %550 : vector<32x128xf32>
    %552 = arith.addf %546, %551 : vector<32x128xf32>
    %c25_247 = arith.constant 25 : index
    %c0_248 = arith.constant 0 : index
    %c0_249 = arith.constant 0 : index
    %553 = vector.load %arg3[%c25_247, %c0_248, %c0_249] : memref<32x32x128xf32, #tpu.memory_space<vmem>>, vector<1x32x128xf32>
    %554 = vector.shape_cast %553 : vector<1x32x128xf32> to vector<32x128xf32>
    %555 = vector.extract_strided_slice %398 {offsets = [25, 0], sizes = [1, 128], strides = [1, 1]} : vector<32x128xf32> to vector<1x128xf32>
    %556 = vector.broadcast %555 : vector<1x128xf32> to vector<32x128xf32>
    %557 = arith.mulf %554, %556 : vector<32x128xf32>
    %558 = arith.addf %552, %557 : vector<32x128xf32>
    %c26_250 = arith.constant 26 : index
    %c0_251 = arith.constant 0 : index
    %c0_252 = arith.constant 0 : index
    %559 = vector.load %arg3[%c26_250, %c0_251, %c0_252] : memref<32x32x128xf32, #tpu.memory_space<vmem>>, vector<1x32x128xf32>
    %560 = vector.shape_cast %559 : vector<1x32x128xf32> to vector<32x128xf32>
    %561 = vector.extract_strided_slice %398 {offsets = [26, 0], sizes = [1, 128], strides = [1, 1]} : vector<32x128xf32> to vector<1x128xf32>
    %562 = vector.broadcast %561 : vector<1x128xf32> to vector<32x128xf32>
    %563 = arith.mulf %560, %562 : vector<32x128xf32>
    %564 = arith.addf %558, %563 : vector<32x128xf32>
    %c27_253 = arith.constant 27 : index
    %c0_254 = arith.constant 0 : index
    %c0_255 = arith.constant 0 : index
    %565 = vector.load %arg3[%c27_253, %c0_254, %c0_255] : memref<32x32x128xf32, #tpu.memory_space<vmem>>, vector<1x32x128xf32>
    %566 = vector.shape_cast %565 : vector<1x32x128xf32> to vector<32x128xf32>
    %567 = vector.extract_strided_slice %398 {offsets = [27, 0], sizes = [1, 128], strides = [1, 1]} : vector<32x128xf32> to vector<1x128xf32>
    %568 = vector.broadcast %567 : vector<1x128xf32> to vector<32x128xf32>
    %569 = arith.mulf %566, %568 : vector<32x128xf32>
    %570 = arith.addf %564, %569 : vector<32x128xf32>
    %c28_256 = arith.constant 28 : index
    %c0_257 = arith.constant 0 : index
    %c0_258 = arith.constant 0 : index
    %571 = vector.load %arg3[%c28_256, %c0_257, %c0_258] : memref<32x32x128xf32, #tpu.memory_space<vmem>>, vector<1x32x128xf32>
    %572 = vector.shape_cast %571 : vector<1x32x128xf32> to vector<32x128xf32>
    %573 = vector.extract_strided_slice %398 {offsets = [28, 0], sizes = [1, 128], strides = [1, 1]} : vector<32x128xf32> to vector<1x128xf32>
    %574 = vector.broadcast %573 : vector<1x128xf32> to vector<32x128xf32>
    %575 = arith.mulf %572, %574 : vector<32x128xf32>
    %576 = arith.addf %570, %575 : vector<32x128xf32>
    %c29_259 = arith.constant 29 : index
    %c0_260 = arith.constant 0 : index
    %c0_261 = arith.constant 0 : index
    %577 = vector.load %arg3[%c29_259, %c0_260, %c0_261] : memref<32x32x128xf32, #tpu.memory_space<vmem>>, vector<1x32x128xf32>
    %578 = vector.shape_cast %577 : vector<1x32x128xf32> to vector<32x128xf32>
    %579 = vector.extract_strided_slice %398 {offsets = [29, 0], sizes = [1, 128], strides = [1, 1]} : vector<32x128xf32> to vector<1x128xf32>
    %580 = vector.broadcast %579 : vector<1x128xf32> to vector<32x128xf32>
    %581 = arith.mulf %578, %580 : vector<32x128xf32>
    %582 = arith.addf %576, %581 : vector<32x128xf32>
    %c30_262 = arith.constant 30 : index
    %c0_263 = arith.constant 0 : index
    %c0_264 = arith.constant 0 : index
    %583 = vector.load %arg3[%c30_262, %c0_263, %c0_264] : memref<32x32x128xf32, #tpu.memory_space<vmem>>, vector<1x32x128xf32>
    %584 = vector.shape_cast %583 : vector<1x32x128xf32> to vector<32x128xf32>
    %585 = vector.extract_strided_slice %398 {offsets = [30, 0], sizes = [1, 128], strides = [1, 1]} : vector<32x128xf32> to vector<1x128xf32>
    %586 = vector.broadcast %585 : vector<1x128xf32> to vector<32x128xf32>
    %587 = arith.mulf %584, %586 : vector<32x128xf32>
    %588 = arith.addf %582, %587 : vector<32x128xf32>
    %c31_265 = arith.constant 31 : index
    %c0_266 = arith.constant 0 : index
    %c0_267 = arith.constant 0 : index
    %589 = vector.load %arg3[%c31_265, %c0_266, %c0_267] : memref<32x32x128xf32, #tpu.memory_space<vmem>>, vector<1x32x128xf32>
    %590 = vector.shape_cast %589 : vector<1x32x128xf32> to vector<32x128xf32>
    %591 = vector.extract_strided_slice %398 {offsets = [31, 0], sizes = [1, 128], strides = [1, 1]} : vector<32x128xf32> to vector<1x128xf32>
    %592 = vector.broadcast %591 : vector<1x128xf32> to vector<32x128xf32>
    %593 = arith.mulf %590, %592 : vector<32x128xf32>
    %594 = arith.addf %588, %593 : vector<32x128xf32>
    %595 = math.tanh %594 : vector<32x128xf32>
    %c3_268 = arith.constant 3 : index
    %c0_269 = arith.constant 0 : index
    %596 = vector.load %arg1[%c3_268, %c0_269] : memref<8x128xf32, #tpu.memory_space<vmem>>, vector<1x128xf32>
    %597 = vector.broadcast %596 : vector<1x128xf32> to vector<32x128xf32>
    %598 = arith.mulf %597, %0 : vector<32x128xf32>
    %599 = arith.addf %598, %1 : vector<32x128xf32>
    %c0_270 = arith.constant 0 : index
    %c0_271 = arith.constant 0 : index
    %c0_272 = arith.constant 0 : index
    %600 = vector.load %arg3[%c0_270, %c0_271, %c0_272] : memref<32x32x128xf32, #tpu.memory_space<vmem>>, vector<1x32x128xf32>
    %601 = vector.shape_cast %600 : vector<1x32x128xf32> to vector<32x128xf32>
    %602 = vector.extract_strided_slice %595 {offsets = [0, 0], sizes = [1, 128], strides = [1, 1]} : vector<32x128xf32> to vector<1x128xf32>
    %603 = vector.broadcast %602 : vector<1x128xf32> to vector<32x128xf32>
    %604 = arith.mulf %601, %603 : vector<32x128xf32>
    %605 = arith.addf %599, %604 : vector<32x128xf32>
    %c1_273 = arith.constant 1 : index
    %c0_274 = arith.constant 0 : index
    %c0_275 = arith.constant 0 : index
    %606 = vector.load %arg3[%c1_273, %c0_274, %c0_275] : memref<32x32x128xf32, #tpu.memory_space<vmem>>, vector<1x32x128xf32>
    %607 = vector.shape_cast %606 : vector<1x32x128xf32> to vector<32x128xf32>
    %608 = vector.extract_strided_slice %595 {offsets = [1, 0], sizes = [1, 128], strides = [1, 1]} : vector<32x128xf32> to vector<1x128xf32>
    %609 = vector.broadcast %608 : vector<1x128xf32> to vector<32x128xf32>
    %610 = arith.mulf %607, %609 : vector<32x128xf32>
    %611 = arith.addf %605, %610 : vector<32x128xf32>
    %c2_276 = arith.constant 2 : index
    %c0_277 = arith.constant 0 : index
    %c0_278 = arith.constant 0 : index
    %612 = vector.load %arg3[%c2_276, %c0_277, %c0_278] : memref<32x32x128xf32, #tpu.memory_space<vmem>>, vector<1x32x128xf32>
    %613 = vector.shape_cast %612 : vector<1x32x128xf32> to vector<32x128xf32>
    %614 = vector.extract_strided_slice %595 {offsets = [2, 0], sizes = [1, 128], strides = [1, 1]} : vector<32x128xf32> to vector<1x128xf32>
    %615 = vector.broadcast %614 : vector<1x128xf32> to vector<32x128xf32>
    %616 = arith.mulf %613, %615 : vector<32x128xf32>
    %617 = arith.addf %611, %616 : vector<32x128xf32>
    %c3_279 = arith.constant 3 : index
    %c0_280 = arith.constant 0 : index
    %c0_281 = arith.constant 0 : index
    %618 = vector.load %arg3[%c3_279, %c0_280, %c0_281] : memref<32x32x128xf32, #tpu.memory_space<vmem>>, vector<1x32x128xf32>
    %619 = vector.shape_cast %618 : vector<1x32x128xf32> to vector<32x128xf32>
    %620 = vector.extract_strided_slice %595 {offsets = [3, 0], sizes = [1, 128], strides = [1, 1]} : vector<32x128xf32> to vector<1x128xf32>
    %621 = vector.broadcast %620 : vector<1x128xf32> to vector<32x128xf32>
    %622 = arith.mulf %619, %621 : vector<32x128xf32>
    %623 = arith.addf %617, %622 : vector<32x128xf32>
    %c4_282 = arith.constant 4 : index
    %c0_283 = arith.constant 0 : index
    %c0_284 = arith.constant 0 : index
    %624 = vector.load %arg3[%c4_282, %c0_283, %c0_284] : memref<32x32x128xf32, #tpu.memory_space<vmem>>, vector<1x32x128xf32>
    %625 = vector.shape_cast %624 : vector<1x32x128xf32> to vector<32x128xf32>
    %626 = vector.extract_strided_slice %595 {offsets = [4, 0], sizes = [1, 128], strides = [1, 1]} : vector<32x128xf32> to vector<1x128xf32>
    %627 = vector.broadcast %626 : vector<1x128xf32> to vector<32x128xf32>
    %628 = arith.mulf %625, %627 : vector<32x128xf32>
    %629 = arith.addf %623, %628 : vector<32x128xf32>
    %c5_285 = arith.constant 5 : index
    %c0_286 = arith.constant 0 : index
    %c0_287 = arith.constant 0 : index
    %630 = vector.load %arg3[%c5_285, %c0_286, %c0_287] : memref<32x32x128xf32, #tpu.memory_space<vmem>>, vector<1x32x128xf32>
    %631 = vector.shape_cast %630 : vector<1x32x128xf32> to vector<32x128xf32>
    %632 = vector.extract_strided_slice %595 {offsets = [5, 0], sizes = [1, 128], strides = [1, 1]} : vector<32x128xf32> to vector<1x128xf32>
    %633 = vector.broadcast %632 : vector<1x128xf32> to vector<32x128xf32>
    %634 = arith.mulf %631, %633 : vector<32x128xf32>
    %635 = arith.addf %629, %634 : vector<32x128xf32>
    %c6_288 = arith.constant 6 : index
    %c0_289 = arith.constant 0 : index
    %c0_290 = arith.constant 0 : index
    %636 = vector.load %arg3[%c6_288, %c0_289, %c0_290] : memref<32x32x128xf32, #tpu.memory_space<vmem>>, vector<1x32x128xf32>
    %637 = vector.shape_cast %636 : vector<1x32x128xf32> to vector<32x128xf32>
    %638 = vector.extract_strided_slice %595 {offsets = [6, 0], sizes = [1, 128], strides = [1, 1]} : vector<32x128xf32> to vector<1x128xf32>
    %639 = vector.broadcast %638 : vector<1x128xf32> to vector<32x128xf32>
    %640 = arith.mulf %637, %639 : vector<32x128xf32>
    %641 = arith.addf %635, %640 : vector<32x128xf32>
    %c7_291 = arith.constant 7 : index
    %c0_292 = arith.constant 0 : index
    %c0_293 = arith.constant 0 : index
    %642 = vector.load %arg3[%c7_291, %c0_292, %c0_293] : memref<32x32x128xf32, #tpu.memory_space<vmem>>, vector<1x32x128xf32>
    %643 = vector.shape_cast %642 : vector<1x32x128xf32> to vector<32x128xf32>
    %644 = vector.extract_strided_slice %595 {offsets = [7, 0], sizes = [1, 128], strides = [1, 1]} : vector<32x128xf32> to vector<1x128xf32>
    %645 = vector.broadcast %644 : vector<1x128xf32> to vector<32x128xf32>
    %646 = arith.mulf %643, %645 : vector<32x128xf32>
    %647 = arith.addf %641, %646 : vector<32x128xf32>
    %c8_294 = arith.constant 8 : index
    %c0_295 = arith.constant 0 : index
    %c0_296 = arith.constant 0 : index
    %648 = vector.load %arg3[%c8_294, %c0_295, %c0_296] : memref<32x32x128xf32, #tpu.memory_space<vmem>>, vector<1x32x128xf32>
    %649 = vector.shape_cast %648 : vector<1x32x128xf32> to vector<32x128xf32>
    %650 = vector.extract_strided_slice %595 {offsets = [8, 0], sizes = [1, 128], strides = [1, 1]} : vector<32x128xf32> to vector<1x128xf32>
    %651 = vector.broadcast %650 : vector<1x128xf32> to vector<32x128xf32>
    %652 = arith.mulf %649, %651 : vector<32x128xf32>
    %653 = arith.addf %647, %652 : vector<32x128xf32>
    %c9_297 = arith.constant 9 : index
    %c0_298 = arith.constant 0 : index
    %c0_299 = arith.constant 0 : index
    %654 = vector.load %arg3[%c9_297, %c0_298, %c0_299] : memref<32x32x128xf32, #tpu.memory_space<vmem>>, vector<1x32x128xf32>
    %655 = vector.shape_cast %654 : vector<1x32x128xf32> to vector<32x128xf32>
    %656 = vector.extract_strided_slice %595 {offsets = [9, 0], sizes = [1, 128], strides = [1, 1]} : vector<32x128xf32> to vector<1x128xf32>
    %657 = vector.broadcast %656 : vector<1x128xf32> to vector<32x128xf32>
    %658 = arith.mulf %655, %657 : vector<32x128xf32>
    %659 = arith.addf %653, %658 : vector<32x128xf32>
    %c10_300 = arith.constant 10 : index
    %c0_301 = arith.constant 0 : index
    %c0_302 = arith.constant 0 : index
    %660 = vector.load %arg3[%c10_300, %c0_301, %c0_302] : memref<32x32x128xf32, #tpu.memory_space<vmem>>, vector<1x32x128xf32>
    %661 = vector.shape_cast %660 : vector<1x32x128xf32> to vector<32x128xf32>
    %662 = vector.extract_strided_slice %595 {offsets = [10, 0], sizes = [1, 128], strides = [1, 1]} : vector<32x128xf32> to vector<1x128xf32>
    %663 = vector.broadcast %662 : vector<1x128xf32> to vector<32x128xf32>
    %664 = arith.mulf %661, %663 : vector<32x128xf32>
    %665 = arith.addf %659, %664 : vector<32x128xf32>
    %c11_303 = arith.constant 11 : index
    %c0_304 = arith.constant 0 : index
    %c0_305 = arith.constant 0 : index
    %666 = vector.load %arg3[%c11_303, %c0_304, %c0_305] : memref<32x32x128xf32, #tpu.memory_space<vmem>>, vector<1x32x128xf32>
    %667 = vector.shape_cast %666 : vector<1x32x128xf32> to vector<32x128xf32>
    %668 = vector.extract_strided_slice %595 {offsets = [11, 0], sizes = [1, 128], strides = [1, 1]} : vector<32x128xf32> to vector<1x128xf32>
    %669 = vector.broadcast %668 : vector<1x128xf32> to vector<32x128xf32>
    %670 = arith.mulf %667, %669 : vector<32x128xf32>
    %671 = arith.addf %665, %670 : vector<32x128xf32>
    %c12_306 = arith.constant 12 : index
    %c0_307 = arith.constant 0 : index
    %c0_308 = arith.constant 0 : index
    %672 = vector.load %arg3[%c12_306, %c0_307, %c0_308] : memref<32x32x128xf32, #tpu.memory_space<vmem>>, vector<1x32x128xf32>
    %673 = vector.shape_cast %672 : vector<1x32x128xf32> to vector<32x128xf32>
    %674 = vector.extract_strided_slice %595 {offsets = [12, 0], sizes = [1, 128], strides = [1, 1]} : vector<32x128xf32> to vector<1x128xf32>
    %675 = vector.broadcast %674 : vector<1x128xf32> to vector<32x128xf32>
    %676 = arith.mulf %673, %675 : vector<32x128xf32>
    %677 = arith.addf %671, %676 : vector<32x128xf32>
    %c13_309 = arith.constant 13 : index
    %c0_310 = arith.constant 0 : index
    %c0_311 = arith.constant 0 : index
    %678 = vector.load %arg3[%c13_309, %c0_310, %c0_311] : memref<32x32x128xf32, #tpu.memory_space<vmem>>, vector<1x32x128xf32>
    %679 = vector.shape_cast %678 : vector<1x32x128xf32> to vector<32x128xf32>
    %680 = vector.extract_strided_slice %595 {offsets = [13, 0], sizes = [1, 128], strides = [1, 1]} : vector<32x128xf32> to vector<1x128xf32>
    %681 = vector.broadcast %680 : vector<1x128xf32> to vector<32x128xf32>
    %682 = arith.mulf %679, %681 : vector<32x128xf32>
    %683 = arith.addf %677, %682 : vector<32x128xf32>
    %c14_312 = arith.constant 14 : index
    %c0_313 = arith.constant 0 : index
    %c0_314 = arith.constant 0 : index
    %684 = vector.load %arg3[%c14_312, %c0_313, %c0_314] : memref<32x32x128xf32, #tpu.memory_space<vmem>>, vector<1x32x128xf32>
    %685 = vector.shape_cast %684 : vector<1x32x128xf32> to vector<32x128xf32>
    %686 = vector.extract_strided_slice %595 {offsets = [14, 0], sizes = [1, 128], strides = [1, 1]} : vector<32x128xf32> to vector<1x128xf32>
    %687 = vector.broadcast %686 : vector<1x128xf32> to vector<32x128xf32>
    %688 = arith.mulf %685, %687 : vector<32x128xf32>
    %689 = arith.addf %683, %688 : vector<32x128xf32>
    %c15_315 = arith.constant 15 : index
    %c0_316 = arith.constant 0 : index
    %c0_317 = arith.constant 0 : index
    %690 = vector.load %arg3[%c15_315, %c0_316, %c0_317] : memref<32x32x128xf32, #tpu.memory_space<vmem>>, vector<1x32x128xf32>
    %691 = vector.shape_cast %690 : vector<1x32x128xf32> to vector<32x128xf32>
    %692 = vector.extract_strided_slice %595 {offsets = [15, 0], sizes = [1, 128], strides = [1, 1]} : vector<32x128xf32> to vector<1x128xf32>
    %693 = vector.broadcast %692 : vector<1x128xf32> to vector<32x128xf32>
    %694 = arith.mulf %691, %693 : vector<32x128xf32>
    %695 = arith.addf %689, %694 : vector<32x128xf32>
    %c16_318 = arith.constant 16 : index
    %c0_319 = arith.constant 0 : index
    %c0_320 = arith.constant 0 : index
    %696 = vector.load %arg3[%c16_318, %c0_319, %c0_320] : memref<32x32x128xf32, #tpu.memory_space<vmem>>, vector<1x32x128xf32>
    %697 = vector.shape_cast %696 : vector<1x32x128xf32> to vector<32x128xf32>
    %698 = vector.extract_strided_slice %595 {offsets = [16, 0], sizes = [1, 128], strides = [1, 1]} : vector<32x128xf32> to vector<1x128xf32>
    %699 = vector.broadcast %698 : vector<1x128xf32> to vector<32x128xf32>
    %700 = arith.mulf %697, %699 : vector<32x128xf32>
    %701 = arith.addf %695, %700 : vector<32x128xf32>
    %c17_321 = arith.constant 17 : index
    %c0_322 = arith.constant 0 : index
    %c0_323 = arith.constant 0 : index
    %702 = vector.load %arg3[%c17_321, %c0_322, %c0_323] : memref<32x32x128xf32, #tpu.memory_space<vmem>>, vector<1x32x128xf32>
    %703 = vector.shape_cast %702 : vector<1x32x128xf32> to vector<32x128xf32>
    %704 = vector.extract_strided_slice %595 {offsets = [17, 0], sizes = [1, 128], strides = [1, 1]} : vector<32x128xf32> to vector<1x128xf32>
    %705 = vector.broadcast %704 : vector<1x128xf32> to vector<32x128xf32>
    %706 = arith.mulf %703, %705 : vector<32x128xf32>
    %707 = arith.addf %701, %706 : vector<32x128xf32>
    %c18_324 = arith.constant 18 : index
    %c0_325 = arith.constant 0 : index
    %c0_326 = arith.constant 0 : index
    %708 = vector.load %arg3[%c18_324, %c0_325, %c0_326] : memref<32x32x128xf32, #tpu.memory_space<vmem>>, vector<1x32x128xf32>
    %709 = vector.shape_cast %708 : vector<1x32x128xf32> to vector<32x128xf32>
    %710 = vector.extract_strided_slice %595 {offsets = [18, 0], sizes = [1, 128], strides = [1, 1]} : vector<32x128xf32> to vector<1x128xf32>
    %711 = vector.broadcast %710 : vector<1x128xf32> to vector<32x128xf32>
    %712 = arith.mulf %709, %711 : vector<32x128xf32>
    %713 = arith.addf %707, %712 : vector<32x128xf32>
    %c19_327 = arith.constant 19 : index
    %c0_328 = arith.constant 0 : index
    %c0_329 = arith.constant 0 : index
    %714 = vector.load %arg3[%c19_327, %c0_328, %c0_329] : memref<32x32x128xf32, #tpu.memory_space<vmem>>, vector<1x32x128xf32>
    %715 = vector.shape_cast %714 : vector<1x32x128xf32> to vector<32x128xf32>
    %716 = vector.extract_strided_slice %595 {offsets = [19, 0], sizes = [1, 128], strides = [1, 1]} : vector<32x128xf32> to vector<1x128xf32>
    %717 = vector.broadcast %716 : vector<1x128xf32> to vector<32x128xf32>
    %718 = arith.mulf %715, %717 : vector<32x128xf32>
    %719 = arith.addf %713, %718 : vector<32x128xf32>
    %c20_330 = arith.constant 20 : index
    %c0_331 = arith.constant 0 : index
    %c0_332 = arith.constant 0 : index
    %720 = vector.load %arg3[%c20_330, %c0_331, %c0_332] : memref<32x32x128xf32, #tpu.memory_space<vmem>>, vector<1x32x128xf32>
    %721 = vector.shape_cast %720 : vector<1x32x128xf32> to vector<32x128xf32>
    %722 = vector.extract_strided_slice %595 {offsets = [20, 0], sizes = [1, 128], strides = [1, 1]} : vector<32x128xf32> to vector<1x128xf32>
    %723 = vector.broadcast %722 : vector<1x128xf32> to vector<32x128xf32>
    %724 = arith.mulf %721, %723 : vector<32x128xf32>
    %725 = arith.addf %719, %724 : vector<32x128xf32>
    %c21_333 = arith.constant 21 : index
    %c0_334 = arith.constant 0 : index
    %c0_335 = arith.constant 0 : index
    %726 = vector.load %arg3[%c21_333, %c0_334, %c0_335] : memref<32x32x128xf32, #tpu.memory_space<vmem>>, vector<1x32x128xf32>
    %727 = vector.shape_cast %726 : vector<1x32x128xf32> to vector<32x128xf32>
    %728 = vector.extract_strided_slice %595 {offsets = [21, 0], sizes = [1, 128], strides = [1, 1]} : vector<32x128xf32> to vector<1x128xf32>
    %729 = vector.broadcast %728 : vector<1x128xf32> to vector<32x128xf32>
    %730 = arith.mulf %727, %729 : vector<32x128xf32>
    %731 = arith.addf %725, %730 : vector<32x128xf32>
    %c22_336 = arith.constant 22 : index
    %c0_337 = arith.constant 0 : index
    %c0_338 = arith.constant 0 : index
    %732 = vector.load %arg3[%c22_336, %c0_337, %c0_338] : memref<32x32x128xf32, #tpu.memory_space<vmem>>, vector<1x32x128xf32>
    %733 = vector.shape_cast %732 : vector<1x32x128xf32> to vector<32x128xf32>
    %734 = vector.extract_strided_slice %595 {offsets = [22, 0], sizes = [1, 128], strides = [1, 1]} : vector<32x128xf32> to vector<1x128xf32>
    %735 = vector.broadcast %734 : vector<1x128xf32> to vector<32x128xf32>
    %736 = arith.mulf %733, %735 : vector<32x128xf32>
    %737 = arith.addf %731, %736 : vector<32x128xf32>
    %c23_339 = arith.constant 23 : index
    %c0_340 = arith.constant 0 : index
    %c0_341 = arith.constant 0 : index
    %738 = vector.load %arg3[%c23_339, %c0_340, %c0_341] : memref<32x32x128xf32, #tpu.memory_space<vmem>>, vector<1x32x128xf32>
    %739 = vector.shape_cast %738 : vector<1x32x128xf32> to vector<32x128xf32>
    %740 = vector.extract_strided_slice %595 {offsets = [23, 0], sizes = [1, 128], strides = [1, 1]} : vector<32x128xf32> to vector<1x128xf32>
    %741 = vector.broadcast %740 : vector<1x128xf32> to vector<32x128xf32>
    %742 = arith.mulf %739, %741 : vector<32x128xf32>
    %743 = arith.addf %737, %742 : vector<32x128xf32>
    %c24_342 = arith.constant 24 : index
    %c0_343 = arith.constant 0 : index
    %c0_344 = arith.constant 0 : index
    %744 = vector.load %arg3[%c24_342, %c0_343, %c0_344] : memref<32x32x128xf32, #tpu.memory_space<vmem>>, vector<1x32x128xf32>
    %745 = vector.shape_cast %744 : vector<1x32x128xf32> to vector<32x128xf32>
    %746 = vector.extract_strided_slice %595 {offsets = [24, 0], sizes = [1, 128], strides = [1, 1]} : vector<32x128xf32> to vector<1x128xf32>
    %747 = vector.broadcast %746 : vector<1x128xf32> to vector<32x128xf32>
    %748 = arith.mulf %745, %747 : vector<32x128xf32>
    %749 = arith.addf %743, %748 : vector<32x128xf32>
    %c25_345 = arith.constant 25 : index
    %c0_346 = arith.constant 0 : index
    %c0_347 = arith.constant 0 : index
    %750 = vector.load %arg3[%c25_345, %c0_346, %c0_347] : memref<32x32x128xf32, #tpu.memory_space<vmem>>, vector<1x32x128xf32>
    %751 = vector.shape_cast %750 : vector<1x32x128xf32> to vector<32x128xf32>
    %752 = vector.extract_strided_slice %595 {offsets = [25, 0], sizes = [1, 128], strides = [1, 1]} : vector<32x128xf32> to vector<1x128xf32>
    %753 = vector.broadcast %752 : vector<1x128xf32> to vector<32x128xf32>
    %754 = arith.mulf %751, %753 : vector<32x128xf32>
    %755 = arith.addf %749, %754 : vector<32x128xf32>
    %c26_348 = arith.constant 26 : index
    %c0_349 = arith.constant 0 : index
    %c0_350 = arith.constant 0 : index
    %756 = vector.load %arg3[%c26_348, %c0_349, %c0_350] : memref<32x32x128xf32, #tpu.memory_space<vmem>>, vector<1x32x128xf32>
    %757 = vector.shape_cast %756 : vector<1x32x128xf32> to vector<32x128xf32>
    %758 = vector.extract_strided_slice %595 {offsets = [26, 0], sizes = [1, 128], strides = [1, 1]} : vector<32x128xf32> to vector<1x128xf32>
    %759 = vector.broadcast %758 : vector<1x128xf32> to vector<32x128xf32>
    %760 = arith.mulf %757, %759 : vector<32x128xf32>
    %761 = arith.addf %755, %760 : vector<32x128xf32>
    %c27_351 = arith.constant 27 : index
    %c0_352 = arith.constant 0 : index
    %c0_353 = arith.constant 0 : index
    %762 = vector.load %arg3[%c27_351, %c0_352, %c0_353] : memref<32x32x128xf32, #tpu.memory_space<vmem>>, vector<1x32x128xf32>
    %763 = vector.shape_cast %762 : vector<1x32x128xf32> to vector<32x128xf32>
    %764 = vector.extract_strided_slice %595 {offsets = [27, 0], sizes = [1, 128], strides = [1, 1]} : vector<32x128xf32> to vector<1x128xf32>
    %765 = vector.broadcast %764 : vector<1x128xf32> to vector<32x128xf32>
    %766 = arith.mulf %763, %765 : vector<32x128xf32>
    %767 = arith.addf %761, %766 : vector<32x128xf32>
    %c28_354 = arith.constant 28 : index
    %c0_355 = arith.constant 0 : index
    %c0_356 = arith.constant 0 : index
    %768 = vector.load %arg3[%c28_354, %c0_355, %c0_356] : memref<32x32x128xf32, #tpu.memory_space<vmem>>, vector<1x32x128xf32>
    %769 = vector.shape_cast %768 : vector<1x32x128xf32> to vector<32x128xf32>
    %770 = vector.extract_strided_slice %595 {offsets = [28, 0], sizes = [1, 128], strides = [1, 1]} : vector<32x128xf32> to vector<1x128xf32>
    %771 = vector.broadcast %770 : vector<1x128xf32> to vector<32x128xf32>
    %772 = arith.mulf %769, %771 : vector<32x128xf32>
    %773 = arith.addf %767, %772 : vector<32x128xf32>
    %c29_357 = arith.constant 29 : index
    %c0_358 = arith.constant 0 : index
    %c0_359 = arith.constant 0 : index
    %774 = vector.load %arg3[%c29_357, %c0_358, %c0_359] : memref<32x32x128xf32, #tpu.memory_space<vmem>>, vector<1x32x128xf32>
    %775 = vector.shape_cast %774 : vector<1x32x128xf32> to vector<32x128xf32>
    %776 = vector.extract_strided_slice %595 {offsets = [29, 0], sizes = [1, 128], strides = [1, 1]} : vector<32x128xf32> to vector<1x128xf32>
    %777 = vector.broadcast %776 : vector<1x128xf32> to vector<32x128xf32>
    %778 = arith.mulf %775, %777 : vector<32x128xf32>
    %779 = arith.addf %773, %778 : vector<32x128xf32>
    %c30_360 = arith.constant 30 : index
    %c0_361 = arith.constant 0 : index
    %c0_362 = arith.constant 0 : index
    %780 = vector.load %arg3[%c30_360, %c0_361, %c0_362] : memref<32x32x128xf32, #tpu.memory_space<vmem>>, vector<1x32x128xf32>
    %781 = vector.shape_cast %780 : vector<1x32x128xf32> to vector<32x128xf32>
    %782 = vector.extract_strided_slice %595 {offsets = [30, 0], sizes = [1, 128], strides = [1, 1]} : vector<32x128xf32> to vector<1x128xf32>
    %783 = vector.broadcast %782 : vector<1x128xf32> to vector<32x128xf32>
    %784 = arith.mulf %781, %783 : vector<32x128xf32>
    %785 = arith.addf %779, %784 : vector<32x128xf32>
    %c31_363 = arith.constant 31 : index
    %c0_364 = arith.constant 0 : index
    %c0_365 = arith.constant 0 : index
    %786 = vector.load %arg3[%c31_363, %c0_364, %c0_365] : memref<32x32x128xf32, #tpu.memory_space<vmem>>, vector<1x32x128xf32>
    %787 = vector.shape_cast %786 : vector<1x32x128xf32> to vector<32x128xf32>
    %788 = vector.extract_strided_slice %595 {offsets = [31, 0], sizes = [1, 128], strides = [1, 1]} : vector<32x128xf32> to vector<1x128xf32>
    %789 = vector.broadcast %788 : vector<1x128xf32> to vector<32x128xf32>
    %790 = arith.mulf %787, %789 : vector<32x128xf32>
    %791 = arith.addf %785, %790 : vector<32x128xf32>
    %792 = math.tanh %791 : vector<32x128xf32>
    %c4_366 = arith.constant 4 : index
    %c0_367 = arith.constant 0 : index
    %793 = vector.load %arg1[%c4_366, %c0_367] : memref<8x128xf32, #tpu.memory_space<vmem>>, vector<1x128xf32>
    %794 = vector.broadcast %793 : vector<1x128xf32> to vector<32x128xf32>
    %795 = arith.mulf %794, %0 : vector<32x128xf32>
    %796 = arith.addf %795, %1 : vector<32x128xf32>
    %c0_368 = arith.constant 0 : index
    %c0_369 = arith.constant 0 : index
    %c0_370 = arith.constant 0 : index
    %797 = vector.load %arg3[%c0_368, %c0_369, %c0_370] : memref<32x32x128xf32, #tpu.memory_space<vmem>>, vector<1x32x128xf32>
    %798 = vector.shape_cast %797 : vector<1x32x128xf32> to vector<32x128xf32>
    %799 = vector.extract_strided_slice %792 {offsets = [0, 0], sizes = [1, 128], strides = [1, 1]} : vector<32x128xf32> to vector<1x128xf32>
    %800 = vector.broadcast %799 : vector<1x128xf32> to vector<32x128xf32>
    %801 = arith.mulf %798, %800 : vector<32x128xf32>
    %802 = arith.addf %796, %801 : vector<32x128xf32>
    %c1_371 = arith.constant 1 : index
    %c0_372 = arith.constant 0 : index
    %c0_373 = arith.constant 0 : index
    %803 = vector.load %arg3[%c1_371, %c0_372, %c0_373] : memref<32x32x128xf32, #tpu.memory_space<vmem>>, vector<1x32x128xf32>
    %804 = vector.shape_cast %803 : vector<1x32x128xf32> to vector<32x128xf32>
    %805 = vector.extract_strided_slice %792 {offsets = [1, 0], sizes = [1, 128], strides = [1, 1]} : vector<32x128xf32> to vector<1x128xf32>
    %806 = vector.broadcast %805 : vector<1x128xf32> to vector<32x128xf32>
    %807 = arith.mulf %804, %806 : vector<32x128xf32>
    %808 = arith.addf %802, %807 : vector<32x128xf32>
    %c2_374 = arith.constant 2 : index
    %c0_375 = arith.constant 0 : index
    %c0_376 = arith.constant 0 : index
    %809 = vector.load %arg3[%c2_374, %c0_375, %c0_376] : memref<32x32x128xf32, #tpu.memory_space<vmem>>, vector<1x32x128xf32>
    %810 = vector.shape_cast %809 : vector<1x32x128xf32> to vector<32x128xf32>
    %811 = vector.extract_strided_slice %792 {offsets = [2, 0], sizes = [1, 128], strides = [1, 1]} : vector<32x128xf32> to vector<1x128xf32>
    %812 = vector.broadcast %811 : vector<1x128xf32> to vector<32x128xf32>
    %813 = arith.mulf %810, %812 : vector<32x128xf32>
    %814 = arith.addf %808, %813 : vector<32x128xf32>
    %c3_377 = arith.constant 3 : index
    %c0_378 = arith.constant 0 : index
    %c0_379 = arith.constant 0 : index
    %815 = vector.load %arg3[%c3_377, %c0_378, %c0_379] : memref<32x32x128xf32, #tpu.memory_space<vmem>>, vector<1x32x128xf32>
    %816 = vector.shape_cast %815 : vector<1x32x128xf32> to vector<32x128xf32>
    %817 = vector.extract_strided_slice %792 {offsets = [3, 0], sizes = [1, 128], strides = [1, 1]} : vector<32x128xf32> to vector<1x128xf32>
    %818 = vector.broadcast %817 : vector<1x128xf32> to vector<32x128xf32>
    %819 = arith.mulf %816, %818 : vector<32x128xf32>
    %820 = arith.addf %814, %819 : vector<32x128xf32>
    %c4_380 = arith.constant 4 : index
    %c0_381 = arith.constant 0 : index
    %c0_382 = arith.constant 0 : index
    %821 = vector.load %arg3[%c4_380, %c0_381, %c0_382] : memref<32x32x128xf32, #tpu.memory_space<vmem>>, vector<1x32x128xf32>
    %822 = vector.shape_cast %821 : vector<1x32x128xf32> to vector<32x128xf32>
    %823 = vector.extract_strided_slice %792 {offsets = [4, 0], sizes = [1, 128], strides = [1, 1]} : vector<32x128xf32> to vector<1x128xf32>
    %824 = vector.broadcast %823 : vector<1x128xf32> to vector<32x128xf32>
    %825 = arith.mulf %822, %824 : vector<32x128xf32>
    %826 = arith.addf %820, %825 : vector<32x128xf32>
    %c5_383 = arith.constant 5 : index
    %c0_384 = arith.constant 0 : index
    %c0_385 = arith.constant 0 : index
    %827 = vector.load %arg3[%c5_383, %c0_384, %c0_385] : memref<32x32x128xf32, #tpu.memory_space<vmem>>, vector<1x32x128xf32>
    %828 = vector.shape_cast %827 : vector<1x32x128xf32> to vector<32x128xf32>
    %829 = vector.extract_strided_slice %792 {offsets = [5, 0], sizes = [1, 128], strides = [1, 1]} : vector<32x128xf32> to vector<1x128xf32>
    %830 = vector.broadcast %829 : vector<1x128xf32> to vector<32x128xf32>
    %831 = arith.mulf %828, %830 : vector<32x128xf32>
    %832 = arith.addf %826, %831 : vector<32x128xf32>
    %c6_386 = arith.constant 6 : index
    %c0_387 = arith.constant 0 : index
    %c0_388 = arith.constant 0 : index
    %833 = vector.load %arg3[%c6_386, %c0_387, %c0_388] : memref<32x32x128xf32, #tpu.memory_space<vmem>>, vector<1x32x128xf32>
    %834 = vector.shape_cast %833 : vector<1x32x128xf32> to vector<32x128xf32>
    %835 = vector.extract_strided_slice %792 {offsets = [6, 0], sizes = [1, 128], strides = [1, 1]} : vector<32x128xf32> to vector<1x128xf32>
    %836 = vector.broadcast %835 : vector<1x128xf32> to vector<32x128xf32>
    %837 = arith.mulf %834, %836 : vector<32x128xf32>
    %838 = arith.addf %832, %837 : vector<32x128xf32>
    %c7_389 = arith.constant 7 : index
    %c0_390 = arith.constant 0 : index
    %c0_391 = arith.constant 0 : index
    %839 = vector.load %arg3[%c7_389, %c0_390, %c0_391] : memref<32x32x128xf32, #tpu.memory_space<vmem>>, vector<1x32x128xf32>
    %840 = vector.shape_cast %839 : vector<1x32x128xf32> to vector<32x128xf32>
    %841 = vector.extract_strided_slice %792 {offsets = [7, 0], sizes = [1, 128], strides = [1, 1]} : vector<32x128xf32> to vector<1x128xf32>
    %842 = vector.broadcast %841 : vector<1x128xf32> to vector<32x128xf32>
    %843 = arith.mulf %840, %842 : vector<32x128xf32>
    %844 = arith.addf %838, %843 : vector<32x128xf32>
    %c8_392 = arith.constant 8 : index
    %c0_393 = arith.constant 0 : index
    %c0_394 = arith.constant 0 : index
    %845 = vector.load %arg3[%c8_392, %c0_393, %c0_394] : memref<32x32x128xf32, #tpu.memory_space<vmem>>, vector<1x32x128xf32>
    %846 = vector.shape_cast %845 : vector<1x32x128xf32> to vector<32x128xf32>
    %847 = vector.extract_strided_slice %792 {offsets = [8, 0], sizes = [1, 128], strides = [1, 1]} : vector<32x128xf32> to vector<1x128xf32>
    %848 = vector.broadcast %847 : vector<1x128xf32> to vector<32x128xf32>
    %849 = arith.mulf %846, %848 : vector<32x128xf32>
    %850 = arith.addf %844, %849 : vector<32x128xf32>
    %c9_395 = arith.constant 9 : index
    %c0_396 = arith.constant 0 : index
    %c0_397 = arith.constant 0 : index
    %851 = vector.load %arg3[%c9_395, %c0_396, %c0_397] : memref<32x32x128xf32, #tpu.memory_space<vmem>>, vector<1x32x128xf32>
    %852 = vector.shape_cast %851 : vector<1x32x128xf32> to vector<32x128xf32>
    %853 = vector.extract_strided_slice %792 {offsets = [9, 0], sizes = [1, 128], strides = [1, 1]} : vector<32x128xf32> to vector<1x128xf32>
    %854 = vector.broadcast %853 : vector<1x128xf32> to vector<32x128xf32>
    %855 = arith.mulf %852, %854 : vector<32x128xf32>
    %856 = arith.addf %850, %855 : vector<32x128xf32>
    %c10_398 = arith.constant 10 : index
    %c0_399 = arith.constant 0 : index
    %c0_400 = arith.constant 0 : index
    %857 = vector.load %arg3[%c10_398, %c0_399, %c0_400] : memref<32x32x128xf32, #tpu.memory_space<vmem>>, vector<1x32x128xf32>
    %858 = vector.shape_cast %857 : vector<1x32x128xf32> to vector<32x128xf32>
    %859 = vector.extract_strided_slice %792 {offsets = [10, 0], sizes = [1, 128], strides = [1, 1]} : vector<32x128xf32> to vector<1x128xf32>
    %860 = vector.broadcast %859 : vector<1x128xf32> to vector<32x128xf32>
    %861 = arith.mulf %858, %860 : vector<32x128xf32>
    %862 = arith.addf %856, %861 : vector<32x128xf32>
    %c11_401 = arith.constant 11 : index
    %c0_402 = arith.constant 0 : index
    %c0_403 = arith.constant 0 : index
    %863 = vector.load %arg3[%c11_401, %c0_402, %c0_403] : memref<32x32x128xf32, #tpu.memory_space<vmem>>, vector<1x32x128xf32>
    %864 = vector.shape_cast %863 : vector<1x32x128xf32> to vector<32x128xf32>
    %865 = vector.extract_strided_slice %792 {offsets = [11, 0], sizes = [1, 128], strides = [1, 1]} : vector<32x128xf32> to vector<1x128xf32>
    %866 = vector.broadcast %865 : vector<1x128xf32> to vector<32x128xf32>
    %867 = arith.mulf %864, %866 : vector<32x128xf32>
    %868 = arith.addf %862, %867 : vector<32x128xf32>
    %c12_404 = arith.constant 12 : index
    %c0_405 = arith.constant 0 : index
    %c0_406 = arith.constant 0 : index
    %869 = vector.load %arg3[%c12_404, %c0_405, %c0_406] : memref<32x32x128xf32, #tpu.memory_space<vmem>>, vector<1x32x128xf32>
    %870 = vector.shape_cast %869 : vector<1x32x128xf32> to vector<32x128xf32>
    %871 = vector.extract_strided_slice %792 {offsets = [12, 0], sizes = [1, 128], strides = [1, 1]} : vector<32x128xf32> to vector<1x128xf32>
    %872 = vector.broadcast %871 : vector<1x128xf32> to vector<32x128xf32>
    %873 = arith.mulf %870, %872 : vector<32x128xf32>
    %874 = arith.addf %868, %873 : vector<32x128xf32>
    %c13_407 = arith.constant 13 : index
    %c0_408 = arith.constant 0 : index
    %c0_409 = arith.constant 0 : index
    %875 = vector.load %arg3[%c13_407, %c0_408, %c0_409] : memref<32x32x128xf32, #tpu.memory_space<vmem>>, vector<1x32x128xf32>
    %876 = vector.shape_cast %875 : vector<1x32x128xf32> to vector<32x128xf32>
    %877 = vector.extract_strided_slice %792 {offsets = [13, 0], sizes = [1, 128], strides = [1, 1]} : vector<32x128xf32> to vector<1x128xf32>
    %878 = vector.broadcast %877 : vector<1x128xf32> to vector<32x128xf32>
    %879 = arith.mulf %876, %878 : vector<32x128xf32>
    %880 = arith.addf %874, %879 : vector<32x128xf32>
    %c14_410 = arith.constant 14 : index
    %c0_411 = arith.constant 0 : index
    %c0_412 = arith.constant 0 : index
    %881 = vector.load %arg3[%c14_410, %c0_411, %c0_412] : memref<32x32x128xf32, #tpu.memory_space<vmem>>, vector<1x32x128xf32>
    %882 = vector.shape_cast %881 : vector<1x32x128xf32> to vector<32x128xf32>
    %883 = vector.extract_strided_slice %792 {offsets = [14, 0], sizes = [1, 128], strides = [1, 1]} : vector<32x128xf32> to vector<1x128xf32>
    %884 = vector.broadcast %883 : vector<1x128xf32> to vector<32x128xf32>
    %885 = arith.mulf %882, %884 : vector<32x128xf32>
    %886 = arith.addf %880, %885 : vector<32x128xf32>
    %c15_413 = arith.constant 15 : index
    %c0_414 = arith.constant 0 : index
    %c0_415 = arith.constant 0 : index
    %887 = vector.load %arg3[%c15_413, %c0_414, %c0_415] : memref<32x32x128xf32, #tpu.memory_space<vmem>>, vector<1x32x128xf32>
    %888 = vector.shape_cast %887 : vector<1x32x128xf32> to vector<32x128xf32>
    %889 = vector.extract_strided_slice %792 {offsets = [15, 0], sizes = [1, 128], strides = [1, 1]} : vector<32x128xf32> to vector<1x128xf32>
    %890 = vector.broadcast %889 : vector<1x128xf32> to vector<32x128xf32>
    %891 = arith.mulf %888, %890 : vector<32x128xf32>
    %892 = arith.addf %886, %891 : vector<32x128xf32>
    %c16_416 = arith.constant 16 : index
    %c0_417 = arith.constant 0 : index
    %c0_418 = arith.constant 0 : index
    %893 = vector.load %arg3[%c16_416, %c0_417, %c0_418] : memref<32x32x128xf32, #tpu.memory_space<vmem>>, vector<1x32x128xf32>
    %894 = vector.shape_cast %893 : vector<1x32x128xf32> to vector<32x128xf32>
    %895 = vector.extract_strided_slice %792 {offsets = [16, 0], sizes = [1, 128], strides = [1, 1]} : vector<32x128xf32> to vector<1x128xf32>
    %896 = vector.broadcast %895 : vector<1x128xf32> to vector<32x128xf32>
    %897 = arith.mulf %894, %896 : vector<32x128xf32>
    %898 = arith.addf %892, %897 : vector<32x128xf32>
    %c17_419 = arith.constant 17 : index
    %c0_420 = arith.constant 0 : index
    %c0_421 = arith.constant 0 : index
    %899 = vector.load %arg3[%c17_419, %c0_420, %c0_421] : memref<32x32x128xf32, #tpu.memory_space<vmem>>, vector<1x32x128xf32>
    %900 = vector.shape_cast %899 : vector<1x32x128xf32> to vector<32x128xf32>
    %901 = vector.extract_strided_slice %792 {offsets = [17, 0], sizes = [1, 128], strides = [1, 1]} : vector<32x128xf32> to vector<1x128xf32>
    %902 = vector.broadcast %901 : vector<1x128xf32> to vector<32x128xf32>
    %903 = arith.mulf %900, %902 : vector<32x128xf32>
    %904 = arith.addf %898, %903 : vector<32x128xf32>
    %c18_422 = arith.constant 18 : index
    %c0_423 = arith.constant 0 : index
    %c0_424 = arith.constant 0 : index
    %905 = vector.load %arg3[%c18_422, %c0_423, %c0_424] : memref<32x32x128xf32, #tpu.memory_space<vmem>>, vector<1x32x128xf32>
    %906 = vector.shape_cast %905 : vector<1x32x128xf32> to vector<32x128xf32>
    %907 = vector.extract_strided_slice %792 {offsets = [18, 0], sizes = [1, 128], strides = [1, 1]} : vector<32x128xf32> to vector<1x128xf32>
    %908 = vector.broadcast %907 : vector<1x128xf32> to vector<32x128xf32>
    %909 = arith.mulf %906, %908 : vector<32x128xf32>
    %910 = arith.addf %904, %909 : vector<32x128xf32>
    %c19_425 = arith.constant 19 : index
    %c0_426 = arith.constant 0 : index
    %c0_427 = arith.constant 0 : index
    %911 = vector.load %arg3[%c19_425, %c0_426, %c0_427] : memref<32x32x128xf32, #tpu.memory_space<vmem>>, vector<1x32x128xf32>
    %912 = vector.shape_cast %911 : vector<1x32x128xf32> to vector<32x128xf32>
    %913 = vector.extract_strided_slice %792 {offsets = [19, 0], sizes = [1, 128], strides = [1, 1]} : vector<32x128xf32> to vector<1x128xf32>
    %914 = vector.broadcast %913 : vector<1x128xf32> to vector<32x128xf32>
    %915 = arith.mulf %912, %914 : vector<32x128xf32>
    %916 = arith.addf %910, %915 : vector<32x128xf32>
    %c20_428 = arith.constant 20 : index
    %c0_429 = arith.constant 0 : index
    %c0_430 = arith.constant 0 : index
    %917 = vector.load %arg3[%c20_428, %c0_429, %c0_430] : memref<32x32x128xf32, #tpu.memory_space<vmem>>, vector<1x32x128xf32>
    %918 = vector.shape_cast %917 : vector<1x32x128xf32> to vector<32x128xf32>
    %919 = vector.extract_strided_slice %792 {offsets = [20, 0], sizes = [1, 128], strides = [1, 1]} : vector<32x128xf32> to vector<1x128xf32>
    %920 = vector.broadcast %919 : vector<1x128xf32> to vector<32x128xf32>
    %921 = arith.mulf %918, %920 : vector<32x128xf32>
    %922 = arith.addf %916, %921 : vector<32x128xf32>
    %c21_431 = arith.constant 21 : index
    %c0_432 = arith.constant 0 : index
    %c0_433 = arith.constant 0 : index
    %923 = vector.load %arg3[%c21_431, %c0_432, %c0_433] : memref<32x32x128xf32, #tpu.memory_space<vmem>>, vector<1x32x128xf32>
    %924 = vector.shape_cast %923 : vector<1x32x128xf32> to vector<32x128xf32>
    %925 = vector.extract_strided_slice %792 {offsets = [21, 0], sizes = [1, 128], strides = [1, 1]} : vector<32x128xf32> to vector<1x128xf32>
    %926 = vector.broadcast %925 : vector<1x128xf32> to vector<32x128xf32>
    %927 = arith.mulf %924, %926 : vector<32x128xf32>
    %928 = arith.addf %922, %927 : vector<32x128xf32>
    %c22_434 = arith.constant 22 : index
    %c0_435 = arith.constant 0 : index
    %c0_436 = arith.constant 0 : index
    %929 = vector.load %arg3[%c22_434, %c0_435, %c0_436] : memref<32x32x128xf32, #tpu.memory_space<vmem>>, vector<1x32x128xf32>
    %930 = vector.shape_cast %929 : vector<1x32x128xf32> to vector<32x128xf32>
    %931 = vector.extract_strided_slice %792 {offsets = [22, 0], sizes = [1, 128], strides = [1, 1]} : vector<32x128xf32> to vector<1x128xf32>
    %932 = vector.broadcast %931 : vector<1x128xf32> to vector<32x128xf32>
    %933 = arith.mulf %930, %932 : vector<32x128xf32>
    %934 = arith.addf %928, %933 : vector<32x128xf32>
    %c23_437 = arith.constant 23 : index
    %c0_438 = arith.constant 0 : index
    %c0_439 = arith.constant 0 : index
    %935 = vector.load %arg3[%c23_437, %c0_438, %c0_439] : memref<32x32x128xf32, #tpu.memory_space<vmem>>, vector<1x32x128xf32>
    %936 = vector.shape_cast %935 : vector<1x32x128xf32> to vector<32x128xf32>
    %937 = vector.extract_strided_slice %792 {offsets = [23, 0], sizes = [1, 128], strides = [1, 1]} : vector<32x128xf32> to vector<1x128xf32>
    %938 = vector.broadcast %937 : vector<1x128xf32> to vector<32x128xf32>
    %939 = arith.mulf %936, %938 : vector<32x128xf32>
    %940 = arith.addf %934, %939 : vector<32x128xf32>
    %c24_440 = arith.constant 24 : index
    %c0_441 = arith.constant 0 : index
    %c0_442 = arith.constant 0 : index
    %941 = vector.load %arg3[%c24_440, %c0_441, %c0_442] : memref<32x32x128xf32, #tpu.memory_space<vmem>>, vector<1x32x128xf32>
    %942 = vector.shape_cast %941 : vector<1x32x128xf32> to vector<32x128xf32>
    %943 = vector.extract_strided_slice %792 {offsets = [24, 0], sizes = [1, 128], strides = [1, 1]} : vector<32x128xf32> to vector<1x128xf32>
    %944 = vector.broadcast %943 : vector<1x128xf32> to vector<32x128xf32>
    %945 = arith.mulf %942, %944 : vector<32x128xf32>
    %946 = arith.addf %940, %945 : vector<32x128xf32>
    %c25_443 = arith.constant 25 : index
    %c0_444 = arith.constant 0 : index
    %c0_445 = arith.constant 0 : index
    %947 = vector.load %arg3[%c25_443, %c0_444, %c0_445] : memref<32x32x128xf32, #tpu.memory_space<vmem>>, vector<1x32x128xf32>
    %948 = vector.shape_cast %947 : vector<1x32x128xf32> to vector<32x128xf32>
    %949 = vector.extract_strided_slice %792 {offsets = [25, 0], sizes = [1, 128], strides = [1, 1]} : vector<32x128xf32> to vector<1x128xf32>
    %950 = vector.broadcast %949 : vector<1x128xf32> to vector<32x128xf32>
    %951 = arith.mulf %948, %950 : vector<32x128xf32>
    %952 = arith.addf %946, %951 : vector<32x128xf32>
    %c26_446 = arith.constant 26 : index
    %c0_447 = arith.constant 0 : index
    %c0_448 = arith.constant 0 : index
    %953 = vector.load %arg3[%c26_446, %c0_447, %c0_448] : memref<32x32x128xf32, #tpu.memory_space<vmem>>, vector<1x32x128xf32>
    %954 = vector.shape_cast %953 : vector<1x32x128xf32> to vector<32x128xf32>
    %955 = vector.extract_strided_slice %792 {offsets = [26, 0], sizes = [1, 128], strides = [1, 1]} : vector<32x128xf32> to vector<1x128xf32>
    %956 = vector.broadcast %955 : vector<1x128xf32> to vector<32x128xf32>
    %957 = arith.mulf %954, %956 : vector<32x128xf32>
    %958 = arith.addf %952, %957 : vector<32x128xf32>
    %c27_449 = arith.constant 27 : index
    %c0_450 = arith.constant 0 : index
    %c0_451 = arith.constant 0 : index
    %959 = vector.load %arg3[%c27_449, %c0_450, %c0_451] : memref<32x32x128xf32, #tpu.memory_space<vmem>>, vector<1x32x128xf32>
    %960 = vector.shape_cast %959 : vector<1x32x128xf32> to vector<32x128xf32>
    %961 = vector.extract_strided_slice %792 {offsets = [27, 0], sizes = [1, 128], strides = [1, 1]} : vector<32x128xf32> to vector<1x128xf32>
    %962 = vector.broadcast %961 : vector<1x128xf32> to vector<32x128xf32>
    %963 = arith.mulf %960, %962 : vector<32x128xf32>
    %964 = arith.addf %958, %963 : vector<32x128xf32>
    %c28_452 = arith.constant 28 : index
    %c0_453 = arith.constant 0 : index
    %c0_454 = arith.constant 0 : index
    %965 = vector.load %arg3[%c28_452, %c0_453, %c0_454] : memref<32x32x128xf32, #tpu.memory_space<vmem>>, vector<1x32x128xf32>
    %966 = vector.shape_cast %965 : vector<1x32x128xf32> to vector<32x128xf32>
    %967 = vector.extract_strided_slice %792 {offsets = [28, 0], sizes = [1, 128], strides = [1, 1]} : vector<32x128xf32> to vector<1x128xf32>
    %968 = vector.broadcast %967 : vector<1x128xf32> to vector<32x128xf32>
    %969 = arith.mulf %966, %968 : vector<32x128xf32>
    %970 = arith.addf %964, %969 : vector<32x128xf32>
    %c29_455 = arith.constant 29 : index
    %c0_456 = arith.constant 0 : index
    %c0_457 = arith.constant 0 : index
    %971 = vector.load %arg3[%c29_455, %c0_456, %c0_457] : memref<32x32x128xf32, #tpu.memory_space<vmem>>, vector<1x32x128xf32>
    %972 = vector.shape_cast %971 : vector<1x32x128xf32> to vector<32x128xf32>
    %973 = vector.extract_strided_slice %792 {offsets = [29, 0], sizes = [1, 128], strides = [1, 1]} : vector<32x128xf32> to vector<1x128xf32>
    %974 = vector.broadcast %973 : vector<1x128xf32> to vector<32x128xf32>
    %975 = arith.mulf %972, %974 : vector<32x128xf32>
    %976 = arith.addf %970, %975 : vector<32x128xf32>
    %c30_458 = arith.constant 30 : index
    %c0_459 = arith.constant 0 : index
    %c0_460 = arith.constant 0 : index
    %977 = vector.load %arg3[%c30_458, %c0_459, %c0_460] : memref<32x32x128xf32, #tpu.memory_space<vmem>>, vector<1x32x128xf32>
    %978 = vector.shape_cast %977 : vector<1x32x128xf32> to vector<32x128xf32>
    %979 = vector.extract_strided_slice %792 {offsets = [30, 0], sizes = [1, 128], strides = [1, 1]} : vector<32x128xf32> to vector<1x128xf32>
    %980 = vector.broadcast %979 : vector<1x128xf32> to vector<32x128xf32>
    %981 = arith.mulf %978, %980 : vector<32x128xf32>
    %982 = arith.addf %976, %981 : vector<32x128xf32>
    %c31_461 = arith.constant 31 : index
    %c0_462 = arith.constant 0 : index
    %c0_463 = arith.constant 0 : index
    %983 = vector.load %arg3[%c31_461, %c0_462, %c0_463] : memref<32x32x128xf32, #tpu.memory_space<vmem>>, vector<1x32x128xf32>
    %984 = vector.shape_cast %983 : vector<1x32x128xf32> to vector<32x128xf32>
    %985 = vector.extract_strided_slice %792 {offsets = [31, 0], sizes = [1, 128], strides = [1, 1]} : vector<32x128xf32> to vector<1x128xf32>
    %986 = vector.broadcast %985 : vector<1x128xf32> to vector<32x128xf32>
    %987 = arith.mulf %984, %986 : vector<32x128xf32>
    %988 = arith.addf %982, %987 : vector<32x128xf32>
    %989 = math.tanh %988 : vector<32x128xf32>
    %c5_464 = arith.constant 5 : index
    %c0_465 = arith.constant 0 : index
    %990 = vector.load %arg1[%c5_464, %c0_465] : memref<8x128xf32, #tpu.memory_space<vmem>>, vector<1x128xf32>
    %991 = vector.broadcast %990 : vector<1x128xf32> to vector<32x128xf32>
    %992 = arith.mulf %991, %0 : vector<32x128xf32>
    %993 = arith.addf %992, %1 : vector<32x128xf32>
    %c0_466 = arith.constant 0 : index
    %c0_467 = arith.constant 0 : index
    %c0_468 = arith.constant 0 : index
    %994 = vector.load %arg3[%c0_466, %c0_467, %c0_468] : memref<32x32x128xf32, #tpu.memory_space<vmem>>, vector<1x32x128xf32>
    %995 = vector.shape_cast %994 : vector<1x32x128xf32> to vector<32x128xf32>
    %996 = vector.extract_strided_slice %989 {offsets = [0, 0], sizes = [1, 128], strides = [1, 1]} : vector<32x128xf32> to vector<1x128xf32>
    %997 = vector.broadcast %996 : vector<1x128xf32> to vector<32x128xf32>
    %998 = arith.mulf %995, %997 : vector<32x128xf32>
    %999 = arith.addf %993, %998 : vector<32x128xf32>
    %c1_469 = arith.constant 1 : index
    %c0_470 = arith.constant 0 : index
    %c0_471 = arith.constant 0 : index
    %1000 = vector.load %arg3[%c1_469, %c0_470, %c0_471] : memref<32x32x128xf32, #tpu.memory_space<vmem>>, vector<1x32x128xf32>
    %1001 = vector.shape_cast %1000 : vector<1x32x128xf32> to vector<32x128xf32>
    %1002 = vector.extract_strided_slice %989 {offsets = [1, 0], sizes = [1, 128], strides = [1, 1]} : vector<32x128xf32> to vector<1x128xf32>
    %1003 = vector.broadcast %1002 : vector<1x128xf32> to vector<32x128xf32>
    %1004 = arith.mulf %1001, %1003 : vector<32x128xf32>
    %1005 = arith.addf %999, %1004 : vector<32x128xf32>
    %c2_472 = arith.constant 2 : index
    %c0_473 = arith.constant 0 : index
    %c0_474 = arith.constant 0 : index
    %1006 = vector.load %arg3[%c2_472, %c0_473, %c0_474] : memref<32x32x128xf32, #tpu.memory_space<vmem>>, vector<1x32x128xf32>
    %1007 = vector.shape_cast %1006 : vector<1x32x128xf32> to vector<32x128xf32>
    %1008 = vector.extract_strided_slice %989 {offsets = [2, 0], sizes = [1, 128], strides = [1, 1]} : vector<32x128xf32> to vector<1x128xf32>
    %1009 = vector.broadcast %1008 : vector<1x128xf32> to vector<32x128xf32>
    %1010 = arith.mulf %1007, %1009 : vector<32x128xf32>
    %1011 = arith.addf %1005, %1010 : vector<32x128xf32>
    %c3_475 = arith.constant 3 : index
    %c0_476 = arith.constant 0 : index
    %c0_477 = arith.constant 0 : index
    %1012 = vector.load %arg3[%c3_475, %c0_476, %c0_477] : memref<32x32x128xf32, #tpu.memory_space<vmem>>, vector<1x32x128xf32>
    %1013 = vector.shape_cast %1012 : vector<1x32x128xf32> to vector<32x128xf32>
    %1014 = vector.extract_strided_slice %989 {offsets = [3, 0], sizes = [1, 128], strides = [1, 1]} : vector<32x128xf32> to vector<1x128xf32>
    %1015 = vector.broadcast %1014 : vector<1x128xf32> to vector<32x128xf32>
    %1016 = arith.mulf %1013, %1015 : vector<32x128xf32>
    %1017 = arith.addf %1011, %1016 : vector<32x128xf32>
    %c4_478 = arith.constant 4 : index
    %c0_479 = arith.constant 0 : index
    %c0_480 = arith.constant 0 : index
    %1018 = vector.load %arg3[%c4_478, %c0_479, %c0_480] : memref<32x32x128xf32, #tpu.memory_space<vmem>>, vector<1x32x128xf32>
    %1019 = vector.shape_cast %1018 : vector<1x32x128xf32> to vector<32x128xf32>
    %1020 = vector.extract_strided_slice %989 {offsets = [4, 0], sizes = [1, 128], strides = [1, 1]} : vector<32x128xf32> to vector<1x128xf32>
    %1021 = vector.broadcast %1020 : vector<1x128xf32> to vector<32x128xf32>
    %1022 = arith.mulf %1019, %1021 : vector<32x128xf32>
    %1023 = arith.addf %1017, %1022 : vector<32x128xf32>
    %c5_481 = arith.constant 5 : index
    %c0_482 = arith.constant 0 : index
    %c0_483 = arith.constant 0 : index
    %1024 = vector.load %arg3[%c5_481, %c0_482, %c0_483] : memref<32x32x128xf32, #tpu.memory_space<vmem>>, vector<1x32x128xf32>
    %1025 = vector.shape_cast %1024 : vector<1x32x128xf32> to vector<32x128xf32>
    %1026 = vector.extract_strided_slice %989 {offsets = [5, 0], sizes = [1, 128], strides = [1, 1]} : vector<32x128xf32> to vector<1x128xf32>
    %1027 = vector.broadcast %1026 : vector<1x128xf32> to vector<32x128xf32>
    %1028 = arith.mulf %1025, %1027 : vector<32x128xf32>
    %1029 = arith.addf %1023, %1028 : vector<32x128xf32>
    %c6_484 = arith.constant 6 : index
    %c0_485 = arith.constant 0 : index
    %c0_486 = arith.constant 0 : index
    %1030 = vector.load %arg3[%c6_484, %c0_485, %c0_486] : memref<32x32x128xf32, #tpu.memory_space<vmem>>, vector<1x32x128xf32>
    %1031 = vector.shape_cast %1030 : vector<1x32x128xf32> to vector<32x128xf32>
    %1032 = vector.extract_strided_slice %989 {offsets = [6, 0], sizes = [1, 128], strides = [1, 1]} : vector<32x128xf32> to vector<1x128xf32>
    %1033 = vector.broadcast %1032 : vector<1x128xf32> to vector<32x128xf32>
    %1034 = arith.mulf %1031, %1033 : vector<32x128xf32>
    %1035 = arith.addf %1029, %1034 : vector<32x128xf32>
    %c7_487 = arith.constant 7 : index
    %c0_488 = arith.constant 0 : index
    %c0_489 = arith.constant 0 : index
    %1036 = vector.load %arg3[%c7_487, %c0_488, %c0_489] : memref<32x32x128xf32, #tpu.memory_space<vmem>>, vector<1x32x128xf32>
    %1037 = vector.shape_cast %1036 : vector<1x32x128xf32> to vector<32x128xf32>
    %1038 = vector.extract_strided_slice %989 {offsets = [7, 0], sizes = [1, 128], strides = [1, 1]} : vector<32x128xf32> to vector<1x128xf32>
    %1039 = vector.broadcast %1038 : vector<1x128xf32> to vector<32x128xf32>
    %1040 = arith.mulf %1037, %1039 : vector<32x128xf32>
    %1041 = arith.addf %1035, %1040 : vector<32x128xf32>
    %c8_490 = arith.constant 8 : index
    %c0_491 = arith.constant 0 : index
    %c0_492 = arith.constant 0 : index
    %1042 = vector.load %arg3[%c8_490, %c0_491, %c0_492] : memref<32x32x128xf32, #tpu.memory_space<vmem>>, vector<1x32x128xf32>
    %1043 = vector.shape_cast %1042 : vector<1x32x128xf32> to vector<32x128xf32>
    %1044 = vector.extract_strided_slice %989 {offsets = [8, 0], sizes = [1, 128], strides = [1, 1]} : vector<32x128xf32> to vector<1x128xf32>
    %1045 = vector.broadcast %1044 : vector<1x128xf32> to vector<32x128xf32>
    %1046 = arith.mulf %1043, %1045 : vector<32x128xf32>
    %1047 = arith.addf %1041, %1046 : vector<32x128xf32>
    %c9_493 = arith.constant 9 : index
    %c0_494 = arith.constant 0 : index
    %c0_495 = arith.constant 0 : index
    %1048 = vector.load %arg3[%c9_493, %c0_494, %c0_495] : memref<32x32x128xf32, #tpu.memory_space<vmem>>, vector<1x32x128xf32>
    %1049 = vector.shape_cast %1048 : vector<1x32x128xf32> to vector<32x128xf32>
    %1050 = vector.extract_strided_slice %989 {offsets = [9, 0], sizes = [1, 128], strides = [1, 1]} : vector<32x128xf32> to vector<1x128xf32>
    %1051 = vector.broadcast %1050 : vector<1x128xf32> to vector<32x128xf32>
    %1052 = arith.mulf %1049, %1051 : vector<32x128xf32>
    %1053 = arith.addf %1047, %1052 : vector<32x128xf32>
    %c10_496 = arith.constant 10 : index
    %c0_497 = arith.constant 0 : index
    %c0_498 = arith.constant 0 : index
    %1054 = vector.load %arg3[%c10_496, %c0_497, %c0_498] : memref<32x32x128xf32, #tpu.memory_space<vmem>>, vector<1x32x128xf32>
    %1055 = vector.shape_cast %1054 : vector<1x32x128xf32> to vector<32x128xf32>
    %1056 = vector.extract_strided_slice %989 {offsets = [10, 0], sizes = [1, 128], strides = [1, 1]} : vector<32x128xf32> to vector<1x128xf32>
    %1057 = vector.broadcast %1056 : vector<1x128xf32> to vector<32x128xf32>
    %1058 = arith.mulf %1055, %1057 : vector<32x128xf32>
    %1059 = arith.addf %1053, %1058 : vector<32x128xf32>
    %c11_499 = arith.constant 11 : index
    %c0_500 = arith.constant 0 : index
    %c0_501 = arith.constant 0 : index
    %1060 = vector.load %arg3[%c11_499, %c0_500, %c0_501] : memref<32x32x128xf32, #tpu.memory_space<vmem>>, vector<1x32x128xf32>
    %1061 = vector.shape_cast %1060 : vector<1x32x128xf32> to vector<32x128xf32>
    %1062 = vector.extract_strided_slice %989 {offsets = [11, 0], sizes = [1, 128], strides = [1, 1]} : vector<32x128xf32> to vector<1x128xf32>
    %1063 = vector.broadcast %1062 : vector<1x128xf32> to vector<32x128xf32>
    %1064 = arith.mulf %1061, %1063 : vector<32x128xf32>
    %1065 = arith.addf %1059, %1064 : vector<32x128xf32>
    %c12_502 = arith.constant 12 : index
    %c0_503 = arith.constant 0 : index
    %c0_504 = arith.constant 0 : index
    %1066 = vector.load %arg3[%c12_502, %c0_503, %c0_504] : memref<32x32x128xf32, #tpu.memory_space<vmem>>, vector<1x32x128xf32>
    %1067 = vector.shape_cast %1066 : vector<1x32x128xf32> to vector<32x128xf32>
    %1068 = vector.extract_strided_slice %989 {offsets = [12, 0], sizes = [1, 128], strides = [1, 1]} : vector<32x128xf32> to vector<1x128xf32>
    %1069 = vector.broadcast %1068 : vector<1x128xf32> to vector<32x128xf32>
    %1070 = arith.mulf %1067, %1069 : vector<32x128xf32>
    %1071 = arith.addf %1065, %1070 : vector<32x128xf32>
    %c13_505 = arith.constant 13 : index
    %c0_506 = arith.constant 0 : index
    %c0_507 = arith.constant 0 : index
    %1072 = vector.load %arg3[%c13_505, %c0_506, %c0_507] : memref<32x32x128xf32, #tpu.memory_space<vmem>>, vector<1x32x128xf32>
    %1073 = vector.shape_cast %1072 : vector<1x32x128xf32> to vector<32x128xf32>
    %1074 = vector.extract_strided_slice %989 {offsets = [13, 0], sizes = [1, 128], strides = [1, 1]} : vector<32x128xf32> to vector<1x128xf32>
    %1075 = vector.broadcast %1074 : vector<1x128xf32> to vector<32x128xf32>
    %1076 = arith.mulf %1073, %1075 : vector<32x128xf32>
    %1077 = arith.addf %1071, %1076 : vector<32x128xf32>
    %c14_508 = arith.constant 14 : index
    %c0_509 = arith.constant 0 : index
    %c0_510 = arith.constant 0 : index
    %1078 = vector.load %arg3[%c14_508, %c0_509, %c0_510] : memref<32x32x128xf32, #tpu.memory_space<vmem>>, vector<1x32x128xf32>
    %1079 = vector.shape_cast %1078 : vector<1x32x128xf32> to vector<32x128xf32>
    %1080 = vector.extract_strided_slice %989 {offsets = [14, 0], sizes = [1, 128], strides = [1, 1]} : vector<32x128xf32> to vector<1x128xf32>
    %1081 = vector.broadcast %1080 : vector<1x128xf32> to vector<32x128xf32>
    %1082 = arith.mulf %1079, %1081 : vector<32x128xf32>
    %1083 = arith.addf %1077, %1082 : vector<32x128xf32>
    %c15_511 = arith.constant 15 : index
    %c0_512 = arith.constant 0 : index
    %c0_513 = arith.constant 0 : index
    %1084 = vector.load %arg3[%c15_511, %c0_512, %c0_513] : memref<32x32x128xf32, #tpu.memory_space<vmem>>, vector<1x32x128xf32>
    %1085 = vector.shape_cast %1084 : vector<1x32x128xf32> to vector<32x128xf32>
    %1086 = vector.extract_strided_slice %989 {offsets = [15, 0], sizes = [1, 128], strides = [1, 1]} : vector<32x128xf32> to vector<1x128xf32>
    %1087 = vector.broadcast %1086 : vector<1x128xf32> to vector<32x128xf32>
    %1088 = arith.mulf %1085, %1087 : vector<32x128xf32>
    %1089 = arith.addf %1083, %1088 : vector<32x128xf32>
    %c16_514 = arith.constant 16 : index
    %c0_515 = arith.constant 0 : index
    %c0_516 = arith.constant 0 : index
    %1090 = vector.load %arg3[%c16_514, %c0_515, %c0_516] : memref<32x32x128xf32, #tpu.memory_space<vmem>>, vector<1x32x128xf32>
    %1091 = vector.shape_cast %1090 : vector<1x32x128xf32> to vector<32x128xf32>
    %1092 = vector.extract_strided_slice %989 {offsets = [16, 0], sizes = [1, 128], strides = [1, 1]} : vector<32x128xf32> to vector<1x128xf32>
    %1093 = vector.broadcast %1092 : vector<1x128xf32> to vector<32x128xf32>
    %1094 = arith.mulf %1091, %1093 : vector<32x128xf32>
    %1095 = arith.addf %1089, %1094 : vector<32x128xf32>
    %c17_517 = arith.constant 17 : index
    %c0_518 = arith.constant 0 : index
    %c0_519 = arith.constant 0 : index
    %1096 = vector.load %arg3[%c17_517, %c0_518, %c0_519] : memref<32x32x128xf32, #tpu.memory_space<vmem>>, vector<1x32x128xf32>
    %1097 = vector.shape_cast %1096 : vector<1x32x128xf32> to vector<32x128xf32>
    %1098 = vector.extract_strided_slice %989 {offsets = [17, 0], sizes = [1, 128], strides = [1, 1]} : vector<32x128xf32> to vector<1x128xf32>
    %1099 = vector.broadcast %1098 : vector<1x128xf32> to vector<32x128xf32>
    %1100 = arith.mulf %1097, %1099 : vector<32x128xf32>
    %1101 = arith.addf %1095, %1100 : vector<32x128xf32>
    %c18_520 = arith.constant 18 : index
    %c0_521 = arith.constant 0 : index
    %c0_522 = arith.constant 0 : index
    %1102 = vector.load %arg3[%c18_520, %c0_521, %c0_522] : memref<32x32x128xf32, #tpu.memory_space<vmem>>, vector<1x32x128xf32>
    %1103 = vector.shape_cast %1102 : vector<1x32x128xf32> to vector<32x128xf32>
    %1104 = vector.extract_strided_slice %989 {offsets = [18, 0], sizes = [1, 128], strides = [1, 1]} : vector<32x128xf32> to vector<1x128xf32>
    %1105 = vector.broadcast %1104 : vector<1x128xf32> to vector<32x128xf32>
    %1106 = arith.mulf %1103, %1105 : vector<32x128xf32>
    %1107 = arith.addf %1101, %1106 : vector<32x128xf32>
    %c19_523 = arith.constant 19 : index
    %c0_524 = arith.constant 0 : index
    %c0_525 = arith.constant 0 : index
    %1108 = vector.load %arg3[%c19_523, %c0_524, %c0_525] : memref<32x32x128xf32, #tpu.memory_space<vmem>>, vector<1x32x128xf32>
    %1109 = vector.shape_cast %1108 : vector<1x32x128xf32> to vector<32x128xf32>
    %1110 = vector.extract_strided_slice %989 {offsets = [19, 0], sizes = [1, 128], strides = [1, 1]} : vector<32x128xf32> to vector<1x128xf32>
    %1111 = vector.broadcast %1110 : vector<1x128xf32> to vector<32x128xf32>
    %1112 = arith.mulf %1109, %1111 : vector<32x128xf32>
    %1113 = arith.addf %1107, %1112 : vector<32x128xf32>
    %c20_526 = arith.constant 20 : index
    %c0_527 = arith.constant 0 : index
    %c0_528 = arith.constant 0 : index
    %1114 = vector.load %arg3[%c20_526, %c0_527, %c0_528] : memref<32x32x128xf32, #tpu.memory_space<vmem>>, vector<1x32x128xf32>
    %1115 = vector.shape_cast %1114 : vector<1x32x128xf32> to vector<32x128xf32>
    %1116 = vector.extract_strided_slice %989 {offsets = [20, 0], sizes = [1, 128], strides = [1, 1]} : vector<32x128xf32> to vector<1x128xf32>
    %1117 = vector.broadcast %1116 : vector<1x128xf32> to vector<32x128xf32>
    %1118 = arith.mulf %1115, %1117 : vector<32x128xf32>
    %1119 = arith.addf %1113, %1118 : vector<32x128xf32>
    %c21_529 = arith.constant 21 : index
    %c0_530 = arith.constant 0 : index
    %c0_531 = arith.constant 0 : index
    %1120 = vector.load %arg3[%c21_529, %c0_530, %c0_531] : memref<32x32x128xf32, #tpu.memory_space<vmem>>, vector<1x32x128xf32>
    %1121 = vector.shape_cast %1120 : vector<1x32x128xf32> to vector<32x128xf32>
    %1122 = vector.extract_strided_slice %989 {offsets = [21, 0], sizes = [1, 128], strides = [1, 1]} : vector<32x128xf32> to vector<1x128xf32>
    %1123 = vector.broadcast %1122 : vector<1x128xf32> to vector<32x128xf32>
    %1124 = arith.mulf %1121, %1123 : vector<32x128xf32>
    %1125 = arith.addf %1119, %1124 : vector<32x128xf32>
    %c22_532 = arith.constant 22 : index
    %c0_533 = arith.constant 0 : index
    %c0_534 = arith.constant 0 : index
    %1126 = vector.load %arg3[%c22_532, %c0_533, %c0_534] : memref<32x32x128xf32, #tpu.memory_space<vmem>>, vector<1x32x128xf32>
    %1127 = vector.shape_cast %1126 : vector<1x32x128xf32> to vector<32x128xf32>
    %1128 = vector.extract_strided_slice %989 {offsets = [22, 0], sizes = [1, 128], strides = [1, 1]} : vector<32x128xf32> to vector<1x128xf32>
    %1129 = vector.broadcast %1128 : vector<1x128xf32> to vector<32x128xf32>
    %1130 = arith.mulf %1127, %1129 : vector<32x128xf32>
    %1131 = arith.addf %1125, %1130 : vector<32x128xf32>
    %c23_535 = arith.constant 23 : index
    %c0_536 = arith.constant 0 : index
    %c0_537 = arith.constant 0 : index
    %1132 = vector.load %arg3[%c23_535, %c0_536, %c0_537] : memref<32x32x128xf32, #tpu.memory_space<vmem>>, vector<1x32x128xf32>
    %1133 = vector.shape_cast %1132 : vector<1x32x128xf32> to vector<32x128xf32>
    %1134 = vector.extract_strided_slice %989 {offsets = [23, 0], sizes = [1, 128], strides = [1, 1]} : vector<32x128xf32> to vector<1x128xf32>
    %1135 = vector.broadcast %1134 : vector<1x128xf32> to vector<32x128xf32>
    %1136 = arith.mulf %1133, %1135 : vector<32x128xf32>
    %1137 = arith.addf %1131, %1136 : vector<32x128xf32>
    %c24_538 = arith.constant 24 : index
    %c0_539 = arith.constant 0 : index
    %c0_540 = arith.constant 0 : index
    %1138 = vector.load %arg3[%c24_538, %c0_539, %c0_540] : memref<32x32x128xf32, #tpu.memory_space<vmem>>, vector<1x32x128xf32>
    %1139 = vector.shape_cast %1138 : vector<1x32x128xf32> to vector<32x128xf32>
    %1140 = vector.extract_strided_slice %989 {offsets = [24, 0], sizes = [1, 128], strides = [1, 1]} : vector<32x128xf32> to vector<1x128xf32>
    %1141 = vector.broadcast %1140 : vector<1x128xf32> to vector<32x128xf32>
    %1142 = arith.mulf %1139, %1141 : vector<32x128xf32>
    %1143 = arith.addf %1137, %1142 : vector<32x128xf32>
    %c25_541 = arith.constant 25 : index
    %c0_542 = arith.constant 0 : index
    %c0_543 = arith.constant 0 : index
    %1144 = vector.load %arg3[%c25_541, %c0_542, %c0_543] : memref<32x32x128xf32, #tpu.memory_space<vmem>>, vector<1x32x128xf32>
    %1145 = vector.shape_cast %1144 : vector<1x32x128xf32> to vector<32x128xf32>
    %1146 = vector.extract_strided_slice %989 {offsets = [25, 0], sizes = [1, 128], strides = [1, 1]} : vector<32x128xf32> to vector<1x128xf32>
    %1147 = vector.broadcast %1146 : vector<1x128xf32> to vector<32x128xf32>
    %1148 = arith.mulf %1145, %1147 : vector<32x128xf32>
    %1149 = arith.addf %1143, %1148 : vector<32x128xf32>
    %c26_544 = arith.constant 26 : index
    %c0_545 = arith.constant 0 : index
    %c0_546 = arith.constant 0 : index
    %1150 = vector.load %arg3[%c26_544, %c0_545, %c0_546] : memref<32x32x128xf32, #tpu.memory_space<vmem>>, vector<1x32x128xf32>
    %1151 = vector.shape_cast %1150 : vector<1x32x128xf32> to vector<32x128xf32>
    %1152 = vector.extract_strided_slice %989 {offsets = [26, 0], sizes = [1, 128], strides = [1, 1]} : vector<32x128xf32> to vector<1x128xf32>
    %1153 = vector.broadcast %1152 : vector<1x128xf32> to vector<32x128xf32>
    %1154 = arith.mulf %1151, %1153 : vector<32x128xf32>
    %1155 = arith.addf %1149, %1154 : vector<32x128xf32>
    %c27_547 = arith.constant 27 : index
    %c0_548 = arith.constant 0 : index
    %c0_549 = arith.constant 0 : index
    %1156 = vector.load %arg3[%c27_547, %c0_548, %c0_549] : memref<32x32x128xf32, #tpu.memory_space<vmem>>, vector<1x32x128xf32>
    %1157 = vector.shape_cast %1156 : vector<1x32x128xf32> to vector<32x128xf32>
    %1158 = vector.extract_strided_slice %989 {offsets = [27, 0], sizes = [1, 128], strides = [1, 1]} : vector<32x128xf32> to vector<1x128xf32>
    %1159 = vector.broadcast %1158 : vector<1x128xf32> to vector<32x128xf32>
    %1160 = arith.mulf %1157, %1159 : vector<32x128xf32>
    %1161 = arith.addf %1155, %1160 : vector<32x128xf32>
    %c28_550 = arith.constant 28 : index
    %c0_551 = arith.constant 0 : index
    %c0_552 = arith.constant 0 : index
    %1162 = vector.load %arg3[%c28_550, %c0_551, %c0_552] : memref<32x32x128xf32, #tpu.memory_space<vmem>>, vector<1x32x128xf32>
    %1163 = vector.shape_cast %1162 : vector<1x32x128xf32> to vector<32x128xf32>
    %1164 = vector.extract_strided_slice %989 {offsets = [28, 0], sizes = [1, 128], strides = [1, 1]} : vector<32x128xf32> to vector<1x128xf32>
    %1165 = vector.broadcast %1164 : vector<1x128xf32> to vector<32x128xf32>
    %1166 = arith.mulf %1163, %1165 : vector<32x128xf32>
    %1167 = arith.addf %1161, %1166 : vector<32x128xf32>
    %c29_553 = arith.constant 29 : index
    %c0_554 = arith.constant 0 : index
    %c0_555 = arith.constant 0 : index
    %1168 = vector.load %arg3[%c29_553, %c0_554, %c0_555] : memref<32x32x128xf32, #tpu.memory_space<vmem>>, vector<1x32x128xf32>
    %1169 = vector.shape_cast %1168 : vector<1x32x128xf32> to vector<32x128xf32>
    %1170 = vector.extract_strided_slice %989 {offsets = [29, 0], sizes = [1, 128], strides = [1, 1]} : vector<32x128xf32> to vector<1x128xf32>
    %1171 = vector.broadcast %1170 : vector<1x128xf32> to vector<32x128xf32>
    %1172 = arith.mulf %1169, %1171 : vector<32x128xf32>
    %1173 = arith.addf %1167, %1172 : vector<32x128xf32>
    %c30_556 = arith.constant 30 : index
    %c0_557 = arith.constant 0 : index
    %c0_558 = arith.constant 0 : index
    %1174 = vector.load %arg3[%c30_556, %c0_557, %c0_558] : memref<32x32x128xf32, #tpu.memory_space<vmem>>, vector<1x32x128xf32>
    %1175 = vector.shape_cast %1174 : vector<1x32x128xf32> to vector<32x128xf32>
    %1176 = vector.extract_strided_slice %989 {offsets = [30, 0], sizes = [1, 128], strides = [1, 1]} : vector<32x128xf32> to vector<1x128xf32>
    %1177 = vector.broadcast %1176 : vector<1x128xf32> to vector<32x128xf32>
    %1178 = arith.mulf %1175, %1177 : vector<32x128xf32>
    %1179 = arith.addf %1173, %1178 : vector<32x128xf32>
    %c31_559 = arith.constant 31 : index
    %c0_560 = arith.constant 0 : index
    %c0_561 = arith.constant 0 : index
    %1180 = vector.load %arg3[%c31_559, %c0_560, %c0_561] : memref<32x32x128xf32, #tpu.memory_space<vmem>>, vector<1x32x128xf32>
    %1181 = vector.shape_cast %1180 : vector<1x32x128xf32> to vector<32x128xf32>
    %1182 = vector.extract_strided_slice %989 {offsets = [31, 0], sizes = [1, 128], strides = [1, 1]} : vector<32x128xf32> to vector<1x128xf32>
    %1183 = vector.broadcast %1182 : vector<1x128xf32> to vector<32x128xf32>
    %1184 = arith.mulf %1181, %1183 : vector<32x128xf32>
    %1185 = arith.addf %1179, %1184 : vector<32x128xf32>
    %1186 = math.tanh %1185 : vector<32x128xf32>
    %c6_562 = arith.constant 6 : index
    %c0_563 = arith.constant 0 : index
    %1187 = vector.load %arg1[%c6_562, %c0_563] : memref<8x128xf32, #tpu.memory_space<vmem>>, vector<1x128xf32>
    %1188 = vector.broadcast %1187 : vector<1x128xf32> to vector<32x128xf32>
    %1189 = arith.mulf %1188, %0 : vector<32x128xf32>
    %1190 = arith.addf %1189, %1 : vector<32x128xf32>
    %c0_564 = arith.constant 0 : index
    %c0_565 = arith.constant 0 : index
    %c0_566 = arith.constant 0 : index
    %1191 = vector.load %arg3[%c0_564, %c0_565, %c0_566] : memref<32x32x128xf32, #tpu.memory_space<vmem>>, vector<1x32x128xf32>
    %1192 = vector.shape_cast %1191 : vector<1x32x128xf32> to vector<32x128xf32>
    %1193 = vector.extract_strided_slice %1186 {offsets = [0, 0], sizes = [1, 128], strides = [1, 1]} : vector<32x128xf32> to vector<1x128xf32>
    %1194 = vector.broadcast %1193 : vector<1x128xf32> to vector<32x128xf32>
    %1195 = arith.mulf %1192, %1194 : vector<32x128xf32>
    %1196 = arith.addf %1190, %1195 : vector<32x128xf32>
    %c1_567 = arith.constant 1 : index
    %c0_568 = arith.constant 0 : index
    %c0_569 = arith.constant 0 : index
    %1197 = vector.load %arg3[%c1_567, %c0_568, %c0_569] : memref<32x32x128xf32, #tpu.memory_space<vmem>>, vector<1x32x128xf32>
    %1198 = vector.shape_cast %1197 : vector<1x32x128xf32> to vector<32x128xf32>
    %1199 = vector.extract_strided_slice %1186 {offsets = [1, 0], sizes = [1, 128], strides = [1, 1]} : vector<32x128xf32> to vector<1x128xf32>
    %1200 = vector.broadcast %1199 : vector<1x128xf32> to vector<32x128xf32>
    %1201 = arith.mulf %1198, %1200 : vector<32x128xf32>
    %1202 = arith.addf %1196, %1201 : vector<32x128xf32>
    %c2_570 = arith.constant 2 : index
    %c0_571 = arith.constant 0 : index
    %c0_572 = arith.constant 0 : index
    %1203 = vector.load %arg3[%c2_570, %c0_571, %c0_572] : memref<32x32x128xf32, #tpu.memory_space<vmem>>, vector<1x32x128xf32>
    %1204 = vector.shape_cast %1203 : vector<1x32x128xf32> to vector<32x128xf32>
    %1205 = vector.extract_strided_slice %1186 {offsets = [2, 0], sizes = [1, 128], strides = [1, 1]} : vector<32x128xf32> to vector<1x128xf32>
    %1206 = vector.broadcast %1205 : vector<1x128xf32> to vector<32x128xf32>
    %1207 = arith.mulf %1204, %1206 : vector<32x128xf32>
    %1208 = arith.addf %1202, %1207 : vector<32x128xf32>
    %c3_573 = arith.constant 3 : index
    %c0_574 = arith.constant 0 : index
    %c0_575 = arith.constant 0 : index
    %1209 = vector.load %arg3[%c3_573, %c0_574, %c0_575] : memref<32x32x128xf32, #tpu.memory_space<vmem>>, vector<1x32x128xf32>
    %1210 = vector.shape_cast %1209 : vector<1x32x128xf32> to vector<32x128xf32>
    %1211 = vector.extract_strided_slice %1186 {offsets = [3, 0], sizes = [1, 128], strides = [1, 1]} : vector<32x128xf32> to vector<1x128xf32>
    %1212 = vector.broadcast %1211 : vector<1x128xf32> to vector<32x128xf32>
    %1213 = arith.mulf %1210, %1212 : vector<32x128xf32>
    %1214 = arith.addf %1208, %1213 : vector<32x128xf32>
    %c4_576 = arith.constant 4 : index
    %c0_577 = arith.constant 0 : index
    %c0_578 = arith.constant 0 : index
    %1215 = vector.load %arg3[%c4_576, %c0_577, %c0_578] : memref<32x32x128xf32, #tpu.memory_space<vmem>>, vector<1x32x128xf32>
    %1216 = vector.shape_cast %1215 : vector<1x32x128xf32> to vector<32x128xf32>
    %1217 = vector.extract_strided_slice %1186 {offsets = [4, 0], sizes = [1, 128], strides = [1, 1]} : vector<32x128xf32> to vector<1x128xf32>
    %1218 = vector.broadcast %1217 : vector<1x128xf32> to vector<32x128xf32>
    %1219 = arith.mulf %1216, %1218 : vector<32x128xf32>
    %1220 = arith.addf %1214, %1219 : vector<32x128xf32>
    %c5_579 = arith.constant 5 : index
    %c0_580 = arith.constant 0 : index
    %c0_581 = arith.constant 0 : index
    %1221 = vector.load %arg3[%c5_579, %c0_580, %c0_581] : memref<32x32x128xf32, #tpu.memory_space<vmem>>, vector<1x32x128xf32>
    %1222 = vector.shape_cast %1221 : vector<1x32x128xf32> to vector<32x128xf32>
    %1223 = vector.extract_strided_slice %1186 {offsets = [5, 0], sizes = [1, 128], strides = [1, 1]} : vector<32x128xf32> to vector<1x128xf32>
    %1224 = vector.broadcast %1223 : vector<1x128xf32> to vector<32x128xf32>
    %1225 = arith.mulf %1222, %1224 : vector<32x128xf32>
    %1226 = arith.addf %1220, %1225 : vector<32x128xf32>
    %c6_582 = arith.constant 6 : index
    %c0_583 = arith.constant 0 : index
    %c0_584 = arith.constant 0 : index
    %1227 = vector.load %arg3[%c6_582, %c0_583, %c0_584] : memref<32x32x128xf32, #tpu.memory_space<vmem>>, vector<1x32x128xf32>
    %1228 = vector.shape_cast %1227 : vector<1x32x128xf32> to vector<32x128xf32>
    %1229 = vector.extract_strided_slice %1186 {offsets = [6, 0], sizes = [1, 128], strides = [1, 1]} : vector<32x128xf32> to vector<1x128xf32>
    %1230 = vector.broadcast %1229 : vector<1x128xf32> to vector<32x128xf32>
    %1231 = arith.mulf %1228, %1230 : vector<32x128xf32>
    %1232 = arith.addf %1226, %1231 : vector<32x128xf32>
    %c7_585 = arith.constant 7 : index
    %c0_586 = arith.constant 0 : index
    %c0_587 = arith.constant 0 : index
    %1233 = vector.load %arg3[%c7_585, %c0_586, %c0_587] : memref<32x32x128xf32, #tpu.memory_space<vmem>>, vector<1x32x128xf32>
    %1234 = vector.shape_cast %1233 : vector<1x32x128xf32> to vector<32x128xf32>
    %1235 = vector.extract_strided_slice %1186 {offsets = [7, 0], sizes = [1, 128], strides = [1, 1]} : vector<32x128xf32> to vector<1x128xf32>
    %1236 = vector.broadcast %1235 : vector<1x128xf32> to vector<32x128xf32>
    %1237 = arith.mulf %1234, %1236 : vector<32x128xf32>
    %1238 = arith.addf %1232, %1237 : vector<32x128xf32>
    %c8_588 = arith.constant 8 : index
    %c0_589 = arith.constant 0 : index
    %c0_590 = arith.constant 0 : index
    %1239 = vector.load %arg3[%c8_588, %c0_589, %c0_590] : memref<32x32x128xf32, #tpu.memory_space<vmem>>, vector<1x32x128xf32>
    %1240 = vector.shape_cast %1239 : vector<1x32x128xf32> to vector<32x128xf32>
    %1241 = vector.extract_strided_slice %1186 {offsets = [8, 0], sizes = [1, 128], strides = [1, 1]} : vector<32x128xf32> to vector<1x128xf32>
    %1242 = vector.broadcast %1241 : vector<1x128xf32> to vector<32x128xf32>
    %1243 = arith.mulf %1240, %1242 : vector<32x128xf32>
    %1244 = arith.addf %1238, %1243 : vector<32x128xf32>
    %c9_591 = arith.constant 9 : index
    %c0_592 = arith.constant 0 : index
    %c0_593 = arith.constant 0 : index
    %1245 = vector.load %arg3[%c9_591, %c0_592, %c0_593] : memref<32x32x128xf32, #tpu.memory_space<vmem>>, vector<1x32x128xf32>
    %1246 = vector.shape_cast %1245 : vector<1x32x128xf32> to vector<32x128xf32>
    %1247 = vector.extract_strided_slice %1186 {offsets = [9, 0], sizes = [1, 128], strides = [1, 1]} : vector<32x128xf32> to vector<1x128xf32>
    %1248 = vector.broadcast %1247 : vector<1x128xf32> to vector<32x128xf32>
    %1249 = arith.mulf %1246, %1248 : vector<32x128xf32>
    %1250 = arith.addf %1244, %1249 : vector<32x128xf32>
    %c10_594 = arith.constant 10 : index
    %c0_595 = arith.constant 0 : index
    %c0_596 = arith.constant 0 : index
    %1251 = vector.load %arg3[%c10_594, %c0_595, %c0_596] : memref<32x32x128xf32, #tpu.memory_space<vmem>>, vector<1x32x128xf32>
    %1252 = vector.shape_cast %1251 : vector<1x32x128xf32> to vector<32x128xf32>
    %1253 = vector.extract_strided_slice %1186 {offsets = [10, 0], sizes = [1, 128], strides = [1, 1]} : vector<32x128xf32> to vector<1x128xf32>
    %1254 = vector.broadcast %1253 : vector<1x128xf32> to vector<32x128xf32>
    %1255 = arith.mulf %1252, %1254 : vector<32x128xf32>
    %1256 = arith.addf %1250, %1255 : vector<32x128xf32>
    %c11_597 = arith.constant 11 : index
    %c0_598 = arith.constant 0 : index
    %c0_599 = arith.constant 0 : index
    %1257 = vector.load %arg3[%c11_597, %c0_598, %c0_599] : memref<32x32x128xf32, #tpu.memory_space<vmem>>, vector<1x32x128xf32>
    %1258 = vector.shape_cast %1257 : vector<1x32x128xf32> to vector<32x128xf32>
    %1259 = vector.extract_strided_slice %1186 {offsets = [11, 0], sizes = [1, 128], strides = [1, 1]} : vector<32x128xf32> to vector<1x128xf32>
    %1260 = vector.broadcast %1259 : vector<1x128xf32> to vector<32x128xf32>
    %1261 = arith.mulf %1258, %1260 : vector<32x128xf32>
    %1262 = arith.addf %1256, %1261 : vector<32x128xf32>
    %c12_600 = arith.constant 12 : index
    %c0_601 = arith.constant 0 : index
    %c0_602 = arith.constant 0 : index
    %1263 = vector.load %arg3[%c12_600, %c0_601, %c0_602] : memref<32x32x128xf32, #tpu.memory_space<vmem>>, vector<1x32x128xf32>
    %1264 = vector.shape_cast %1263 : vector<1x32x128xf32> to vector<32x128xf32>
    %1265 = vector.extract_strided_slice %1186 {offsets = [12, 0], sizes = [1, 128], strides = [1, 1]} : vector<32x128xf32> to vector<1x128xf32>
    %1266 = vector.broadcast %1265 : vector<1x128xf32> to vector<32x128xf32>
    %1267 = arith.mulf %1264, %1266 : vector<32x128xf32>
    %1268 = arith.addf %1262, %1267 : vector<32x128xf32>
    %c13_603 = arith.constant 13 : index
    %c0_604 = arith.constant 0 : index
    %c0_605 = arith.constant 0 : index
    %1269 = vector.load %arg3[%c13_603, %c0_604, %c0_605] : memref<32x32x128xf32, #tpu.memory_space<vmem>>, vector<1x32x128xf32>
    %1270 = vector.shape_cast %1269 : vector<1x32x128xf32> to vector<32x128xf32>
    %1271 = vector.extract_strided_slice %1186 {offsets = [13, 0], sizes = [1, 128], strides = [1, 1]} : vector<32x128xf32> to vector<1x128xf32>
    %1272 = vector.broadcast %1271 : vector<1x128xf32> to vector<32x128xf32>
    %1273 = arith.mulf %1270, %1272 : vector<32x128xf32>
    %1274 = arith.addf %1268, %1273 : vector<32x128xf32>
    %c14_606 = arith.constant 14 : index
    %c0_607 = arith.constant 0 : index
    %c0_608 = arith.constant 0 : index
    %1275 = vector.load %arg3[%c14_606, %c0_607, %c0_608] : memref<32x32x128xf32, #tpu.memory_space<vmem>>, vector<1x32x128xf32>
    %1276 = vector.shape_cast %1275 : vector<1x32x128xf32> to vector<32x128xf32>
    %1277 = vector.extract_strided_slice %1186 {offsets = [14, 0], sizes = [1, 128], strides = [1, 1]} : vector<32x128xf32> to vector<1x128xf32>
    %1278 = vector.broadcast %1277 : vector<1x128xf32> to vector<32x128xf32>
    %1279 = arith.mulf %1276, %1278 : vector<32x128xf32>
    %1280 = arith.addf %1274, %1279 : vector<32x128xf32>
    %c15_609 = arith.constant 15 : index
    %c0_610 = arith.constant 0 : index
    %c0_611 = arith.constant 0 : index
    %1281 = vector.load %arg3[%c15_609, %c0_610, %c0_611] : memref<32x32x128xf32, #tpu.memory_space<vmem>>, vector<1x32x128xf32>
    %1282 = vector.shape_cast %1281 : vector<1x32x128xf32> to vector<32x128xf32>
    %1283 = vector.extract_strided_slice %1186 {offsets = [15, 0], sizes = [1, 128], strides = [1, 1]} : vector<32x128xf32> to vector<1x128xf32>
    %1284 = vector.broadcast %1283 : vector<1x128xf32> to vector<32x128xf32>
    %1285 = arith.mulf %1282, %1284 : vector<32x128xf32>
    %1286 = arith.addf %1280, %1285 : vector<32x128xf32>
    %c16_612 = arith.constant 16 : index
    %c0_613 = arith.constant 0 : index
    %c0_614 = arith.constant 0 : index
    %1287 = vector.load %arg3[%c16_612, %c0_613, %c0_614] : memref<32x32x128xf32, #tpu.memory_space<vmem>>, vector<1x32x128xf32>
    %1288 = vector.shape_cast %1287 : vector<1x32x128xf32> to vector<32x128xf32>
    %1289 = vector.extract_strided_slice %1186 {offsets = [16, 0], sizes = [1, 128], strides = [1, 1]} : vector<32x128xf32> to vector<1x128xf32>
    %1290 = vector.broadcast %1289 : vector<1x128xf32> to vector<32x128xf32>
    %1291 = arith.mulf %1288, %1290 : vector<32x128xf32>
    %1292 = arith.addf %1286, %1291 : vector<32x128xf32>
    %c17_615 = arith.constant 17 : index
    %c0_616 = arith.constant 0 : index
    %c0_617 = arith.constant 0 : index
    %1293 = vector.load %arg3[%c17_615, %c0_616, %c0_617] : memref<32x32x128xf32, #tpu.memory_space<vmem>>, vector<1x32x128xf32>
    %1294 = vector.shape_cast %1293 : vector<1x32x128xf32> to vector<32x128xf32>
    %1295 = vector.extract_strided_slice %1186 {offsets = [17, 0], sizes = [1, 128], strides = [1, 1]} : vector<32x128xf32> to vector<1x128xf32>
    %1296 = vector.broadcast %1295 : vector<1x128xf32> to vector<32x128xf32>
    %1297 = arith.mulf %1294, %1296 : vector<32x128xf32>
    %1298 = arith.addf %1292, %1297 : vector<32x128xf32>
    %c18_618 = arith.constant 18 : index
    %c0_619 = arith.constant 0 : index
    %c0_620 = arith.constant 0 : index
    %1299 = vector.load %arg3[%c18_618, %c0_619, %c0_620] : memref<32x32x128xf32, #tpu.memory_space<vmem>>, vector<1x32x128xf32>
    %1300 = vector.shape_cast %1299 : vector<1x32x128xf32> to vector<32x128xf32>
    %1301 = vector.extract_strided_slice %1186 {offsets = [18, 0], sizes = [1, 128], strides = [1, 1]} : vector<32x128xf32> to vector<1x128xf32>
    %1302 = vector.broadcast %1301 : vector<1x128xf32> to vector<32x128xf32>
    %1303 = arith.mulf %1300, %1302 : vector<32x128xf32>
    %1304 = arith.addf %1298, %1303 : vector<32x128xf32>
    %c19_621 = arith.constant 19 : index
    %c0_622 = arith.constant 0 : index
    %c0_623 = arith.constant 0 : index
    %1305 = vector.load %arg3[%c19_621, %c0_622, %c0_623] : memref<32x32x128xf32, #tpu.memory_space<vmem>>, vector<1x32x128xf32>
    %1306 = vector.shape_cast %1305 : vector<1x32x128xf32> to vector<32x128xf32>
    %1307 = vector.extract_strided_slice %1186 {offsets = [19, 0], sizes = [1, 128], strides = [1, 1]} : vector<32x128xf32> to vector<1x128xf32>
    %1308 = vector.broadcast %1307 : vector<1x128xf32> to vector<32x128xf32>
    %1309 = arith.mulf %1306, %1308 : vector<32x128xf32>
    %1310 = arith.addf %1304, %1309 : vector<32x128xf32>
    %c20_624 = arith.constant 20 : index
    %c0_625 = arith.constant 0 : index
    %c0_626 = arith.constant 0 : index
    %1311 = vector.load %arg3[%c20_624, %c0_625, %c0_626] : memref<32x32x128xf32, #tpu.memory_space<vmem>>, vector<1x32x128xf32>
    %1312 = vector.shape_cast %1311 : vector<1x32x128xf32> to vector<32x128xf32>
    %1313 = vector.extract_strided_slice %1186 {offsets = [20, 0], sizes = [1, 128], strides = [1, 1]} : vector<32x128xf32> to vector<1x128xf32>
    %1314 = vector.broadcast %1313 : vector<1x128xf32> to vector<32x128xf32>
    %1315 = arith.mulf %1312, %1314 : vector<32x128xf32>
    %1316 = arith.addf %1310, %1315 : vector<32x128xf32>
    %c21_627 = arith.constant 21 : index
    %c0_628 = arith.constant 0 : index
    %c0_629 = arith.constant 0 : index
    %1317 = vector.load %arg3[%c21_627, %c0_628, %c0_629] : memref<32x32x128xf32, #tpu.memory_space<vmem>>, vector<1x32x128xf32>
    %1318 = vector.shape_cast %1317 : vector<1x32x128xf32> to vector<32x128xf32>
    %1319 = vector.extract_strided_slice %1186 {offsets = [21, 0], sizes = [1, 128], strides = [1, 1]} : vector<32x128xf32> to vector<1x128xf32>
    %1320 = vector.broadcast %1319 : vector<1x128xf32> to vector<32x128xf32>
    %1321 = arith.mulf %1318, %1320 : vector<32x128xf32>
    %1322 = arith.addf %1316, %1321 : vector<32x128xf32>
    %c22_630 = arith.constant 22 : index
    %c0_631 = arith.constant 0 : index
    %c0_632 = arith.constant 0 : index
    %1323 = vector.load %arg3[%c22_630, %c0_631, %c0_632] : memref<32x32x128xf32, #tpu.memory_space<vmem>>, vector<1x32x128xf32>
    %1324 = vector.shape_cast %1323 : vector<1x32x128xf32> to vector<32x128xf32>
    %1325 = vector.extract_strided_slice %1186 {offsets = [22, 0], sizes = [1, 128], strides = [1, 1]} : vector<32x128xf32> to vector<1x128xf32>
    %1326 = vector.broadcast %1325 : vector<1x128xf32> to vector<32x128xf32>
    %1327 = arith.mulf %1324, %1326 : vector<32x128xf32>
    %1328 = arith.addf %1322, %1327 : vector<32x128xf32>
    %c23_633 = arith.constant 23 : index
    %c0_634 = arith.constant 0 : index
    %c0_635 = arith.constant 0 : index
    %1329 = vector.load %arg3[%c23_633, %c0_634, %c0_635] : memref<32x32x128xf32, #tpu.memory_space<vmem>>, vector<1x32x128xf32>
    %1330 = vector.shape_cast %1329 : vector<1x32x128xf32> to vector<32x128xf32>
    %1331 = vector.extract_strided_slice %1186 {offsets = [23, 0], sizes = [1, 128], strides = [1, 1]} : vector<32x128xf32> to vector<1x128xf32>
    %1332 = vector.broadcast %1331 : vector<1x128xf32> to vector<32x128xf32>
    %1333 = arith.mulf %1330, %1332 : vector<32x128xf32>
    %1334 = arith.addf %1328, %1333 : vector<32x128xf32>
    %c24_636 = arith.constant 24 : index
    %c0_637 = arith.constant 0 : index
    %c0_638 = arith.constant 0 : index
    %1335 = vector.load %arg3[%c24_636, %c0_637, %c0_638] : memref<32x32x128xf32, #tpu.memory_space<vmem>>, vector<1x32x128xf32>
    %1336 = vector.shape_cast %1335 : vector<1x32x128xf32> to vector<32x128xf32>
    %1337 = vector.extract_strided_slice %1186 {offsets = [24, 0], sizes = [1, 128], strides = [1, 1]} : vector<32x128xf32> to vector<1x128xf32>
    %1338 = vector.broadcast %1337 : vector<1x128xf32> to vector<32x128xf32>
    %1339 = arith.mulf %1336, %1338 : vector<32x128xf32>
    %1340 = arith.addf %1334, %1339 : vector<32x128xf32>
    %c25_639 = arith.constant 25 : index
    %c0_640 = arith.constant 0 : index
    %c0_641 = arith.constant 0 : index
    %1341 = vector.load %arg3[%c25_639, %c0_640, %c0_641] : memref<32x32x128xf32, #tpu.memory_space<vmem>>, vector<1x32x128xf32>
    %1342 = vector.shape_cast %1341 : vector<1x32x128xf32> to vector<32x128xf32>
    %1343 = vector.extract_strided_slice %1186 {offsets = [25, 0], sizes = [1, 128], strides = [1, 1]} : vector<32x128xf32> to vector<1x128xf32>
    %1344 = vector.broadcast %1343 : vector<1x128xf32> to vector<32x128xf32>
    %1345 = arith.mulf %1342, %1344 : vector<32x128xf32>
    %1346 = arith.addf %1340, %1345 : vector<32x128xf32>
    %c26_642 = arith.constant 26 : index
    %c0_643 = arith.constant 0 : index
    %c0_644 = arith.constant 0 : index
    %1347 = vector.load %arg3[%c26_642, %c0_643, %c0_644] : memref<32x32x128xf32, #tpu.memory_space<vmem>>, vector<1x32x128xf32>
    %1348 = vector.shape_cast %1347 : vector<1x32x128xf32> to vector<32x128xf32>
    %1349 = vector.extract_strided_slice %1186 {offsets = [26, 0], sizes = [1, 128], strides = [1, 1]} : vector<32x128xf32> to vector<1x128xf32>
    %1350 = vector.broadcast %1349 : vector<1x128xf32> to vector<32x128xf32>
    %1351 = arith.mulf %1348, %1350 : vector<32x128xf32>
    %1352 = arith.addf %1346, %1351 : vector<32x128xf32>
    %c27_645 = arith.constant 27 : index
    %c0_646 = arith.constant 0 : index
    %c0_647 = arith.constant 0 : index
    %1353 = vector.load %arg3[%c27_645, %c0_646, %c0_647] : memref<32x32x128xf32, #tpu.memory_space<vmem>>, vector<1x32x128xf32>
    %1354 = vector.shape_cast %1353 : vector<1x32x128xf32> to vector<32x128xf32>
    %1355 = vector.extract_strided_slice %1186 {offsets = [27, 0], sizes = [1, 128], strides = [1, 1]} : vector<32x128xf32> to vector<1x128xf32>
    %1356 = vector.broadcast %1355 : vector<1x128xf32> to vector<32x128xf32>
    %1357 = arith.mulf %1354, %1356 : vector<32x128xf32>
    %1358 = arith.addf %1352, %1357 : vector<32x128xf32>
    %c28_648 = arith.constant 28 : index
    %c0_649 = arith.constant 0 : index
    %c0_650 = arith.constant 0 : index
    %1359 = vector.load %arg3[%c28_648, %c0_649, %c0_650] : memref<32x32x128xf32, #tpu.memory_space<vmem>>, vector<1x32x128xf32>
    %1360 = vector.shape_cast %1359 : vector<1x32x128xf32> to vector<32x128xf32>
    %1361 = vector.extract_strided_slice %1186 {offsets = [28, 0], sizes = [1, 128], strides = [1, 1]} : vector<32x128xf32> to vector<1x128xf32>
    %1362 = vector.broadcast %1361 : vector<1x128xf32> to vector<32x128xf32>
    %1363 = arith.mulf %1360, %1362 : vector<32x128xf32>
    %1364 = arith.addf %1358, %1363 : vector<32x128xf32>
    %c29_651 = arith.constant 29 : index
    %c0_652 = arith.constant 0 : index
    %c0_653 = arith.constant 0 : index
    %1365 = vector.load %arg3[%c29_651, %c0_652, %c0_653] : memref<32x32x128xf32, #tpu.memory_space<vmem>>, vector<1x32x128xf32>
    %1366 = vector.shape_cast %1365 : vector<1x32x128xf32> to vector<32x128xf32>
    %1367 = vector.extract_strided_slice %1186 {offsets = [29, 0], sizes = [1, 128], strides = [1, 1]} : vector<32x128xf32> to vector<1x128xf32>
    %1368 = vector.broadcast %1367 : vector<1x128xf32> to vector<32x128xf32>
    %1369 = arith.mulf %1366, %1368 : vector<32x128xf32>
    %1370 = arith.addf %1364, %1369 : vector<32x128xf32>
    %c30_654 = arith.constant 30 : index
    %c0_655 = arith.constant 0 : index
    %c0_656 = arith.constant 0 : index
    %1371 = vector.load %arg3[%c30_654, %c0_655, %c0_656] : memref<32x32x128xf32, #tpu.memory_space<vmem>>, vector<1x32x128xf32>
    %1372 = vector.shape_cast %1371 : vector<1x32x128xf32> to vector<32x128xf32>
    %1373 = vector.extract_strided_slice %1186 {offsets = [30, 0], sizes = [1, 128], strides = [1, 1]} : vector<32x128xf32> to vector<1x128xf32>
    %1374 = vector.broadcast %1373 : vector<1x128xf32> to vector<32x128xf32>
    %1375 = arith.mulf %1372, %1374 : vector<32x128xf32>
    %1376 = arith.addf %1370, %1375 : vector<32x128xf32>
    %c31_657 = arith.constant 31 : index
    %c0_658 = arith.constant 0 : index
    %c0_659 = arith.constant 0 : index
    %1377 = vector.load %arg3[%c31_657, %c0_658, %c0_659] : memref<32x32x128xf32, #tpu.memory_space<vmem>>, vector<1x32x128xf32>
    %1378 = vector.shape_cast %1377 : vector<1x32x128xf32> to vector<32x128xf32>
    %1379 = vector.extract_strided_slice %1186 {offsets = [31, 0], sizes = [1, 128], strides = [1, 1]} : vector<32x128xf32> to vector<1x128xf32>
    %1380 = vector.broadcast %1379 : vector<1x128xf32> to vector<32x128xf32>
    %1381 = arith.mulf %1378, %1380 : vector<32x128xf32>
    %1382 = arith.addf %1376, %1381 : vector<32x128xf32>
    %1383 = math.tanh %1382 : vector<32x128xf32>
    %c7_660 = arith.constant 7 : index
    %c0_661 = arith.constant 0 : index
    %1384 = vector.load %arg1[%c7_660, %c0_661] : memref<8x128xf32, #tpu.memory_space<vmem>>, vector<1x128xf32>
    %1385 = vector.broadcast %1384 : vector<1x128xf32> to vector<32x128xf32>
    %1386 = arith.mulf %1385, %0 : vector<32x128xf32>
    %1387 = arith.addf %1386, %1 : vector<32x128xf32>
    %c0_662 = arith.constant 0 : index
    %c0_663 = arith.constant 0 : index
    %c0_664 = arith.constant 0 : index
    %1388 = vector.load %arg3[%c0_662, %c0_663, %c0_664] : memref<32x32x128xf32, #tpu.memory_space<vmem>>, vector<1x32x128xf32>
    %1389 = vector.shape_cast %1388 : vector<1x32x128xf32> to vector<32x128xf32>
    %1390 = vector.extract_strided_slice %1383 {offsets = [0, 0], sizes = [1, 128], strides = [1, 1]} : vector<32x128xf32> to vector<1x128xf32>
    %1391 = vector.broadcast %1390 : vector<1x128xf32> to vector<32x128xf32>
    %1392 = arith.mulf %1389, %1391 : vector<32x128xf32>
    %1393 = arith.addf %1387, %1392 : vector<32x128xf32>
    %c1_665 = arith.constant 1 : index
    %c0_666 = arith.constant 0 : index
    %c0_667 = arith.constant 0 : index
    %1394 = vector.load %arg3[%c1_665, %c0_666, %c0_667] : memref<32x32x128xf32, #tpu.memory_space<vmem>>, vector<1x32x128xf32>
    %1395 = vector.shape_cast %1394 : vector<1x32x128xf32> to vector<32x128xf32>
    %1396 = vector.extract_strided_slice %1383 {offsets = [1, 0], sizes = [1, 128], strides = [1, 1]} : vector<32x128xf32> to vector<1x128xf32>
    %1397 = vector.broadcast %1396 : vector<1x128xf32> to vector<32x128xf32>
    %1398 = arith.mulf %1395, %1397 : vector<32x128xf32>
    %1399 = arith.addf %1393, %1398 : vector<32x128xf32>
    %c2_668 = arith.constant 2 : index
    %c0_669 = arith.constant 0 : index
    %c0_670 = arith.constant 0 : index
    %1400 = vector.load %arg3[%c2_668, %c0_669, %c0_670] : memref<32x32x128xf32, #tpu.memory_space<vmem>>, vector<1x32x128xf32>
    %1401 = vector.shape_cast %1400 : vector<1x32x128xf32> to vector<32x128xf32>
    %1402 = vector.extract_strided_slice %1383 {offsets = [2, 0], sizes = [1, 128], strides = [1, 1]} : vector<32x128xf32> to vector<1x128xf32>
    %1403 = vector.broadcast %1402 : vector<1x128xf32> to vector<32x128xf32>
    %1404 = arith.mulf %1401, %1403 : vector<32x128xf32>
    %1405 = arith.addf %1399, %1404 : vector<32x128xf32>
    %c3_671 = arith.constant 3 : index
    %c0_672 = arith.constant 0 : index
    %c0_673 = arith.constant 0 : index
    %1406 = vector.load %arg3[%c3_671, %c0_672, %c0_673] : memref<32x32x128xf32, #tpu.memory_space<vmem>>, vector<1x32x128xf32>
    %1407 = vector.shape_cast %1406 : vector<1x32x128xf32> to vector<32x128xf32>
    %1408 = vector.extract_strided_slice %1383 {offsets = [3, 0], sizes = [1, 128], strides = [1, 1]} : vector<32x128xf32> to vector<1x128xf32>
    %1409 = vector.broadcast %1408 : vector<1x128xf32> to vector<32x128xf32>
    %1410 = arith.mulf %1407, %1409 : vector<32x128xf32>
    %1411 = arith.addf %1405, %1410 : vector<32x128xf32>
    %c4_674 = arith.constant 4 : index
    %c0_675 = arith.constant 0 : index
    %c0_676 = arith.constant 0 : index
    %1412 = vector.load %arg3[%c4_674, %c0_675, %c0_676] : memref<32x32x128xf32, #tpu.memory_space<vmem>>, vector<1x32x128xf32>
    %1413 = vector.shape_cast %1412 : vector<1x32x128xf32> to vector<32x128xf32>
    %1414 = vector.extract_strided_slice %1383 {offsets = [4, 0], sizes = [1, 128], strides = [1, 1]} : vector<32x128xf32> to vector<1x128xf32>
    %1415 = vector.broadcast %1414 : vector<1x128xf32> to vector<32x128xf32>
    %1416 = arith.mulf %1413, %1415 : vector<32x128xf32>
    %1417 = arith.addf %1411, %1416 : vector<32x128xf32>
    %c5_677 = arith.constant 5 : index
    %c0_678 = arith.constant 0 : index
    %c0_679 = arith.constant 0 : index
    %1418 = vector.load %arg3[%c5_677, %c0_678, %c0_679] : memref<32x32x128xf32, #tpu.memory_space<vmem>>, vector<1x32x128xf32>
    %1419 = vector.shape_cast %1418 : vector<1x32x128xf32> to vector<32x128xf32>
    %1420 = vector.extract_strided_slice %1383 {offsets = [5, 0], sizes = [1, 128], strides = [1, 1]} : vector<32x128xf32> to vector<1x128xf32>
    %1421 = vector.broadcast %1420 : vector<1x128xf32> to vector<32x128xf32>
    %1422 = arith.mulf %1419, %1421 : vector<32x128xf32>
    %1423 = arith.addf %1417, %1422 : vector<32x128xf32>
    %c6_680 = arith.constant 6 : index
    %c0_681 = arith.constant 0 : index
    %c0_682 = arith.constant 0 : index
    %1424 = vector.load %arg3[%c6_680, %c0_681, %c0_682] : memref<32x32x128xf32, #tpu.memory_space<vmem>>, vector<1x32x128xf32>
    %1425 = vector.shape_cast %1424 : vector<1x32x128xf32> to vector<32x128xf32>
    %1426 = vector.extract_strided_slice %1383 {offsets = [6, 0], sizes = [1, 128], strides = [1, 1]} : vector<32x128xf32> to vector<1x128xf32>
    %1427 = vector.broadcast %1426 : vector<1x128xf32> to vector<32x128xf32>
    %1428 = arith.mulf %1425, %1427 : vector<32x128xf32>
    %1429 = arith.addf %1423, %1428 : vector<32x128xf32>
    %c7_683 = arith.constant 7 : index
    %c0_684 = arith.constant 0 : index
    %c0_685 = arith.constant 0 : index
    %1430 = vector.load %arg3[%c7_683, %c0_684, %c0_685] : memref<32x32x128xf32, #tpu.memory_space<vmem>>, vector<1x32x128xf32>
    %1431 = vector.shape_cast %1430 : vector<1x32x128xf32> to vector<32x128xf32>
    %1432 = vector.extract_strided_slice %1383 {offsets = [7, 0], sizes = [1, 128], strides = [1, 1]} : vector<32x128xf32> to vector<1x128xf32>
    %1433 = vector.broadcast %1432 : vector<1x128xf32> to vector<32x128xf32>
    %1434 = arith.mulf %1431, %1433 : vector<32x128xf32>
    %1435 = arith.addf %1429, %1434 : vector<32x128xf32>
    %c8_686 = arith.constant 8 : index
    %c0_687 = arith.constant 0 : index
    %c0_688 = arith.constant 0 : index
    %1436 = vector.load %arg3[%c8_686, %c0_687, %c0_688] : memref<32x32x128xf32, #tpu.memory_space<vmem>>, vector<1x32x128xf32>
    %1437 = vector.shape_cast %1436 : vector<1x32x128xf32> to vector<32x128xf32>
    %1438 = vector.extract_strided_slice %1383 {offsets = [8, 0], sizes = [1, 128], strides = [1, 1]} : vector<32x128xf32> to vector<1x128xf32>
    %1439 = vector.broadcast %1438 : vector<1x128xf32> to vector<32x128xf32>
    %1440 = arith.mulf %1437, %1439 : vector<32x128xf32>
    %1441 = arith.addf %1435, %1440 : vector<32x128xf32>
    %c9_689 = arith.constant 9 : index
    %c0_690 = arith.constant 0 : index
    %c0_691 = arith.constant 0 : index
    %1442 = vector.load %arg3[%c9_689, %c0_690, %c0_691] : memref<32x32x128xf32, #tpu.memory_space<vmem>>, vector<1x32x128xf32>
    %1443 = vector.shape_cast %1442 : vector<1x32x128xf32> to vector<32x128xf32>
    %1444 = vector.extract_strided_slice %1383 {offsets = [9, 0], sizes = [1, 128], strides = [1, 1]} : vector<32x128xf32> to vector<1x128xf32>
    %1445 = vector.broadcast %1444 : vector<1x128xf32> to vector<32x128xf32>
    %1446 = arith.mulf %1443, %1445 : vector<32x128xf32>
    %1447 = arith.addf %1441, %1446 : vector<32x128xf32>
    %c10_692 = arith.constant 10 : index
    %c0_693 = arith.constant 0 : index
    %c0_694 = arith.constant 0 : index
    %1448 = vector.load %arg3[%c10_692, %c0_693, %c0_694] : memref<32x32x128xf32, #tpu.memory_space<vmem>>, vector<1x32x128xf32>
    %1449 = vector.shape_cast %1448 : vector<1x32x128xf32> to vector<32x128xf32>
    %1450 = vector.extract_strided_slice %1383 {offsets = [10, 0], sizes = [1, 128], strides = [1, 1]} : vector<32x128xf32> to vector<1x128xf32>
    %1451 = vector.broadcast %1450 : vector<1x128xf32> to vector<32x128xf32>
    %1452 = arith.mulf %1449, %1451 : vector<32x128xf32>
    %1453 = arith.addf %1447, %1452 : vector<32x128xf32>
    %c11_695 = arith.constant 11 : index
    %c0_696 = arith.constant 0 : index
    %c0_697 = arith.constant 0 : index
    %1454 = vector.load %arg3[%c11_695, %c0_696, %c0_697] : memref<32x32x128xf32, #tpu.memory_space<vmem>>, vector<1x32x128xf32>
    %1455 = vector.shape_cast %1454 : vector<1x32x128xf32> to vector<32x128xf32>
    %1456 = vector.extract_strided_slice %1383 {offsets = [11, 0], sizes = [1, 128], strides = [1, 1]} : vector<32x128xf32> to vector<1x128xf32>
    %1457 = vector.broadcast %1456 : vector<1x128xf32> to vector<32x128xf32>
    %1458 = arith.mulf %1455, %1457 : vector<32x128xf32>
    %1459 = arith.addf %1453, %1458 : vector<32x128xf32>
    %c12_698 = arith.constant 12 : index
    %c0_699 = arith.constant 0 : index
    %c0_700 = arith.constant 0 : index
    %1460 = vector.load %arg3[%c12_698, %c0_699, %c0_700] : memref<32x32x128xf32, #tpu.memory_space<vmem>>, vector<1x32x128xf32>
    %1461 = vector.shape_cast %1460 : vector<1x32x128xf32> to vector<32x128xf32>
    %1462 = vector.extract_strided_slice %1383 {offsets = [12, 0], sizes = [1, 128], strides = [1, 1]} : vector<32x128xf32> to vector<1x128xf32>
    %1463 = vector.broadcast %1462 : vector<1x128xf32> to vector<32x128xf32>
    %1464 = arith.mulf %1461, %1463 : vector<32x128xf32>
    %1465 = arith.addf %1459, %1464 : vector<32x128xf32>
    %c13_701 = arith.constant 13 : index
    %c0_702 = arith.constant 0 : index
    %c0_703 = arith.constant 0 : index
    %1466 = vector.load %arg3[%c13_701, %c0_702, %c0_703] : memref<32x32x128xf32, #tpu.memory_space<vmem>>, vector<1x32x128xf32>
    %1467 = vector.shape_cast %1466 : vector<1x32x128xf32> to vector<32x128xf32>
    %1468 = vector.extract_strided_slice %1383 {offsets = [13, 0], sizes = [1, 128], strides = [1, 1]} : vector<32x128xf32> to vector<1x128xf32>
    %1469 = vector.broadcast %1468 : vector<1x128xf32> to vector<32x128xf32>
    %1470 = arith.mulf %1467, %1469 : vector<32x128xf32>
    %1471 = arith.addf %1465, %1470 : vector<32x128xf32>
    %c14_704 = arith.constant 14 : index
    %c0_705 = arith.constant 0 : index
    %c0_706 = arith.constant 0 : index
    %1472 = vector.load %arg3[%c14_704, %c0_705, %c0_706] : memref<32x32x128xf32, #tpu.memory_space<vmem>>, vector<1x32x128xf32>
    %1473 = vector.shape_cast %1472 : vector<1x32x128xf32> to vector<32x128xf32>
    %1474 = vector.extract_strided_slice %1383 {offsets = [14, 0], sizes = [1, 128], strides = [1, 1]} : vector<32x128xf32> to vector<1x128xf32>
    %1475 = vector.broadcast %1474 : vector<1x128xf32> to vector<32x128xf32>
    %1476 = arith.mulf %1473, %1475 : vector<32x128xf32>
    %1477 = arith.addf %1471, %1476 : vector<32x128xf32>
    %c15_707 = arith.constant 15 : index
    %c0_708 = arith.constant 0 : index
    %c0_709 = arith.constant 0 : index
    %1478 = vector.load %arg3[%c15_707, %c0_708, %c0_709] : memref<32x32x128xf32, #tpu.memory_space<vmem>>, vector<1x32x128xf32>
    %1479 = vector.shape_cast %1478 : vector<1x32x128xf32> to vector<32x128xf32>
    %1480 = vector.extract_strided_slice %1383 {offsets = [15, 0], sizes = [1, 128], strides = [1, 1]} : vector<32x128xf32> to vector<1x128xf32>
    %1481 = vector.broadcast %1480 : vector<1x128xf32> to vector<32x128xf32>
    %1482 = arith.mulf %1479, %1481 : vector<32x128xf32>
    %1483 = arith.addf %1477, %1482 : vector<32x128xf32>
    %c16_710 = arith.constant 16 : index
    %c0_711 = arith.constant 0 : index
    %c0_712 = arith.constant 0 : index
    %1484 = vector.load %arg3[%c16_710, %c0_711, %c0_712] : memref<32x32x128xf32, #tpu.memory_space<vmem>>, vector<1x32x128xf32>
    %1485 = vector.shape_cast %1484 : vector<1x32x128xf32> to vector<32x128xf32>
    %1486 = vector.extract_strided_slice %1383 {offsets = [16, 0], sizes = [1, 128], strides = [1, 1]} : vector<32x128xf32> to vector<1x128xf32>
    %1487 = vector.broadcast %1486 : vector<1x128xf32> to vector<32x128xf32>
    %1488 = arith.mulf %1485, %1487 : vector<32x128xf32>
    %1489 = arith.addf %1483, %1488 : vector<32x128xf32>
    %c17_713 = arith.constant 17 : index
    %c0_714 = arith.constant 0 : index
    %c0_715 = arith.constant 0 : index
    %1490 = vector.load %arg3[%c17_713, %c0_714, %c0_715] : memref<32x32x128xf32, #tpu.memory_space<vmem>>, vector<1x32x128xf32>
    %1491 = vector.shape_cast %1490 : vector<1x32x128xf32> to vector<32x128xf32>
    %1492 = vector.extract_strided_slice %1383 {offsets = [17, 0], sizes = [1, 128], strides = [1, 1]} : vector<32x128xf32> to vector<1x128xf32>
    %1493 = vector.broadcast %1492 : vector<1x128xf32> to vector<32x128xf32>
    %1494 = arith.mulf %1491, %1493 : vector<32x128xf32>
    %1495 = arith.addf %1489, %1494 : vector<32x128xf32>
    %c18_716 = arith.constant 18 : index
    %c0_717 = arith.constant 0 : index
    %c0_718 = arith.constant 0 : index
    %1496 = vector.load %arg3[%c18_716, %c0_717, %c0_718] : memref<32x32x128xf32, #tpu.memory_space<vmem>>, vector<1x32x128xf32>
    %1497 = vector.shape_cast %1496 : vector<1x32x128xf32> to vector<32x128xf32>
    %1498 = vector.extract_strided_slice %1383 {offsets = [18, 0], sizes = [1, 128], strides = [1, 1]} : vector<32x128xf32> to vector<1x128xf32>
    %1499 = vector.broadcast %1498 : vector<1x128xf32> to vector<32x128xf32>
    %1500 = arith.mulf %1497, %1499 : vector<32x128xf32>
    %1501 = arith.addf %1495, %1500 : vector<32x128xf32>
    %c19_719 = arith.constant 19 : index
    %c0_720 = arith.constant 0 : index
    %c0_721 = arith.constant 0 : index
    %1502 = vector.load %arg3[%c19_719, %c0_720, %c0_721] : memref<32x32x128xf32, #tpu.memory_space<vmem>>, vector<1x32x128xf32>
    %1503 = vector.shape_cast %1502 : vector<1x32x128xf32> to vector<32x128xf32>
    %1504 = vector.extract_strided_slice %1383 {offsets = [19, 0], sizes = [1, 128], strides = [1, 1]} : vector<32x128xf32> to vector<1x128xf32>
    %1505 = vector.broadcast %1504 : vector<1x128xf32> to vector<32x128xf32>
    %1506 = arith.mulf %1503, %1505 : vector<32x128xf32>
    %1507 = arith.addf %1501, %1506 : vector<32x128xf32>
    %c20_722 = arith.constant 20 : index
    %c0_723 = arith.constant 0 : index
    %c0_724 = arith.constant 0 : index
    %1508 = vector.load %arg3[%c20_722, %c0_723, %c0_724] : memref<32x32x128xf32, #tpu.memory_space<vmem>>, vector<1x32x128xf32>
    %1509 = vector.shape_cast %1508 : vector<1x32x128xf32> to vector<32x128xf32>
    %1510 = vector.extract_strided_slice %1383 {offsets = [20, 0], sizes = [1, 128], strides = [1, 1]} : vector<32x128xf32> to vector<1x128xf32>
    %1511 = vector.broadcast %1510 : vector<1x128xf32> to vector<32x128xf32>
    %1512 = arith.mulf %1509, %1511 : vector<32x128xf32>
    %1513 = arith.addf %1507, %1512 : vector<32x128xf32>
    %c21_725 = arith.constant 21 : index
    %c0_726 = arith.constant 0 : index
    %c0_727 = arith.constant 0 : index
    %1514 = vector.load %arg3[%c21_725, %c0_726, %c0_727] : memref<32x32x128xf32, #tpu.memory_space<vmem>>, vector<1x32x128xf32>
    %1515 = vector.shape_cast %1514 : vector<1x32x128xf32> to vector<32x128xf32>
    %1516 = vector.extract_strided_slice %1383 {offsets = [21, 0], sizes = [1, 128], strides = [1, 1]} : vector<32x128xf32> to vector<1x128xf32>
    %1517 = vector.broadcast %1516 : vector<1x128xf32> to vector<32x128xf32>
    %1518 = arith.mulf %1515, %1517 : vector<32x128xf32>
    %1519 = arith.addf %1513, %1518 : vector<32x128xf32>
    %c22_728 = arith.constant 22 : index
    %c0_729 = arith.constant 0 : index
    %c0_730 = arith.constant 0 : index
    %1520 = vector.load %arg3[%c22_728, %c0_729, %c0_730] : memref<32x32x128xf32, #tpu.memory_space<vmem>>, vector<1x32x128xf32>
    %1521 = vector.shape_cast %1520 : vector<1x32x128xf32> to vector<32x128xf32>
    %1522 = vector.extract_strided_slice %1383 {offsets = [22, 0], sizes = [1, 128], strides = [1, 1]} : vector<32x128xf32> to vector<1x128xf32>
    %1523 = vector.broadcast %1522 : vector<1x128xf32> to vector<32x128xf32>
    %1524 = arith.mulf %1521, %1523 : vector<32x128xf32>
    %1525 = arith.addf %1519, %1524 : vector<32x128xf32>
    %c23_731 = arith.constant 23 : index
    %c0_732 = arith.constant 0 : index
    %c0_733 = arith.constant 0 : index
    %1526 = vector.load %arg3[%c23_731, %c0_732, %c0_733] : memref<32x32x128xf32, #tpu.memory_space<vmem>>, vector<1x32x128xf32>
    %1527 = vector.shape_cast %1526 : vector<1x32x128xf32> to vector<32x128xf32>
    %1528 = vector.extract_strided_slice %1383 {offsets = [23, 0], sizes = [1, 128], strides = [1, 1]} : vector<32x128xf32> to vector<1x128xf32>
    %1529 = vector.broadcast %1528 : vector<1x128xf32> to vector<32x128xf32>
    %1530 = arith.mulf %1527, %1529 : vector<32x128xf32>
    %1531 = arith.addf %1525, %1530 : vector<32x128xf32>
    %c24_734 = arith.constant 24 : index
    %c0_735 = arith.constant 0 : index
    %c0_736 = arith.constant 0 : index
    %1532 = vector.load %arg3[%c24_734, %c0_735, %c0_736] : memref<32x32x128xf32, #tpu.memory_space<vmem>>, vector<1x32x128xf32>
    %1533 = vector.shape_cast %1532 : vector<1x32x128xf32> to vector<32x128xf32>
    %1534 = vector.extract_strided_slice %1383 {offsets = [24, 0], sizes = [1, 128], strides = [1, 1]} : vector<32x128xf32> to vector<1x128xf32>
    %1535 = vector.broadcast %1534 : vector<1x128xf32> to vector<32x128xf32>
    %1536 = arith.mulf %1533, %1535 : vector<32x128xf32>
    %1537 = arith.addf %1531, %1536 : vector<32x128xf32>
    %c25_737 = arith.constant 25 : index
    %c0_738 = arith.constant 0 : index
    %c0_739 = arith.constant 0 : index
    %1538 = vector.load %arg3[%c25_737, %c0_738, %c0_739] : memref<32x32x128xf32, #tpu.memory_space<vmem>>, vector<1x32x128xf32>
    %1539 = vector.shape_cast %1538 : vector<1x32x128xf32> to vector<32x128xf32>
    %1540 = vector.extract_strided_slice %1383 {offsets = [25, 0], sizes = [1, 128], strides = [1, 1]} : vector<32x128xf32> to vector<1x128xf32>
    %1541 = vector.broadcast %1540 : vector<1x128xf32> to vector<32x128xf32>
    %1542 = arith.mulf %1539, %1541 : vector<32x128xf32>
    %1543 = arith.addf %1537, %1542 : vector<32x128xf32>
    %c26_740 = arith.constant 26 : index
    %c0_741 = arith.constant 0 : index
    %c0_742 = arith.constant 0 : index
    %1544 = vector.load %arg3[%c26_740, %c0_741, %c0_742] : memref<32x32x128xf32, #tpu.memory_space<vmem>>, vector<1x32x128xf32>
    %1545 = vector.shape_cast %1544 : vector<1x32x128xf32> to vector<32x128xf32>
    %1546 = vector.extract_strided_slice %1383 {offsets = [26, 0], sizes = [1, 128], strides = [1, 1]} : vector<32x128xf32> to vector<1x128xf32>
    %1547 = vector.broadcast %1546 : vector<1x128xf32> to vector<32x128xf32>
    %1548 = arith.mulf %1545, %1547 : vector<32x128xf32>
    %1549 = arith.addf %1543, %1548 : vector<32x128xf32>
    %c27_743 = arith.constant 27 : index
    %c0_744 = arith.constant 0 : index
    %c0_745 = arith.constant 0 : index
    %1550 = vector.load %arg3[%c27_743, %c0_744, %c0_745] : memref<32x32x128xf32, #tpu.memory_space<vmem>>, vector<1x32x128xf32>
    %1551 = vector.shape_cast %1550 : vector<1x32x128xf32> to vector<32x128xf32>
    %1552 = vector.extract_strided_slice %1383 {offsets = [27, 0], sizes = [1, 128], strides = [1, 1]} : vector<32x128xf32> to vector<1x128xf32>
    %1553 = vector.broadcast %1552 : vector<1x128xf32> to vector<32x128xf32>
    %1554 = arith.mulf %1551, %1553 : vector<32x128xf32>
    %1555 = arith.addf %1549, %1554 : vector<32x128xf32>
    %c28_746 = arith.constant 28 : index
    %c0_747 = arith.constant 0 : index
    %c0_748 = arith.constant 0 : index
    %1556 = vector.load %arg3[%c28_746, %c0_747, %c0_748] : memref<32x32x128xf32, #tpu.memory_space<vmem>>, vector<1x32x128xf32>
    %1557 = vector.shape_cast %1556 : vector<1x32x128xf32> to vector<32x128xf32>
    %1558 = vector.extract_strided_slice %1383 {offsets = [28, 0], sizes = [1, 128], strides = [1, 1]} : vector<32x128xf32> to vector<1x128xf32>
    %1559 = vector.broadcast %1558 : vector<1x128xf32> to vector<32x128xf32>
    %1560 = arith.mulf %1557, %1559 : vector<32x128xf32>
    %1561 = arith.addf %1555, %1560 : vector<32x128xf32>
    %c29_749 = arith.constant 29 : index
    %c0_750 = arith.constant 0 : index
    %c0_751 = arith.constant 0 : index
    %1562 = vector.load %arg3[%c29_749, %c0_750, %c0_751] : memref<32x32x128xf32, #tpu.memory_space<vmem>>, vector<1x32x128xf32>
    %1563 = vector.shape_cast %1562 : vector<1x32x128xf32> to vector<32x128xf32>
    %1564 = vector.extract_strided_slice %1383 {offsets = [29, 0], sizes = [1, 128], strides = [1, 1]} : vector<32x128xf32> to vector<1x128xf32>
    %1565 = vector.broadcast %1564 : vector<1x128xf32> to vector<32x128xf32>
    %1566 = arith.mulf %1563, %1565 : vector<32x128xf32>
    %1567 = arith.addf %1561, %1566 : vector<32x128xf32>
    %c30_752 = arith.constant 30 : index
    %c0_753 = arith.constant 0 : index
    %c0_754 = arith.constant 0 : index
    %1568 = vector.load %arg3[%c30_752, %c0_753, %c0_754] : memref<32x32x128xf32, #tpu.memory_space<vmem>>, vector<1x32x128xf32>
    %1569 = vector.shape_cast %1568 : vector<1x32x128xf32> to vector<32x128xf32>
    %1570 = vector.extract_strided_slice %1383 {offsets = [30, 0], sizes = [1, 128], strides = [1, 1]} : vector<32x128xf32> to vector<1x128xf32>
    %1571 = vector.broadcast %1570 : vector<1x128xf32> to vector<32x128xf32>
    %1572 = arith.mulf %1569, %1571 : vector<32x128xf32>
    %1573 = arith.addf %1567, %1572 : vector<32x128xf32>
    %c31_755 = arith.constant 31 : index
    %c0_756 = arith.constant 0 : index
    %c0_757 = arith.constant 0 : index
    %1574 = vector.load %arg3[%c31_755, %c0_756, %c0_757] : memref<32x32x128xf32, #tpu.memory_space<vmem>>, vector<1x32x128xf32>
    %1575 = vector.shape_cast %1574 : vector<1x32x128xf32> to vector<32x128xf32>
    %1576 = vector.extract_strided_slice %1383 {offsets = [31, 0], sizes = [1, 128], strides = [1, 1]} : vector<32x128xf32> to vector<1x128xf32>
    %1577 = vector.broadcast %1576 : vector<1x128xf32> to vector<32x128xf32>
    %1578 = arith.mulf %1575, %1577 : vector<32x128xf32>
    %1579 = arith.addf %1573, %1578 : vector<32x128xf32>
    %1580 = math.tanh %1579 : vector<32x128xf32>
    %1581 = arith.mulf %1580, %2 : vector<32x128xf32>
    %cst = arith.constant dense<0.000000e+00> : vector<128xf32>
    %1582 = vector.multi_reduction <add>, %1581, %cst [0] : vector<32x128xf32> to vector<128xf32>
    %1583 = vector.shape_cast %1582 : vector<128xf32> to vector<1x128xf32>
    %1584 = arith.addf %1583, %4 : vector<1x128xf32>
    %c0_758 = arith.constant 0 : index
    %c0_759 = arith.constant 0 : index
    %1585 = vector.load %arg4[%c0_758, %c0_759] : memref<1x128xf32, #tpu.memory_space<vmem>>, vector<1x128xf32>
    tpu.vector_store %arg4[%c0_758, %c0_759], %1584 {strides = array<i32>} : memref<1x128xf32, #tpu.memory_space<vmem>>, vector<1x128xf32>,
    return
  }
  func.func @transform_0(%arg0: i32) -> (i32, i32) {
    %c0_i32 = arith.constant 0 : i32
    %c0_i32_0 = arith.constant 0 : i32
    return %c0_i32, %arg0 : i32, i32
  }
  func.func @transform_1(%arg0: i32) -> (i32, i32) {
    %c0_i32 = arith.constant 0 : i32
    %c0_i32_0 = arith.constant 0 : i32
    return %c0_i32, %arg0 : i32, i32
  }
  func.func @transform_2(%arg0: i32) -> (i32, i32, i32) {
    %c0_i32 = arith.constant 0 : i32
    %c0_i32_0 = arith.constant 0 : i32
    %c0_i32_1 = arith.constant 0 : i32
    return %c0_i32, %c0_i32_0, %arg0 : i32, i32, i32
  }
  func.func @transform_3(%arg0: i32) -> (i32, i32) {
    %c0_i32 = arith.constant 0 : i32
    %c0_i32_0 = arith.constant 0 : i32
    return %c0_i32, %arg0 : i32, i32
  }
}

</mosaic_0001>

<bundles_post_ra>
// kernel: tpu_custom_call.1
= control target key start
LH: loop header
LB: loop body
LE: loop exit
PB: predicated region body
PF: predicated region fallthrough
CT: control target
= control target key end

     0   :  { %s8215_s0 = inlined_call_operand.hbm [shape: f32[8,256], index: 0, kind: input, shape index: {}]   ;;  %s8216_s1 = inlined_call_operand.hbm [shape: f32[129,256], index: 1, kind: input, shape index: {}]   ;;  %s8217_s2 = inlined_call_operand.hbm [shape: f32[32,32,256], index: 2, kind: input, shape index: {}]   ;;  %s8218_s3 = inlined_call_operand.hbm [shape: f32[1,256], index: 3, kind: output, shape index: {}]  }
   0x1   :  { %8622 = sst [smem:[#allocation113_spill]] %s8216_s1 }
   0x2   :  { %8 = vsyncpa [#allocation3], 0 }
   0x3   :  { %10 = vsyncpa [#allocation3 + $0x1], 0 }
   0x4   :  { %11 = vsyncpa [#allocation6], 0 }
   0x5   :  { %13 = vsyncpa [#allocation6 + $0x1], 0 }
   0x6   :  { %14 = vsyncpa [#allocation4], 0 }
   0x7   :  { %16 = vsyncpa [#allocation4 + $0x1], 0  ;;  %s4649_s12 = smov 0   ;;  %s4651_s13 = smov 0  }
   0x8   :  { %s4653_s14 = smov 0   ;;  %s4655_s15 = smov 0  }
   0x9 LB: > { %s4670_s16 = sadd.s32 4294967295, %s4620_s15   ;;  %s3781_s17 = sadd.s32 4294967294, %s4620_s15   ;;  %s4620_s15 = sphi %s4655_s15, %s9437_s15   ;;  %s4616_s14 = sphi %s4653_s14, %s9436_s14   ;;  %s4612_s13 = sphi %s4651_s13, %s9435_s13   ;;  %s4608_s12 = sphi %s4649_s12, %s9434_s12  }
   0xa   : > { %s4674_s18 = sadd.s32 1, %s4620_s15   ;;  %s29_s19 = sadd.s32 1, %s4616_s14 }
   0xb   : > { %s26_s20 = ssub.s32 %s4620_s15, %s4674_s18  ;;  %p36_p0 = scmp.ne.s32.totalorder %s4616_s14, %s4612_s13 }
   0xc   : > { %p27_p1 = scmp.eq.s32.totalorder %s26_s20, 0  ;;  %p37_p2 = scmp.eq.s32.totalorder %s4620_s15, 0 }
   0xd   : > { %p42_p3 = scmp.ne.s32.totalorder %s4612_s13, %s4608_s12  ;;  %p43_p4 = scmp.eq.s32.totalorder %s4670_s16, 0 }
   0xe   : > { %s4686_s21 = scalar_select %p27_p1, %s4616_s14, %s29_s19  }
   0xf   : > { %p38_p5 = por %p37_p2, %p36_p0  ;;  %p4688_p6 = por %p43_p4, %p42_p3 }
  0x10   : > { %p118_p7 = scmp.eq.s32.totalorder %s4670_s16, 1  ;;  %p124_p8 = scmp.eq.s32.totalorder %s3781_s17, 1 }
  0x11   : > { %s8623_s22 = scalar_select %p4688_p6, 1, 0 }
  0x12   : > { %p3951_p10 = scmp.lt.s32.totalorder %s4620_s15, 2  ;;  %p4695_p11 = por %p118_p7, %p36_p0 }
  0x13   : > { %p4699_p12 = por %p124_p8, %p42_p3  ;;  %s4704_s25 = sand.u32 1, %s4616_s14  }
  0x14   : > { %s8624_s23 = scalar_select %p4695_p11, 1, 0 }
  0x15   : > { %s8625_s24 = scalar_select %p4699_p12, 1, 0 }
  0x16   : > { %s4707_s26 = sshll.u32 %s4620_s15, 7  ;;  %p4709_p13 = pnand %p3951_p10, %p38_p5 }
  0x17   : > { %s162_s28 = sand.u32 1, %s4620_s15   ;;  %s3927_s29 = smul.u32 136, %s4704_s25 }
  0x18   : > { %s8627_s1 = sld [smem:[#allocation113_spill]]  ;;  %s4723_s8 = scalar_lea.sflag [#allocation6], %s162_s28 }
  0x19   : > { %s166_s6 = scalar_lea.vmem [#allocation5], %s3927_s29  ;;  %p4729_p1 = pneg %p4709_p13 }
  0x1a   : > { %s172_s7 = sshll.u32 %s166_s6, 4  ;;  %s4721_s7 = int_to_ptr.vmem [resolvable:$true] %s172_s7 }
  0x1e   : > { %s4719_s5 = scalar_lea.hbm %s8627_s1, %s4707_s26  ;;  %s4465_s19 = scalar_lea.hbm %s8627_s1, 4352 }
  0x1f   : > { %s4460_s9 = scalar_lea.hbm %s4719_s5, 2176  ;;  %p4466_p4 = scmp.lt.u32.totalorder %s4719_s5, %s8627_s1 }
  0x20   : > { %p4461_p0 = scmp.ne.s32.totalorder %s4719_s5, %s4460_s9  ;;  %p4467_p5 = scmp.lt.u32.totalorder %s4465_s19, %s4460_s9 }
  0x21   : > { %p4469_p8 = scmp.lt.u32.totalorder %s4460_s9, %s4719_s5 }
  0x22   : > { %p4463_p2 = pnand %p4729_p1, %p4461_p0  ;;  %p4468_p7 = por %p4467_p5, %p4466_p4 }
  0x24   : > { %p4464_p3 = pneg %p4463_p2  ;;  %p4470_p10 = por %p4469_p8, %p4468_p7 }
  0x26   : > { %p4471_p9 = pnand %p4470_p10, %p4464_p3 }
  0x28   : > { %4474 = shalt.err (!%p4471_p9)
}
  0x29   : > { %s4475_s28 = scalar_lea.vmem %s4721_s7, 2176  ;;  %s4622_s30 = smov [#allocation5]  }
  0x2a   : > { %p4476_p0 = scmp.ne.s32.totalorder %s4721_s7, %s4475_s28  ;;  %s4480_s4 = sshll.u32 %s4622_s30, 4  ;;  %s4481_s4 = int_to_ptr.vmem [resolvable:$false] %s4480_s4 }
  0x2b   : > { %s4482_s6 = scalar_lea.vmem %s4481_s4, 4352  ;;  %p4483_p11 = scmp.lt.s32.totalorder %s4721_s7, %s4481_s4 }
  0x2c   : > { %p4478_p2 = pnand %p4476_p0, %p4729_p1  ;;  %p4484_p6 = scmp.lt.s32.totalorder %s4482_s6, %s4475_s28 }
  0x2e   : > { %p4479_p12 = pneg %p4478_p2  ;;  %p4485_p4 = por %p4484_p6, %p4483_p11 }
  0x30   : > { %p4486_p5 = pnand %p4485_p4, %p4479_p12 }
  0x32   : > { %4489 = shalt.err (!%p4486_p5)
}
  0x33   : > { %s8221_s9 = smov 256   ;;  %s8222_s11 = smov 128  }
  0x34   : > { %s8223_s17 = smov 8   ;;  %p3789_p6 = scmp.ge.s32.totalorder %s4620_s15, 1 }
  0x35   : > { %3943 = dma.hbm_to_vmem [thread:$0]  (!%p4709_p13), %s4719_s5, 2176, %s4721_s7, %s4723_s8, %s8221_s9, %s8222_s11, %s8223_s17  }
  0x36   : > { %p200_p9 = scmp.lt.s32.totalorder %s4620_s15, 3  ;;  %s3784_s19 = sshll.u32 %s4704_s25, 3 }
  0x37   : > { %s4767_s30 = scalar_lea.hbm %s8215_s0, %s4707_s26  ;;  %s148_s4 = scalar_lea.vmem [#allocation2], %s3784_s19 }
  0x38   : > { %p4759_p11 = pnand %p3789_p6, %p200_p9  ;;  %s155_s6 = sshll.u32 %s148_s4, 4  ;;  %s4769_s6 = int_to_ptr.vmem [resolvable:$true] %s155_s6 }
  0x39   : > { %s3787_s5 = sshll.u32 %s4704_s25, 10  ;;  %s145_s7 = scalar_lea.sflag [#allocation3], %s4704_s25 }
  0x3a   : > { %s8629_s20 = scalar_select %p4759_p11, 1, 0 }
  0x3b   : > { %s4490_s9 = scalar_lea.hbm %s4767_s30, 128  ;;  %s4495_s29 = scalar_lea.hbm %s8215_s0, 256 }
  0x3c   : > { %p4491_p12 = scmp.ne.s32.totalorder %s4767_s30, %s4490_s9  ;;  %p4496_p8 = scmp.lt.u32.totalorder %s4767_s30, %s8215_s0 }
  0x3d   : > { %p4497_p10 = scmp.lt.u32.totalorder %s4495_s29, %s4490_s9  ;;  %p4499_p2 = scmp.lt.u32.totalorder %s4490_s9, %s4767_s30 }
  0x3e   : > { %p4493_p3 = pnand %p4491_p12, %p4729_p1 }
  0x3f   : > { %p4498_p0 = por %p4497_p10, %p4496_p8 }
  0x40   : > { %p4494_p7 = pneg %p4493_p3 }
  0x41   : > { %p4500_p4 = por %p4499_p2, %p4498_p0 }
  0x43   : > { %p4501_p5 = pnand %p4500_p4, %p4494_p7 }
  0x45   : > { %4504 = shalt.err (!%p4501_p5)
}
  0x46   : > { %s4505_s19 = scalar_lea.vmem %s4769_s6, 128  ;;  %s4626_s11 = smov [#allocation2]  }
  0x47   : > { %p4506_p6 = scmp.ne.s32.totalorder %s4769_s6, %s4505_s19  ;;  %s4510_s17 = sshll.u32 %s4626_s11, 4  ;;  %s4511_s17 = int_to_ptr.vmem [resolvable:$false] %s4510_s17 }
  0x48   : > { %s4512_s1 = scalar_lea.vmem %s4511_s17, 256  ;;  %p4513_p3 = scmp.lt.s32.totalorder %s4769_s6, %s4511_s17 }
  0x49   : > { %p4508_p9 = pnand %p4506_p6, %p4729_p1  ;;  %p4514_p11 = scmp.lt.s32.totalorder %s4512_s1, %s4505_s19 }
  0x4b   : > { %p4509_p12 = pneg %p4508_p9  ;;  %p4515_p8 = por %p4514_p11, %p4513_p3 }
  0x4d   : > { %p4516_p10 = pnand %p4515_p8, %p4509_p12 }
  0x4f   : > { %4519 = shalt.err (!%p4516_p10)
}
  0x50   : > { %3940 = dma.hbm_to_vmem [thread:$0]  (!%p4709_p13), %s4767_s30, 128, %s4769_s6, %s145_s7  }
  0x51   : > { %s4798_s29 = scalar_lea.hbm %s8217_s2, %s4707_s26  ;;  %s186_s28 = scalar_lea.vmem [#allocation7], %s3787_s5 }
  0x52   : > { %s192_s19 = sshll.u32 %s186_s28, 4  ;;  %s4520_s11 = scalar_lea.hbm %s4798_s29, 16384  ;;  %s4802_s19 = int_to_ptr.vmem [resolvable:$true] %s192_s19 }
  0x53   : > { %p4521_p11 = scmp.ne.s32.totalorder %s4798_s29, %s4520_s11  ;;  %s4525_s7 = scalar_lea.hbm %s8217_s2, 32768 }
  0x54   : > { %p4526_p2 = scmp.lt.u32.totalorder %s4798_s29, %s8217_s2  ;;  %p4527_p4 = scmp.lt.u32.totalorder %s4525_s7, %s4520_s11 }
  0x55   : > { %p4523_p7 = pnand %p4521_p11, %p4729_p1  ;;  %p4529_p6 = scmp.lt.u32.totalorder %s4520_s11, %s4798_s29 }
  0x56   : > { %p4528_p5 = por %p4527_p4, %p4526_p2 }
  0x57   : > { %p4524_p0 = pneg %p4523_p7 }
  0x58   : > { %p4530_p9 = por %p4529_p6, %p4528_p5 }
  0x5a   : > { %p4531_p12 = pnand %p4530_p9, %p4524_p0 }
  0x5c   : > { %4534 = shalt.err (!%p4531_p12)
}
  0x5d   : > { %s4535_s25 = scalar_lea.vmem %s4802_s19, 16384  ;;  %s4627_s5 = smov [#allocation7]  }
  0x5e   : > { %p4536_p3 = scmp.ne.s32.totalorder %s4802_s19, %s4535_s25  ;;  %s4540_s1 = sshll.u32 %s4627_s5, 4  ;;  %s4541_s1 = int_to_ptr.vmem [resolvable:$false] %s4540_s1 }
  0x5f   : > { %s4542_s9 = scalar_lea.vmem %s4541_s1, 32768  ;;  %p4543_p11 = scmp.lt.s32.totalorder %s4802_s19, %s4541_s1 }
  0x60   : > { %p4538_p8 = pnand %p4536_p3, %p4729_p1  ;;  %p4544_p7 = scmp.lt.s32.totalorder %s4542_s9, %s4535_s25 }
  0x62   : > { %p4539_p10 = pneg %p4538_p8  ;;  %p4545_p2 = por %p4544_p7, %p4543_p11 }
  0x64   : > { %p4546_p4 = pnand %p4545_p2, %p4539_p10 }
  0x66   : > { %4549 = shalt.err (!%p4546_p4)
}
  0x67   : > { %s8630_s4 = smov 8   ;;  %s8631_s28 = smov 128  }
  0x68   : > { %s8632_s11 = smov 256   ;;  %p8633_p1 = scmp.ne.s32.totalorder %s8629_s20, 0 }
  0x69   : > { %3946 = dma.hbm_to_vmem [thread:$0]  (!%p4709_p13), %s4798_s29, 16384, %s4802_s19, %s4723_s8, %s8632_s11, %s8631_s28, %s8630_s4  }
  0x6a   : > { %204 = sbr.rel (%p8633_p1) target bundleno = 874 (0x36a), region = 32 }
  0x71   : > { %s4832_s10 = sand.u32 1, %s4612_s13   ;;  %p8634_p0 = scmp.ne.s32.totalorder %s8623_s22, 0 }
  0x72   : > { %s3790_s30 = sshll.u32 %s4832_s10, 3  ;;  %s207_s6 = scalar_lea.sflag [#allocation3], %s4832_s10 }
  0x73   : > { %s4836_s7 = scalar_lea.vmem [#allocation2], %s3790_s30 }
  0x74   : > { %4595 = dma.done.wait (%p8634_p0), %s207_s6, 128  }
  0x75   : > { %4597 = vsyncadd (%p8634_p0), %s207_s6, 4294967168  ;;  %s215_s27 = sand.u32 1, %s4670_s16   ;;  %s3928_s8 = smul.u32 136, %s4832_s10 }
  0x76   : > { %s216_s20 = scalar_lea.sflag [#allocation6], %s215_s27 }
  0x77   : > { %s4844_s29 = scalar_lea.vmem [#allocation5], %s3928_s8 }
  0x78   : > { %4599 = dma.done.wait (%p8634_p0), %s216_s20, 18560  }
  0x79   : > { %4601 = vsyncadd (%p8634_p0), %s216_s20, 4294948736  ;;  %v294_v0 = vlaneseq  ;;  %s3791_s19 = sshll.u32 %s4832_s10, 10  ;;  %v4860_v6 = vld [vmem:[%s4844_s29] sm:$0xff]  ;;  %v4863_v7 = vld [vmem:[%s4844_s29 + $0x8] sm:$0xff]  ;;  %s3924_s26 = sshll.u32 %s4670_s16, 4 }
  0x7a   : > { %v4866_v8 = vld [vmem:[%s4844_s29 + $0x10] sm:$0xff]  ;;  %v4869_v9 = vld [vmem:[%s4844_s29 + $0x18] sm:$0xff]  ;;  %v4874_v11 = vld [vmem:[%s4844_s29 + $0x20] sm:$0xff]  ;;  %s4907_s22 = scalar_lea.vmem [#allocation7], %s3791_s19  ;;  %s259_s17 = scalar_lea.vmem [#allocation8], %s4832_s10 }
  0x7b   : > { %v295_v1 = vshrl.u32 %v294_v0, 7  ;;  %v4877_v12 = vld [vmem:[%s4844_s29 + $0x28] sm:$0xff]  ;;  %v4880_v13 = vld [vmem:[%s4844_s29 + $0x60] sm:$0xff]  ;;  %v4889_v17 = vld [vmem:[%s4844_s29 + $0x30] sm:$0xff]  ;;  %s3672_s25 = sshll.u32 %s259_s17, 4  ;;  %s8171_s9 = scalar_lea.hbm %s8218_s3, %s3924_s26  ;;  %s8173_s25 = int_to_ptr.vmem [resolvable:$true] %s3672_s25 }
  0x7c   : > { %v4892_v18 = vld [vmem:[%s4844_s29 + $0x38] sm:$0xff]  ;;  %v3792_v19 = vld [vmem:[%s4836_s7] ss:$0 sm:$0xff]  ;;  %v4919_v31 = vld [vmem:[%s4907_s22 + $0x18] sm:$0xff]  ;;  %s3660_s4 = scalar_lea.sflag [#allocation4], %s4832_s10  ;;  %s4550_s28 = scalar_lea.vmem %s8173_s25, 16 }
  0x7d   : > { %v4851_v2 = vsub.s32 0, %v295_v1  ;;  %v4853_v3 = vsub.s32 1, %v295_v1  ;;  %v4855_v4 = vsub.s32 2, %v295_v1  ;;  %v4857_v5 = vsub.s32 3, %v295_v1  ;;  %v4910_v28 = vld [vmem:[%s4907_s22] sm:$0xff]  ;;  %v4913_v29 = vld [vmem:[%s4907_s22 + $0x8] sm:$0xff]  ;;  %p4551_p13 = scmp.ne.s32.totalorder %s8173_s25, %s4550_s28 }
  0x7e   : > { %v4871_v10 = vsub.s32 4, %v295_v1  ;;  %v4882_v14 = vsub.s32 5, %v295_v1  ;;  %v4884_v15 = vsub.s32 6, %v295_v1  ;;  %v4886_v16 = vsub.s32 7, %v295_v1  ;;  %v4916_v30 = vld [vmem:[%s4907_s22 + $0x10] sm:$0xff]  ;;  %v4925_v35 = vld [vmem:[%s4907_s22 + $0x20] sm:$0xff] }
  0x7f   : > { %v297_v20 = vrot.slane %v4880_v13, %v4851_v2  ;;  %v314_v21 = vrot.slane %v4880_v13, %v4853_v3  ;;  %v331_v22 = vrot.slane %v4880_v13, %v4855_v4  ;;  %v348_v23 = vrot.slane %v4880_v13, %v4857_v5  ;;  %v4928_v36 = vld [vmem:[%s4907_s22 + $0x28] sm:$0xff]  ;;  %v4937_v42 = vld [vmem:[%s4907_s22 + $0x30] sm:$0xff]  ;;  %v4940_v43 = vld [vmem:[%s4907_s22 + $0x38] sm:$0xff]  ;;  %p9431_p5 = scmp.ne.s32.totalorder %s8624_s23, 0  ;;  %s4628_s16 = smov [#allocation8]  }
  0x80   : > { %v282_v24 = vmul.f32 %v3792_v19, %v4860_v6  ;;  %v283_v25 = vmul.f32 %v3792_v19, %v4863_v7  ;;  %v284_v26 = vmul.f32 %v3792_v19, %v4866_v8  ;;  %v285_v27 = vmul.f32 %v3792_v19, %v4869_v9  ;;  %v4943_v44 = vld [vmem:[%s4907_s22 + $0x40] sm:$0xff]  ;;  %v4950_v49 = vld [vmem:[%s4907_s22 + $0x48] sm:$0xff]  ;;  %v4953_v50 = vld [vmem:[%s4907_s22 + $0x50] sm:$0xff]  ;;  %s4554_s11 = sshll.u32 %s4628_s16, 4  ;;  %s4555_s11 = int_to_ptr.vmem [resolvable:$false] %s4554_s11 }
  0x81   : > { %v298_v32 = vmul.f32 %v297_v20, %v4910_v28  ;;  %v299_v33 = vmul.f32 %v297_v20, %v4913_v29  ;;  %v300_v34 = vmul.f32 %v297_v20, %v4916_v30  ;;  %v365_v37 = vrot.slane %v4880_v13, %v4871_v10  ;;  %v4956_v51 = vld [vmem:[%s4907_s22 + $0x58] sm:$0xff]  ;;  %v4960_v56 = vld [vmem:[%s4907_s22 + $0x60] sm:$0xff]  ;;  %v4963_v57 = vld [vmem:[%s4907_s22 + $0x68] sm:$0xff]  ;;  %p4552_p6 = pnand %p4551_p13, %p9431_p5  ;;  %s4556_s30 = scalar_lea.vmem %s4555_s11, 32 }
  0x82   : > { %v286_v38 = vadd.f32 %v282_v24, %v4874_v11  ;;  %v287_v39 = vadd.f32 %v283_v25, %v4877_v12  ;;  %v288_v40 = vadd.f32 %v284_v26, %v4889_v17  ;;  %v289_v41 = vadd.f32 %v285_v27, %v4892_v18  ;;  %v4966_v58 = vld [vmem:[%s4907_s22 + $0x70] sm:$0xff]  ;;  %v4972_v63 = vld [vmem:[%s4907_s22 + $0x78] sm:$0xff]  ;;  %v4979_v24 = vld [vmem:[%s4907_s22 + $0x88] sm:$0xff]  ;;  %p4557_p12 = scmp.lt.s32.totalorder %s8173_s25, %s4555_s11  ;;  %p4558_p3 = scmp.lt.s32.totalorder %s4556_s30, %s4550_s28 }
  0x83   : > { %v301_v45 = vmul.f32 %v297_v20, %v4919_v31  ;;  %v315_v46 = vmul.f32 %v4925_v35, %v314_v21  ;;  %v316_v47 = vmul.f32 %v4928_v36, %v314_v21  ;;  %v317_v48 = vmul.f32 %v4937_v42, %v314_v21  ;;  %8636 = vst [vmem:[#allocation13_spill] sm:$0xff] %v4979_v24  ;;  %v4982_v25 = vld [vmem:[%s4907_s22 + $0x90] sm:$0xff]  ;;  %p4553_p9 = pneg %p4552_p6 }
  0x84   : > { %v302_v52 = vadd.f32 %v298_v32, %v286_v38  ;;  %v303_v53 = vadd.f32 %v299_v33, %v287_v39  ;;  %v304_v54 = vadd.f32 %v300_v34, %v288_v40  ;;  %v318_v55 = vmul.f32 %v4940_v43, %v314_v21  ;;  %v4976_v21 = vld [vmem:[%s4907_s22 + $0x80] sm:$0xff]  ;;  %8637 = vst [vmem:[#allocation14_spill] sm:$0xff] %v4982_v25  ;;  %v4988_v34 = vld [vmem:[%s4907_s22 + $0x98] sm:$0xff]  ;;  %p4559_p8 = por %p4558_p3, %p4557_p12 }
  0x85   : > { %v305_v59 = vadd.f32 %v301_v45, %v289_v41  ;;  %v332_v60 = vmul.f32 %v4943_v44, %v331_v22  ;;  %v333_v61 = vmul.f32 %v4950_v49, %v331_v22  ;;  %v334_v62 = vmul.f32 %v4953_v50, %v331_v22  ;;  %8635 = vst [vmem:[#allocation12_spill] sm:$0xff] %v4976_v21  ;;  %v4992_v41 = vld [vmem:[%s4844_s29 + $0x68] sm:$0xff] }
  0x86   : > { %v319_v0 = vadd.f32 %v315_v46, %v302_v52  ;;  %v320_v1 = vadd.f32 %v316_v47, %v303_v53  ;;  %v321_v19 = vadd.f32 %v317_v48, %v304_v54  ;;  %v335_v20 = vmul.f32 %v4956_v51, %v331_v22  ;;  %8638 = vst [vmem:[#allocation15_spill] sm:$0xff] %v4988_v34  ;;  %v4998_v52 = vld [vmem:[%s4907_s22 + $0xa0] sm:$0xff]  ;;  %p4560_p10 = pnand %p4559_p8, %p4553_p9 }
  0x87   : > { %v322_v26 = vadd.f32 %v318_v55, %v305_v59  ;;  %v349_v27 = vmul.f32 %v4960_v56, %v348_v23  ;;  %v350_v32 = vmul.f32 %v4963_v57, %v348_v23  ;;  %v351_v33 = vmul.f32 %v4966_v58, %v348_v23  ;;  %8639 = vst [vmem:[#allocation16_spill] sm:$0xff] %v4998_v52  ;;  %v5002_v59 = vld [vmem:[%s4907_s22 + $0xa8] sm:$0xff] }
  0x88   : > { %v336_v38 = vadd.f32 %v332_v60, %v319_v0  ;;  %v337_v22 = vadd.f32 %v333_v61, %v320_v1  ;;  %v338_v39 = vadd.f32 %v334_v62, %v321_v19  ;;  %v352_v40 = vmul.f32 %v4972_v63, %v348_v23  ;;  %8640 = vst [vmem:[#allocation17_spill] sm:$0xff] %v5002_v59  ;;  %v5005_v60 = vld [vmem:[%s4907_s22 + $0xb0] sm:$0xff]  ;;  %v5008_v61 = vld [vmem:[%s4907_s22 + $0xb8] sm:$0xff]  ;;  %v5013_v1 = vld [vmem:[%s4907_s22 + $0xc0] sm:$0xff] }
  0x89   : > { %v339_v45 = vadd.f32 %v335_v20, %v322_v26  ;;  %v366_v46 = vmul.f32 %v4976_v21, %v365_v37  ;;  %v367_v47 = vmul.f32 %v4979_v24, %v365_v37  ;;  %v368_v48 = vmul.f32 %v4982_v25, %v365_v37  ;;  %8641 = vst [vmem:[#allocation18_spill] sm:$0xff] %v5005_v60  ;;  %v5016_v19 = vld [vmem:[%s4907_s22 + $0xc8] sm:$0xff]  ;;  %v5019_v20 = vld [vmem:[%s4907_s22 + $0xd0] sm:$0xff]  ;;  %v5051_v25 = vld [vmem:[%s4907_s22 + $0x100] sm:$0xff] }
  0x8a   : > { %v353_v53 = vadd.f32 %v349_v27, %v336_v38  ;;  %v354_v54 = vadd.f32 %v350_v32, %v337_v22  ;;  %v355_v55 = vadd.f32 %v351_v33, %v338_v39  ;;  %v369_v23 = vmul.f32 %v4988_v34, %v365_v37  ;;  %8642 = vst [vmem:[#allocation19_spill] sm:$0xff] %v5008_v61  ;;  %v5026_v38 = vld [vmem:[%s4907_s22 + $0xd8] sm:$0xff]  ;;  %v5054_v24 = vld [vmem:[%s4907_s22 + $0x108] sm:$0xff] }
  0x8b   : > { %v356_v62 = vadd.f32 %v352_v40, %v339_v45  ;;  %v382_v0 = vrot.slane %v4880_v13, %v4882_v14  ;;  %8643 = vst [vmem:[#allocation20_spill] sm:$0xff] %v5013_v1  ;;  %8644 = vst [vmem:[#allocation21_spill] sm:$0xff] %v5016_v19  ;;  %v399_v37 = vrot.slane %v4880_v13, %v4884_v15 }
  0x8c   : > { %8645 = vst [vmem:[#allocation22_spill] sm:$0xff] %v5019_v20  ;;  %v416_v26 = vrot.slane %v4880_v13, %v4886_v16  ;;  %v370_v27 = vadd.f32 %v366_v46, %v353_v53  ;;  %v371_v32 = vadd.f32 %v367_v47, %v354_v54  ;;  %v372_v33 = vadd.f32 %v368_v48, %v355_v55  ;;  %v5034_v13 = vld [vmem:[%s4907_s22 + $0xe0] sm:$0xff]  ;;  %v5037_v46 = vld [vmem:[%s4907_s22 + $0xe8] sm:$0xff]  ;;  %v5040_v47 = vld [vmem:[%s4907_s22 + $0xf0] sm:$0xff] }
  0x8d   : > { %8646 = vst [vmem:[#allocation23_spill] sm:$0xff] %v5026_v38  ;;  %v433_v22 = vrot.slane %v4992_v41, %v4851_v2  ;;  %v373_v39 = vadd.f32 %v369_v23, %v356_v62  ;;  %v383_v40 = vmul.f32 %v4998_v52, %v382_v0  ;;  %v384_v45 = vmul.f32 %v5002_v59, %v382_v0  ;;  %v5047_v23 = vld [vmem:[%s4907_s22 + $0xf8] sm:$0xff] }
  0x8e   : > { %v385_v34 = vmul.f32 %v5005_v60, %v382_v0  ;;  %8647 = vst [vmem:[#allocation24_spill] sm:$0xff] %v5034_v13  ;;  %8648 = vst [vmem:[#allocation25_spill] sm:$0xff] %v5037_v46  ;;  %v386_v48 = vmul.f32 %v5008_v61, %v382_v0  ;;  %v400_v53 = vmul.f32 %v5013_v1, %v399_v37  ;;  %v5057_v0 = vld [vmem:[%s4907_s22 + $0x110] sm:$0xff] }
  0x8f   : > { %8649 = vst [vmem:[#allocation26_spill] sm:$0xff] %v5040_v47  ;;  %v401_v54 = vmul.f32 %v5016_v19, %v399_v37  ;;  %v402_v55 = vmul.f32 %v5019_v20, %v399_v37  ;;  %8650 = vst [vmem:[#allocation27_spill] sm:$0xff] %v5047_v23  ;;  %v387_v62 = vadd.f32 %v383_v40, %v370_v27  ;;  %v5063_v27 = vld [vmem:[%s4907_s22 + $0x118] sm:$0xff] }
  0x90   : > { %v388_v59 = vadd.f32 %v384_v45, %v371_v32  ;;  %v389_v60 = vadd.f32 %v385_v34, %v372_v33  ;;  %v403_v52 = vmul.f32 %v5026_v38, %v399_v37  ;;  %8651 = vst [vmem:[#allocation28_spill] sm:$0xff] %v5051_v25  ;;  %8652 = vst [vmem:[#allocation29_spill] sm:$0xff] %v5054_v24  ;;  %v5126_v38 = vld [vmem:[%s4907_s22 + $0x188] sm:$0xff] }
  0x91   : > { %8653 = vst [vmem:[#allocation30_spill] sm:$0xff] %v5057_v0  ;;  %v390_v61 = vadd.f32 %v386_v48, %v373_v39  ;;  %v417_v1 = vmul.f32 %v5034_v13, %v416_v26  ;;  %v418_v19 = vmul.f32 %v5037_v46, %v416_v26  ;;  %v419_v20 = vmul.f32 %v5040_v47, %v416_v26  ;;  %v5070_v47 = vld [vmem:[%s4907_s22 + $0x120] sm:$0xff] }
  0x92   : > { %8654 = vst [vmem:[#allocation31_spill] sm:$0xff] %v5063_v27  ;;  %v404_v34 = vadd.f32 %v400_v53, %v387_v62  ;;  %v405_v37 = vadd.f32 %v401_v54, %v388_v59  ;;  %v406_v32 = vadd.f32 %v402_v55, %v389_v60  ;;  %v420_v33 = vmul.f32 %v5047_v23, %v416_v26  ;;  %v5074_v60 = vld [vmem:[%s4907_s22 + $0x128] sm:$0xff]  ;;  %v5077_v26 = vld [vmem:[%s4907_s22 + $0x130] sm:$0xff]  ;;  %v5085_v55 = vld [vmem:[%s4907_s22 + $0x140] sm:$0xff] }
  0x93   : > { %v407_v40 = vadd.f32 %v403_v52, %v390_v61  ;;  %v434_v39 = vmul.f32 %v5051_v25, %v433_v22  ;;  %v435_v45 = vmul.f32 %v5054_v24, %v433_v22  ;;  %v436_v48 = vmul.f32 %v5057_v0, %v433_v22  ;;  %8655 = vst [vmem:[#allocation32_spill] sm:$0xff] %v5070_v47  ;;  %v5080_v52 = vld [vmem:[%s4907_s22 + $0x138] sm:$0xff]  ;;  %v5106_v25 = vld [vmem:[%s4907_s22 + $0x160] sm:$0xff] }
  0x94   : > { %v421_v46 = vadd.f32 %v417_v1, %v404_v34  ;;  %v422_v13 = vadd.f32 %v418_v19, %v405_v37  ;;  %v423_v53 = vadd.f32 %v419_v20, %v406_v32  ;;  %v437_v59 = vmul.f32 %v5063_v27, %v433_v22  ;;  %8656 = vst [vmem:[#allocation33_spill] sm:$0xff] %v5074_v60  ;;  %v5088_v1 = vld [vmem:[%s4907_s22 + $0x148] sm:$0xff]  ;;  %v5091_v19 = vld [vmem:[%s4907_s22 + $0x150] sm:$0xff]  ;;  %v5098_v32 = vld [vmem:[%s4907_s22 + $0x158] sm:$0xff] }
  0x95   : > { %8657 = vst [vmem:[#allocation34_spill] sm:$0xff] %v5077_v26  ;;  %8658 = vst [vmem:[#allocation35_spill] sm:$0xff] %v5080_v52  ;;  %v424_v61 = vadd.f32 %v420_v33, %v407_v40  ;;  %v450_v54 = vrot.slane %v4992_v41, %v4853_v3  ;;  %v467_v20 = vrot.slane %v4992_v41, %v4855_v4  ;;  %v5123_v23 = vld [vmem:[%s4907_s22 + $0x180] sm:$0xff] }
  0x96   : > { %8659 = vst [vmem:[#allocation36_spill] sm:$0xff] %v5085_v55  ;;  %8660 = vst [vmem:[#allocation37_spill] sm:$0xff] %v5088_v1  ;;  %v484_v22 = vrot.slane %v4992_v41, %v4857_v5  ;;  %v438_v62 = vadd.f32 %v434_v39, %v421_v46  ;;  %v439_v34 = vadd.f32 %v435_v45, %v422_v13  ;;  %v5109_v46 = vld [vmem:[%s4907_s22 + $0x168] sm:$0xff]  ;;  %v5112_v13 = vld [vmem:[%s4907_s22 + $0x170] sm:$0xff] }
  0x97   : > { %8661 = vst [vmem:[#allocation38_spill] sm:$0xff] %v5091_v19  ;;  %v440_v37 = vadd.f32 %v436_v48, %v423_v53  ;;  %8662 = vst [vmem:[#allocation39_spill] sm:$0xff] %v5098_v32  ;;  %v501_v33 = vrot.slane %v4992_v41, %v4871_v10  ;;  %v441_v40 = vadd.f32 %v437_v59, %v424_v61  ;;  %v5119_v59 = vld [vmem:[%s4907_s22 + $0x178] sm:$0xff] }
  0x98   : > { %v451_v27 = vmul.f32 %v5070_v47, %v450_v54  ;;  %v452_v0 = vmul.f32 %v5074_v60, %v450_v54  ;;  %v453_v24 = vmul.f32 %v5077_v26, %v450_v54  ;;  %8663 = vst [vmem:[#allocation40_spill] sm:$0xff] %v5106_v25  ;;  %8664 = vst [vmem:[#allocation41_spill] sm:$0xff] %v5109_v46 }
  0x99   : > { %8665 = vst [vmem:[#allocation42_spill] sm:$0xff] %v5112_v13  ;;  %v454_v39 = vmul.f32 %v5080_v52, %v450_v54  ;;  %v468_v45 = vmul.f32 %v5085_v55, %v467_v20  ;;  %v469_v48 = vmul.f32 %v5088_v1, %v467_v20  ;;  %v470_v53 = vmul.f32 %v5091_v19, %v467_v20  ;;  %v5129_v54 = vld [vmem:[%s4907_s22 + $0x190] sm:$0xff] }
  0x9a   : > { %8666 = vst [vmem:[#allocation43_spill] sm:$0xff] %v5119_v59  ;;  %v455_v61 = vadd.f32 %v451_v27, %v438_v62  ;;  %v456_v26 = vadd.f32 %v452_v0, %v439_v34  ;;  %v457_v60 = vadd.f32 %v453_v24, %v440_v37  ;;  %v471_v47 = vmul.f32 %v5098_v32, %v467_v20  ;;  %v5135_v27 = vld [vmem:[%s4907_s22 + $0x198] sm:$0xff]  ;;  %v5139_v34 = vld [vmem:[%s4844_s29 + $0x70] sm:$0xff] }
  0x9b   : > { %8667 = vst [vmem:[#allocation44_spill] sm:$0xff] %v5123_v23  ;;  %8668 = vst [vmem:[#allocation45_spill] sm:$0xff] %v5126_v38  ;;  %v458_v55 = vadd.f32 %v454_v39, %v441_v40  ;;  %v485_v1 = vmul.f32 %v5106_v25, %v484_v22  ;;  %v486_v19 = vmul.f32 %v5109_v46, %v484_v22  ;;  %v5145_v46 = vld [vmem:[%s4907_s22 + $0x1a0] sm:$0xff]  ;;  %v5201_v32 = vld [vmem:[%s4907_s22 + $0x208] sm:$0xff] }
  0x9c   : > { %8669 = vst [vmem:[#allocation46_spill] sm:$0xff] %v5129_v54  ;;  %v487_v52 = vmul.f32 %v5112_v13, %v484_v22  ;;  %8670 = vst [vmem:[#allocation47_spill] sm:$0xff] %v5135_v27  ;;  %v472_v24 = vadd.f32 %v468_v45, %v455_v61  ;;  %v473_v0 = vadd.f32 %v469_v48, %v456_v26  ;;  %v5152_v48 = vld [vmem:[%s4907_s22 + $0x1b0] sm:$0xff]  ;;  %v5198_v25 = vld [vmem:[%s4907_s22 + $0x200] sm:$0xff] }
  0x9d   : > { %v474_v20 = vadd.f32 %v470_v53, %v457_v60  ;;  %v488_v62 = vmul.f32 %v5119_v59, %v484_v22  ;;  %v475_v37 = vadd.f32 %v471_v47, %v458_v55  ;;  %v502_v40 = vmul.f32 %v5123_v23, %v501_v33  ;;  %8671 = vst [vmem:[#allocation48_spill] sm:$0xff] %v5145_v46  ;;  %v5149_v22 = vld [vmem:[%s4907_s22 + $0x1a8] sm:$0xff]  ;;  %v5155_v47 = vld [vmem:[%s4907_s22 + $0x1b8] sm:$0xff] }
  0x9e   : > { %v503_v39 = vmul.f32 %v5126_v38, %v501_v33  ;;  %v504_v13 = vmul.f32 %v5129_v54, %v501_v33  ;;  %v489_v45 = vadd.f32 %v485_v1, %v472_v24  ;;  %v490_v61 = vadd.f32 %v486_v19, %v473_v0  ;;  %8672 = vst [vmem:[#allocation49_spill] sm:$0xff] %v5149_v22  ;;  %v5160_v54 = vld [vmem:[%s4907_s22 + $0x1c0] sm:$0xff]  ;;  %v5163_v1 = vld [vmem:[%s4907_s22 + $0x1c8] sm:$0xff] }
  0x9f   : > { %v491_v60 = vadd.f32 %v487_v52, %v474_v20  ;;  %v505_v26 = vmul.f32 %v5135_v27, %v501_v33  ;;  %8673 = vst [vmem:[#allocation50_spill] sm:$0xff] %v5152_v48  ;;  %8674 = vst [vmem:[#allocation51_spill] sm:$0xff] %v5155_v47  ;;  %v492_v55 = vadd.f32 %v488_v62, %v475_v37  ;;  %v5166_v52 = vld [vmem:[%s4907_s22 + $0x1d0] sm:$0xff]  ;;  %v5173_v62 = vld [vmem:[%s4907_s22 + $0x1d8] sm:$0xff] }
  0xa0   : > { %v518_v53 = vrot.slane %v4992_v41, %v4882_v14  ;;  %8675 = vst [vmem:[#allocation52_spill] sm:$0xff] %v5160_v54  ;;  %8676 = vst [vmem:[#allocation53_spill] sm:$0xff] %v5163_v1  ;;  %v535_v19 = vrot.slane %v4992_v41, %v4884_v15  ;;  %v552_v33 = vrot.slane %v4992_v41, %v4886_v16  ;;  %v5181_v41 = vld [vmem:[%s4907_s22 + $0x1e0] sm:$0xff] }
  0xa1   : > { %8677 = vst [vmem:[#allocation54_spill] sm:$0xff] %v5166_v52  ;;  %v506_v24 = vadd.f32 %v502_v40, %v489_v45  ;;  %v507_v0 = vadd.f32 %v503_v39, %v490_v61  ;;  %v508_v20 = vadd.f32 %v504_v13, %v491_v60  ;;  %8678 = vst [vmem:[#allocation55_spill] sm:$0xff] %v5173_v62  ;;  %v5184_v40 = vld [vmem:[%s4907_s22 + $0x1e8] sm:$0xff]  ;;  %v5187_v13 = vld [vmem:[%s4907_s22 + $0x1f0] sm:$0xff] }
  0xa2   : > { %v569_v37 = vrot.slane %v5139_v34, %v4851_v2  ;;  %v509_v27 = vadd.f32 %v505_v26, %v492_v55  ;;  %v519_v38 = vmul.f32 %v5145_v46, %v518_v53  ;;  %v520_v23 = vmul.f32 %v5149_v22, %v518_v53  ;;  %8679 = vst [vmem:[#allocation56_spill] sm:$0xff] %v5181_v41  ;;  %v5194_v26 = vld [vmem:[%s4907_s22 + $0x1f8] sm:$0xff] }
  0xa3   : > { %v521_v59 = vmul.f32 %v5152_v48, %v518_v53  ;;  %8680 = vst [vmem:[#allocation57_spill] sm:$0xff] %v5184_v40  ;;  %8681 = vst [vmem:[#allocation58_spill] sm:$0xff] %v5187_v13  ;;  %v522_v39 = vmul.f32 %v5155_v47, %v518_v53  ;;  %v536_v45 = vmul.f32 %v5160_v54, %v535_v19  ;;  %v5204_v53 = vld [vmem:[%s4907_s22 + $0x210] sm:$0xff] }
  0xa4   : > { %v537_v61 = vmul.f32 %v5163_v1, %v535_v19  ;;  %v538_v60 = vmul.f32 %v5166_v52, %v535_v19  ;;  %8682 = vst [vmem:[#allocation59_spill] sm:$0xff] %v5194_v26  ;;  %v523_v55 = vadd.f32 %v519_v38, %v506_v24  ;;  %v524_v22 = vadd.f32 %v520_v23, %v507_v0  ;;  %v5210_v38 = vld [vmem:[%s4907_s22 + $0x218] sm:$0xff] }
  0xa5   : > { %v525_v48 = vadd.f32 %v521_v59, %v508_v20  ;;  %v539_v46 = vmul.f32 %v5173_v62, %v535_v19  ;;  %8683 = vst [vmem:[#allocation60_spill] sm:$0xff] %v5198_v25  ;;  %8684 = vst [vmem:[#allocation61_spill] sm:$0xff] %v5201_v32  ;;  %v526_v47 = vadd.f32 %v522_v39, %v509_v27  ;;  %v5273_v62 = vld [vmem:[%s4907_s22 + $0x288] sm:$0xff] }
  0xa6   : > { %8685 = vst [vmem:[#allocation62_spill] sm:$0xff] %v5204_v53  ;;  %v553_v54 = vmul.f32 %v5181_v41, %v552_v33  ;;  %v554_v1 = vmul.f32 %v5184_v40, %v552_v33  ;;  %v555_v52 = vmul.f32 %v5187_v13, %v552_v33  ;;  %8686 = vst [vmem:[#allocation63_spill] sm:$0xff] %v5210_v38  ;;  %v5217_v13 = vld [vmem:[%s4907_s22 + $0x220] sm:$0xff] }
  0xa7   : > { %v540_v23 = vadd.f32 %v536_v45, %v523_v55  ;;  %v541_v59 = vadd.f32 %v537_v61, %v524_v22  ;;  %v542_v19 = vadd.f32 %v538_v60, %v525_v48  ;;  %v556_v24 = vmul.f32 %v5194_v26, %v552_v33  ;;  %8687 = vst [vmem:[#allocation64_spill] sm:$0xff] %v5217_v13  ;;  %v5221_v48 = vld [vmem:[%s4907_s22 + $0x228] sm:$0xff]  ;;  %v5224_v33 = vld [vmem:[%s4907_s22 + $0x230] sm:$0xff]  ;;  %v5232_v60 = vld [vmem:[%s4907_s22 + $0x240] sm:$0xff] }
  0xa8   : > { %v543_v0 = vadd.f32 %v539_v46, %v526_v47  ;;  %v570_v27 = vmul.f32 %v5198_v25, %v569_v37  ;;  %v571_v20 = vmul.f32 %v5201_v32, %v569_v37  ;;  %v572_v39 = vmul.f32 %v5204_v53, %v569_v37  ;;  %8688 = vst [vmem:[#allocation65_spill] sm:$0xff] %v5221_v48  ;;  %v5227_v46 = vld [vmem:[%s4907_s22 + $0x238] sm:$0xff]  ;;  %v5253_v25 = vld [vmem:[%s4907_s22 + $0x260] sm:$0xff] }
  0xa9   : > { %v557_v40 = vadd.f32 %v553_v54, %v540_v23  ;;  %v558_v41 = vadd.f32 %v554_v1, %v541_v59  ;;  %v559_v45 = vadd.f32 %v555_v52, %v542_v19  ;;  %v573_v22 = vmul.f32 %v5210_v38, %v569_v37  ;;  %8689 = vst [vmem:[#allocation66_spill] sm:$0xff] %v5224_v33  ;;  %v5235_v54 = vld [vmem:[%s4907_s22 + $0x248] sm:$0xff]  ;;  %v5238_v1 = vld [vmem:[%s4907_s22 + $0x250] sm:$0xff]  ;;  %v5245_v19 = vld [vmem:[%s4907_s22 + $0x258] sm:$0xff] }
  0xaa   : > { %8690 = vst [vmem:[#allocation67_spill] sm:$0xff] %v5227_v46  ;;  %v560_v47 = vadd.f32 %v556_v24, %v543_v0  ;;  %v586_v61 = vrot.slane %v5139_v34, %v4853_v3  ;;  %8691 = vst [vmem:[#allocation68_spill] sm:$0xff] %v5232_v60  ;;  %v603_v52 = vrot.slane %v5139_v34, %v4855_v4  ;;  %v5270_v26 = vld [vmem:[%s4907_s22 + $0x280] sm:$0xff] }
  0xab   : > { %8692 = vst [vmem:[#allocation69_spill] sm:$0xff] %v5235_v54  ;;  %8693 = vst [vmem:[#allocation70_spill] sm:$0xff] %v5238_v1  ;;  %v620_v37 = vrot.slane %v5139_v34, %v4857_v5  ;;  %v574_v55 = vadd.f32 %v570_v27, %v557_v40  ;;  %v575_v23 = vadd.f32 %v571_v20, %v558_v41  ;;  %v5256_v40 = vld [vmem:[%s4907_s22 + $0x268] sm:$0xff]  ;;  %v5259_v41 = vld [vmem:[%s4907_s22 + $0x270] sm:$0xff] }
  0xac   : > { %v576_v59 = vadd.f32 %v572_v39, %v559_v45  ;;  %8694 = vst [vmem:[#allocation71_spill] sm:$0xff] %v5245_v19  ;;  %v637_v24 = vrot.slane %v5139_v34, %v4871_v10  ;;  %v577_v0 = vadd.f32 %v573_v22, %v560_v47  ;;  %v587_v38 = vmul.f32 %v5217_v13, %v586_v61  ;;  %v5266_v22 = vld [vmem:[%s4907_s22 + $0x278] sm:$0xff] }
  0xad   : > { %v588_v53 = vmul.f32 %v5221_v48, %v586_v61  ;;  %v589_v32 = vmul.f32 %v5224_v33, %v586_v61  ;;  %8695 = vst [vmem:[#allocation72_spill] sm:$0xff] %v5253_v25  ;;  %8696 = vst [vmem:[#allocation73_spill] sm:$0xff] %v5256_v40  ;;  %v590_v27 = vmul.f32 %v5227_v46, %v586_v61  ;;  %v5276_v61 = vld [vmem:[%s4907_s22 + $0x290] sm:$0xff] }
  0xae   : > { %8697 = vst [vmem:[#allocation74_spill] sm:$0xff] %v5259_v41  ;;  %v604_v20 = vmul.f32 %v5232_v60, %v603_v52  ;;  %v605_v39 = vmul.f32 %v5235_v54, %v603_v52  ;;  %v606_v45 = vmul.f32 %v5238_v1, %v603_v52  ;;  %8698 = vst [vmem:[#allocation75_spill] sm:$0xff] %v5266_v22 }
  0xaf   : > { %v591_v47 = vadd.f32 %v587_v38, %v574_v55  ;;  %v592_v33 = vadd.f32 %v588_v53, %v575_v23  ;;  %v593_v48 = vadd.f32 %v589_v32, %v576_v59  ;;  %v607_v13 = vmul.f32 %v5245_v19, %v603_v52  ;;  %8699 = vst [vmem:[#allocation76_spill] sm:$0xff] %v5270_v26  ;;  %v5282_v38 = vld [vmem:[%s4907_s22 + $0x298] sm:$0xff]  ;;  %v5286_v23 = vld [vmem:[%s4844_s29 + $0x78] sm:$0xff] }
  0xb0   : > { %8700 = vst [vmem:[#allocation77_spill] sm:$0xff] %v5273_v62  ;;  %8701 = vst [vmem:[#allocation78_spill] sm:$0xff] %v5276_v61  ;;  %v594_v60 = vadd.f32 %v590_v27, %v577_v0  ;;  %v621_v54 = vmul.f32 %v5253_v25, %v620_v37  ;;  %v622_v1 = vmul.f32 %v5256_v40, %v620_v37  ;;  %v5292_v40 = vld [vmem:[%s4907_s22 + $0x2a0] sm:$0xff]  ;;  %v5348_v19 = vld [vmem:[%s4907_s22 + $0x308] sm:$0xff] }
  0xb1   : > { %v623_v46 = vmul.f32 %v5259_v41, %v620_v37  ;;  %8702 = vst [vmem:[#allocation79_spill] sm:$0xff] %v5282_v38  ;;  %v608_v32 = vadd.f32 %v604_v20, %v591_v47  ;;  %v609_v53 = vadd.f32 %v605_v39, %v592_v33  ;;  %v610_v52 = vadd.f32 %v606_v45, %v593_v48  ;;  %v5299_v39 = vld [vmem:[%s4907_s22 + $0x2b0] sm:$0xff]  ;;  %v5345_v25 = vld [vmem:[%s4907_s22 + $0x300] sm:$0xff] }
  0xb2   : > { %v624_v55 = vmul.f32 %v5266_v22, %v620_v37  ;;  %v611_v59 = vadd.f32 %v607_v13, %v594_v60  ;;  %v638_v0 = vmul.f32 %v5270_v26, %v637_v24  ;;  %v639_v27 = vmul.f32 %v5273_v62, %v637_v24  ;;  %8703 = vst [vmem:[#allocation80_spill] sm:$0xff] %v5292_v40  ;;  %v5296_v37 = vld [vmem:[%s4907_s22 + $0x2a8] sm:$0xff]  ;;  %v5302_v13 = vld [vmem:[%s4907_s22 + $0x2b8] sm:$0xff] }
  0xb3   : > { %v640_v41 = vmul.f32 %v5276_v61, %v637_v24  ;;  %v625_v20 = vadd.f32 %v621_v54, %v608_v32  ;;  %v626_v47 = vadd.f32 %v622_v1, %v609_v53  ;;  %v627_v48 = vadd.f32 %v623_v46, %v610_v52  ;;  %8704 = vst [vmem:[#allocation81_spill] sm:$0xff] %v5296_v37  ;;  %v5307_v61 = vld [vmem:[%s4907_s22 + $0x2c0] sm:$0xff]  ;;  %v5310_v54 = vld [vmem:[%s4907_s22 + $0x2c8] sm:$0xff]  ;;  %v5313_v46 = vld [vmem:[%s4907_s22 + $0x2d0] sm:$0xff] }
  0xb4   : > { %v641_v33 = vmul.f32 %v5282_v38, %v637_v24  ;;  %8705 = vst [vmem:[#allocation82_spill] sm:$0xff] %v5299_v39  ;;  %8706 = vst [vmem:[#allocation83_spill] sm:$0xff] %v5302_v13  ;;  %v628_v60 = vadd.f32 %v624_v55, %v611_v59  ;;  %v654_v45 = vrot.slane %v5139_v34, %v4882_v14  ;;  %v5320_v55 = vld [vmem:[%s4907_s22 + $0x2d8] sm:$0xff] }
  0xb5   : > { %8707 = vst [vmem:[#allocation84_spill] sm:$0xff] %v5307_v61  ;;  %8708 = vst [vmem:[#allocation85_spill] sm:$0xff] %v5310_v54  ;;  %v671_v1 = vrot.slane %v5139_v34, %v4884_v15  ;;  %v688_v24 = vrot.slane %v5139_v34, %v4886_v16  ;;  %v642_v32 = vadd.f32 %v638_v0, %v625_v20  ;;  %v5328_v34 = vld [vmem:[%s4907_s22 + $0x2e0] sm:$0xff]  ;;  %v5331_v0 = vld [vmem:[%s4907_s22 + $0x2e8] sm:$0xff] }
  0xb6   : > { %8709 = vst [vmem:[#allocation86_spill] sm:$0xff] %v5313_v46  ;;  %v643_v53 = vadd.f32 %v639_v27, %v626_v47  ;;  %v644_v52 = vadd.f32 %v640_v41, %v627_v48  ;;  %8710 = vst [vmem:[#allocation87_spill] sm:$0xff] %v5320_v55  ;;  %v705_v59 = vrot.slane %v5286_v23, %v4851_v2  ;;  %v5334_v41 = vld [vmem:[%s4907_s22 + $0x2f0] sm:$0xff] }
  0xb7   : > { %v645_v38 = vadd.f32 %v641_v33, %v628_v60  ;;  %v655_v62 = vmul.f32 %v5292_v40, %v654_v45  ;;  %v656_v26 = vmul.f32 %v5296_v37, %v654_v45  ;;  %v657_v22 = vmul.f32 %v5299_v39, %v654_v45  ;;  %8711 = vst [vmem:[#allocation88_spill] sm:$0xff] %v5328_v34  ;;  %v5341_v33 = vld [vmem:[%s4907_s22 + $0x2f8] sm:$0xff] }
  0xb8   : > { %8712 = vst [vmem:[#allocation89_spill] sm:$0xff] %v5331_v0  ;;  %8713 = vst [vmem:[#allocation90_spill] sm:$0xff] %v5334_v41  ;;  %v658_v27 = vmul.f32 %v5302_v13, %v654_v45  ;;  %v672_v20 = vmul.f32 %v5307_v61, %v671_v1  ;;  %v673_v47 = vmul.f32 %v5310_v54, %v671_v1  ;;  %v5351_v45 = vld [vmem:[%s4907_s22 + $0x310] sm:$0xff] }
  0xb9   : > { %v674_v48 = vmul.f32 %v5313_v46, %v671_v1  ;;  %8714 = vst [vmem:[#allocation91_spill] sm:$0xff] %v5341_v33  ;;  %v659_v60 = vadd.f32 %v655_v62, %v642_v32  ;;  %v660_v37 = vadd.f32 %v656_v26, %v643_v53  ;;  %v661_v39 = vadd.f32 %v657_v22, %v644_v52  ;;  %v5357_v62 = vld [vmem:[%s4907_s22 + $0x318] sm:$0xff] }
  0xba   : > { %v675_v40 = vmul.f32 %v5320_v55, %v671_v1  ;;  %8715 = vst [vmem:[#allocation92_spill] sm:$0xff] %v5345_v25  ;;  %8716 = vst [vmem:[#allocation93_spill] sm:$0xff] %v5348_v19  ;;  %v662_v13 = vadd.f32 %v658_v27, %v645_v38  ;;  %v689_v61 = vmul.f32 %v5328_v34, %v688_v24  ;;  %v5420_v55 = vld [vmem:[%s4907_s22 + $0x388] sm:$0xff] }
  0xbb   : > { %8717 = vst [vmem:[#allocation94_spill] sm:$0xff] %v5351_v45  ;;  %v690_v54 = vmul.f32 %v5331_v0, %v688_v24  ;;  %v691_v46 = vmul.f32 %v5334_v41, %v688_v24  ;;  %8718 = vst [vmem:[#allocation95_spill] sm:$0xff] %v5357_v62  ;;  %v676_v26 = vadd.f32 %v672_v20, %v659_v60  ;;  %v5364_v41 = vld [vmem:[%s4907_s22 + $0x320] sm:$0xff] }
  0xbc   : > { %v677_v22 = vadd.f32 %v673_v47, %v660_v37  ;;  %v678_v1 = vadd.f32 %v674_v48, %v661_v39  ;;  %v692_v32 = vmul.f32 %v5341_v33, %v688_v24  ;;  %v679_v53 = vadd.f32 %v675_v40, %v662_v13  ;;  %8719 = vst [vmem:[#allocation96_spill] sm:$0xff] %v5364_v41  ;;  %v5368_v39 = vld [vmem:[%s4907_s22 + $0x328] sm:$0xff]  ;;  %v5371_v24 = vld [vmem:[%s4907_s22 + $0x330] sm:$0xff]  ;;  %v5374_v40 = vld [vmem:[%s4907_s22 + $0x338] sm:$0xff] }
  0xbd   : > { %v706_v38 = vmul.f32 %v5345_v25, %v705_v59  ;;  %v707_v52 = vmul.f32 %v5348_v19, %v705_v59  ;;  %v708_v27 = vmul.f32 %v5351_v45, %v705_v59  ;;  %v693_v0 = vadd.f32 %v689_v61, %v676_v26  ;;  %8720 = vst [vmem:[#allocation97_spill] sm:$0xff] %v5368_v39  ;;  %v5379_v48 = vld [vmem:[%s4907_s22 + $0x340] sm:$0xff]  ;;  %v5382_v61 = vld [vmem:[%s4907_s22 + $0x348] sm:$0xff] }
  0xbe   : > { %v694_v34 = vadd.f32 %v690_v54, %v677_v22  ;;  %v695_v20 = vadd.f32 %v691_v46, %v678_v1  ;;  %v709_v37 = vmul.f32 %v5357_v62, %v705_v59  ;;  %8721 = vst [vmem:[#allocation98_spill] sm:$0xff] %v5371_v24  ;;  %v696_v13 = vadd.f32 %v692_v32, %v679_v53  ;;  %v5385_v54 = vld [vmem:[%s4907_s22 + $0x350] sm:$0xff]  ;;  %v5392_v1 = vld [vmem:[%s4907_s22 + $0x358] sm:$0xff]  ;;  %v5400_v25 = vld [vmem:[%s4907_s22 + $0x360] sm:$0xff] }
  0xbf   : > { %v722_v47 = vrot.slane %v5286_v23, %v4853_v3  ;;  %8722 = vst [vmem:[#allocation99_spill] sm:$0xff] %v5379_v48  ;;  %8723 = vst [vmem:[#allocation100_spill] sm:$0xff] %v5382_v61  ;;  %v739_v46 = vrot.slane %v5286_v23, %v4855_v4  ;;  %v756_v59 = vrot.slane %v5286_v23, %v4857_v5  ;;  %v5417_v33 = vld [vmem:[%s4907_s22 + $0x380] sm:$0xff] }
  0xc0   : > { %8724 = vst [vmem:[#allocation101_spill] sm:$0xff] %v5385_v54  ;;  %v710_v60 = vadd.f32 %v706_v38, %v693_v0  ;;  %v711_v26 = vadd.f32 %v707_v52, %v694_v34  ;;  %v712_v22 = vadd.f32 %v708_v27, %v695_v20  ;;  %v773_v32 = vrot.slane %v5286_v23, %v4871_v10  ;;  %v5403_v0 = vld [vmem:[%s4907_s22 + $0x368] sm:$0xff]  ;;  %v5406_v34 = vld [vmem:[%s4907_s22 + $0x370] sm:$0xff] }
  0xc1   : > { %v713_v53 = vadd.f32 %v709_v37, %v696_v13  ;;  %v723_v62 = vmul.f32 %v5364_v41, %v722_v47  ;;  %v724_v45 = vmul.f32 %v5368_v39, %v722_v47  ;;  %v725_v19 = vmul.f32 %v5371_v24, %v722_v47  ;;  %8725 = vst [vmem:[#allocation102_spill] sm:$0xff] %v5403_v0  ;;  %v5413_v37 = vld [vmem:[%s4907_s22 + $0x378] sm:$0xff] }
  0xc2   : > { %8726 = vst [vmem:[#allocation103_spill] sm:$0xff] %v5406_v34  ;;  %v726_v38 = vmul.f32 %v5374_v40, %v722_v47  ;;  %v740_v52 = vmul.f32 %v5379_v48, %v739_v46  ;;  %v741_v27 = vmul.f32 %v5382_v61, %v739_v46  ;;  %v742_v20 = vmul.f32 %v5385_v54, %v739_v46  ;;  %v5426_v48 = vld [vmem:[%s4907_s22 + $0x390] sm:$0xff] }
  0xc3   : > { %v727_v13 = vadd.f32 %v723_v62, %v710_v60  ;;  %v728_v24 = vadd.f32 %v724_v45, %v711_v26  ;;  %v729_v39 = vadd.f32 %v725_v19, %v712_v22  ;;  %v743_v41 = vmul.f32 %v5392_v1, %v739_v46  ;;  %8727 = vst [vmem:[#allocation104_spill] sm:$0xff] %v5420_v55  ;;  %v5430_v60 = vld [vmem:[%s4907_s22 + $0x398] sm:$0xff] }
  0xc4   : > { %v730_v21 = vadd.f32 %v726_v38, %v713_v53  ;;  %v757_v47 = vmul.f32 %v5400_v25, %v756_v59  ;;  %v758_v61 = vmul.f32 %v5403_v0, %v756_v59  ;;  %v759_v54 = vmul.f32 %v5406_v34, %v756_v59  ;;  %8728 = vst [vmem:[#allocation105_spill] sm:$0xff] %v5426_v48 }
  0xc5   : > { %v744_v62 = vadd.f32 %v740_v52, %v727_v13  ;;  %v745_v19 = vadd.f32 %v741_v27, %v728_v24  ;;  %v746_v45 = vadd.f32 %v742_v20, %v729_v39  ;;  %v760_v46 = vmul.f32 %v5413_v37, %v756_v59  ;;  %8729 = vst [vmem:[#allocation106_spill] sm:$0xff] %v5430_v60  ;;  %v5436_v13 = vld [vmem:[%s4907_s22 + $0x3a0] sm:$0xff]  ;;  %v5439_v39 = vld [vmem:[%s4907_s22 + $0x3a8] sm:$0xff]  ;;  %v5453_v20 = vld [vmem:[%s4907_s22 + $0x3b8] sm:$0xff] }
  0xc6   : > { %v747_v26 = vadd.f32 %v743_v41, %v730_v21  ;;  %v774_v22 = vmul.f32 %v5417_v33, %v773_v32  ;;  %v775_v53 = vmul.f32 %v5420_v55, %v773_v32  ;;  %v776_v52 = vmul.f32 %v5426_v48, %v773_v32  ;;  %8730 = vst [vmem:[#allocation107_spill] sm:$0xff] %v5436_v13  ;;  %v5443_v21 = vld [vmem:[%s4907_s22 + $0x3b0] sm:$0xff]  ;;  %v5448_v27 = vld [vmem:[%s4907_s22 + $0x3c0] sm:$0xff] }
  0xc7   : > { %v761_v38 = vadd.f32 %v757_v47, %v744_v62  ;;  %v762_v0 = vadd.f32 %v758_v61, %v745_v19  ;;  %v763_v34 = vadd.f32 %v759_v54, %v746_v45  ;;  %8731 = vst [vmem:[#allocation108_spill] sm:$0xff] %v5439_v39  ;;  %v777_v59 = vmul.f32 %v5430_v60, %v773_v32  ;;  %v5460_v45 = vld [vmem:[%s4907_s22 + $0x3e0] sm:$0xff]  ;;  %v5464_v60 = vld [vmem:[%s4907_s22 + $0x3c8] sm:$0xff] }
  0xc8   : > { %v764_v24 = vadd.f32 %v760_v46, %v747_v26  ;;  %8732 = vst [vmem:[#allocation109_spill] sm:$0xff] %v5443_v21  ;;  %v790_v41 = vrot.slane %v5286_v23, %v4882_v14  ;;  %8733 = vst [vmem:[#allocation110_spill] sm:$0xff] %v5448_v27  ;;  %v807_v61 = vrot.slane %v5286_v23, %v4884_v15 }
  0xc9   : > { %v778_v54 = vadd.f32 %v774_v22, %v761_v38  ;;  %8734 = vst [vmem:[#allocation111_spill] sm:$0xff] %v5453_v20  ;;  %v824_v47 = vrot.slane %v5286_v23, %v4886_v16  ;;  %v779_v62 = vadd.f32 %v775_v53, %v762_v0  ;;  %v780_v46 = vadd.f32 %v776_v52, %v763_v34  ;;  %v5469_v53 = vld [vmem:[%s4907_s22 + $0x3d0] sm:$0xff] }
  0xca   : > { %v791_v32 = vmul.f32 %v5436_v13, %v790_v41  ;;  %v792_v19 = vmul.f32 %v5439_v39, %v790_v41  ;;  %v793_v26 = vmul.f32 %v5443_v21, %v790_v41  ;;  %v808_v22 = vmul.f32 %v5448_v27, %v807_v61  ;;  %8735 = vst [vmem:[#allocation112_spill] sm:$0xff] %v5469_v53  ;;  %v5472_v13 = vld [vmem:[%s4907_s22 + $0x3d8] sm:$0xff]  ;;  %v5478_v27 = vld [vmem:[%s4907_s22 + $0x3e8] sm:$0xff] }
  0xcb   : > { %v781_v38 = vadd.f32 %v777_v59, %v764_v24  ;;  %v794_v23 = vmul.f32 %v5453_v20, %v790_v41  ;;  %v825_v39 = vmul.f32 %v5460_v45, %v824_v47  ;;  %v809_v34 = vmul.f32 %v5464_v60, %v807_v61  ;;  %v5482_v41 = vld [vmem:[%s4907_s22 + $0x3f0] sm:$0xff] }
  0xcc   : > { %v795_v0 = vadd.f32 %v791_v32, %v778_v54  ;;  %v796_v48 = vadd.f32 %v792_v19, %v779_v62  ;;  %v797_v21 = vadd.f32 %v793_v26, %v780_v46  ;;  %v810_v55 = vmul.f32 %v5469_v53, %v807_v61  ;;  %v5485_v32 = vld [vmem:[%s4907_s22 + $0x3f8] sm:$0xff] }
  0xcd   : > { %v798_v24 = vadd.f32 %v794_v23, %v781_v38  ;;  %v811_v59 = vmul.f32 %v5472_v13, %v807_v61  ;;  %v826_v62 = vmul.f32 %v5478_v27, %v824_v47  ;;  %v828_v26 = vmul.f32 %v5485_v32, %v824_v47 }
  0xce   : > { %v812_v52 = vadd.f32 %v808_v22, %v795_v0  ;;  %v813_v20 = vadd.f32 %v809_v34, %v796_v48  ;;  %v814_v19 = vadd.f32 %v810_v55, %v797_v21  ;;  %v827_v22 = vmul.f32 %v5482_v41, %v824_v47  ;;  %v3917_v0 = vld [vmem:[%s4836_s7 + $0x1] ss:$0 sm:$0xff] }
  0xcf   : > { %v815_v46 = vadd.f32 %v811_v59, %v798_v24  ;;  %v842_v61 = vmul.f32 %v3917_v0, %v4860_v6  ;;  %v845_v48 = vmul.f32 %v3917_v0, %v4869_v9 }
  0xd0   : > { %v829_v54 = vadd.f32 %v825_v39, %v812_v52  ;;  %v830_v53 = vadd.f32 %v826_v62, %v813_v20  ;;  %v831_v38 = vadd.f32 %v827_v22, %v814_v19  ;;  %v843_v39 = vmul.f32 %v3917_v0, %v4863_v7 }
  0xd1   : > { %v832_v23 = vadd.f32 %v828_v26, %v815_v46  ;;  %v844_v52 = vmul.f32 %v3917_v0, %v4866_v8  ;;  %v846_v55 = vadd.f32 %v842_v61, %v4874_v11  ;;  %v849_v34 = vadd.f32 %v845_v48, %v4892_v18 }
  0xd2   : > { %3988 = vtanh.f32 %v829_v54  ;;  %v847_v47 = vadd.f32 %v843_v39, %v4877_v12 }
  0xd3   : > { %3990 = vtanh.f32 %v830_v53  ;;  %v848_v20 = vadd.f32 %v844_v52, %v4889_v17 }
  0xd4   : > { %3992 = vtanh.f32 %v831_v38 }
  0xd5   : > { %3994 = vtanh.f32 %v832_v23 }
  0xdc   : > { %v3989_v21 = vpop.eup %3988 }
  0xdd   : > { %v853_v6 = vrot.slane %v3989_v21, %v4851_v2  ;;  %v865_v7 = vrot.slane %v3989_v21, %v4853_v3  ;;  %v877_v8 = vrot.slane %v3989_v21, %v4855_v4  ;;  %v889_v9 = vrot.slane %v3989_v21, %v4857_v5  ;;  %v5519_v52 = vpop.eup %3990 }
  0xde   : > { %v901_v53 = vrot.slane %v3989_v21, %v4871_v10  ;;  %v913_v11 = vrot.slane %v3989_v21, %v4882_v14  ;;  %v925_v24 = vrot.slane %v3989_v21, %v4884_v15  ;;  %v937_v12 = vrot.slane %v3989_v21, %v4886_v16 }
  0xdf   : > { %v854_v17 = vmul.f32 %v853_v6, %v4910_v28  ;;  %v855_v18 = vmul.f32 %v853_v6, %v4913_v29  ;;  %v856_v59 = vmul.f32 %v853_v6, %v4916_v30  ;;  %v857_v54 = vmul.f32 %v853_v6, %v4919_v31  ;;  %v8737_v6 = vld [vmem:[#allocation13_spill] sm:$0xff] }
  0xe0   : > { %v866_v62 = vmul.f32 %v4925_v35, %v865_v7  ;;  %v867_v19 = vmul.f32 %v4928_v36, %v865_v7  ;;  %v868_v22 = vmul.f32 %v4937_v42, %v865_v7  ;;  %v869_v46 = vmul.f32 %v4940_v43, %v865_v7 }
  0xe1   : > { %v858_v26 = vadd.f32 %v854_v17, %v846_v55  ;;  %v859_v0 = vadd.f32 %v855_v18, %v847_v47  ;;  %v860_v38 = vadd.f32 %v856_v59, %v848_v20  ;;  %v861_v61 = vadd.f32 %v857_v54, %v849_v34  ;;  %v5525_v55 = vpop.eup %3992  ;;  %v8736_v20 = vld [vmem:[#allocation12_spill] sm:$0xff]  ;;  %v8739_v17 = vld [vmem:[#allocation15_spill] sm:$0xff] }
  0xe2   : > { %v878_v28 = vmul.f32 %v4943_v44, %v877_v8  ;;  %v879_v29 = vmul.f32 %v4950_v49, %v877_v8  ;;  %v880_v30 = vmul.f32 %v4953_v50, %v877_v8  ;;  %v881_v31 = vmul.f32 %v4956_v51, %v877_v8  ;;  %v5527_v47 = vpop.eup %3994  ;;  %v8738_v8 = vld [vmem:[#allocation14_spill] sm:$0xff] }
  0xe3   : > { %v870_v23 = vadd.f32 %v866_v62, %v858_v26  ;;  %v871_v35 = vadd.f32 %v867_v19, %v859_v0  ;;  %v872_v39 = vadd.f32 %v868_v22, %v860_v38  ;;  %v873_v36 = vadd.f32 %v869_v46, %v861_v61  ;;  %v8741_v62 = vld [vmem:[#allocation17_spill] sm:$0xff]  ;;  %v8742_v22 = vld [vmem:[#allocation18_spill] sm:$0xff]  ;;  %v8743_v26 = vld [vmem:[#allocation19_spill] sm:$0xff] }
  0xe4   : > { %v890_v42 = vmul.f32 %v4960_v56, %v889_v9  ;;  %v891_v43 = vmul.f32 %v4963_v57, %v889_v9  ;;  %v892_v48 = vmul.f32 %v4966_v58, %v889_v9  ;;  %v893_v44 = vmul.f32 %v4972_v63, %v889_v9  ;;  %v8740_v9 = vld [vmem:[#allocation16_spill] sm:$0xff] }
  0xe5   : > { %v882_v49 = vadd.f32 %v878_v28, %v870_v23  ;;  %v883_v50 = vadd.f32 %v879_v29, %v871_v35  ;;  %v884_v21 = vadd.f32 %v880_v30, %v872_v39  ;;  %v885_v51 = vadd.f32 %v881_v31, %v873_v36  ;;  %v8744_v30 = vld [vmem:[#allocation20_spill] sm:$0xff]  ;;  %v8745_v23 = vld [vmem:[#allocation21_spill] sm:$0xff]  ;;  %v8746_v35 = vld [vmem:[#allocation22_spill] sm:$0xff] }
  0xe6   : > { %v902_v34 = vmul.f32 %v8736_v20, %v901_v53  ;;  %v903_v7 = vmul.f32 %v8737_v6, %v901_v53  ;;  %v904_v56 = vmul.f32 %v8738_v8, %v901_v53  ;;  %v905_v57 = vmul.f32 %v8739_v17, %v901_v53  ;;  %v8747_v36 = vld [vmem:[#allocation23_spill] sm:$0xff]  ;;  %v8750_v20 = vld [vmem:[#allocation26_spill] sm:$0xff] }
  0xe7   : > { %v894_v18 = vadd.f32 %v890_v42, %v882_v49  ;;  %v895_v58 = vadd.f32 %v891_v43, %v883_v50  ;;  %v896_v59 = vadd.f32 %v892_v48, %v884_v21  ;;  %v897_v63 = vadd.f32 %v893_v44, %v885_v51  ;;  %v8748_v50 = vld [vmem:[#allocation24_spill] sm:$0xff]  ;;  %v8749_v51 = vld [vmem:[#allocation25_spill] sm:$0xff]  ;;  %v8751_v6 = vld [vmem:[#allocation27_spill] sm:$0xff] }
  0xe8   : > { %v914_v54 = vmul.f32 %v8740_v9, %v913_v11  ;;  %v915_v19 = vmul.f32 %v8741_v62, %v913_v11  ;;  %v916_v46 = vmul.f32 %v8742_v22, %v913_v11  ;;  %v917_v0 = vmul.f32 %v8743_v26, %v913_v11  ;;  %v8752_v62 = vld [vmem:[#allocation28_spill] sm:$0xff]  ;;  %v8753_v22 = vld [vmem:[#allocation29_spill] sm:$0xff]  ;;  %v8754_v26 = vld [vmem:[#allocation30_spill] sm:$0xff] }
  0xe9   : > { %v906_v38 = vadd.f32 %v902_v34, %v894_v18  ;;  %v907_v61 = vadd.f32 %v903_v7, %v895_v58  ;;  %v908_v28 = vadd.f32 %v904_v56, %v896_v59  ;;  %v909_v29 = vadd.f32 %v905_v57, %v897_v63 }
  0xea   : > { %v926_v31 = vmul.f32 %v8744_v30, %v925_v24  ;;  %v927_v53 = vmul.f32 %v8745_v23, %v925_v24  ;;  %v928_v39 = vmul.f32 %v8746_v35, %v925_v24  ;;  %v929_v42 = vmul.f32 %v8747_v36, %v925_v24  ;;  %v8757_v30 = vld [vmem:[#allocation33_spill] sm:$0xff]  ;;  %v8758_v23 = vld [vmem:[#allocation34_spill] sm:$0xff]  ;;  %v8759_v35 = vld [vmem:[#allocation35_spill] sm:$0xff] }
  0xeb   : > { %v918_v43 = vadd.f32 %v914_v54, %v906_v38  ;;  %v919_v48 = vadd.f32 %v915_v19, %v907_v61  ;;  %v920_v44 = vadd.f32 %v916_v46, %v908_v28  ;;  %v921_v49 = vadd.f32 %v917_v0, %v909_v29  ;;  %v8755_v38 = vld [vmem:[#allocation31_spill] sm:$0xff]  ;;  %v8756_v28 = vld [vmem:[#allocation32_spill] sm:$0xff] }
  0xec   : > { %v938_v21 = vmul.f32 %v8748_v50, %v937_v12  ;;  %v939_v11 = vmul.f32 %v8749_v51, %v937_v12  ;;  %v940_v34 = vmul.f32 %v8750_v20, %v937_v12  ;;  %v941_v7 = vmul.f32 %v8751_v6, %v937_v12  ;;  %v8761_v50 = vld [vmem:[#allocation37_spill] sm:$0xff]  ;;  %v8762_v51 = vld [vmem:[#allocation38_spill] sm:$0xff]  ;;  %v8763_v20 = vld [vmem:[#allocation39_spill] sm:$0xff] }
  0xed   : > { %v930_v8 = vadd.f32 %v926_v31, %v918_v43  ;;  %v931_v56 = vadd.f32 %v927_v53, %v919_v48  ;;  %v932_v17 = vadd.f32 %v928_v39, %v920_v44  ;;  %v933_v57 = vadd.f32 %v929_v42, %v921_v49  ;;  %v8760_v44 = vld [vmem:[#allocation36_spill] sm:$0xff] }
  0xee   : > { %v949_v18 = vrot.slane %v5519_v52, %v4851_v2  ;;  %v961_v24 = vrot.slane %v5519_v52, %v4853_v3  ;;  %v973_v58 = vrot.slane %v5519_v52, %v4855_v4  ;;  %v985_v59 = vrot.slane %v5519_v52, %v4857_v5 }
  0xef   : > { %v942_v63 = vadd.f32 %v938_v21, %v930_v8  ;;  %v943_v9 = vadd.f32 %v939_v11, %v931_v56  ;;  %v944_v54 = vadd.f32 %v940_v34, %v932_v17  ;;  %v945_v12 = vadd.f32 %v941_v7, %v933_v57  ;;  %v8764_v17 = vld [vmem:[#allocation40_spill] sm:$0xff] }
  0xf0   : > { %v950_v19 = vmul.f32 %v8752_v62, %v949_v18  ;;  %v951_v46 = vmul.f32 %v8753_v22, %v949_v18  ;;  %v952_v0 = vmul.f32 %v8754_v26, %v949_v18  ;;  %v953_v61 = vmul.f32 %v8755_v38, %v949_v18  ;;  %v8765_v18 = vld [vmem:[#allocation41_spill] sm:$0xff] }
  0xf1   : > { %v962_v29 = vmul.f32 %v8756_v28, %v961_v24  ;;  %v963_v31 = vmul.f32 %v8757_v30, %v961_v24  ;;  %v964_v53 = vmul.f32 %v8758_v23, %v961_v24  ;;  %v965_v39 = vmul.f32 %v8759_v35, %v961_v24  ;;  %v8768_v30 = vld [vmem:[#allocation44_spill] sm:$0xff]  ;;  %v8769_v23 = vld [vmem:[#allocation45_spill] sm:$0xff]  ;;  %v8770_v35 = vld [vmem:[#allocation46_spill] sm:$0xff] }
  0xf2   : > { %v954_v36 = vadd.f32 %v950_v19, %v942_v63  ;;  %v955_v42 = vadd.f32 %v951_v46, %v943_v9  ;;  %v956_v43 = vadd.f32 %v952_v0, %v944_v54  ;;  %v957_v48 = vadd.f32 %v953_v61, %v945_v12  ;;  %v8766_v63 = vld [vmem:[#allocation42_spill] sm:$0xff]  ;;  %v8767_v54 = vld [vmem:[#allocation43_spill] sm:$0xff] }
  0xf3   : > { %v974_v49 = vmul.f32 %v8760_v44, %v973_v58  ;;  %v975_v21 = vmul.f32 %v8761_v50, %v973_v58  ;;  %v976_v11 = vmul.f32 %v8762_v51, %v973_v58  ;;  %v977_v34 = vmul.f32 %v8763_v20, %v973_v58  ;;  %v8773_v44 = vld [vmem:[#allocation49_spill] sm:$0xff]  ;;  %v8774_v50 = vld [vmem:[#allocation50_spill] sm:$0xff]  ;;  %v8775_v51 = vld [vmem:[#allocation51_spill] sm:$0xff] }
  0xf4   : > { %v966_v6 = vadd.f32 %v962_v29, %v954_v36  ;;  %v967_v7 = vadd.f32 %v963_v31, %v955_v42  ;;  %v968_v8 = vadd.f32 %v964_v53, %v956_v43  ;;  %v969_v56 = vadd.f32 %v965_v39, %v957_v48  ;;  %v8771_v36 = vld [vmem:[#allocation47_spill] sm:$0xff]  ;;  %v8772_v43 = vld [vmem:[#allocation48_spill] sm:$0xff] }
  0xf5   : > { %v986_v57 = vmul.f32 %v8764_v17, %v985_v59  ;;  %v987_v24 = vmul.f32 %v8765_v18, %v985_v59  ;;  %v988_v9 = vmul.f32 %v8766_v63, %v985_v59  ;;  %v989_v12 = vmul.f32 %v8767_v54, %v985_v59 }
  0xf6   : > { %v978_v62 = vadd.f32 %v974_v49, %v966_v6  ;;  %v979_v19 = vadd.f32 %v975_v21, %v967_v7  ;;  %v980_v22 = vadd.f32 %v976_v11, %v968_v8  ;;  %v981_v46 = vadd.f32 %v977_v34, %v969_v56  ;;  %v8776_v7 = vld [vmem:[#allocation52_spill] sm:$0xff]  ;;  %v8777_v56 = vld [vmem:[#allocation53_spill] sm:$0xff] }
  0xf7   : > { %v997_v26 = vrot.slane %v5519_v52, %v4871_v10  ;;  %v1009_v58 = vrot.slane %v5519_v52, %v4882_v14  ;;  %v1021_v0 = vrot.slane %v5519_v52, %v4884_v15  ;;  %v1033_v38 = vrot.slane %v5519_v52, %v4886_v16 }
  0xf8   : > { %v990_v61 = vadd.f32 %v986_v57, %v978_v62  ;;  %v991_v28 = vadd.f32 %v987_v24, %v979_v19  ;;  %v992_v29 = vadd.f32 %v988_v9, %v980_v22  ;;  %v993_v59 = vadd.f32 %v989_v12, %v981_v46  ;;  %v8778_v57 = vld [vmem:[#allocation54_spill] sm:$0xff]  ;;  %v8779_v24 = vld [vmem:[#allocation55_spill] sm:$0xff]  ;;  %v8780_v19 = vld [vmem:[#allocation56_spill] sm:$0xff] }
  0xf9   : > { %v998_v31 = vmul.f32 %v8768_v30, %v997_v26  ;;  %v999_v53 = vmul.f32 %v8769_v23, %v997_v26  ;;  %v1000_v39 = vmul.f32 %v8770_v35, %v997_v26  ;;  %v1001_v42 = vmul.f32 %v8771_v36, %v997_v26  ;;  %v8781_v46 = vld [vmem:[#allocation57_spill] sm:$0xff] }
  0xfa   : > { %v1010_v48 = vmul.f32 %v8772_v43, %v1009_v58  ;;  %v1011_v49 = vmul.f32 %v8773_v44, %v1009_v58  ;;  %v1012_v21 = vmul.f32 %v8774_v50, %v1009_v58  ;;  %v1013_v52 = vmul.f32 %v8775_v51, %v1009_v58  ;;  %v8782_v58 = vld [vmem:[#allocation58_spill] sm:$0xff] }
  0xfb   : > { %v1002_v11 = vadd.f32 %v998_v31, %v990_v61  ;;  %v1003_v20 = vadd.f32 %v999_v53, %v991_v28  ;;  %v1004_v34 = vadd.f32 %v1000_v39, %v992_v29  ;;  %v1005_v6 = vadd.f32 %v1001_v42, %v993_v59  ;;  %v8783_v28 = vld [vmem:[#allocation59_spill] sm:$0xff] }
  0xfc   : > { %v1022_v8 = vmul.f32 %v8776_v7, %v1021_v0  ;;  %v1023_v17 = vmul.f32 %v8777_v56, %v1021_v0  ;;  %v1024_v18 = vmul.f32 %v8778_v57, %v1021_v0  ;;  %v1025_v63 = vmul.f32 %v8779_v24, %v1021_v0 }
  0xfd   : > { %v1014_v9 = vadd.f32 %v1010_v48, %v1002_v11  ;;  %v1015_v54 = vadd.f32 %v1011_v49, %v1003_v20  ;;  %v1016_v12 = vadd.f32 %v1012_v21, %v1004_v34  ;;  %v1017_v62 = vadd.f32 %v1013_v52, %v1005_v6  ;;  %v8784_v48 = vld [vmem:[#allocation60_spill] sm:$0xff]  ;;  %v8785_v49 = vld [vmem:[#allocation61_spill] sm:$0xff]  ;;  %v8786_v21 = vld [vmem:[#allocation62_spill] sm:$0xff] }
  0xfe   : > { %v1034_v22 = vmul.f32 %v8780_v19, %v1033_v38  ;;  %v1035_v26 = vmul.f32 %v8781_v46, %v1033_v38  ;;  %v1036_v61 = vmul.f32 %v8782_v58, %v1033_v38  ;;  %v1037_v29 = vmul.f32 %v8783_v28, %v1033_v38  ;;  %v8787_v52 = vld [vmem:[#allocation63_spill] sm:$0xff]  ;;  %v8788_v20 = vld [vmem:[#allocation64_spill] sm:$0xff]  ;;  %v8789_v6 = vld [vmem:[#allocation65_spill] sm:$0xff] }
  0xff   : > { %v1026_v59 = vadd.f32 %v1022_v8, %v1014_v9  ;;  %v1027_v30 = vadd.f32 %v1023_v17, %v1015_v54  ;;  %v1028_v31 = vadd.f32 %v1024_v18, %v1016_v12  ;;  %v1029_v23 = vadd.f32 %v1025_v63, %v1017_v62  ;;  %v8790_v8 = vld [vmem:[#allocation66_spill] sm:$0xff]  ;;  %v8791_v17 = vld [vmem:[#allocation67_spill] sm:$0xff]  ;;  %v8792_v54 = vld [vmem:[#allocation68_spill] sm:$0xff] }
 0x100   : > { %v1045_v53 = vrot.slane %v5525_v55, %v4851_v2  ;;  %v1057_v0 = vrot.slane %v5525_v55, %v4853_v3  ;;  %v1069_v35 = vrot.slane %v5525_v55, %v4855_v4  ;;  %v1081_v39 = vrot.slane %v5525_v55, %v4857_v5  ;;  %v8793_v62 = vld [vmem:[#allocation69_spill] sm:$0xff] }
 0x101   : > { %v1038_v36 = vadd.f32 %v1034_v22, %v1026_v59  ;;  %v1039_v42 = vadd.f32 %v1035_v26, %v1027_v30  ;;  %v1040_v43 = vadd.f32 %v1036_v61, %v1028_v31  ;;  %v1041_v38 = vadd.f32 %v1037_v29, %v1029_v23  ;;  %v8794_v22 = vld [vmem:[#allocation70_spill] sm:$0xff]  ;;  %v8795_v26 = vld [vmem:[#allocation71_spill] sm:$0xff]  ;;  %v8796_v30 = vld [vmem:[#allocation72_spill] sm:$0xff] }
 0x102   : > { %v1046_v44 = vmul.f32 %v8784_v48, %v1045_v53  ;;  %v1047_v50 = vmul.f32 %v8785_v49, %v1045_v53  ;;  %v1048_v51 = vmul.f32 %v8786_v21, %v1045_v53  ;;  %v1049_v11 = vmul.f32 %v8787_v52, %v1045_v53  ;;  %v8797_v23 = vld [vmem:[#allocation73_spill] sm:$0xff] }
 0x103   : > { %v1058_v34 = vmul.f32 %v8788_v20, %v1057_v0  ;;  %v1059_v7 = vmul.f32 %v8789_v6, %v1057_v0  ;;  %v1060_v56 = vmul.f32 %v8790_v8, %v1057_v0  ;;  %v1061_v57 = vmul.f32 %v8791_v17, %v1057_v0  ;;  %v8798_v0 = vld [vmem:[#allocation74_spill] sm:$0xff] }
 0x104   : > { %v1050_v18 = vadd.f32 %v1046_v44, %v1038_v36  ;;  %v1051_v24 = vadd.f32 %v1047_v50, %v1039_v42  ;;  %v1052_v63 = vadd.f32 %v1048_v51, %v1040_v43  ;;  %v1053_v9 = vadd.f32 %v1049_v11, %v1041_v38  ;;  %v8799_v42 = vld [vmem:[#allocation75_spill] sm:$0xff] }
 0x105   : > { %v1070_v12 = vmul.f32 %v8792_v54, %v1069_v35  ;;  %v1071_v19 = vmul.f32 %v8793_v62, %v1069_v35  ;;  %v1072_v46 = vmul.f32 %v8794_v22, %v1069_v35  ;;  %v1073_v58 = vmul.f32 %v8795_v26, %v1069_v35 }
 0x106   : > { %v1062_v61 = vadd.f32 %v1058_v34, %v1050_v18  ;;  %v1063_v28 = vadd.f32 %v1059_v7, %v1051_v24  ;;  %v1064_v29 = vadd.f32 %v1060_v56, %v1052_v63  ;;  %v1065_v59 = vadd.f32 %v1061_v57, %v1053_v9  ;;  %v8800_v34 = vld [vmem:[#allocation76_spill] sm:$0xff]  ;;  %v8801_v7 = vld [vmem:[#allocation77_spill] sm:$0xff]  ;;  %v8802_v56 = vld [vmem:[#allocation78_spill] sm:$0xff] }
 0x107   : > { %v1082_v31 = vmul.f32 %v8796_v30, %v1081_v39  ;;  %v1083_v53 = vmul.f32 %v8797_v23, %v1081_v39  ;;  %v1084_v36 = vmul.f32 %v8798_v0, %v1081_v39  ;;  %v1085_v43 = vmul.f32 %v8799_v42, %v1081_v39  ;;  %v8803_v57 = vld [vmem:[#allocation79_spill] sm:$0xff]  ;;  %v8804_v24 = vld [vmem:[#allocation80_spill] sm:$0xff]  ;;  %v8805_v9 = vld [vmem:[#allocation81_spill] sm:$0xff] }
 0x108   : > { %v1074_v38 = vadd.f32 %v1070_v12, %v1062_v61  ;;  %v1075_v48 = vadd.f32 %v1071_v19, %v1063_v28  ;;  %v1076_v44 = vadd.f32 %v1072_v46, %v1064_v29  ;;  %v1077_v49 = vadd.f32 %v1073_v58, %v1065_v59  ;;  %v8806_v12 = vld [vmem:[#allocation82_spill] sm:$0xff]  ;;  %v8807_v19 = vld [vmem:[#allocation83_spill] sm:$0xff]  ;;  %v8808_v61 = vld [vmem:[#allocation84_spill] sm:$0xff] }
 0x109   : > { %v1093_v50 = vrot.slane %v5525_v55, %v4871_v10  ;;  %v1105_v35 = vrot.slane %v5525_v55, %v4882_v14  ;;  %v1117_v21 = vrot.slane %v5525_v55, %v4884_v15  ;;  %v1129_v51 = vrot.slane %v5525_v55, %v4886_v16  ;;  %v8809_v29 = vld [vmem:[#allocation85_spill] sm:$0xff]  ;;  %v8810_v30 = vld [vmem:[#allocation86_spill] sm:$0xff]  ;;  %v8811_v23 = vld [vmem:[#allocation87_spill] sm:$0xff] }
 0x10a   : > { %v1086_v52 = vadd.f32 %v1082_v31, %v1074_v38  ;;  %v1087_v11 = vadd.f32 %v1083_v53, %v1075_v48  ;;  %v1088_v20 = vadd.f32 %v1084_v36, %v1076_v44  ;;  %v1089_v39 = vadd.f32 %v1085_v43, %v1077_v49  ;;  %v8812_v38 = vld [vmem:[#allocation88_spill] sm:$0xff]  ;;  %v8813_v44 = vld [vmem:[#allocation89_spill] sm:$0xff] }
 0x10b   : > { %v1094_v6 = vmul.f32 %v8800_v34, %v1093_v50  ;;  %v1095_v8 = vmul.f32 %v8801_v7, %v1093_v50  ;;  %v1096_v17 = vmul.f32 %v8802_v56, %v1093_v50  ;;  %v1097_v18 = vmul.f32 %v8803_v57, %v1093_v50  ;;  %v8814_v50 = vld [vmem:[#allocation90_spill] sm:$0xff] }
 0x10c   : > { %v1106_v63 = vmul.f32 %v8804_v24, %v1105_v35  ;;  %v1107_v54 = vmul.f32 %v8805_v9, %v1105_v35  ;;  %v1108_v62 = vmul.f32 %v8806_v12, %v1105_v35  ;;  %v1109_v55 = vmul.f32 %v8807_v19, %v1105_v35  ;;  %v8816_v24 = vld [vmem:[#allocation92_spill] sm:$0xff]  ;;  %v8817_v9 = vld [vmem:[#allocation93_spill] sm:$0xff]  ;;  %v8818_v12 = vld [vmem:[#allocation94_spill] sm:$0xff] }
 0x10d   : > { %v1098_v22 = vadd.f32 %v1094_v6, %v1086_v52  ;;  %v1099_v46 = vadd.f32 %v1095_v8, %v1087_v11  ;;  %v1100_v26 = vadd.f32 %v1096_v17, %v1088_v20  ;;  %v1101_v58 = vadd.f32 %v1097_v18, %v1089_v39  ;;  %v8815_v52 = vld [vmem:[#allocation91_spill] sm:$0xff] }
 0x10e   : > { %v1118_v28 = vmul.f32 %v8808_v61, %v1117_v21  ;;  %v1119_v59 = vmul.f32 %v8809_v29, %v1117_v21  ;;  %v1120_v31 = vmul.f32 %v8810_v30, %v1117_v21  ;;  %v1121_v53 = vmul.f32 %v8811_v23, %v1117_v21  ;;  %v8819_v19 = vld [vmem:[#allocation95_spill] sm:$0xff]  ;;  %v8822_v61 = vld [vmem:[#allocation98_spill] sm:$0xff] }
 0x10f   : > { %v1110_v0 = vadd.f32 %v1106_v63, %v1098_v22  ;;  %v1111_v36 = vadd.f32 %v1107_v54, %v1099_v46  ;;  %v1112_v42 = vadd.f32 %v1108_v62, %v1100_v26  ;;  %v1113_v43 = vadd.f32 %v1109_v55, %v1101_v58  ;;  %v8820_v22 = vld [vmem:[#allocation96_spill] sm:$0xff]  ;;  %v8821_v26 = vld [vmem:[#allocation97_spill] sm:$0xff] }
 0x110   : > { %v1130_v48 = vmul.f32 %v8812_v38, %v1129_v51  ;;  %v1131_v49 = vmul.f32 %v8813_v44, %v1129_v51  ;;  %v1132_v35 = vmul.f32 %v8814_v50, %v1129_v51  ;;  %v1133_v11 = vmul.f32 %v8815_v52, %v1129_v51 }
 0x111   : > { %v1122_v20 = vadd.f32 %v1118_v28, %v1110_v0  ;;  %v1123_v39 = vadd.f32 %v1119_v59, %v1111_v36  ;;  %v1124_v34 = vadd.f32 %v1120_v31, %v1112_v42  ;;  %v1125_v6 = vadd.f32 %v1121_v53, %v1113_v43  ;;  %v8823_v53 = vld [vmem:[#allocation99_spill] sm:$0xff]  ;;  %v8824_v36 = vld [vmem:[#allocation100_spill] sm:$0xff]  ;;  %v8825_v43 = vld [vmem:[#allocation101_spill] sm:$0xff] }
 0x112   : > { %v1141_v7 = vrot.slane %v5527_v47, %v4851_v2  ;;  %v1153_v21 = vrot.slane %v5527_v47, %v4853_v3  ;;  %v1165_v8 = vrot.slane %v5527_v47, %v4855_v4  ;;  %v1177_v56 = vrot.slane %v5527_v47, %v4857_v5 }
 0x113   : > { %v1134_v17 = vadd.f32 %v1130_v48, %v1122_v20  ;;  %v1135_v57 = vadd.f32 %v1131_v49, %v1123_v39  ;;  %v1136_v18 = vadd.f32 %v1132_v35, %v1124_v34  ;;  %v1137_v51 = vadd.f32 %v1133_v11, %v1125_v6  ;;  %v8826_v11 = vld [vmem:[#allocation102_spill] sm:$0xff]  ;;  %v8827_v20 = vld [vmem:[#allocation103_spill] sm:$0xff] }
 0x114   : > { %v1142_v63 = vmul.f32 %v8816_v24, %v1141_v7  ;;  %v1143_v54 = vmul.f32 %v8817_v9, %v1141_v7  ;;  %v1144_v62 = vmul.f32 %v8818_v12, %v1141_v7  ;;  %v1145_v55 = vmul.f32 %v8819_v19, %v1141_v7  ;;  %v8829_v9 = vld [vmem:[#allocation105_spill] sm:$0xff]  ;;  %v8830_v12 = vld [vmem:[#allocation106_spill] sm:$0xff]  ;;  %v8831_v19 = vld [vmem:[#allocation107_spill] sm:$0xff] }
 0x115   : > { %v1154_v46 = vmul.f32 %v8820_v22, %v1153_v21  ;;  %v1155_v58 = vmul.f32 %v8821_v26, %v1153_v21  ;;  %v1156_v28 = vmul.f32 %v8822_v61, %v1153_v21  ;;  %v1157_v29 = vmul.f32 %v5374_v40, %v1153_v21 }
 0x116   : > { %v1146_v59 = vadd.f32 %v1142_v63, %v1134_v17  ;;  %v1147_v30 = vadd.f32 %v1143_v54, %v1135_v57  ;;  %v1148_v31 = vadd.f32 %v1144_v62, %v1136_v18  ;;  %v1149_v23 = vadd.f32 %v1145_v55, %v1137_v51 }
 0x117   : > { %v1166_v0 = vmul.f32 %v8823_v53, %v1165_v8  ;;  %v1167_v42 = vmul.f32 %v8824_v36, %v1165_v8  ;;  %v1168_v38 = vmul.f32 %v8825_v43, %v1165_v8  ;;  %v1169_v48 = vmul.f32 %v5392_v1, %v1165_v8 }
 0x118   : > { %v1158_v44 = vadd.f32 %v1154_v46, %v1146_v59  ;;  %v1159_v49 = vadd.f32 %v1155_v58, %v1147_v30  ;;  %v1160_v50 = vadd.f32 %v1156_v28, %v1148_v31  ;;  %v1161_v35 = vadd.f32 %v1157_v29, %v1149_v23  ;;  %v8832_v58 = vld [vmem:[#allocation108_spill] sm:$0xff]  ;;  %v8833_v29 = vld [vmem:[#allocation109_spill] sm:$0xff]  ;;  %v8834_v30 = vld [vmem:[#allocation110_spill] sm:$0xff] }
 0x119   : > { %v1178_v52 = vmul.f32 %v5400_v25, %v1177_v56  ;;  %v1179_v40 = vmul.f32 %v8826_v11, %v1177_v56  ;;  %v1180_v39 = vmul.f32 %v8827_v20, %v1177_v56  ;;  %v1181_v34 = vmul.f32 %v5413_v37, %v1177_v56  ;;  %v8828_v37 = vld [vmem:[#allocation104_spill] sm:$0xff]  ;;  %v8835_v23 = vld [vmem:[#allocation111_spill] sm:$0xff] }
 0x11a   : > { %v1170_v6 = vadd.f32 %v1166_v0, %v1158_v44  ;;  %v1171_v7 = vadd.f32 %v1167_v42, %v1159_v49  ;;  %v1172_v21 = vadd.f32 %v1168_v38, %v1160_v50  ;;  %v1173_v17 = vadd.f32 %v1169_v48, %v1161_v35  ;;  %v8836_v48 = vld [vmem:[#allocation112_spill] sm:$0xff] }
 0x11b   : > { %v1189_v57 = vrot.slane %v5527_v47, %v4871_v10  ;;  %v1201_v1 = vrot.slane %v5527_v47, %v4882_v14  ;;  %v1213_v8 = vrot.slane %v5527_v47, %v4884_v15  ;;  %v1225_v22 = vrot.slane %v5527_v47, %v4886_v16 }
 0x11c   : > { %v1182_v25 = vadd.f32 %v1178_v52, %v1170_v6  ;;  %v1183_v18 = vadd.f32 %v1179_v40, %v1171_v7  ;;  %v1184_v51 = vadd.f32 %v1180_v39, %v1172_v21  ;;  %v1185_v24 = vadd.f32 %v1181_v34, %v1173_v17  ;;  %v3918_v39 = vld [vmem:[%s4836_s7 + $0x2] ss:$0 sm:$0xff]  ;;  %v5691_v7 = vld [vmem:[%s4844_s29] sm:$0xff] }
 0x11d   : > { %v1190_v63 = vmul.f32 %v5417_v33, %v1189_v57  ;;  %v1191_v56 = vmul.f32 %v8828_v37, %v1189_v57  ;;  %v1192_v54 = vmul.f32 %v8829_v9, %v1189_v57  ;;  %v1193_v62 = vmul.f32 %v8830_v12, %v1189_v57 }
 0x11e   : > { %v1202_v55 = vmul.f32 %v8831_v19, %v1201_v1  ;;  %v1203_v61 = vmul.f32 %v8832_v58, %v1201_v1  ;;  %v1204_v59 = vmul.f32 %v8833_v29, %v1201_v1  ;;  %v1214_v33 = vmul.f32 %v8834_v30, %v1213_v8  ;;  %v5737_v58 = vld [vmem:[%s4907_s22] sm:$0xff] }
 0x11f   : > { %v1194_v46 = vadd.f32 %v1190_v63, %v1182_v25  ;;  %v1195_v26 = vadd.f32 %v1191_v56, %v1183_v18  ;;  %v1196_v28 = vadd.f32 %v1192_v54, %v1184_v51  ;;  %v1197_v31 = vadd.f32 %v1193_v62, %v1185_v24  ;;  %v5711_v51 = vld [vmem:[%s4844_s29 + $0x28] sm:$0xff]  ;;  %v5715_v63 = vld [vmem:[%s4844_s29 + $0x30] sm:$0xff]  ;;  %v5719_v56 = vld [vmem:[%s4844_s29 + $0x38] sm:$0xff] }
 0x120   : > { %v1205_v53 = vmul.f32 %v8835_v23, %v1201_v1  ;;  %v1226_v36 = vmul.f32 %v5460_v45, %v1225_v22  ;;  %v1215_v43 = vmul.f32 %v5464_v60, %v1213_v8  ;;  %v1216_v44 = vmul.f32 %v8836_v48, %v1213_v8  ;;  %v5753_v23 = vld [vmem:[%s4907_s22 + $0x20] sm:$0xff] }
 0x121   : > { %v1206_v0 = vadd.f32 %v1202_v55, %v1194_v46  ;;  %v1207_v42 = vadd.f32 %v1203_v61, %v1195_v26  ;;  %v1208_v38 = vadd.f32 %v1204_v59, %v1196_v28  ;;  %v1217_v50 = vmul.f32 %v5472_v13, %v1213_v8  ;;  %v5707_v8 = vld [vmem:[%s4844_s29 + $0x20] sm:$0xff]  ;;  %v5741_v28 = vld [vmem:[%s4907_s22 + $0x8] sm:$0xff] }
 0x122   : > { %v1209_v49 = vadd.f32 %v1205_v53, %v1197_v31  ;;  %v1227_v11 = vmul.f32 %v5478_v27, %v1225_v22  ;;  %v1228_v40 = vmul.f32 %v5482_v41, %v1225_v22  ;;  %v1229_v20 = vmul.f32 %v5485_v32, %v1225_v22  ;;  %v5695_v27 = vld [vmem:[%s4844_s29 + $0x8] sm:$0xff]  ;;  %v5699_v41 = vld [vmem:[%s4844_s29 + $0x10] sm:$0xff]  ;;  %v5703_v32 = vld [vmem:[%s4844_s29 + $0x18] sm:$0xff] }
 0x123   : > { %v1218_v47 = vadd.f32 %v1214_v33, %v1206_v0  ;;  %v1219_v52 = vadd.f32 %v1215_v43, %v1207_v42  ;;  %v1220_v45 = vadd.f32 %v1216_v44, %v1208_v38  ;;  %v1243_v13 = vmul.f32 %v5691_v7, %v3918_v39  ;;  %v5745_v59 = vld [vmem:[%s4907_s22 + $0x10] sm:$0xff]  ;;  %v5749_v33 = vld [vmem:[%s4907_s22 + $0x18] sm:$0xff]  ;;  %v5757_v0 = vld [vmem:[%s4907_s22 + $0x28] sm:$0xff] }
 0x124   : > { %v1221_v60 = vadd.f32 %v1217_v50, %v1209_v49  ;;  %v1244_v17 = vmul.f32 %v5695_v27, %v3918_v39  ;;  %v1245_v57 = vmul.f32 %v5699_v41, %v3918_v39  ;;  %v1246_v1 = vmul.f32 %v5703_v32, %v3918_v39  ;;  %v5761_v42 = vld [vmem:[%s4907_s22 + $0x30] sm:$0xff] }
 0x125   : > { %v1230_v35 = vadd.f32 %v1226_v36, %v1218_v47  ;;  %v1231_v34 = vadd.f32 %v1227_v11, %v1219_v52  ;;  %v1232_v6 = vadd.f32 %v1228_v40, %v1220_v45  ;;  %v1247_v25 = vadd.f32 %v5707_v8, %v1243_v13  ;;  %v5765_v47 = vld [vmem:[%s4907_s22 + $0x38] sm:$0xff]  ;;  %v5773_v11 = vld [vmem:[%s4907_s22 + $0x48] sm:$0xff]  ;;  %v5777_v40 = vld [vmem:[%s4907_s22 + $0x50] sm:$0xff] }
 0x126   : > { %v1233_v21 = vadd.f32 %v1229_v20, %v1221_v60  ;;  %v1248_v24 = vadd.f32 %v5711_v51, %v1244_v17  ;;  %v1249_v37 = vadd.f32 %v5715_v63, %v1245_v57  ;;  %v1250_v9 = vadd.f32 %v5719_v56, %v1246_v1  ;;  %v5781_v20 = vld [vmem:[%s4907_s22 + $0x58] sm:$0xff]  ;;  %v5787_v57 = vld [vmem:[%s4907_s22 + $0x60] sm:$0xff] }
 0x127   : > { %3996 = vtanh.f32 %v1230_v35  ;;  %v5769_v35 = vld [vmem:[%s4907_s22 + $0x40] sm:$0xff] }
 0x128   : > { %3998 = vtanh.f32 %v1231_v34 }
 0x129   : > { %4000 = vtanh.f32 %v1232_v6 }
 0x12a   : > { %4002 = vtanh.f32 %v1233_v21 }
 0x131   : > { %v3997_v18 = vpop.eup %3996 }
 0x132   : > { %v1254_v54 = vrot.slane %v3997_v18, %v4851_v2  ;;  %v1266_v12 = vrot.slane %v3997_v18, %v4853_v3  ;;  %v1278_v62 = vrot.slane %v3997_v18, %v4855_v4  ;;  %v1290_v19 = vrot.slane %v3997_v18, %v4857_v5  ;;  %v5784_v17 = vpop.eup %3998 }
 0x133   : > { %v1302_v55 = vrot.slane %v3997_v18, %v4871_v10  ;;  %v5728_v22 = vrot.slane %v3997_v18, %v4882_v14  ;;  %v5731_v46 = vrot.slane %v3997_v18, %v4884_v15  ;;  %v5734_v26 = vrot.slane %v3997_v18, %v4886_v16 }
 0x134   : > { %v1255_v61 = vmul.f32 %v5737_v58, %v1254_v54  ;;  %v1256_v29 = vmul.f32 %v5741_v28, %v1254_v54  ;;  %v1257_v30 = vmul.f32 %v5745_v59, %v1254_v54  ;;  %v1258_v31 = vmul.f32 %v5749_v33, %v1254_v54 }
 0x135   : > { %v1267_v53 = vmul.f32 %v5753_v23, %v1266_v12  ;;  %v1268_v36 = vmul.f32 %v5757_v0, %v1266_v12  ;;  %v1269_v43 = vmul.f32 %v5761_v42, %v1266_v12  ;;  %v1270_v38 = vmul.f32 %v5765_v47, %v1266_v12  ;;  %v5802_v12 = vpop.eup %4000 }
 0x136   : > { %v1259_v48 = vadd.f32 %v1255_v61, %v1247_v25  ;;  %v1260_v44 = vadd.f32 %v1256_v29, %v1248_v24  ;;  %v1261_v49 = vadd.f32 %v1257_v30, %v1249_v37  ;;  %v1262_v50 = vadd.f32 %v1258_v31, %v1250_v9  ;;  %v5791_v25 = vld [vmem:[%s4907_s22 + $0x68] sm:$0xff]  ;;  %v5795_v24 = vld [vmem:[%s4907_s22 + $0x70] sm:$0xff]  ;;  %v5799_v9 = vld [vmem:[%s4907_s22 + $0x78] sm:$0xff]  ;;  %v5804_v31 = vpop.eup %4002 }
 0x137   : > { %v1279_v52 = vmul.f32 %v5769_v35, %v1278_v62  ;;  %v1280_v45 = vmul.f32 %v5773_v11, %v1278_v62  ;;  %v1281_v60 = vmul.f32 %v5777_v40, %v1278_v62  ;;  %v1282_v39 = vmul.f32 %v5781_v20, %v1278_v62 }
 0x138   : > { %v1271_v34 = vadd.f32 %v1267_v53, %v1259_v48  ;;  %v1272_v6 = vadd.f32 %v1268_v36, %v1260_v44  ;;  %v1273_v13 = vadd.f32 %v1269_v43, %v1261_v49  ;;  %v1274_v21 = vadd.f32 %v1270_v38, %v1262_v50  ;;  %v5807_v53 = vld [vmem:[%s4907_s22 + $0x80] sm:$0xff]  ;;  %v5811_v43 = vld [vmem:[%s4907_s22 + $0x88] sm:$0xff]  ;;  %v5815_v38 = vld [vmem:[%s4907_s22 + $0x90] sm:$0xff] }
 0x139   : > { %v1291_v1 = vmul.f32 %v5787_v57, %v1290_v19  ;;  %v1292_v18 = vmul.f32 %v5791_v25, %v1290_v19  ;;  %v1293_v37 = vmul.f32 %v5795_v24, %v1290_v19  ;;  %v1294_v54 = vmul.f32 %v5799_v9, %v1290_v19  ;;  %v5819_v44 = vld [vmem:[%s4907_s22 + $0x98] sm:$0xff] }
 0x13a   : > { %v1283_v62 = vadd.f32 %v1279_v52, %v1271_v34  ;;  %v1284_v61 = vadd.f32 %v1280_v45, %v1272_v6  ;;  %v1285_v29 = vadd.f32 %v1281_v60, %v1273_v13  ;;  %v1286_v30 = vadd.f32 %v1282_v39, %v1274_v21  ;;  %8837 = vst [vmem:[#allocation12_spill] sm:$0xff] %v5819_v44  ;;  %v5823_v39 = vld [vmem:[%s4907_s22 + $0xa0] sm:$0xff]  ;;  %v5828_v6 = vld [vmem:[%s4907_s22 + $0xa8] sm:$0xff]  ;;  %v5833_v21 = vld [vmem:[%s4907_s22 + $0xb0] sm:$0xff] }
 0x13b   : > { %v1303_v36 = vmul.f32 %v5807_v53, %v1302_v55  ;;  %v1304_v19 = vmul.f32 %v5811_v43, %v1302_v55  ;;  %v1305_v48 = vmul.f32 %v5815_v38, %v1302_v55  ;;  %v1306_v49 = vmul.f32 %v5819_v44, %v1302_v55  ;;  %8838 = vst [vmem:[#allocation13_spill] sm:$0xff] %v5823_v39  ;;  %v5951_v44 = vld [vmem:[%s4907_s22 + $0x178] sm:$0xff] }
 0x13c   : > { %v1295_v50 = vadd.f32 %v1291_v1, %v1283_v62  ;;  %v1296_v52 = vadd.f32 %v1292_v18, %v1284_v61  ;;  %v1297_v45 = vadd.f32 %v1293_v37, %v1285_v29  ;;  %v1298_v60 = vadd.f32 %v1294_v54, %v1286_v30  ;;  %8839 = vst [vmem:[#allocation14_spill] sm:$0xff] %v5828_v6  ;;  %v5838_v1 = vld [vmem:[%s4907_s22 + $0xb8] sm:$0xff]  ;;  %v5843_v29 = vld [vmem:[%s4907_s22 + $0xc0] sm:$0xff] }
 0x13d   : > { %v1315_v34 = vmul.f32 %v5823_v39, %v5728_v22  ;;  %v1316_v13 = vmul.f32 %v5828_v6, %v5728_v22  ;;  %8840 = vst [vmem:[#allocation15_spill] sm:$0xff] %v5833_v21  ;;  %v1317_v55 = vmul.f32 %v5833_v21, %v5728_v22  ;;  %8841 = vst [vmem:[#allocation16_spill] sm:$0xff] %v5838_v1  ;;  %v5848_v6 = vld [vmem:[%s4907_s22 + $0xc8] sm:$0xff]  ;;  %v5853_v39 = vld [vmem:[%s4907_s22 + $0xd0] sm:$0xff] }
 0x13e   : > { %v1318_v18 = vmul.f32 %v5838_v1, %v5728_v22  ;;  %v1307_v37 = vadd.f32 %v1303_v36, %v1295_v50  ;;  %v1308_v54 = vadd.f32 %v1304_v19, %v1296_v52  ;;  %v1309_v62 = vadd.f32 %v1305_v48, %v1297_v45  ;;  %8842 = vst [vmem:[#allocation17_spill] sm:$0xff] %v5843_v29  ;;  %v5858_v36 = vld [vmem:[%s4907_s22 + $0xd8] sm:$0xff]  ;;  %v5863_v45 = vld [vmem:[%s4907_s22 + $0xe0] sm:$0xff]  ;;  %v5931_v1 = vld [vmem:[%s4907_s22 + $0x150] sm:$0xff] }
 0x13f   : > { %v1310_v61 = vadd.f32 %v1306_v49, %v1298_v60  ;;  %v1327_v30 = vmul.f32 %v5843_v29, %v5731_v46  ;;  %8843 = vst [vmem:[#allocation18_spill] sm:$0xff] %v5848_v6  ;;  %v1328_v21 = vmul.f32 %v5848_v6, %v5731_v46  ;;  %8844 = vst [vmem:[#allocation19_spill] sm:$0xff] %v5853_v39  ;;  %v5868_v6 = vld [vmem:[%s4907_s22 + $0xe8] sm:$0xff] }
 0x140   : > { %v1329_v22 = vmul.f32 %v5853_v39, %v5731_v46  ;;  %8845 = vst [vmem:[#allocation20_spill] sm:$0xff] %v5858_v36  ;;  %v1330_v19 = vmul.f32 %v5858_v36, %v5731_v46  ;;  %v1319_v48 = vadd.f32 %v1315_v34, %v1307_v37  ;;  %v1320_v49 = vadd.f32 %v1316_v13, %v1308_v54  ;;  %v5873_v39 = vld [vmem:[%s4907_s22 + $0xf0] sm:$0xff]  ;;  %v5878_v34 = vld [vmem:[%s4907_s22 + $0xf8] sm:$0xff] }
 0x141   : > { %v1321_v50 = vadd.f32 %v1317_v55, %v1309_v62  ;;  %v1322_v52 = vadd.f32 %v1318_v18, %v1310_v61  ;;  %8846 = vst [vmem:[#allocation21_spill] sm:$0xff] %v5863_v45  ;;  %v1339_v60 = vmul.f32 %v5863_v45, %v5734_v26  ;;  %8847 = vst [vmem:[#allocation22_spill] sm:$0xff] %v5868_v6  ;;  %v5903_v45 = vld [vmem:[%s4907_s22 + $0x118] sm:$0xff] }
 0x142   : > { %v1340_v29 = vmul.f32 %v5868_v6, %v5734_v26  ;;  %8848 = vst [vmem:[#allocation23_spill] sm:$0xff] %v5873_v39  ;;  %v1341_v46 = vmul.f32 %v5873_v39, %v5734_v26  ;;  %8849 = vst [vmem:[#allocation24_spill] sm:$0xff] %v5878_v34  ;;  %v1342_v13 = vmul.f32 %v5878_v34, %v5734_v26  ;;  %v5899_v34 = vld [vmem:[%s4907_s22 + $0x110] sm:$0xff] }
 0x143   : > { %v1331_v55 = vadd.f32 %v1327_v30, %v1319_v48  ;;  %v1332_v18 = vadd.f32 %v1328_v21, %v1320_v49  ;;  %v1333_v37 = vadd.f32 %v1329_v22, %v1321_v50  ;;  %v1334_v54 = vadd.f32 %v1330_v19, %v1322_v52  ;;  %v5891_v48 = vld [vmem:[%s4907_s22 + $0x100] sm:$0xff]  ;;  %v5895_v50 = vld [vmem:[%s4907_s22 + $0x108] sm:$0xff]  ;;  %8852 = vst [vmem:[#allocation27_spill] sm:$0xff] %v5899_v34 }
 0x144   : > { %v1350_v62 = vrot.slane %v5784_v17, %v4851_v2  ;;  %v1362_v61 = vrot.slane %v5784_v17, %v4853_v3  ;;  %v1374_v39 = vrot.slane %v5784_v17, %v4855_v4  ;;  %v1386_v26 = vrot.slane %v5784_v17, %v4857_v5  ;;  %8850 = vst [vmem:[#allocation25_spill] sm:$0xff] %v5891_v48 }
 0x145   : > { %v1343_v30 = vadd.f32 %v1339_v60, %v1331_v55  ;;  %v1344_v21 = vadd.f32 %v1340_v29, %v1332_v18  ;;  %v1345_v22 = vadd.f32 %v1341_v46, %v1333_v37  ;;  %v1346_v19 = vadd.f32 %v1342_v13, %v1334_v54  ;;  %8851 = vst [vmem:[#allocation26_spill] sm:$0xff] %v5895_v50  ;;  %v5907_v60 = vld [vmem:[%s4907_s22 + $0x120] sm:$0xff]  ;;  %v5911_v13 = vld [vmem:[%s4907_s22 + $0x128] sm:$0xff]  ;;  %v5915_v18 = vld [vmem:[%s4907_s22 + $0x130] sm:$0xff] }
 0x146   : > { %v1351_v49 = vmul.f32 %v5891_v48, %v1350_v62  ;;  %v1352_v52 = vmul.f32 %v5895_v50, %v1350_v62  ;;  %v1353_v6 = vmul.f32 %v5899_v34, %v1350_v62  ;;  %8853 = vst [vmem:[#allocation28_spill] sm:$0xff] %v5903_v45  ;;  %v1354_v29 = vmul.f32 %v5903_v45, %v1350_v62  ;;  %v5919_v54 = vld [vmem:[%s4907_s22 + $0x138] sm:$0xff] }
 0x147   : > { %8854 = vst [vmem:[#allocation29_spill] sm:$0xff] %v5907_v60  ;;  %v1363_v46 = vmul.f32 %v5907_v60, %v1362_v61  ;;  %8855 = vst [vmem:[#allocation30_spill] sm:$0xff] %v5911_v13  ;;  %v1364_v55 = vmul.f32 %v5911_v13, %v1362_v61  ;;  %v1365_v37 = vmul.f32 %v5915_v18, %v1362_v61  ;;  %v5923_v60 = vld [vmem:[%s4907_s22 + $0x140] sm:$0xff]  ;;  %v5927_v13 = vld [vmem:[%s4907_s22 + $0x148] sm:$0xff] }
 0x148   : > { %8856 = vst [vmem:[#allocation31_spill] sm:$0xff] %v5915_v18  ;;  %8857 = vst [vmem:[#allocation32_spill] sm:$0xff] %v5919_v54  ;;  %v1366_v34 = vmul.f32 %v5919_v54, %v1362_v61  ;;  %v1355_v50 = vadd.f32 %v1351_v49, %v1343_v30  ;;  %v1356_v62 = vadd.f32 %v1352_v52, %v1344_v21  ;;  %v5935_v30 = vld [vmem:[%s4907_s22 + $0x158] sm:$0xff]  ;;  %v5939_v52 = vld [vmem:[%s4907_s22 + $0x160] sm:$0xff] }
 0x149   : > { %v1357_v45 = vadd.f32 %v1353_v6, %v1345_v22  ;;  %v1358_v48 = vadd.f32 %v1354_v29, %v1346_v19  ;;  %8858 = vst [vmem:[#allocation33_spill] sm:$0xff] %v5923_v60  ;;  %v1375_v36 = vmul.f32 %v5923_v60, %v1374_v39  ;;  %8859 = vst [vmem:[#allocation34_spill] sm:$0xff] %v5927_v13  ;;  %v5943_v60 = vld [vmem:[%s4907_s22 + $0x168] sm:$0xff]  ;;  %v5947_v54 = vld [vmem:[%s4907_s22 + $0x170] sm:$0xff] }
 0x14a   : > { %v1376_v18 = vmul.f32 %v5927_v13, %v1374_v39  ;;  %8860 = vst [vmem:[#allocation35_spill] sm:$0xff] %v5931_v1  ;;  %v1377_v61 = vmul.f32 %v5931_v1, %v1374_v39  ;;  %v1378_v6 = vmul.f32 %v5935_v30, %v1374_v39  ;;  %v1367_v21 = vadd.f32 %v1363_v46, %v1355_v50 }
 0x14b   : > { %v1368_v22 = vadd.f32 %v1364_v55, %v1356_v62  ;;  %v1369_v19 = vadd.f32 %v1365_v37, %v1357_v45  ;;  %v1370_v49 = vadd.f32 %v1366_v34, %v1358_v48  ;;  %8861 = vst [vmem:[#allocation36_spill] sm:$0xff] %v5939_v52  ;;  %v1387_v29 = vmul.f32 %v5939_v52, %v1386_v26  ;;  %v6023_v52 = vld [vmem:[%s4907_s22 + $0x1f8] sm:$0xff] }
 0x14c   : > { %8862 = vst [vmem:[#allocation37_spill] sm:$0xff] %v5943_v60  ;;  %v1388_v13 = vmul.f32 %v5943_v60, %v1386_v26  ;;  %8863 = vst [vmem:[#allocation38_spill] sm:$0xff] %v5947_v54  ;;  %v1389_v1 = vmul.f32 %v5947_v54, %v1386_v26  ;;  %v1390_v39 = vmul.f32 %v5951_v44, %v1386_v26  ;;  %v6003_v60 = vld [vmem:[%s4907_s22 + $0x1d0] sm:$0xff] }
 0x14d   : > { %8864 = vst [vmem:[#allocation39_spill] sm:$0xff] %v5951_v44  ;;  %v1379_v45 = vadd.f32 %v1375_v36, %v1367_v21  ;;  %v1380_v34 = vadd.f32 %v1376_v18, %v1368_v22  ;;  %v1381_v48 = vadd.f32 %v1377_v61, %v1369_v19  ;;  %v1382_v50 = vadd.f32 %v1378_v6, %v1370_v49  ;;  %v5963_v6 = vld [vmem:[%s4907_s22 + $0x180] sm:$0xff]  ;;  %v5967_v22 = vld [vmem:[%s4907_s22 + $0x188] sm:$0xff]  ;;  %v5971_v49 = vld [vmem:[%s4907_s22 + $0x190] sm:$0xff] }
 0x14e   : > { %v1398_v46 = vrot.slane %v5784_v17, %v4871_v10  ;;  %v1410_v55 = vrot.slane %v5784_v17, %v4882_v14  ;;  %v1422_v37 = vrot.slane %v5784_v17, %v4884_v15  ;;  %v1434_v26 = vrot.slane %v5784_v17, %v4886_v16  ;;  %8865 = vst [vmem:[#allocation40_spill] sm:$0xff] %v5963_v6  ;;  %v5975_v17 = vld [vmem:[%s4907_s22 + $0x198] sm:$0xff] }
 0x14f   : > { %v1391_v36 = vadd.f32 %v1387_v29, %v1379_v45  ;;  %v1392_v18 = vadd.f32 %v1388_v13, %v1380_v34  ;;  %v1393_v62 = vadd.f32 %v1389_v1, %v1381_v48  ;;  %v1394_v61 = vadd.f32 %v1390_v39, %v1382_v50  ;;  %8866 = vst [vmem:[#allocation41_spill] sm:$0xff] %v5967_v22  ;;  %v5979_v13 = vld [vmem:[%s4907_s22 + $0x1a0] sm:$0xff]  ;;  %v5983_v39 = vld [vmem:[%s4907_s22 + $0x1a8] sm:$0xff]  ;;  %v5987_v34 = vld [vmem:[%s4907_s22 + $0x1b0] sm:$0xff] }
 0x150   : > { %v1399_v21 = vmul.f32 %v5963_v6, %v1398_v46  ;;  %v1400_v19 = vmul.f32 %v5967_v22, %v1398_v46  ;;  %8867 = vst [vmem:[#allocation42_spill] sm:$0xff] %v5971_v49  ;;  %v1401_v44 = vmul.f32 %v5971_v49, %v1398_v46  ;;  %8868 = vst [vmem:[#allocation43_spill] sm:$0xff] %v5975_v17  ;;  %v5991_v50 = vld [vmem:[%s4907_s22 + $0x1b8] sm:$0xff] }
 0x151   : > { %v1402_v1 = vmul.f32 %v5975_v17, %v1398_v46  ;;  %8869 = vst [vmem:[#allocation44_spill] sm:$0xff] %v5979_v13  ;;  %v1411_v29 = vmul.f32 %v5979_v13, %v1410_v55  ;;  %8870 = vst [vmem:[#allocation45_spill] sm:$0xff] %v5983_v39  ;;  %v1412_v45 = vmul.f32 %v5983_v39, %v1410_v55  ;;  %v5995_v13 = vld [vmem:[%s4907_s22 + $0x1c0] sm:$0xff]  ;;  %v5999_v39 = vld [vmem:[%s4907_s22 + $0x1c8] sm:$0xff] }
 0x152   : > { %8871 = vst [vmem:[#allocation46_spill] sm:$0xff] %v5987_v34  ;;  %v1413_v48 = vmul.f32 %v5987_v34, %v1410_v55  ;;  %8872 = vst [vmem:[#allocation47_spill] sm:$0xff] %v5991_v50  ;;  %v1414_v49 = vmul.f32 %v5991_v50, %v1410_v55  ;;  %v1403_v22 = vadd.f32 %v1399_v21, %v1391_v36  ;;  %v6007_v36 = vld [vmem:[%s4907_s22 + $0x1d8] sm:$0xff]  ;;  %v6019_v50 = vld [vmem:[%s4907_s22 + $0x1f0] sm:$0xff] }
 0x153   : > { %v1404_v46 = vadd.f32 %v1400_v19, %v1392_v18  ;;  %v1405_v17 = vadd.f32 %v1401_v44, %v1393_v62  ;;  %v1406_v6 = vadd.f32 %v1402_v1, %v1394_v61  ;;  %8873 = vst [vmem:[#allocation48_spill] sm:$0xff] %v5995_v13  ;;  %v1423_v54 = vmul.f32 %v5995_v13, %v1422_v37  ;;  %v6011_v19 = vld [vmem:[%s4907_s22 + $0x1e0] sm:$0xff]  ;;  %v6015_v13 = vld [vmem:[%s4907_s22 + $0x1e8] sm:$0xff] }
 0x154   : > { %8874 = vst [vmem:[#allocation49_spill] sm:$0xff] %v5999_v39  ;;  %v1424_v34 = vmul.f32 %v5999_v39, %v1422_v37  ;;  %8875 = vst [vmem:[#allocation50_spill] sm:$0xff] %v6003_v60  ;;  %v1425_v55 = vmul.f32 %v6003_v60, %v1422_v37  ;;  %v1426_v44 = vmul.f32 %v6007_v36, %v1422_v37 }
 0x155   : > { %8876 = vst [vmem:[#allocation51_spill] sm:$0xff] %v6007_v36  ;;  %v1415_v18 = vadd.f32 %v1411_v29, %v1403_v22  ;;  %v1416_v62 = vadd.f32 %v1412_v45, %v1404_v46  ;;  %v1417_v61 = vadd.f32 %v1413_v48, %v1405_v17  ;;  %v1418_v21 = vadd.f32 %v1414_v49, %v1406_v6  ;;  %v6095_v36 = vld [vmem:[%s4907_s22 + $0x278] sm:$0xff] }
 0x156   : > { %8877 = vst [vmem:[#allocation52_spill] sm:$0xff] %v6011_v19  ;;  %v1435_v1 = vmul.f32 %v6011_v19, %v1434_v26  ;;  %8878 = vst [vmem:[#allocation53_spill] sm:$0xff] %v6015_v13  ;;  %v1436_v39 = vmul.f32 %v6015_v13, %v1434_v26  ;;  %v1437_v60 = vmul.f32 %v6019_v50, %v1434_v26  ;;  %v6075_v19 = vld [vmem:[%s4907_s22 + $0x250] sm:$0xff] }
 0x157   : > { %8879 = vst [vmem:[#allocation54_spill] sm:$0xff] %v6019_v50  ;;  %8880 = vst [vmem:[#allocation55_spill] sm:$0xff] %v6023_v52  ;;  %v1438_v37 = vmul.f32 %v6023_v52, %v1434_v26  ;;  %v1427_v22 = vadd.f32 %v1423_v54, %v1415_v18  ;;  %v1428_v6 = vadd.f32 %v1424_v34, %v1416_v62  ;;  %v6039_v62 = vld [vmem:[%s4907_s22 + $0x208] sm:$0xff]  ;;  %v6047_v50 = vld [vmem:[%s4907_s22 + $0x218] sm:$0xff] }
 0x158   : > { %v1429_v49 = vadd.f32 %v1425_v55, %v1417_v61  ;;  %v1430_v17 = vadd.f32 %v1426_v44, %v1418_v21  ;;  %v1446_v29 = vrot.slane %v5802_v12, %v4851_v2  ;;  %v1458_v45 = vrot.slane %v5802_v12, %v4853_v3  ;;  %v6035_v44 = vld [vmem:[%s4907_s22 + $0x200] sm:$0xff]  ;;  %8882 = vst [vmem:[#allocation57_spill] sm:$0xff] %v6039_v62  ;;  %v6043_v21 = vld [vmem:[%s4907_s22 + $0x210] sm:$0xff] }
 0x159   : > { %v1470_v48 = vrot.slane %v5802_v12, %v4855_v4  ;;  %v1482_v26 = vrot.slane %v5802_v12, %v4857_v5  ;;  %v1439_v54 = vadd.f32 %v1435_v1, %v1427_v22  ;;  %v1440_v34 = vadd.f32 %v1436_v39, %v1428_v6  ;;  %8881 = vst [vmem:[#allocation56_spill] sm:$0xff] %v6035_v44  ;;  %v6051_v39 = vld [vmem:[%s4907_s22 + $0x220] sm:$0xff]  ;;  %v6059_v6 = vld [vmem:[%s4907_s22 + $0x230] sm:$0xff] }
 0x15a   : > { %v1441_v46 = vadd.f32 %v1437_v60, %v1429_v49  ;;  %v1442_v55 = vadd.f32 %v1438_v37, %v1430_v17  ;;  %v1447_v18 = vmul.f32 %v6035_v44, %v1446_v29  ;;  %v1448_v61 = vmul.f32 %v6039_v62, %v1446_v29  ;;  %8883 = vst [vmem:[#allocation58_spill] sm:$0xff] %v6043_v21  ;;  %v6055_v37 = vld [vmem:[%s4907_s22 + $0x228] sm:$0xff]  ;;  %v6063_v17 = vld [vmem:[%s4907_s22 + $0x238] sm:$0xff] }
 0x15b   : > { %v1449_v52 = vmul.f32 %v6043_v21, %v1446_v29  ;;  %8884 = vst [vmem:[#allocation59_spill] sm:$0xff] %v6047_v50  ;;  %v1450_v60 = vmul.f32 %v6047_v50, %v1446_v29  ;;  %8885 = vst [vmem:[#allocation60_spill] sm:$0xff] %v6051_v39  ;;  %v1459_v1 = vmul.f32 %v6051_v39, %v1458_v45  ;;  %v6067_v39 = vld [vmem:[%s4907_s22 + $0x240] sm:$0xff] }
 0x15c   : > { %8886 = vst [vmem:[#allocation61_spill] sm:$0xff] %v6055_v37  ;;  %v1460_v22 = vmul.f32 %v6055_v37, %v1458_v45  ;;  %8887 = vst [vmem:[#allocation62_spill] sm:$0xff] %v6059_v6  ;;  %v1461_v49 = vmul.f32 %v6059_v6, %v1458_v45  ;;  %v1462_v21 = vmul.f32 %v6063_v17, %v1458_v45  ;;  %v6071_v37 = vld [vmem:[%s4907_s22 + $0x248] sm:$0xff] }
 0x15d   : > { %8888 = vst [vmem:[#allocation63_spill] sm:$0xff] %v6063_v17  ;;  %v1451_v62 = vadd.f32 %v1447_v18, %v1439_v54  ;;  %v1452_v29 = vadd.f32 %v1448_v61, %v1440_v34  ;;  %v1453_v50 = vadd.f32 %v1449_v52, %v1441_v46  ;;  %v1454_v44 = vadd.f32 %v1450_v60, %v1442_v55  ;;  %v6079_v54 = vld [vmem:[%s4907_s22 + $0x258] sm:$0xff]  ;;  %v6083_v61 = vld [vmem:[%s4907_s22 + $0x260] sm:$0xff]  ;;  %v6091_v17 = vld [vmem:[%s4907_s22 + $0x270] sm:$0xff] }
 0x15e   : > { %8889 = vst [vmem:[#allocation64_spill] sm:$0xff] %v6067_v39  ;;  %v1471_v13 = vmul.f32 %v6067_v39, %v1470_v48  ;;  %8890 = vst [vmem:[#allocation65_spill] sm:$0xff] %v6071_v37  ;;  %v1472_v6 = vmul.f32 %v6071_v37, %v1470_v48  ;;  %v1473_v45 = vmul.f32 %v6075_v19, %v1470_v48  ;;  %v6087_v39 = vld [vmem:[%s4907_s22 + $0x268] sm:$0xff] }
 0x15f   : > { %8891 = vst [vmem:[#allocation66_spill] sm:$0xff] %v6075_v19  ;;  %v1474_v52 = vmul.f32 %v6079_v54, %v1470_v48  ;;  %v1463_v34 = vadd.f32 %v1459_v1, %v1451_v62  ;;  %v1464_v46 = vadd.f32 %v1460_v22, %v1452_v29  ;;  %v1465_v55 = vadd.f32 %v1461_v49, %v1453_v50 }
 0x160   : > { %v1466_v18 = vadd.f32 %v1462_v21, %v1454_v44  ;;  %8892 = vst [vmem:[#allocation67_spill] sm:$0xff] %v6083_v61  ;;  %v1483_v60 = vmul.f32 %v6083_v61, %v1482_v26  ;;  %8893 = vst [vmem:[#allocation68_spill] sm:$0xff] %v6087_v39  ;;  %v1484_v37 = vmul.f32 %v6087_v39, %v1482_v26  ;;  %v6147_v39 = vld [vmem:[%s4907_s22 + $0x2d0] sm:$0xff]  ;;  %v6167_v61 = vld [vmem:[%s4907_s22 + $0x2f8] sm:$0xff] }
 0x161   : > { %8894 = vst [vmem:[#allocation69_spill] sm:$0xff] %v6091_v17  ;;  %v1485_v19 = vmul.f32 %v6091_v17, %v1482_v26  ;;  %8895 = vst [vmem:[#allocation70_spill] sm:$0xff] %v6095_v36  ;;  %v1486_v48 = vmul.f32 %v6095_v36, %v1482_v26  ;;  %v1475_v50 = vadd.f32 %v1471_v13, %v1463_v34 }
 0x162   : > { %v1476_v44 = vadd.f32 %v1472_v6, %v1464_v46  ;;  %v1477_v62 = vadd.f32 %v1473_v45, %v1465_v55  ;;  %v1478_v21 = vadd.f32 %v1474_v52, %v1466_v18  ;;  %v1494_v1 = vrot.slane %v5802_v12, %v4871_v10  ;;  %v6107_v52 = vld [vmem:[%s4907_s22 + $0x280] sm:$0xff]  ;;  %v6111_v46 = vld [vmem:[%s4907_s22 + $0x288] sm:$0xff]  ;;  %v6115_v18 = vld [vmem:[%s4907_s22 + $0x290] sm:$0xff]  ;;  %8906 = vst [vmem:[#allocation81_spill] sm:$0xff] %v6147_v39 }
 0x163   : > { %v1506_v22 = vrot.slane %v5802_v12, %v4882_v14  ;;  %v1518_v49 = vrot.slane %v5802_v12, %v4884_v15  ;;  %v1530_v26 = vrot.slane %v5802_v12, %v4886_v16  ;;  %v1487_v13 = vadd.f32 %v1483_v60, %v1475_v50  ;;  %8896 = vst [vmem:[#allocation71_spill] sm:$0xff] %v6107_v52  ;;  %v6119_v12 = vld [vmem:[%s4907_s22 + $0x298] sm:$0xff] }
 0x164   : > { %v1488_v6 = vadd.f32 %v1484_v37, %v1476_v44  ;;  %v1489_v29 = vadd.f32 %v1485_v19, %v1477_v62  ;;  %v1490_v45 = vadd.f32 %v1486_v48, %v1478_v21  ;;  %v1495_v34 = vmul.f32 %v6107_v52, %v1494_v1  ;;  %8897 = vst [vmem:[#allocation72_spill] sm:$0xff] %v6111_v46  ;;  %v6123_v37 = vld [vmem:[%s4907_s22 + $0x2a0] sm:$0xff]  ;;  %v6127_v48 = vld [vmem:[%s4907_s22 + $0x2a8] sm:$0xff]  ;;  %v6131_v44 = vld [vmem:[%s4907_s22 + $0x2b0] sm:$0xff] }
 0x165   : > { %v1496_v55 = vmul.f32 %v6111_v46, %v1494_v1  ;;  %8898 = vst [vmem:[#allocation73_spill] sm:$0xff] %v6115_v18  ;;  %v1497_v36 = vmul.f32 %v6115_v18, %v1494_v1  ;;  %8899 = vst [vmem:[#allocation74_spill] sm:$0xff] %v6119_v12  ;;  %v1498_v19 = vmul.f32 %v6119_v12, %v1494_v1  ;;  %v6135_v21 = vld [vmem:[%s4907_s22 + $0x2b8] sm:$0xff] }
 0x166   : > { %8900 = vst [vmem:[#allocation75_spill] sm:$0xff] %v6123_v37  ;;  %v1507_v60 = vmul.f32 %v6123_v37, %v1506_v22  ;;  %8901 = vst [vmem:[#allocation76_spill] sm:$0xff] %v6127_v48  ;;  %v1508_v50 = vmul.f32 %v6127_v48, %v1506_v22  ;;  %v1509_v62 = vmul.f32 %v6131_v44, %v1506_v22  ;;  %v6139_v37 = vld [vmem:[%s4907_s22 + $0x2c0] sm:$0xff]  ;;  %v6143_v48 = vld [vmem:[%s4907_s22 + $0x2c8] sm:$0xff] }
 0x167   : > { %8902 = vst [vmem:[#allocation77_spill] sm:$0xff] %v6131_v44  ;;  %8903 = vst [vmem:[#allocation78_spill] sm:$0xff] %v6135_v21  ;;  %v1510_v18 = vmul.f32 %v6135_v21, %v1506_v22  ;;  %v1499_v46 = vadd.f32 %v1495_v34, %v1487_v13  ;;  %v1500_v1 = vadd.f32 %v1496_v55, %v1488_v6  ;;  %v6151_v13 = vld [vmem:[%s4907_s22 + $0x2d8] sm:$0xff]  ;;  %v6155_v55 = vld [vmem:[%s4907_s22 + $0x2e0] sm:$0xff] }
 0x168   : > { %v1501_v12 = vadd.f32 %v1497_v36, %v1489_v29  ;;  %v1502_v52 = vadd.f32 %v1498_v19, %v1490_v45  ;;  %8904 = vst [vmem:[#allocation79_spill] sm:$0xff] %v6139_v37  ;;  %v1519_v17 = vmul.f32 %v6139_v37, %v1518_v49  ;;  %8905 = vst [vmem:[#allocation80_spill] sm:$0xff] %v6143_v48  ;;  %v6159_v37 = vld [vmem:[%s4907_s22 + $0x2e8] sm:$0xff]  ;;  %v6163_v21 = vld [vmem:[%s4907_s22 + $0x2f0] sm:$0xff] }
 0x169   : > { %v1520_v44 = vmul.f32 %v6143_v48, %v1518_v49  ;;  %v1521_v22 = vmul.f32 %v6147_v39, %v1518_v49  ;;  %8907 = vst [vmem:[#allocation82_spill] sm:$0xff] %v6151_v13  ;;  %v1522_v36 = vmul.f32 %v6151_v13, %v1518_v49  ;;  %v1511_v6 = vadd.f32 %v1507_v60, %v1499_v46  ;;  %v6239_v13 = vld [vmem:[%s4907_s22 + $0x378] sm:$0xff] }
 0x16a   : > { %v1512_v29 = vadd.f32 %v1508_v50, %v1500_v1  ;;  %v1513_v45 = vadd.f32 %v1509_v62, %v1501_v12  ;;  %v1514_v34 = vadd.f32 %v1510_v18, %v1502_v52  ;;  %8908 = vst [vmem:[#allocation83_spill] sm:$0xff] %v6155_v55  ;;  %v1531_v19 = vmul.f32 %v6155_v55, %v1530_v26  ;;  %v6219_v55 = vld [vmem:[%s4907_s22 + $0x350] sm:$0xff] }
 0x16b   : > { %8909 = vst [vmem:[#allocation84_spill] sm:$0xff] %v6159_v37  ;;  %v1532_v48 = vmul.f32 %v6159_v37, %v1530_v26  ;;  %8910 = vst [vmem:[#allocation85_spill] sm:$0xff] %v6163_v21  ;;  %v1533_v39 = vmul.f32 %v6163_v21, %v1530_v26  ;;  %v1534_v49 = vmul.f32 %v6167_v61, %v1530_v26  ;;  %v6191_v21 = vld [vmem:[%s4907_s22 + $0x318] sm:$0xff] }
 0x16c   : > { %8911 = vst [vmem:[#allocation86_spill] sm:$0xff] %v6167_v61  ;;  %v1523_v46 = vadd.f32 %v1519_v17, %v1511_v6  ;;  %v1524_v52 = vadd.f32 %v1520_v44, %v1512_v29  ;;  %v1525_v18 = vadd.f32 %v1521_v22, %v1513_v45  ;;  %v1526_v12 = vadd.f32 %v1522_v36, %v1514_v34  ;;  %v6179_v36 = vld [vmem:[%s4907_s22 + $0x300] sm:$0xff]  ;;  %v6183_v29 = vld [vmem:[%s4907_s22 + $0x308] sm:$0xff]  ;;  %v6187_v34 = vld [vmem:[%s4907_s22 + $0x310] sm:$0xff] }
 0x16d   : > { %v1542_v60 = vrot.slane %v5804_v31, %v4851_v2  ;;  %v1554_v50 = vrot.slane %v5804_v31, %v4853_v3  ;;  %v1566_v62 = vrot.slane %v5804_v31, %v4855_v4  ;;  %v1578_v26 = vrot.slane %v5804_v31, %v4857_v5  ;;  %8912 = vst [vmem:[#allocation87_spill] sm:$0xff] %v6179_v36 }
 0x16e   : > { %v1535_v17 = vadd.f32 %v1531_v19, %v1523_v46  ;;  %v1536_v44 = vadd.f32 %v1532_v48, %v1524_v52  ;;  %v1537_v1 = vadd.f32 %v1533_v39, %v1525_v18  ;;  %v1538_v22 = vadd.f32 %v1534_v49, %v1526_v12  ;;  %8913 = vst [vmem:[#allocation88_spill] sm:$0xff] %v6183_v29  ;;  %v6195_v48 = vld [vmem:[%s4907_s22 + $0x320] sm:$0xff]  ;;  %v6199_v49 = vld [vmem:[%s4907_s22 + $0x328] sm:$0xff]  ;;  %v6203_v52 = vld [vmem:[%s4907_s22 + $0x330] sm:$0xff] }
 0x16f   : > { %v1543_v6 = vmul.f32 %v6179_v36, %v1542_v60  ;;  %v1544_v45 = vmul.f32 %v6183_v29, %v1542_v60  ;;  %8914 = vst [vmem:[#allocation89_spill] sm:$0xff] %v6187_v34  ;;  %v1545_v61 = vmul.f32 %v6187_v34, %v1542_v60  ;;  %8915 = vst [vmem:[#allocation90_spill] sm:$0xff] %v6191_v21  ;;  %v6207_v12 = vld [vmem:[%s4907_s22 + $0x338] sm:$0xff] }
 0x170   : > { %v1546_v39 = vmul.f32 %v6191_v21, %v1542_v60  ;;  %8916 = vst [vmem:[#allocation91_spill] sm:$0xff] %v6195_v48  ;;  %v1555_v19 = vmul.f32 %v6195_v48, %v1554_v50  ;;  %8917 = vst [vmem:[#allocation92_spill] sm:$0xff] %v6199_v49  ;;  %v1556_v46 = vmul.f32 %v6199_v49, %v1554_v50  ;;  %v6211_v48 = vld [vmem:[%s4907_s22 + $0x340] sm:$0xff]  ;;  %v6215_v49 = vld [vmem:[%s4907_s22 + $0x348] sm:$0xff] }
 0x171   : > { %8918 = vst [vmem:[#allocation93_spill] sm:$0xff] %v6203_v52  ;;  %v1557_v18 = vmul.f32 %v6203_v52, %v1554_v50  ;;  %8919 = vst [vmem:[#allocation94_spill] sm:$0xff] %v6207_v12  ;;  %v1558_v34 = vmul.f32 %v6207_v12, %v1554_v50  ;;  %v1547_v29 = vadd.f32 %v1543_v6, %v1535_v17  ;;  %v6223_v17 = vld [vmem:[%s4907_s22 + $0x358] sm:$0xff]  ;;  %v6235_v12 = vld [vmem:[%s4907_s22 + $0x370] sm:$0xff] }
 0x172   : > { %v1548_v60 = vadd.f32 %v1544_v45, %v1536_v44  ;;  %v1549_v21 = vadd.f32 %v1545_v61, %v1537_v1  ;;  %v1550_v36 = vadd.f32 %v1546_v39, %v1538_v22  ;;  %8920 = vst [vmem:[#allocation95_spill] sm:$0xff] %v6211_v48  ;;  %v1567_v37 = vmul.f32 %v6211_v48, %v1566_v62  ;;  %v6227_v45 = vld [vmem:[%s4907_s22 + $0x360] sm:$0xff]  ;;  %v6231_v48 = vld [vmem:[%s4907_s22 + $0x368] sm:$0xff] }
 0x173   : > { %8921 = vst [vmem:[#allocation96_spill] sm:$0xff] %v6215_v49  ;;  %v1568_v52 = vmul.f32 %v6215_v49, %v1566_v62  ;;  %8922 = vst [vmem:[#allocation97_spill] sm:$0xff] %v6219_v55  ;;  %v1569_v50 = vmul.f32 %v6219_v55, %v1566_v62  ;;  %v1570_v61 = vmul.f32 %v6223_v17, %v1566_v62 }
 0x174   : > { %v1559_v44 = vadd.f32 %v1555_v19, %v1547_v29  ;;  %v1560_v1 = vadd.f32 %v1556_v46, %v1548_v60  ;;  %v1561_v22 = vadd.f32 %v1557_v18, %v1549_v21  ;;  %v1562_v6 = vadd.f32 %v1558_v34, %v1550_v36  ;;  %8923 = vst [vmem:[#allocation98_spill] sm:$0xff] %v6235_v12 }
 0x175   : > { %v1579_v39 = vmul.f32 %v6227_v45, %v1578_v26  ;;  %v1580_v49 = vmul.f32 %v6231_v48, %v1578_v26  ;;  %v1581_v55 = vmul.f32 %v6235_v12, %v1578_v26  ;;  %8924 = vst [vmem:[#allocation99_spill] sm:$0xff] %v6239_v13  ;;  %v1582_v62 = vmul.f32 %v6239_v13, %v1578_v26 }
 0x176   : > { %v1571_v21 = vadd.f32 %v1567_v37, %v1559_v44  ;;  %v1572_v36 = vadd.f32 %v1568_v52, %v1560_v1  ;;  %v1573_v29 = vadd.f32 %v1569_v50, %v1561_v22  ;;  %v1574_v34 = vadd.f32 %v1570_v61, %v1562_v6  ;;  %v6249_v37 = vld [vmem:[%s4907_s22 + $0x380] sm:$0xff]  ;;  %v6253_v50 = vld [vmem:[%s4907_s22 + $0x388] sm:$0xff]  ;;  %v6257_v44 = vld [vmem:[%s4907_s22 + $0x390] sm:$0xff] }
 0x177   : > { %v1590_v19 = vrot.slane %v5804_v31, %v4871_v10  ;;  %v1602_v46 = vrot.slane %v5804_v31, %v4882_v14  ;;  %v1614_v18 = vrot.slane %v5804_v31, %v4884_v15  ;;  %8925 = vst [vmem:[#allocation100_spill] sm:$0xff] %v6253_v50  ;;  %8926 = vst [vmem:[#allocation101_spill] sm:$0xff] %v6257_v44  ;;  %v6261_v22 = vld [vmem:[%s4907_s22 + $0x398] sm:$0xff] }
 0x178   : > { %v1583_v60 = vadd.f32 %v1579_v39, %v1571_v21  ;;  %v1584_v12 = vadd.f32 %v1580_v49, %v1572_v36  ;;  %v1585_v26 = vadd.f32 %v1581_v55, %v1573_v29  ;;  %v1586_v13 = vadd.f32 %v1582_v62, %v1574_v34  ;;  %8927 = vst [vmem:[#allocation102_spill] sm:$0xff] %v6261_v22  ;;  %v6265_v49 = vld [vmem:[%s4907_s22 + $0x3a0] sm:$0xff]  ;;  %v6271_v36 = vld [vmem:[%s4907_s22 + $0x3a8] sm:$0xff] }
 0x179   : > { %v1591_v52 = vmul.f32 %v6249_v37, %v1590_v19  ;;  %v1592_v61 = vmul.f32 %v6253_v50, %v1590_v19  ;;  %v1593_v1 = vmul.f32 %v6257_v44, %v1590_v19  ;;  %v1594_v55 = vmul.f32 %v6261_v22, %v1590_v19  ;;  %8928 = vst [vmem:[#allocation103_spill] sm:$0xff] %v6265_v49  ;;  %v6275_v44 = vld [vmem:[%s4907_s22 + $0x3b0] sm:$0xff]  ;;  %v6279_v22 = vld [vmem:[%s4907_s22 + $0x3c0] sm:$0xff] }
 0x17a   : > { %v1603_v6 = vmul.f32 %v6265_v49, %v1602_v46  ;;  %v1626_v39 = vrot.slane %v5804_v31, %v4886_v16  ;;  %8929 = vst [vmem:[#allocation104_spill] sm:$0xff] %v6271_v36  ;;  %v1604_v29 = vmul.f32 %v6271_v36, %v1602_v46  ;;  %8930 = vst [vmem:[#allocation105_spill] sm:$0xff] %v6275_v44  ;;  %v6283_v31 = vld [vmem:[%s4907_s22 + $0x3b8] sm:$0xff] }
 0x17b   : > { %v1595_v62 = vadd.f32 %v1591_v52, %v1583_v60  ;;  %v1596_v21 = vadd.f32 %v1592_v61, %v1584_v12  ;;  %v1597_v34 = vadd.f32 %v1593_v1, %v1585_v26  ;;  %v1605_v19 = vmul.f32 %v6275_v44, %v1602_v46  ;;  %8931 = vst [vmem:[#allocation106_spill] sm:$0xff] %v6279_v22  ;;  %v6287_v52 = vld [vmem:[%s4907_s22 + $0x3e0] sm:$0xff]  ;;  %v6291_v1 = vld [vmem:[%s4907_s22 + $0x3c8] sm:$0xff] }
 0x17c   : > { %v1615_v49 = vmul.f32 %v6279_v22, %v1614_v18  ;;  %v1598_v50 = vadd.f32 %v1594_v55, %v1586_v13  ;;  %8932 = vst [vmem:[#allocation107_spill] sm:$0xff] %v6283_v31  ;;  %v1606_v12 = vmul.f32 %v6283_v31, %v1602_v46  ;;  %8933 = vst [vmem:[#allocation108_spill] sm:$0xff] %v6287_v52  ;;  %v6295_v13 = vld [vmem:[%s4907_s22 + $0x3d0] sm:$0xff] }
 0x17d   : > { %v1607_v60 = vadd.f32 %v1603_v6, %v1595_v62  ;;  %v1627_v26 = vmul.f32 %v6287_v52, %v1626_v39  ;;  %v1608_v61 = vadd.f32 %v1604_v29, %v1596_v21  ;;  %8934 = vst [vmem:[#allocation109_spill] sm:$0xff] %v6291_v1  ;;  %v1616_v44 = vmul.f32 %v6291_v1, %v1614_v18  ;;  %v6299_v6 = vld [vmem:[%s4907_s22 + $0x3d8] sm:$0xff]  ;;  %v6303_v29 = vld [vmem:[%s4907_s22 + $0x3e8] sm:$0xff] }
 0x17e   : > { %v1609_v22 = vadd.f32 %v1605_v19, %v1597_v34  ;;  %8935 = vst [vmem:[#allocation110_spill] sm:$0xff] %v6295_v13  ;;  %v1617_v46 = vmul.f32 %v6295_v13, %v1614_v18  ;;  %v1610_v55 = vadd.f32 %v1606_v12, %v1598_v50  ;;  %v1618_v62 = vmul.f32 %v6299_v6, %v1614_v18  ;;  %v6311_v1 = vld [vmem:[%s4907_s22 + $0x3f8] sm:$0xff]  ;;  %v3919_v12 = vld [vmem:[%s4836_s7 + $0x3] ss:$0 sm:$0xff] }
 0x17f   : > { %v1619_v36 = vadd.f32 %v1615_v49, %v1607_v60  ;;  %v1620_v21 = vadd.f32 %v1616_v44, %v1608_v61  ;;  %v1628_v31 = vmul.f32 %v6303_v29, %v1626_v39  ;;  %v6307_v60 = vld [vmem:[%s4907_s22 + $0x3f0] sm:$0xff]  ;;  %v1630_v50 = vmul.f32 %v6311_v1, %v1626_v39 }
 0x180   : > { %v1621_v49 = vadd.f32 %v1617_v46, %v1609_v22  ;;  %v1629_v34 = vmul.f32 %v6307_v60, %v1626_v39  ;;  %v1622_v19 = vadd.f32 %v1618_v62, %v1610_v55  ;;  %v1644_v44 = vmul.f32 %v5691_v7, %v3919_v12 }
 0x181   : > { %v1631_v52 = vadd.f32 %v1627_v26, %v1619_v36  ;;  %v1632_v13 = vadd.f32 %v1628_v31, %v1620_v21  ;;  %v1645_v26 = vmul.f32 %v5695_v27, %v3919_v12  ;;  %v1647_v22 = vmul.f32 %v5703_v32, %v3919_v12 }
 0x182   : > { %v1633_v18 = vadd.f32 %v1629_v34, %v1621_v49  ;;  %v1634_v36 = vadd.f32 %v1630_v50, %v1622_v19  ;;  %v1648_v61 = vadd.f32 %v5707_v8, %v1644_v44 }
 0x183   : > { %4004 = vtanh.f32 %v1631_v52  ;;  %v1646_v52 = vmul.f32 %v5699_v41, %v3919_v12  ;;  %v1649_v39 = vadd.f32 %v5711_v51, %v1645_v26  ;;  %v1651_v55 = vadd.f32 %v5719_v56, %v1647_v22 }
 0x184   : > { %4006 = vtanh.f32 %v1632_v13 }
 0x185   : > { %4008 = vtanh.f32 %v1633_v18  ;;  %v1650_v31 = vadd.f32 %v5715_v63, %v1646_v52 }
 0x186   : > { %4010 = vtanh.f32 %v1634_v36 }
 0x18d   : > { %v4005_v46 = vpop.eup %4004 }
 0x18e   : > { %v1655_v7 = vrot.slane %v4005_v46, %v4851_v2  ;;  %v1667_v27 = vrot.slane %v4005_v46, %v4853_v3  ;;  %v1679_v41 = vrot.slane %v4005_v46, %v4855_v4  ;;  %v1691_v32 = vrot.slane %v4005_v46, %v4857_v5 }
 0x18f   : > { %v1703_v13 = vrot.slane %v4005_v46, %v4871_v10  ;;  %v1715_v8 = vrot.slane %v4005_v46, %v4882_v14  ;;  %v1727_v62 = vrot.slane %v4005_v46, %v4884_v15  ;;  %v1739_v51 = vrot.slane %v4005_v46, %v4886_v16  ;;  %v6343_v46 = vpop.eup %4006 }
 0x190   : > { %v1656_v63 = vmul.f32 %v5737_v58, %v1655_v7  ;;  %v1657_v56 = vmul.f32 %v5741_v28, %v1655_v7  ;;  %v1658_v21 = vmul.f32 %v5745_v59, %v1655_v7  ;;  %v1659_v49 = vmul.f32 %v5749_v33, %v1655_v7 }
 0x191   : > { %v1668_v34 = vmul.f32 %v5753_v23, %v1667_v27  ;;  %v1669_v19 = vmul.f32 %v5757_v0, %v1667_v27  ;;  %v1670_v50 = vmul.f32 %v5761_v42, %v1667_v27  ;;  %v1671_v12 = vmul.f32 %v5765_v47, %v1667_v27 }
 0x192   : > { %v1660_v18 = vadd.f32 %v1656_v63, %v1648_v61  ;;  %v1661_v44 = vadd.f32 %v1657_v56, %v1649_v39  ;;  %v1662_v36 = vadd.f32 %v1658_v21, %v1650_v31  ;;  %v1663_v26 = vadd.f32 %v1659_v49, %v1651_v55  ;;  %v6349_v39 = vpop.eup %4008  ;;  %v8938_v49 = vld [vmem:[#allocation14_spill] sm:$0xff] }
 0x193   : > { %v1680_v58 = vmul.f32 %v5769_v35, %v1679_v41  ;;  %v1681_v28 = vmul.f32 %v5773_v11, %v1679_v41  ;;  %v1682_v59 = vmul.f32 %v5777_v40, %v1679_v41  ;;  %v1683_v33 = vmul.f32 %v5781_v20, %v1679_v41  ;;  %v6351_v55 = vpop.eup %4010  ;;  %v8936_v41 = vld [vmem:[#allocation12_spill] sm:$0xff] }
 0x194   : > { %v1672_v52 = vadd.f32 %v1668_v34, %v1660_v18  ;;  %v1673_v23 = vadd.f32 %v1669_v19, %v1661_v44  ;;  %v1674_v22 = vadd.f32 %v1670_v50, %v1662_v36  ;;  %v1675_v0 = vadd.f32 %v1671_v12, %v1663_v26  ;;  %v8939_v19 = vld [vmem:[#allocation15_spill] sm:$0xff]  ;;  %v8940_v12 = vld [vmem:[#allocation16_spill] sm:$0xff]  ;;  %v8941_v26 = vld [vmem:[#allocation17_spill] sm:$0xff] }
 0x195   : > { %v1692_v42 = vmul.f32 %v5787_v57, %v1691_v32  ;;  %v1693_v47 = vmul.f32 %v5791_v25, %v1691_v32  ;;  %v1694_v61 = vmul.f32 %v5795_v24, %v1691_v32  ;;  %v1695_v35 = vmul.f32 %v5799_v9, %v1691_v32  ;;  %v8937_v32 = vld [vmem:[#allocation13_spill] sm:$0xff] }
 0x196   : > { %v1684_v11 = vadd.f32 %v1680_v58, %v1672_v52  ;;  %v1685_v40 = vadd.f32 %v1681_v28, %v1673_v23  ;;  %v1686_v31 = vadd.f32 %v1682_v59, %v1674_v22  ;;  %v1687_v20 = vadd.f32 %v1683_v33, %v1675_v0  ;;  %v8942_v58 = vld [vmem:[#allocation18_spill] sm:$0xff]  ;;  %v8943_v28 = vld [vmem:[#allocation19_spill] sm:$0xff]  ;;  %v8944_v33 = vld [vmem:[#allocation20_spill] sm:$0xff] }
 0x197   : > { %v1704_v7 = vmul.f32 %v5807_v53, %v1703_v13  ;;  %v1705_v27 = vmul.f32 %v5811_v43, %v1703_v13  ;;  %v1706_v57 = vmul.f32 %v5815_v38, %v1703_v13  ;;  %v1707_v25 = vmul.f32 %v8936_v41, %v1703_v13 }
 0x198   : > { %v1696_v63 = vadd.f32 %v1692_v42, %v1684_v11  ;;  %v1697_v24 = vadd.f32 %v1693_v47, %v1685_v40  ;;  %v1698_v56 = vadd.f32 %v1694_v61, %v1686_v31  ;;  %v1699_v9 = vadd.f32 %v1695_v35, %v1687_v20  ;;  %v8945_v47 = vld [vmem:[#allocation21_spill] sm:$0xff]  ;;  %v8946_v35 = vld [vmem:[#allocation22_spill] sm:$0xff]  ;;  %v8947_v11 = vld [vmem:[#allocation23_spill] sm:$0xff] }
 0x199   : > { %v1716_v21 = vmul.f32 %v8937_v32, %v1715_v8  ;;  %v1717_v34 = vmul.f32 %v8938_v49, %v1715_v8  ;;  %v1718_v50 = vmul.f32 %v8939_v19, %v1715_v8  ;;  %v1719_v18 = vmul.f32 %v8940_v12, %v1715_v8  ;;  %v8948_v31 = vld [vmem:[#allocation24_spill] sm:$0xff] }
 0x19a   : > { %v1708_v44 = vadd.f32 %v1704_v7, %v1696_v63  ;;  %v1709_v53 = vadd.f32 %v1705_v27, %v1697_v24  ;;  %v1710_v36 = vadd.f32 %v1706_v57, %v1698_v56  ;;  %v1711_v43 = vadd.f32 %v1707_v25, %v1699_v9 }
 0x19b   : > { %v1728_v38 = vmul.f32 %v8941_v26, %v1727_v62  ;;  %v1729_v13 = vmul.f32 %v8942_v58, %v1727_v62  ;;  %v1730_v59 = vmul.f32 %v8943_v28, %v1727_v62  ;;  %v1731_v52 = vmul.f32 %v8944_v33, %v1727_v62 }
 0x19c   : > { %v1720_v23 = vadd.f32 %v1716_v21, %v1708_v44  ;;  %v1721_v22 = vadd.f32 %v1717_v34, %v1709_v53  ;;  %v1722_v0 = vadd.f32 %v1718_v50, %v1710_v36  ;;  %v1723_v42 = vadd.f32 %v1719_v18, %v1711_v43  ;;  %v8949_v21 = vld [vmem:[#allocation25_spill] sm:$0xff]  ;;  %v8950_v34 = vld [vmem:[#allocation26_spill] sm:$0xff]  ;;  %v8951_v50 = vld [vmem:[#allocation27_spill] sm:$0xff] }
 0x19d   : > { %v1740_v61 = vmul.f32 %v8945_v47, %v1739_v51  ;;  %v1741_v8 = vmul.f32 %v8946_v35, %v1739_v51  ;;  %v1742_v40 = vmul.f32 %v8947_v11, %v1739_v51  ;;  %v1743_v20 = vmul.f32 %v8948_v31, %v1739_v51  ;;  %v8952_v18 = vld [vmem:[#allocation28_spill] sm:$0xff]  ;;  %v8953_v53 = vld [vmem:[#allocation29_spill] sm:$0xff]  ;;  %v8954_v43 = vld [vmem:[#allocation30_spill] sm:$0xff] }
 0x19e   : > { %v1732_v7 = vadd.f32 %v1728_v38, %v1720_v23  ;;  %v1733_v27 = vadd.f32 %v1729_v13, %v1721_v22  ;;  %v1734_v57 = vadd.f32 %v1730_v59, %v1722_v0  ;;  %v1735_v41 = vadd.f32 %v1731_v52, %v1723_v42  ;;  %v8955_v38 = vld [vmem:[#allocation31_spill] sm:$0xff]  ;;  %v8956_v13 = vld [vmem:[#allocation32_spill] sm:$0xff]  ;;  %v8957_v22 = vld [vmem:[#allocation33_spill] sm:$0xff] }
 0x19f   : > { %v1751_v25 = vrot.slane %v6343_v46, %v4851_v2  ;;  %v1763_v62 = vrot.slane %v6343_v46, %v4853_v3  ;;  %v1775_v63 = vrot.slane %v6343_v46, %v4855_v4  ;;  %v1787_v24 = vrot.slane %v6343_v46, %v4857_v5  ;;  %v8958_v42 = vld [vmem:[#allocation34_spill] sm:$0xff] }
 0x1a0   : > { %v1744_v56 = vadd.f32 %v1740_v61, %v1732_v7  ;;  %v1745_v9 = vadd.f32 %v1741_v8, %v1733_v27  ;;  %v1746_v32 = vadd.f32 %v1742_v40, %v1734_v57  ;;  %v1747_v51 = vadd.f32 %v1743_v20, %v1735_v41  ;;  %v8959_v61 = vld [vmem:[#allocation35_spill] sm:$0xff]  ;;  %v8960_v7 = vld [vmem:[#allocation36_spill] sm:$0xff]  ;;  %v8961_v57 = vld [vmem:[#allocation37_spill] sm:$0xff] }
 0x1a1   : > { %v1752_v49 = vmul.f32 %v8949_v21, %v1751_v25  ;;  %v1753_v19 = vmul.f32 %v8950_v34, %v1751_v25  ;;  %v1754_v12 = vmul.f32 %v8951_v50, %v1751_v25  ;;  %v1755_v44 = vmul.f32 %v8952_v18, %v1751_v25  ;;  %v8962_v25 = vld [vmem:[#allocation38_spill] sm:$0xff] }
 0x1a2   : > { %v1764_v36 = vmul.f32 %v8953_v53, %v1763_v62  ;;  %v1765_v26 = vmul.f32 %v8954_v43, %v1763_v62  ;;  %v1766_v58 = vmul.f32 %v8955_v38, %v1763_v62  ;;  %v1767_v28 = vmul.f32 %v8956_v13, %v1763_v62 }
 0x1a3   : > { %v1756_v59 = vadd.f32 %v1752_v49, %v1744_v56  ;;  %v1757_v33 = vadd.f32 %v1753_v19, %v1745_v9  ;;  %v1758_v52 = vadd.f32 %v1754_v12, %v1746_v32  ;;  %v1759_v23 = vadd.f32 %v1755_v44, %v1747_v51  ;;  %v8963_v56 = vld [vmem:[#allocation39_spill] sm:$0xff]  ;;  %v8964_v44 = vld [vmem:[#allocation40_spill] sm:$0xff] }
 0x1a4   : > { %v1776_v0 = vmul.f32 %v8957_v22, %v1775_v63  ;;  %v1777_v47 = vmul.f32 %v8958_v42, %v1775_v63  ;;  %v1778_v35 = vmul.f32 %v8959_v61, %v1775_v63  ;;  %v1779_v8 = vmul.f32 %v5935_v30, %v1775_v63 }
 0x1a5   : > { %v1768_v11 = vadd.f32 %v1764_v36, %v1756_v59  ;;  %v1769_v40 = vadd.f32 %v1765_v26, %v1757_v33  ;;  %v1770_v31 = vadd.f32 %v1766_v58, %v1758_v52  ;;  %v1771_v20 = vadd.f32 %v1767_v28, %v1759_v23  ;;  %v8965_v36 = vld [vmem:[#allocation41_spill] sm:$0xff]  ;;  %v8966_v26 = vld [vmem:[#allocation42_spill] sm:$0xff]  ;;  %v8967_v58 = vld [vmem:[#allocation43_spill] sm:$0xff] }
 0x1a6   : > { %v1788_v27 = vmul.f32 %v8960_v7, %v1787_v24  ;;  %v1789_v41 = vmul.f32 %v8961_v57, %v1787_v24  ;;  %v1790_v62 = vmul.f32 %v8962_v25, %v1787_v24  ;;  %v1791_v9 = vmul.f32 %v8963_v56, %v1787_v24  ;;  %v8968_v28 = vld [vmem:[#allocation44_spill] sm:$0xff]  ;;  %v8969_v33 = vld [vmem:[#allocation45_spill] sm:$0xff]  ;;  %v8970_v23 = vld [vmem:[#allocation46_spill] sm:$0xff] }
 0x1a7   : > { %v1780_v32 = vadd.f32 %v1776_v0, %v1768_v11  ;;  %v1781_v51 = vadd.f32 %v1777_v47, %v1769_v40  ;;  %v1782_v21 = vadd.f32 %v1778_v35, %v1770_v31  ;;  %v1783_v49 = vadd.f32 %v1779_v8, %v1771_v20  ;;  %v8971_v0 = vld [vmem:[#allocation47_spill] sm:$0xff]  ;;  %v8972_v8 = vld [vmem:[#allocation48_spill] sm:$0xff]  ;;  %v8973_v40 = vld [vmem:[#allocation49_spill] sm:$0xff] }
 0x1a8   : > { %v1799_v34 = vrot.slane %v6343_v46, %v4871_v10  ;;  %v1811_v30 = vrot.slane %v6343_v46, %v4882_v14  ;;  %v1823_v63 = vrot.slane %v6343_v46, %v4884_v15  ;;  %v1835_v19 = vrot.slane %v6343_v46, %v4886_v16  ;;  %v8974_v20 = vld [vmem:[#allocation50_spill] sm:$0xff] }
 0x1a9   : > { %v1792_v50 = vadd.f32 %v1788_v27, %v1780_v32  ;;  %v1793_v12 = vadd.f32 %v1789_v41, %v1781_v51  ;;  %v1794_v18 = vadd.f32 %v1790_v62, %v1782_v21  ;;  %v1795_v24 = vadd.f32 %v1791_v9, %v1783_v49  ;;  %v8975_v27 = vld [vmem:[#allocation51_spill] sm:$0xff]  ;;  %v8976_v9 = vld [vmem:[#allocation52_spill] sm:$0xff]  ;;  %v8977_v51 = vld [vmem:[#allocation53_spill] sm:$0xff] }
 0x1aa   : > { %v1800_v53 = vmul.f32 %v8964_v44, %v1799_v34  ;;  %v1801_v43 = vmul.f32 %v8965_v36, %v1799_v34  ;;  %v1802_v38 = vmul.f32 %v8966_v26, %v1799_v34  ;;  %v1803_v13 = vmul.f32 %v8967_v58, %v1799_v34  ;;  %v8978_v49 = vld [vmem:[#allocation54_spill] sm:$0xff] }
 0x1ab   : > { %v1812_v59 = vmul.f32 %v8968_v28, %v1811_v30  ;;  %v1813_v52 = vmul.f32 %v8969_v33, %v1811_v30  ;;  %v1814_v22 = vmul.f32 %v8970_v23, %v1811_v30  ;;  %v1815_v46 = vmul.f32 %v8971_v0, %v1811_v30  ;;  %v8979_v30 = vld [vmem:[#allocation55_spill] sm:$0xff] }
 0x1ac   : > { %v1804_v42 = vadd.f32 %v1800_v53, %v1792_v50  ;;  %v1805_v47 = vadd.f32 %v1801_v43, %v1793_v12  ;;  %v1806_v61 = vadd.f32 %v1802_v38, %v1794_v18  ;;  %v1807_v35 = vadd.f32 %v1803_v13, %v1795_v24  ;;  %v8980_v13 = vld [vmem:[#allocation56_spill] sm:$0xff] }
 0x1ad   : > { %v1824_v11 = vmul.f32 %v8972_v8, %v1823_v63  ;;  %v1825_v31 = vmul.f32 %v8973_v40, %v1823_v63  ;;  %v1826_v7 = vmul.f32 %v8974_v20, %v1823_v63  ;;  %v1827_v57 = vmul.f32 %v8975_v27, %v1823_v63 }
 0x1ae   : > { %v1816_v41 = vadd.f32 %v1812_v59, %v1804_v42  ;;  %v1817_v25 = vadd.f32 %v1813_v52, %v1805_v47  ;;  %v1818_v62 = vadd.f32 %v1814_v22, %v1806_v61  ;;  %v1819_v56 = vadd.f32 %v1815_v46, %v1807_v35  ;;  %v8981_v59 = vld [vmem:[#allocation57_spill] sm:$0xff]  ;;  %v8982_v52 = vld [vmem:[#allocation58_spill] sm:$0xff]  ;;  %v8983_v22 = vld [vmem:[#allocation59_spill] sm:$0xff] }
 0x1af   : > { %v1836_v32 = vmul.f32 %v8976_v9, %v1835_v19  ;;  %v1837_v21 = vmul.f32 %v8977_v51, %v1835_v19  ;;  %v1838_v34 = vmul.f32 %v8978_v49, %v1835_v19  ;;  %v1839_v50 = vmul.f32 %v8979_v30, %v1835_v19  ;;  %v8984_v46 = vld [vmem:[#allocation60_spill] sm:$0xff]  ;;  %v8985_v47 = vld [vmem:[#allocation61_spill] sm:$0xff]  ;;  %v8986_v35 = vld [vmem:[#allocation62_spill] sm:$0xff] }
 0x1b0   : > { %v1828_v12 = vadd.f32 %v1824_v11, %v1816_v41  ;;  %v1829_v18 = vadd.f32 %v1825_v31, %v1817_v25  ;;  %v1830_v24 = vadd.f32 %v1826_v7, %v1818_v62  ;;  %v1831_v44 = vadd.f32 %v1827_v57, %v1819_v56  ;;  %v8987_v11 = vld [vmem:[#allocation63_spill] sm:$0xff]  ;;  %v8988_v57 = vld [vmem:[#allocation64_spill] sm:$0xff]  ;;  %v8989_v25 = vld [vmem:[#allocation65_spill] sm:$0xff] }
 0x1b1   : > { %v1847_v53 = vrot.slane %v6349_v39, %v4851_v2  ;;  %v1859_v63 = vrot.slane %v6349_v39, %v4853_v3  ;;  %v1871_v36 = vrot.slane %v6349_v39, %v4855_v4  ;;  %v1883_v43 = vrot.slane %v6349_v39, %v4857_v5  ;;  %v8990_v56 = vld [vmem:[#allocation66_spill] sm:$0xff]  ;;  %v8991_v30 = vld [vmem:[#allocation67_spill] sm:$0xff] }
 0x1b2   : > { %v1840_v26 = vadd.f32 %v1836_v32, %v1828_v12  ;;  %v1841_v38 = vadd.f32 %v1837_v21, %v1829_v18  ;;  %v1842_v58 = vadd.f32 %v1838_v34, %v1830_v24  ;;  %v1843_v19 = vadd.f32 %v1839_v50, %v1831_v44  ;;  %v8992_v12 = vld [vmem:[#allocation68_spill] sm:$0xff]  ;;  %v8993_v24 = vld [vmem:[#allocation69_spill] sm:$0xff] }
 0x1b3   : > { %v1848_v28 = vmul.f32 %v8980_v13, %v1847_v53  ;;  %v1849_v33 = vmul.f32 %v8981_v59, %v1847_v53  ;;  %v1850_v23 = vmul.f32 %v8982_v52, %v1847_v53  ;;  %v1851_v0 = vmul.f32 %v8983_v22, %v1847_v53  ;;  %v8994_v53 = vld [vmem:[#allocation70_spill] sm:$0xff] }
 0x1b4   : > { %v1860_v42 = vmul.f32 %v8984_v46, %v1859_v63  ;;  %v1861_v61 = vmul.f32 %v8985_v47, %v1859_v63  ;;  %v1862_v8 = vmul.f32 %v8986_v35, %v1859_v63  ;;  %v1863_v40 = vmul.f32 %v8987_v11, %v1859_v63 }
 0x1b5   : > { %v1852_v31 = vadd.f32 %v1848_v28, %v1840_v26  ;;  %v1853_v20 = vadd.f32 %v1849_v33, %v1841_v38  ;;  %v1854_v7 = vadd.f32 %v1850_v23, %v1842_v58  ;;  %v1855_v27 = vadd.f32 %v1851_v0, %v1843_v19  ;;  %v8995_v23 = vld [vmem:[#allocation71_spill] sm:$0xff]  ;;  %v8996_v0 = vld [vmem:[#allocation72_spill] sm:$0xff] }
 0x1b6   : > { %v1872_v41 = vmul.f32 %v8988_v57, %v1871_v36  ;;  %v1873_v62 = vmul.f32 %v8989_v25, %v1871_v36  ;;  %v1874_v9 = vmul.f32 %v8990_v56, %v1871_v36  ;;  %v1875_v32 = vmul.f32 %v6079_v54, %v1871_v36  ;;  %v9003_v56 = vld [vmem:[#allocation79_spill] sm:$0xff] }
 0x1b7   : > { %v1864_v51 = vadd.f32 %v1860_v42, %v1852_v31  ;;  %v1865_v21 = vadd.f32 %v1861_v61, %v1853_v20  ;;  %v1866_v49 = vadd.f32 %v1862_v8, %v1854_v7  ;;  %v1867_v34 = vadd.f32 %v1863_v40, %v1855_v27  ;;  %v8997_v42 = vld [vmem:[#allocation73_spill] sm:$0xff]  ;;  %v8998_v61 = vld [vmem:[#allocation74_spill] sm:$0xff]  ;;  %v8999_v8 = vld [vmem:[#allocation75_spill] sm:$0xff] }
 0x1b8   : > { %v1884_v50 = vmul.f32 %v8991_v30, %v1883_v43  ;;  %v1885_v18 = vmul.f32 %v8992_v12, %v1883_v43  ;;  %v1886_v44 = vmul.f32 %v8993_v24, %v1883_v43  ;;  %v1887_v63 = vmul.f32 %v8994_v53, %v1883_v43  ;;  %v9000_v40 = vld [vmem:[#allocation76_spill] sm:$0xff]  ;;  %v9001_v20 = vld [vmem:[#allocation77_spill] sm:$0xff]  ;;  %v9002_v27 = vld [vmem:[#allocation78_spill] sm:$0xff] }
 0x1b9   : > { %v1876_v26 = vadd.f32 %v1872_v41, %v1864_v51  ;;  %v1877_v38 = vadd.f32 %v1873_v62, %v1865_v21  ;;  %v1878_v58 = vadd.f32 %v1874_v9, %v1866_v49  ;;  %v1879_v19 = vadd.f32 %v1875_v32, %v1867_v34  ;;  %v9004_v32 = vld [vmem:[#allocation80_spill] sm:$0xff]  ;;  %v9005_v21 = vld [vmem:[#allocation81_spill] sm:$0xff]  ;;  %v9006_v34 = vld [vmem:[#allocation82_spill] sm:$0xff] }
 0x1ba   : > { %v1895_v13 = vrot.slane %v6349_v39, %v4871_v10  ;;  %v1907_v54 = vrot.slane %v6349_v39, %v4882_v14  ;;  %v1919_v36 = vrot.slane %v6349_v39, %v4884_v15  ;;  %v1931_v28 = vrot.slane %v6349_v39, %v4886_v16 }
 0x1bb   : > { %v1888_v59 = vadd.f32 %v1884_v50, %v1876_v26  ;;  %v1889_v33 = vadd.f32 %v1885_v18, %v1877_v38  ;;  %v1890_v52 = vadd.f32 %v1886_v44, %v1878_v58  ;;  %v1891_v43 = vadd.f32 %v1887_v63, %v1879_v19  ;;  %v9007_v44 = vld [vmem:[#allocation83_spill] sm:$0xff]  ;;  %v9008_v63 = vld [vmem:[#allocation84_spill] sm:$0xff]  ;;  %v9009_v38 = vld [vmem:[#allocation85_spill] sm:$0xff] }
 0x1bc   : > { %v1896_v22 = vmul.f32 %v8995_v23, %v1895_v13  ;;  %v1897_v46 = vmul.f32 %v8996_v0, %v1895_v13  ;;  %v1898_v47 = vmul.f32 %v8997_v42, %v1895_v13  ;;  %v1899_v35 = vmul.f32 %v8998_v61, %v1895_v13  ;;  %v9010_v19 = vld [vmem:[#allocation86_spill] sm:$0xff] }
 0x1bd   : > { %v1908_v11 = vmul.f32 %v8999_v8, %v1907_v54  ;;  %v1909_v31 = vmul.f32 %v9000_v40, %v1907_v54  ;;  %v1910_v7 = vmul.f32 %v9001_v20, %v1907_v54  ;;  %v1911_v39 = vmul.f32 %v9002_v27, %v1907_v54 }
 0x1be   : > { %v1900_v57 = vadd.f32 %v1896_v22, %v1888_v59  ;;  %v1901_v41 = vadd.f32 %v1897_v46, %v1889_v33  ;;  %v1902_v25 = vadd.f32 %v1898_v47, %v1890_v52  ;;  %v1903_v62 = vadd.f32 %v1899_v35, %v1891_v43  ;;  %v9011_v47 = vld [vmem:[#allocation87_spill] sm:$0xff]  ;;  %v9012_v35 = vld [vmem:[#allocation88_spill] sm:$0xff] }
 0x1bf   : > { %v1920_v9 = vmul.f32 %v9003_v56, %v1919_v36  ;;  %v1921_v51 = vmul.f32 %v9004_v32, %v1919_v36  ;;  %v1922_v49 = vmul.f32 %v9005_v21, %v1919_v36  ;;  %v1923_v30 = vmul.f32 %v9006_v34, %v1919_v36 }
 0x1c0   : > { %v1912_v50 = vadd.f32 %v1908_v11, %v1900_v57  ;;  %v1913_v12 = vadd.f32 %v1909_v31, %v1901_v41  ;;  %v1914_v18 = vadd.f32 %v1910_v7, %v1902_v25  ;;  %v1915_v24 = vadd.f32 %v1911_v39, %v1903_v62  ;;  %v9013_v11 = vld [vmem:[#allocation89_spill] sm:$0xff]  ;;  %v9014_v31 = vld [vmem:[#allocation90_spill] sm:$0xff]  ;;  %v9015_v7 = vld [vmem:[#allocation91_spill] sm:$0xff] }
 0x1c1   : > { %v1932_v53 = vmul.f32 %v9007_v44, %v1931_v28  ;;  %v1933_v26 = vmul.f32 %v9008_v63, %v1931_v28  ;;  %v1934_v58 = vmul.f32 %v9009_v38, %v1931_v28  ;;  %v1935_v13 = vmul.f32 %v9010_v19, %v1931_v28  ;;  %v9016_v39 = vld [vmem:[#allocation92_spill] sm:$0xff]  ;;  %v9017_v41 = vld [vmem:[#allocation93_spill] sm:$0xff]  ;;  %v9018_v62 = vld [vmem:[#allocation94_spill] sm:$0xff] }
 0x1c2   : > { %v1924_v54 = vadd.f32 %v1920_v9, %v1912_v50  ;;  %v1925_v59 = vadd.f32 %v1921_v51, %v1913_v12  ;;  %v1926_v33 = vadd.f32 %v1922_v49, %v1914_v18  ;;  %v1927_v52 = vadd.f32 %v1923_v30, %v1915_v24  ;;  %v9019_v49 = vld [vmem:[#allocation95_spill] sm:$0xff]  ;;  %v9020_v30 = vld [vmem:[#allocation96_spill] sm:$0xff]  ;;  %v9021_v12 = vld [vmem:[#allocation97_spill] sm:$0xff] }
 0x1c3   : > { %v1943_v43 = vrot.slane %v6351_v55, %v4851_v2  ;;  %v1955_v36 = vrot.slane %v6351_v55, %v4853_v3  ;;  %v1967_v23 = vrot.slane %v6351_v55, %v4855_v4  ;;  %v1979_v22 = vrot.slane %v6351_v55, %v4857_v5  ;;  %v9022_v19 = vld [vmem:[#allocation98_spill] sm:$0xff] }
 0x1c4   : > { %v1936_v0 = vadd.f32 %v1932_v53, %v1924_v54  ;;  %v1937_v46 = vadd.f32 %v1933_v26, %v1925_v59  ;;  %v1938_v42 = vadd.f32 %v1934_v58, %v1926_v33  ;;  %v1939_v28 = vadd.f32 %v1935_v13, %v1927_v52  ;;  %v9023_v54 = vld [vmem:[#allocation99_spill] sm:$0xff] }
 0x1c5   : > { %v1944_v61 = vmul.f32 %v9011_v47, %v1943_v43  ;;  %v1945_v8 = vmul.f32 %v9012_v35, %v1943_v43  ;;  %v1946_v40 = vmul.f32 %v9013_v11, %v1943_v43  ;;  %v1947_v20 = vmul.f32 %v9014_v31, %v1943_v43 }
 0x1c6   : > { %v1956_v27 = vmul.f32 %v9015_v7, %v1955_v36  ;;  %v1957_v57 = vmul.f32 %v9016_v39, %v1955_v36  ;;  %v1958_v25 = vmul.f32 %v9017_v41, %v1955_v36  ;;  %v1959_v56 = vmul.f32 %v9018_v62, %v1955_v36  ;;  %v9028_v39 = vld [vmem:[#allocation104_spill] sm:$0xff] }
 0x1c7   : > { %v1948_v9 = vadd.f32 %v1944_v61, %v1936_v0  ;;  %v1949_v32 = vadd.f32 %v1945_v8, %v1937_v46  ;;  %v1950_v51 = vadd.f32 %v1946_v40, %v1938_v42  ;;  %v1951_v21 = vadd.f32 %v1947_v20, %v1939_v28  ;;  %v9025_v61 = vld [vmem:[#allocation101_spill] sm:$0xff]  ;;  %v9026_v8 = vld [vmem:[#allocation102_spill] sm:$0xff]  ;;  %v9027_v40 = vld [vmem:[#allocation103_spill] sm:$0xff] }
 0x1c8   : > { %v1968_v34 = vmul.f32 %v9019_v49, %v1967_v23  ;;  %v1969_v50 = vmul.f32 %v9020_v30, %v1967_v23  ;;  %v1970_v18 = vmul.f32 %v9021_v12, %v1967_v23  ;;  %v1971_v24 = vmul.f32 %v6223_v17, %v1967_v23  ;;  %v9032_v49 = vld [vmem:[#allocation108_spill] sm:$0xff] }
 0x1c9   : > { %v1960_v44 = vadd.f32 %v1956_v27, %v1948_v9  ;;  %v1961_v53 = vadd.f32 %v1957_v57, %v1949_v32  ;;  %v1962_v63 = vadd.f32 %v1958_v25, %v1950_v51  ;;  %v1963_v26 = vadd.f32 %v1959_v56, %v1951_v21  ;;  %v9029_v25 = vld [vmem:[#allocation105_spill] sm:$0xff]  ;;  %v9030_v56 = vld [vmem:[#allocation106_spill] sm:$0xff]  ;;  %v9031_v32 = vld [vmem:[#allocation107_spill] sm:$0xff] }
 0x1ca   : > { %v1980_v38 = vmul.f32 %v6227_v45, %v1979_v22  ;;  %v1981_v58 = vmul.f32 %v6231_v48, %v1979_v22  ;;  %v1982_v13 = vmul.f32 %v9022_v19, %v1979_v22  ;;  %v1983_v59 = vmul.f32 %v9023_v54, %v1979_v22  ;;  %v9024_v22 = vld [vmem:[#allocation100_spill] sm:$0xff] }
 0x1cb   : > { %v1972_v33 = vadd.f32 %v1968_v34, %v1960_v44  ;;  %v1973_v52 = vadd.f32 %v1969_v50, %v1961_v53  ;;  %v1974_v43 = vadd.f32 %v1970_v18, %v1962_v63  ;;  %v1975_v36 = vadd.f32 %v1971_v24, %v1963_v26  ;;  %v9033_v50 = vld [vmem:[#allocation109_spill] sm:$0xff]  ;;  %v9034_v24 = vld [vmem:[#allocation110_spill] sm:$0xff] }
 0x1cc   : > { %v1991_v0 = vrot.slane %v6351_v55, %v4871_v10  ;;  %v2003_v17 = vrot.slane %v6351_v55, %v4882_v14  ;;  %v2015_v23 = vrot.slane %v6351_v55, %v4884_v15  ;;  %v2027_v20 = vrot.slane %v6351_v55, %v4886_v16 }
 0x1cd   : > { %v1984_v45 = vadd.f32 %v1980_v38, %v1972_v33  ;;  %v1985_v46 = vadd.f32 %v1981_v58, %v1973_v52  ;;  %v1986_v48 = vadd.f32 %v1982_v13, %v1974_v43  ;;  %v1987_v42 = vadd.f32 %v1983_v59, %v1975_v36  ;;  %v3920_v33 = vld [vmem:[%s4836_s7 + $0x4] ss:$0 sm:$0xff]  ;;  %v6515_v36 = vld [vmem:[%s4844_s29] sm:$0xff] }
 0x1ce   : > { %v1992_v28 = vmul.f32 %v6249_v37, %v1991_v0  ;;  %v1993_v47 = vmul.f32 %v9024_v22, %v1991_v0  ;;  %v1994_v35 = vmul.f32 %v9025_v61, %v1991_v0  ;;  %v1995_v11 = vmul.f32 %v9026_v8, %v1991_v0 }
 0x1cf   : > { %v2004_v31 = vmul.f32 %v9027_v40, %v2003_v17  ;;  %v2005_v57 = vmul.f32 %v9028_v39, %v2003_v17  ;;  %v2006_v62 = vmul.f32 %v9029_v25, %v2003_v17  ;;  %v2016_v37 = vmul.f32 %v9030_v56, %v2015_v23 }
 0x1d0   : > { %v1996_v7 = vadd.f32 %v1992_v28, %v1984_v45  ;;  %v1997_v27 = vadd.f32 %v1993_v47, %v1985_v46  ;;  %v1998_v41 = vadd.f32 %v1994_v35, %v1986_v48  ;;  %v1999_v9 = vadd.f32 %v1995_v11, %v1987_v42  ;;  %v6531_v46 = vld [vmem:[%s4844_s29 + $0x20] sm:$0xff]  ;;  %v6535_v28 = vld [vmem:[%s4844_s29 + $0x28] sm:$0xff]  ;;  %v6539_v47 = vld [vmem:[%s4844_s29 + $0x30] sm:$0xff] }
 0x1d1   : > { %v2007_v51 = vmul.f32 %v9031_v32, %v2003_v17  ;;  %v2028_v34 = vmul.f32 %v9032_v49, %v2027_v20  ;;  %v2017_v12 = vmul.f32 %v9033_v50, %v2015_v23  ;;  %v2018_v44 = vmul.f32 %v9034_v24, %v2015_v23  ;;  %v6543_v35 = vld [vmem:[%s4844_s29 + $0x38] sm:$0xff]  ;;  %v6573_v32 = vld [vmem:[%s4907_s22 + $0x18] sm:$0xff] }
 0x1d2   : > { %v2008_v21 = vadd.f32 %v2004_v31, %v1996_v7  ;;  %v2009_v30 = vadd.f32 %v2005_v57, %v1997_v27  ;;  %v2010_v18 = vadd.f32 %v2006_v62, %v1998_v41  ;;  %v2019_v63 = vmul.f32 %v6299_v6, %v2015_v23  ;;  %v6561_v41 = vld [vmem:[%s4907_s22] sm:$0xff]  ;;  %v6565_v62 = vld [vmem:[%s4907_s22 + $0x8] sm:$0xff]  ;;  %v6585_v50 = vld [vmem:[%s4907_s22 + $0x30] sm:$0xff] }
 0x1d3   : > { %v2011_v53 = vadd.f32 %v2007_v51, %v1999_v9  ;;  %v2029_v58 = vmul.f32 %v6303_v29, %v2027_v20  ;;  %v2030_v13 = vmul.f32 %v6307_v60, %v2027_v20  ;;  %v2031_v59 = vmul.f32 %v6311_v1, %v2027_v20  ;;  %v6519_v29 = vld [vmem:[%s4844_s29 + $0x8] sm:$0xff]  ;;  %v6523_v60 = vld [vmem:[%s4844_s29 + $0x10] sm:$0xff]  ;;  %v6527_v1 = vld [vmem:[%s4844_s29 + $0x18] sm:$0xff] }
 0x1d4   : > { %v2020_v55 = vadd.f32 %v2016_v37, %v2008_v21  ;;  %v2021_v38 = vadd.f32 %v2017_v12, %v2009_v30  ;;  %v2022_v19 = vadd.f32 %v2018_v44, %v2010_v18  ;;  %v2045_v6 = vmul.f32 %v6515_v36, %v3920_v33  ;;  %v6569_v37 = vld [vmem:[%s4907_s22 + $0x10] sm:$0xff]  ;;  %v6577_v21 = vld [vmem:[%s4907_s22 + $0x20] sm:$0xff] }
 0x1d5   : > { %v2023_v54 = vadd.f32 %v2019_v63, %v2011_v53  ;;  %v2046_v17 = vmul.f32 %v6519_v29, %v3920_v33  ;;  %v2047_v23 = vmul.f32 %v6523_v60, %v3920_v33  ;;  %v2048_v45 = vmul.f32 %v6527_v1, %v3920_v33 }
 0x1d6   : > { %v2032_v26 = vadd.f32 %v2028_v34, %v2020_v55  ;;  %v2033_v52 = vadd.f32 %v2029_v58, %v2021_v38  ;;  %v2034_v43 = vadd.f32 %v2030_v13, %v2022_v19  ;;  %v2049_v48 = vadd.f32 %v6531_v46, %v2045_v6  ;;  %v6581_v34 = vld [vmem:[%s4907_s22 + $0x28] sm:$0xff]  ;;  %v6589_v55 = vld [vmem:[%s4907_s22 + $0x38] sm:$0xff]  ;;  %v6601_v13 = vld [vmem:[%s4907_s22 + $0x50] sm:$0xff] }
 0x1d7   : > { %v2035_v0 = vadd.f32 %v2031_v59, %v2023_v54  ;;  %v2050_v22 = vadd.f32 %v6535_v28, %v2046_v17  ;;  %v2051_v61 = vadd.f32 %v6539_v47, %v2047_v23  ;;  %v2052_v8 = vadd.f32 %v6543_v35, %v2048_v45  ;;  %v6597_v58 = vld [vmem:[%s4907_s22 + $0x48] sm:$0xff]  ;;  %v6605_v59 = vld [vmem:[%s4907_s22 + $0x58] sm:$0xff]  ;;  %v6611_v23 = vld [vmem:[%s4907_s22 + $0x60] sm:$0xff] }
 0x1d8   : > { %4012 = vtanh.f32 %v2032_v26  ;;  %v6593_v26 = vld [vmem:[%s4907_s22 + $0x40] sm:$0xff] }
 0x1d9   : > { %4014 = vtanh.f32 %v2033_v52 }
 0x1da   : > { %4016 = vtanh.f32 %v2034_v43 }
 0x1db   : > { %4018 = vtanh.f32 %v2035_v0 }
 0x1e2   : > { %v4013_v42 = vpop.eup %4012 }
 0x1e3   : > { %v2056_v11 = vrot.slane %v4013_v42, %v4851_v2  ;;  %v2068_v40 = vrot.slane %v4013_v42, %v4853_v3  ;;  %v2080_v31 = vrot.slane %v4013_v42, %v4855_v4  ;;  %v2092_v20 = vrot.slane %v4013_v42, %v4857_v5  ;;  %v6608_v17 = vpop.eup %4014 }
 0x1e4   : > { %v2104_v7 = vrot.slane %v4013_v42, %v4871_v10  ;;  %v6552_v27 = vrot.slane %v4013_v42, %v4882_v14  ;;  %v6555_v39 = vrot.slane %v4013_v42, %v4884_v15  ;;  %v6558_v57 = vrot.slane %v4013_v42, %v4886_v16 }
 0x1e5   : > { %v2057_v25 = vmul.f32 %v6561_v41, %v2056_v11  ;;  %v2058_v56 = vmul.f32 %v6565_v62, %v2056_v11  ;;  %v2059_v9 = vmul.f32 %v6569_v37, %v2056_v11  ;;  %v2060_v51 = vmul.f32 %v6573_v32, %v2056_v11 }
 0x1e6   : > { %v2069_v49 = vmul.f32 %v6577_v21, %v2068_v40  ;;  %v2070_v30 = vmul.f32 %v6581_v34, %v2068_v40  ;;  %v2071_v12 = vmul.f32 %v6585_v50, %v2068_v40  ;;  %v2072_v18 = vmul.f32 %v6589_v55, %v2068_v40  ;;  %v6626_v40 = vpop.eup %4016 }
 0x1e7   : > { %v2061_v24 = vadd.f32 %v2057_v25, %v2049_v48  ;;  %v2062_v44 = vadd.f32 %v2058_v56, %v2050_v22  ;;  %v2063_v53 = vadd.f32 %v2059_v9, %v2051_v61  ;;  %v2064_v63 = vadd.f32 %v2060_v51, %v2052_v8  ;;  %v6615_v48 = vld [vmem:[%s4907_s22 + $0x68] sm:$0xff]  ;;  %v6619_v22 = vld [vmem:[%s4907_s22 + $0x70] sm:$0xff]  ;;  %v6623_v8 = vld [vmem:[%s4907_s22 + $0x78] sm:$0xff]  ;;  %v6628_v51 = vpop.eup %4018 }
 0x1e8   : > { %v2081_v38 = vmul.f32 %v6593_v26, %v2080_v31  ;;  %v2082_v19 = vmul.f32 %v6597_v58, %v2080_v31  ;;  %v2083_v54 = vmul.f32 %v6601_v13, %v2080_v31  ;;  %v2084_v33 = vmul.f32 %v6605_v59, %v2080_v31 }
 0x1e9   : > { %v2073_v52 = vadd.f32 %v2069_v49, %v2061_v24  ;;  %v2074_v43 = vadd.f32 %v2070_v30, %v2062_v44  ;;  %v2075_v6 = vadd.f32 %v2071_v12, %v2063_v53  ;;  %v2076_v0 = vadd.f32 %v2072_v18, %v2064_v63  ;;  %v6631_v49 = vld [vmem:[%s4907_s22 + $0x80] sm:$0xff]  ;;  %v6635_v12 = vld [vmem:[%s4907_s22 + $0x88] sm:$0xff]  ;;  %v6639_v18 = vld [vmem:[%s4907_s22 + $0x90] sm:$0xff] }
 0x1ea   : > { %v2093_v45 = vmul.f32 %v6611_v23, %v2092_v20  ;;  %v2094_v42 = vmul.f32 %v6615_v48, %v2092_v20  ;;  %v2095_v61 = vmul.f32 %v6619_v22, %v2092_v20  ;;  %v2096_v11 = vmul.f32 %v6623_v8, %v2092_v20  ;;  %v6643_v44 = vld [vmem:[%s4907_s22 + $0x98] sm:$0xff] }
 0x1eb   : > { %v2085_v31 = vadd.f32 %v2081_v38, %v2073_v52  ;;  %v2086_v25 = vadd.f32 %v2082_v19, %v2074_v43  ;;  %v2087_v56 = vadd.f32 %v2083_v54, %v2075_v6  ;;  %v2088_v9 = vadd.f32 %v2084_v33, %v2076_v0  ;;  %9035 = vst [vmem:[#allocation111_spill] sm:$0xff] %v6643_v44  ;;  %v6647_v33 = vld [vmem:[%s4907_s22 + $0xa0] sm:$0xff]  ;;  %v6652_v43 = vld [vmem:[%s4907_s22 + $0xa8] sm:$0xff]  ;;  %v6657_v0 = vld [vmem:[%s4907_s22 + $0xb0] sm:$0xff] }
 0x1ec   : > { %v2105_v30 = vmul.f32 %v6631_v49, %v2104_v7  ;;  %v2106_v20 = vmul.f32 %v6635_v12, %v2104_v7  ;;  %v2107_v24 = vmul.f32 %v6639_v18, %v2104_v7  ;;  %v2108_v53 = vmul.f32 %v6643_v44, %v2104_v7  ;;  %9036 = vst [vmem:[#allocation112_spill] sm:$0xff] %v6647_v33  ;;  %v6775_v44 = vld [vmem:[%s4907_s22 + $0x178] sm:$0xff] }
 0x1ed   : > { %v2097_v63 = vadd.f32 %v2093_v45, %v2085_v31  ;;  %v2098_v38 = vadd.f32 %v2094_v42, %v2086_v25  ;;  %v2099_v19 = vadd.f32 %v2095_v61, %v2087_v56  ;;  %v2100_v54 = vadd.f32 %v2096_v11, %v2088_v9  ;;  %9037 = vst [vmem:[#allocation12_spill] sm:$0xff] %v6652_v43  ;;  %v6662_v45 = vld [vmem:[%s4907_s22 + $0xb8] sm:$0xff]  ;;  %v6667_v56 = vld [vmem:[%s4907_s22 + $0xc0] sm:$0xff] }
 0x1ee   : > { %v2117_v52 = vmul.f32 %v6647_v33, %v6552_v27  ;;  %v2118_v6 = vmul.f32 %v6652_v43, %v6552_v27  ;;  %9038 = vst [vmem:[#allocation13_spill] sm:$0xff] %v6657_v0  ;;  %v2119_v7 = vmul.f32 %v6657_v0, %v6552_v27  ;;  %9039 = vst [vmem:[#allocation14_spill] sm:$0xff] %v6662_v45  ;;  %v6672_v43 = vld [vmem:[%s4907_s22 + $0xc8] sm:$0xff]  ;;  %v6677_v33 = vld [vmem:[%s4907_s22 + $0xd0] sm:$0xff] }
 0x1ef   : > { %v2120_v42 = vmul.f32 %v6662_v45, %v6552_v27  ;;  %v2109_v61 = vadd.f32 %v2105_v30, %v2097_v63  ;;  %v2110_v11 = vadd.f32 %v2106_v20, %v2098_v38  ;;  %v2111_v31 = vadd.f32 %v2107_v24, %v2099_v19  ;;  %9040 = vst [vmem:[#allocation15_spill] sm:$0xff] %v6667_v56  ;;  %v6682_v30 = vld [vmem:[%s4907_s22 + $0xd8] sm:$0xff]  ;;  %v6687_v19 = vld [vmem:[%s4907_s22 + $0xe0] sm:$0xff]  ;;  %v6755_v45 = vld [vmem:[%s4907_s22 + $0x150] sm:$0xff] }
 0x1f0   : > { %v2112_v25 = vadd.f32 %v2108_v53, %v2100_v54  ;;  %v2129_v9 = vmul.f32 %v6667_v56, %v6555_v39  ;;  %9041 = vst [vmem:[#allocation16_spill] sm:$0xff] %v6672_v43  ;;  %v2130_v0 = vmul.f32 %v6672_v43, %v6555_v39  ;;  %9042 = vst [vmem:[#allocation17_spill] sm:$0xff] %v6677_v33  ;;  %v6692_v43 = vld [vmem:[%s4907_s22 + $0xe8] sm:$0xff] }
 0x1f1   : > { %v2131_v27 = vmul.f32 %v6677_v33, %v6555_v39  ;;  %9043 = vst [vmem:[#allocation18_spill] sm:$0xff] %v6682_v30  ;;  %v2132_v20 = vmul.f32 %v6682_v30, %v6555_v39  ;;  %v2121_v24 = vadd.f32 %v2117_v52, %v2109_v61  ;;  %v2122_v53 = vadd.f32 %v2118_v6, %v2110_v11  ;;  %v6697_v33 = vld [vmem:[%s4907_s22 + $0xf0] sm:$0xff]  ;;  %v6702_v52 = vld [vmem:[%s4907_s22 + $0xf8] sm:$0xff] }
 0x1f2   : > { %v2123_v63 = vadd.f32 %v2119_v7, %v2111_v31  ;;  %v2124_v38 = vadd.f32 %v2120_v42, %v2112_v25  ;;  %9044 = vst [vmem:[#allocation19_spill] sm:$0xff] %v6687_v19  ;;  %v2141_v54 = vmul.f32 %v6687_v19, %v6558_v57  ;;  %9045 = vst [vmem:[#allocation20_spill] sm:$0xff] %v6692_v43  ;;  %v6727_v19 = vld [vmem:[%s4907_s22 + $0x118] sm:$0xff] }
 0x1f3   : > { %v2142_v56 = vmul.f32 %v6692_v43, %v6558_v57  ;;  %9046 = vst [vmem:[#allocation21_spill] sm:$0xff] %v6697_v33  ;;  %v2143_v39 = vmul.f32 %v6697_v33, %v6558_v57  ;;  %9047 = vst [vmem:[#allocation22_spill] sm:$0xff] %v6702_v52  ;;  %v2144_v6 = vmul.f32 %v6702_v52, %v6558_v57  ;;  %v6723_v52 = vld [vmem:[%s4907_s22 + $0x110] sm:$0xff] }
 0x1f4   : > { %v2133_v7 = vadd.f32 %v2129_v9, %v2121_v24  ;;  %v2134_v42 = vadd.f32 %v2130_v0, %v2122_v53  ;;  %v2135_v61 = vadd.f32 %v2131_v27, %v2123_v63  ;;  %v2136_v11 = vadd.f32 %v2132_v20, %v2124_v38  ;;  %v6715_v24 = vld [vmem:[%s4907_s22 + $0x100] sm:$0xff]  ;;  %v6719_v63 = vld [vmem:[%s4907_s22 + $0x108] sm:$0xff]  ;;  %9050 = vst [vmem:[#allocation25_spill] sm:$0xff] %v6723_v52 }
 0x1f5   : > { %v2152_v31 = vrot.slane %v6608_v17, %v4851_v2  ;;  %v2164_v25 = vrot.slane %v6608_v17, %v4853_v3  ;;  %v2176_v33 = vrot.slane %v6608_v17, %v4855_v4  ;;  %v2188_v57 = vrot.slane %v6608_v17, %v4857_v5  ;;  %9048 = vst [vmem:[#allocation23_spill] sm:$0xff] %v6715_v24 }
 0x1f6   : > { %v2145_v9 = vadd.f32 %v2141_v54, %v2133_v7  ;;  %v2146_v0 = vadd.f32 %v2142_v56, %v2134_v42  ;;  %v2147_v27 = vadd.f32 %v2143_v39, %v2135_v61  ;;  %v2148_v20 = vadd.f32 %v2144_v6, %v2136_v11  ;;  %9049 = vst [vmem:[#allocation24_spill] sm:$0xff] %v6719_v63  ;;  %v6731_v54 = vld [vmem:[%s4907_s22 + $0x120] sm:$0xff]  ;;  %v6735_v6 = vld [vmem:[%s4907_s22 + $0x128] sm:$0xff]  ;;  %v6739_v42 = vld [vmem:[%s4907_s22 + $0x130] sm:$0xff] }
 0x1f7   : > { %v2153_v53 = vmul.f32 %v6715_v24, %v2152_v31  ;;  %v2154_v38 = vmul.f32 %v6719_v63, %v2152_v31  ;;  %v2155_v43 = vmul.f32 %v6723_v52, %v2152_v31  ;;  %9051 = vst [vmem:[#allocation26_spill] sm:$0xff] %v6727_v19  ;;  %v2156_v56 = vmul.f32 %v6727_v19, %v2152_v31  ;;  %v6743_v11 = vld [vmem:[%s4907_s22 + $0x138] sm:$0xff] }
 0x1f8   : > { %9052 = vst [vmem:[#allocation27_spill] sm:$0xff] %v6731_v54  ;;  %v2165_v39 = vmul.f32 %v6731_v54, %v2164_v25  ;;  %9053 = vst [vmem:[#allocation28_spill] sm:$0xff] %v6735_v6  ;;  %v2166_v7 = vmul.f32 %v6735_v6, %v2164_v25  ;;  %v2167_v61 = vmul.f32 %v6739_v42, %v2164_v25  ;;  %v6747_v54 = vld [vmem:[%s4907_s22 + $0x140] sm:$0xff]  ;;  %v6751_v6 = vld [vmem:[%s4907_s22 + $0x148] sm:$0xff] }
 0x1f9   : > { %9054 = vst [vmem:[#allocation29_spill] sm:$0xff] %v6739_v42  ;;  %9055 = vst [vmem:[#allocation30_spill] sm:$0xff] %v6743_v11  ;;  %v2168_v52 = vmul.f32 %v6743_v11, %v2164_v25  ;;  %v2157_v63 = vadd.f32 %v2153_v53, %v2145_v9  ;;  %v2158_v31 = vadd.f32 %v2154_v38, %v2146_v0  ;;  %v6759_v9 = vld [vmem:[%s4907_s22 + $0x158] sm:$0xff]  ;;  %v6763_v38 = vld [vmem:[%s4907_s22 + $0x160] sm:$0xff] }
 0x1fa   : > { %v2159_v19 = vadd.f32 %v2155_v43, %v2147_v27  ;;  %v2160_v24 = vadd.f32 %v2156_v56, %v2148_v20  ;;  %9056 = vst [vmem:[#allocation31_spill] sm:$0xff] %v6747_v54  ;;  %v2177_v30 = vmul.f32 %v6747_v54, %v2176_v33  ;;  %9057 = vst [vmem:[#allocation32_spill] sm:$0xff] %v6751_v6  ;;  %v6767_v54 = vld [vmem:[%s4907_s22 + $0x168] sm:$0xff]  ;;  %v6771_v11 = vld [vmem:[%s4907_s22 + $0x170] sm:$0xff] }
 0x1fb   : > { %v2178_v42 = vmul.f32 %v6751_v6, %v2176_v33  ;;  %9058 = vst [vmem:[#allocation33_spill] sm:$0xff] %v6755_v45  ;;  %v2179_v25 = vmul.f32 %v6755_v45, %v2176_v33  ;;  %v2180_v43 = vmul.f32 %v6759_v9, %v2176_v33  ;;  %v2169_v0 = vadd.f32 %v2165_v39, %v2157_v63 }
 0x1fc   : > { %v2170_v27 = vadd.f32 %v2166_v7, %v2158_v31  ;;  %v2171_v20 = vadd.f32 %v2167_v61, %v2159_v19  ;;  %v2172_v53 = vadd.f32 %v2168_v52, %v2160_v24  ;;  %9059 = vst [vmem:[#allocation34_spill] sm:$0xff] %v6763_v38  ;;  %v2189_v56 = vmul.f32 %v6763_v38, %v2188_v57  ;;  %v6847_v38 = vld [vmem:[%s4907_s22 + $0x1f8] sm:$0xff] }
 0x1fd   : > { %9060 = vst [vmem:[#allocation35_spill] sm:$0xff] %v6767_v54  ;;  %v2190_v6 = vmul.f32 %v6767_v54, %v2188_v57  ;;  %9061 = vst [vmem:[#allocation36_spill] sm:$0xff] %v6771_v11  ;;  %v2191_v45 = vmul.f32 %v6771_v11, %v2188_v57  ;;  %v2192_v33 = vmul.f32 %v6775_v44, %v2188_v57  ;;  %v6827_v54 = vld [vmem:[%s4907_s22 + $0x1d0] sm:$0xff] }
 0x1fe   : > { %9062 = vst [vmem:[#allocation37_spill] sm:$0xff] %v6775_v44  ;;  %v2181_v19 = vadd.f32 %v2177_v30, %v2169_v0  ;;  %v2182_v52 = vadd.f32 %v2178_v42, %v2170_v27  ;;  %v2183_v24 = vadd.f32 %v2179_v25, %v2171_v20  ;;  %v2184_v63 = vadd.f32 %v2180_v43, %v2172_v53  ;;  %v6787_v43 = vld [vmem:[%s4907_s22 + $0x180] sm:$0xff]  ;;  %v6791_v27 = vld [vmem:[%s4907_s22 + $0x188] sm:$0xff]  ;;  %v6795_v53 = vld [vmem:[%s4907_s22 + $0x190] sm:$0xff] }
 0x1ff   : > { %v2200_v39 = vrot.slane %v6608_v17, %v4871_v10  ;;  %v2212_v7 = vrot.slane %v6608_v17, %v4882_v14  ;;  %v2224_v61 = vrot.slane %v6608_v17, %v4884_v15  ;;  %v2236_v57 = vrot.slane %v6608_v17, %v4886_v16  ;;  %9063 = vst [vmem:[#allocation38_spill] sm:$0xff] %v6787_v43  ;;  %v6799_v17 = vld [vmem:[%s4907_s22 + $0x198] sm:$0xff] }
 0x200   : > { %v2193_v30 = vadd.f32 %v2189_v56, %v2181_v19  ;;  %v2194_v42 = vadd.f32 %v2190_v6, %v2182_v52  ;;  %v2195_v31 = vadd.f32 %v2191_v45, %v2183_v24  ;;  %v2196_v25 = vadd.f32 %v2192_v33, %v2184_v63  ;;  %9064 = vst [vmem:[#allocation39_spill] sm:$0xff] %v6791_v27  ;;  %v6803_v6 = vld [vmem:[%s4907_s22 + $0x1a0] sm:$0xff]  ;;  %v6807_v33 = vld [vmem:[%s4907_s22 + $0x1a8] sm:$0xff]  ;;  %v6811_v52 = vld [vmem:[%s4907_s22 + $0x1b0] sm:$0xff] }
 0x201   : > { %v2201_v0 = vmul.f32 %v6787_v43, %v2200_v39  ;;  %v2202_v20 = vmul.f32 %v6791_v27, %v2200_v39  ;;  %9065 = vst [vmem:[#allocation40_spill] sm:$0xff] %v6795_v53  ;;  %v2203_v44 = vmul.f32 %v6795_v53, %v2200_v39  ;;  %9066 = vst [vmem:[#allocation41_spill] sm:$0xff] %v6799_v17  ;;  %v6815_v63 = vld [vmem:[%s4907_s22 + $0x1b8] sm:$0xff] }
 0x202   : > { %v2204_v45 = vmul.f32 %v6799_v17, %v2200_v39  ;;  %9067 = vst [vmem:[#allocation42_spill] sm:$0xff] %v6803_v6  ;;  %v2213_v56 = vmul.f32 %v6803_v6, %v2212_v7  ;;  %9068 = vst [vmem:[#allocation43_spill] sm:$0xff] %v6807_v33  ;;  %v2214_v19 = vmul.f32 %v6807_v33, %v2212_v7  ;;  %v6819_v6 = vld [vmem:[%s4907_s22 + $0x1c0] sm:$0xff]  ;;  %v6823_v33 = vld [vmem:[%s4907_s22 + $0x1c8] sm:$0xff] }
 0x203   : > { %9069 = vst [vmem:[#allocation44_spill] sm:$0xff] %v6811_v52  ;;  %v2215_v24 = vmul.f32 %v6811_v52, %v2212_v7  ;;  %9070 = vst [vmem:[#allocation45_spill] sm:$0xff] %v6815_v63  ;;  %v2216_v53 = vmul.f32 %v6815_v63, %v2212_v7  ;;  %v2205_v27 = vadd.f32 %v2201_v0, %v2193_v30  ;;  %v6831_v30 = vld [vmem:[%s4907_s22 + $0x1d8] sm:$0xff]  ;;  %v6843_v63 = vld [vmem:[%s4907_s22 + $0x1f0] sm:$0xff] }
 0x204   : > { %v2206_v39 = vadd.f32 %v2202_v20, %v2194_v42  ;;  %v2207_v17 = vadd.f32 %v2203_v44, %v2195_v31  ;;  %v2208_v43 = vadd.f32 %v2204_v45, %v2196_v25  ;;  %9071 = vst [vmem:[#allocation46_spill] sm:$0xff] %v6819_v6  ;;  %v2225_v11 = vmul.f32 %v6819_v6, %v2224_v61  ;;  %v6835_v20 = vld [vmem:[%s4907_s22 + $0x1e0] sm:$0xff]  ;;  %v6839_v6 = vld [vmem:[%s4907_s22 + $0x1e8] sm:$0xff] }
 0x205   : > { %9072 = vst [vmem:[#allocation47_spill] sm:$0xff] %v6823_v33  ;;  %v2226_v52 = vmul.f32 %v6823_v33, %v2224_v61  ;;  %9073 = vst [vmem:[#allocation48_spill] sm:$0xff] %v6827_v54  ;;  %v2227_v7 = vmul.f32 %v6827_v54, %v2224_v61  ;;  %v2228_v44 = vmul.f32 %v6831_v30, %v2224_v61 }
 0x206   : > { %9074 = vst [vmem:[#allocation49_spill] sm:$0xff] %v6831_v30  ;;  %v2217_v42 = vadd.f32 %v2213_v56, %v2205_v27  ;;  %v2218_v31 = vadd.f32 %v2214_v19, %v2206_v39  ;;  %v2219_v25 = vadd.f32 %v2215_v24, %v2207_v17  ;;  %v2220_v0 = vadd.f32 %v2216_v53, %v2208_v43  ;;  %v6919_v30 = vld [vmem:[%s4907_s22 + $0x278] sm:$0xff] }
 0x207   : > { %9075 = vst [vmem:[#allocation50_spill] sm:$0xff] %v6835_v20  ;;  %v2237_v45 = vmul.f32 %v6835_v20, %v2236_v57  ;;  %9076 = vst [vmem:[#allocation51_spill] sm:$0xff] %v6839_v6  ;;  %v2238_v33 = vmul.f32 %v6839_v6, %v2236_v57  ;;  %v2239_v54 = vmul.f32 %v6843_v63, %v2236_v57  ;;  %v6899_v20 = vld [vmem:[%s4907_s22 + $0x250] sm:$0xff] }
 0x208   : > { %9077 = vst [vmem:[#allocation52_spill] sm:$0xff] %v6843_v63  ;;  %9078 = vst [vmem:[#allocation53_spill] sm:$0xff] %v6847_v38  ;;  %v2240_v61 = vmul.f32 %v6847_v38, %v2236_v57  ;;  %v2229_v27 = vadd.f32 %v2225_v11, %v2217_v42  ;;  %v2230_v43 = vadd.f32 %v2226_v52, %v2218_v31  ;;  %v6863_v31 = vld [vmem:[%s4907_s22 + $0x208] sm:$0xff]  ;;  %v6871_v63 = vld [vmem:[%s4907_s22 + $0x218] sm:$0xff] }
 0x209   : > { %v2231_v53 = vadd.f32 %v2227_v7, %v2219_v25  ;;  %v2232_v17 = vadd.f32 %v2228_v44, %v2220_v0  ;;  %v2248_v56 = vrot.slane %v6626_v40, %v4851_v2  ;;  %v2260_v19 = vrot.slane %v6626_v40, %v4853_v3  ;;  %v6859_v44 = vld [vmem:[%s4907_s22 + $0x200] sm:$0xff]  ;;  %9080 = vst [vmem:[#allocation55_spill] sm:$0xff] %v6863_v31  ;;  %v6867_v0 = vld [vmem:[%s4907_s22 + $0x210] sm:$0xff] }
 0x20a   : > { %v2272_v24 = vrot.slane %v6626_v40, %v4855_v4  ;;  %v2284_v57 = vrot.slane %v6626_v40, %v4857_v5  ;;  %v2241_v11 = vadd.f32 %v2237_v45, %v2229_v27  ;;  %v2242_v52 = vadd.f32 %v2238_v33, %v2230_v43  ;;  %9079 = vst [vmem:[#allocation54_spill] sm:$0xff] %v6859_v44  ;;  %v6875_v33 = vld [vmem:[%s4907_s22 + $0x220] sm:$0xff]  ;;  %v6883_v43 = vld [vmem:[%s4907_s22 + $0x230] sm:$0xff] }
 0x20b   : > { %v2243_v39 = vadd.f32 %v2239_v54, %v2231_v53  ;;  %v2244_v7 = vadd.f32 %v2240_v61, %v2232_v17  ;;  %v2249_v42 = vmul.f32 %v6859_v44, %v2248_v56  ;;  %v2250_v25 = vmul.f32 %v6863_v31, %v2248_v56  ;;  %9081 = vst [vmem:[#allocation56_spill] sm:$0xff] %v6867_v0  ;;  %v6879_v61 = vld [vmem:[%s4907_s22 + $0x228] sm:$0xff]  ;;  %v6887_v17 = vld [vmem:[%s4907_s22 + $0x238] sm:$0xff] }
 0x20c   : > { %v2251_v38 = vmul.f32 %v6867_v0, %v2248_v56  ;;  %9082 = vst [vmem:[#allocation57_spill] sm:$0xff] %v6871_v63  ;;  %v2252_v54 = vmul.f32 %v6871_v63, %v2248_v56  ;;  %9083 = vst [vmem:[#allocation58_spill] sm:$0xff] %v6875_v33  ;;  %v2261_v45 = vmul.f32 %v6875_v33, %v2260_v19  ;;  %v6891_v33 = vld [vmem:[%s4907_s22 + $0x240] sm:$0xff] }
 0x20d   : > { %9084 = vst [vmem:[#allocation59_spill] sm:$0xff] %v6879_v61  ;;  %v2262_v27 = vmul.f32 %v6879_v61, %v2260_v19  ;;  %9085 = vst [vmem:[#allocation60_spill] sm:$0xff] %v6883_v43  ;;  %v2263_v53 = vmul.f32 %v6883_v43, %v2260_v19  ;;  %v2264_v0 = vmul.f32 %v6887_v17, %v2260_v19  ;;  %v6895_v61 = vld [vmem:[%s4907_s22 + $0x248] sm:$0xff] }
 0x20e   : > { %9086 = vst [vmem:[#allocation61_spill] sm:$0xff] %v6887_v17  ;;  %v2253_v31 = vadd.f32 %v2249_v42, %v2241_v11  ;;  %v2254_v56 = vadd.f32 %v2250_v25, %v2242_v52  ;;  %v2255_v63 = vadd.f32 %v2251_v38, %v2243_v39  ;;  %v2256_v44 = vadd.f32 %v2252_v54, %v2244_v7  ;;  %v6903_v11 = vld [vmem:[%s4907_s22 + $0x258] sm:$0xff]  ;;  %v6907_v25 = vld [vmem:[%s4907_s22 + $0x260] sm:$0xff]  ;;  %v6915_v17 = vld [vmem:[%s4907_s22 + $0x270] sm:$0xff] }
 0x20f   : > { %9087 = vst [vmem:[#allocation62_spill] sm:$0xff] %v6891_v33  ;;  %v2273_v6 = vmul.f32 %v6891_v33, %v2272_v24  ;;  %9088 = vst [vmem:[#allocation63_spill] sm:$0xff] %v6895_v61  ;;  %v2274_v43 = vmul.f32 %v6895_v61, %v2272_v24  ;;  %v2275_v19 = vmul.f32 %v6899_v20, %v2272_v24  ;;  %v6911_v33 = vld [vmem:[%s4907_s22 + $0x268] sm:$0xff] }
 0x210   : > { %9089 = vst [vmem:[#allocation64_spill] sm:$0xff] %v6899_v20  ;;  %v2276_v38 = vmul.f32 %v6903_v11, %v2272_v24  ;;  %v2265_v52 = vadd.f32 %v2261_v45, %v2253_v31  ;;  %v2266_v39 = vadd.f32 %v2262_v27, %v2254_v56  ;;  %v2267_v7 = vadd.f32 %v2263_v53, %v2255_v63 }
 0x211   : > { %v2268_v42 = vadd.f32 %v2264_v0, %v2256_v44  ;;  %9090 = vst [vmem:[#allocation65_spill] sm:$0xff] %v6907_v25  ;;  %v2285_v54 = vmul.f32 %v6907_v25, %v2284_v57  ;;  %9091 = vst [vmem:[#allocation66_spill] sm:$0xff] %v6911_v33  ;;  %v2286_v61 = vmul.f32 %v6911_v33, %v2284_v57  ;;  %v6971_v33 = vld [vmem:[%s4907_s22 + $0x2d0] sm:$0xff]  ;;  %v6991_v25 = vld [vmem:[%s4907_s22 + $0x2f8] sm:$0xff] }
 0x212   : > { %9092 = vst [vmem:[#allocation67_spill] sm:$0xff] %v6915_v17  ;;  %v2287_v20 = vmul.f32 %v6915_v17, %v2284_v57  ;;  %9093 = vst [vmem:[#allocation68_spill] sm:$0xff] %v6919_v30  ;;  %v2288_v24 = vmul.f32 %v6919_v30, %v2284_v57  ;;  %v2277_v63 = vadd.f32 %v2273_v6, %v2265_v52 }
 0x213   : > { %v2278_v44 = vadd.f32 %v2274_v43, %v2266_v39  ;;  %v2279_v31 = vadd.f32 %v2275_v19, %v2267_v7  ;;  %v2280_v0 = vadd.f32 %v2276_v38, %v2268_v42  ;;  %v2296_v45 = vrot.slane %v6626_v40, %v4871_v10  ;;  %v6931_v38 = vld [vmem:[%s4907_s22 + $0x280] sm:$0xff]  ;;  %v6935_v39 = vld [vmem:[%s4907_s22 + $0x288] sm:$0xff]  ;;  %v6939_v42 = vld [vmem:[%s4907_s22 + $0x290] sm:$0xff]  ;;  %9104 = vst [vmem:[#allocation79_spill] sm:$0xff] %v6971_v33 }
 0x214   : > { %v2308_v27 = vrot.slane %v6626_v40, %v4882_v14  ;;  %v2320_v53 = vrot.slane %v6626_v40, %v4884_v15  ;;  %v2332_v57 = vrot.slane %v6626_v40, %v4886_v16  ;;  %v2289_v6 = vadd.f32 %v2285_v54, %v2277_v63  ;;  %9094 = vst [vmem:[#allocation69_spill] sm:$0xff] %v6931_v38  ;;  %v6943_v40 = vld [vmem:[%s4907_s22 + $0x298] sm:$0xff] }
 0x215   : > { %v2290_v43 = vadd.f32 %v2286_v61, %v2278_v44  ;;  %v2291_v56 = vadd.f32 %v2287_v20, %v2279_v31  ;;  %v2292_v19 = vadd.f32 %v2288_v24, %v2280_v0  ;;  %v2297_v52 = vmul.f32 %v6931_v38, %v2296_v45  ;;  %9095 = vst [vmem:[#allocation70_spill] sm:$0xff] %v6935_v39  ;;  %v6947_v61 = vld [vmem:[%s4907_s22 + $0x2a0] sm:$0xff]  ;;  %v6951_v24 = vld [vmem:[%s4907_s22 + $0x2a8] sm:$0xff]  ;;  %v6955_v44 = vld [vmem:[%s4907_s22 + $0x2b0] sm:$0xff] }
 0x216   : > { %v2298_v7 = vmul.f32 %v6935_v39, %v2296_v45  ;;  %9096 = vst [vmem:[#allocation71_spill] sm:$0xff] %v6939_v42  ;;  %v2299_v30 = vmul.f32 %v6939_v42, %v2296_v45  ;;  %9097 = vst [vmem:[#allocation72_spill] sm:$0xff] %v6943_v40  ;;  %v2300_v20 = vmul.f32 %v6943_v40, %v2296_v45  ;;  %v6959_v0 = vld [vmem:[%s4907_s22 + $0x2b8] sm:$0xff] }
 0x217   : > { %9098 = vst [vmem:[#allocation73_spill] sm:$0xff] %v6947_v61  ;;  %v2309_v54 = vmul.f32 %v6947_v61, %v2308_v27  ;;  %9099 = vst [vmem:[#allocation74_spill] sm:$0xff] %v6951_v24  ;;  %v2310_v63 = vmul.f32 %v6951_v24, %v2308_v27  ;;  %v2311_v31 = vmul.f32 %v6955_v44, %v2308_v27  ;;  %v6963_v61 = vld [vmem:[%s4907_s22 + $0x2c0] sm:$0xff]  ;;  %v6967_v24 = vld [vmem:[%s4907_s22 + $0x2c8] sm:$0xff] }
 0x218   : > { %9100 = vst [vmem:[#allocation75_spill] sm:$0xff] %v6955_v44  ;;  %9101 = vst [vmem:[#allocation76_spill] sm:$0xff] %v6959_v0  ;;  %v2312_v42 = vmul.f32 %v6959_v0, %v2308_v27  ;;  %v2301_v39 = vadd.f32 %v2297_v52, %v2289_v6  ;;  %v2302_v45 = vadd.f32 %v2298_v7, %v2290_v43  ;;  %v6975_v6 = vld [vmem:[%s4907_s22 + $0x2d8] sm:$0xff]  ;;  %v6979_v7 = vld [vmem:[%s4907_s22 + $0x2e0] sm:$0xff] }
 0x219   : > { %v2303_v40 = vadd.f32 %v2299_v30, %v2291_v56  ;;  %v2304_v38 = vadd.f32 %v2300_v20, %v2292_v19  ;;  %9102 = vst [vmem:[#allocation77_spill] sm:$0xff] %v6963_v61  ;;  %v2321_v17 = vmul.f32 %v6963_v61, %v2320_v53  ;;  %9103 = vst [vmem:[#allocation78_spill] sm:$0xff] %v6967_v24  ;;  %v6983_v61 = vld [vmem:[%s4907_s22 + $0x2e8] sm:$0xff]  ;;  %v6987_v0 = vld [vmem:[%s4907_s22 + $0x2f0] sm:$0xff] }
 0x21a   : > { %v2322_v44 = vmul.f32 %v6967_v24, %v2320_v53  ;;  %v2323_v27 = vmul.f32 %v6971_v33, %v2320_v53  ;;  %9105 = vst [vmem:[#allocation80_spill] sm:$0xff] %v6975_v6  ;;  %v2324_v30 = vmul.f32 %v6975_v6, %v2320_v53  ;;  %v2313_v43 = vadd.f32 %v2309_v54, %v2301_v39  ;;  %v7063_v6 = vld [vmem:[%s4907_s22 + $0x378] sm:$0xff] }
 0x21b   : > { %v2314_v56 = vadd.f32 %v2310_v63, %v2302_v45  ;;  %v2315_v19 = vadd.f32 %v2311_v31, %v2303_v40  ;;  %v2316_v52 = vadd.f32 %v2312_v42, %v2304_v38  ;;  %9106 = vst [vmem:[#allocation81_spill] sm:$0xff] %v6979_v7  ;;  %v2333_v20 = vmul.f32 %v6979_v7, %v2332_v57  ;;  %v7043_v7 = vld [vmem:[%s4907_s22 + $0x350] sm:$0xff] }
 0x21c   : > { %9107 = vst [vmem:[#allocation82_spill] sm:$0xff] %v6983_v61  ;;  %v2334_v24 = vmul.f32 %v6983_v61, %v2332_v57  ;;  %9108 = vst [vmem:[#allocation83_spill] sm:$0xff] %v6987_v0  ;;  %v2335_v33 = vmul.f32 %v6987_v0, %v2332_v57  ;;  %v2336_v53 = vmul.f32 %v6991_v25, %v2332_v57  ;;  %v7015_v0 = vld [vmem:[%s4907_s22 + $0x318] sm:$0xff] }
 0x21d   : > { %9109 = vst [vmem:[#allocation84_spill] sm:$0xff] %v6991_v25  ;;  %v2325_v39 = vadd.f32 %v2321_v17, %v2313_v43  ;;  %v2326_v38 = vadd.f32 %v2322_v44, %v2314_v56  ;;  %v2327_v42 = vadd.f32 %v2323_v27, %v2315_v19  ;;  %v2328_v40 = vadd.f32 %v2324_v30, %v2316_v52  ;;  %v7003_v30 = vld [vmem:[%s4907_s22 + $0x300] sm:$0xff]  ;;  %v7007_v56 = vld [vmem:[%s4907_s22 + $0x308] sm:$0xff]  ;;  %v7011_v52 = vld [vmem:[%s4907_s22 + $0x310] sm:$0xff] }
 0x21e   : > { %v2344_v54 = vrot.slane %v6628_v51, %v4851_v2  ;;  %v2356_v63 = vrot.slane %v6628_v51, %v4853_v3  ;;  %v2368_v31 = vrot.slane %v6628_v51, %v4855_v4  ;;  %v2380_v57 = vrot.slane %v6628_v51, %v4857_v5  ;;  %9110 = vst [vmem:[#allocation85_spill] sm:$0xff] %v7003_v30 }
 0x21f   : > { %v2337_v17 = vadd.f32 %v2333_v20, %v2325_v39  ;;  %v2338_v44 = vadd.f32 %v2334_v24, %v2326_v38  ;;  %v2339_v45 = vadd.f32 %v2335_v33, %v2327_v42  ;;  %v2340_v27 = vadd.f32 %v2336_v53, %v2328_v40  ;;  %9111 = vst [vmem:[#allocation86_spill] sm:$0xff] %v7007_v56  ;;  %v7019_v24 = vld [vmem:[%s4907_s22 + $0x320] sm:$0xff]  ;;  %v7023_v53 = vld [vmem:[%s4907_s22 + $0x328] sm:$0xff]  ;;  %v7027_v38 = vld [vmem:[%s4907_s22 + $0x330] sm:$0xff] }
 0x220   : > { %v2345_v43 = vmul.f32 %v7003_v30, %v2344_v54  ;;  %v2346_v19 = vmul.f32 %v7007_v56, %v2344_v54  ;;  %9112 = vst [vmem:[#allocation87_spill] sm:$0xff] %v7011_v52  ;;  %v2347_v25 = vmul.f32 %v7011_v52, %v2344_v54  ;;  %9113 = vst [vmem:[#allocation88_spill] sm:$0xff] %v7015_v0  ;;  %v7031_v40 = vld [vmem:[%s4907_s22 + $0x338] sm:$0xff] }
 0x221   : > { %v2348_v33 = vmul.f32 %v7015_v0, %v2344_v54  ;;  %9114 = vst [vmem:[#allocation89_spill] sm:$0xff] %v7019_v24  ;;  %v2357_v20 = vmul.f32 %v7019_v24, %v2356_v63  ;;  %9115 = vst [vmem:[#allocation90_spill] sm:$0xff] %v7023_v53  ;;  %v2358_v39 = vmul.f32 %v7023_v53, %v2356_v63  ;;  %v7035_v24 = vld [vmem:[%s4907_s22 + $0x340] sm:$0xff]  ;;  %v7039_v53 = vld [vmem:[%s4907_s22 + $0x348] sm:$0xff] }
 0x222   : > { %9116 = vst [vmem:[#allocation91_spill] sm:$0xff] %v7027_v38  ;;  %v2359_v42 = vmul.f32 %v7027_v38, %v2356_v63  ;;  %9117 = vst [vmem:[#allocation92_spill] sm:$0xff] %v7031_v40  ;;  %v2360_v52 = vmul.f32 %v7031_v40, %v2356_v63  ;;  %v2349_v56 = vadd.f32 %v2345_v43, %v2337_v17  ;;  %v7047_v17 = vld [vmem:[%s4907_s22 + $0x358] sm:$0xff]  ;;  %v7059_v40 = vld [vmem:[%s4907_s22 + $0x370] sm:$0xff] }
 0x223   : > { %v2350_v54 = vadd.f32 %v2346_v19, %v2338_v44  ;;  %v2351_v0 = vadd.f32 %v2347_v25, %v2339_v45  ;;  %v2352_v30 = vadd.f32 %v2348_v33, %v2340_v27  ;;  %9118 = vst [vmem:[#allocation93_spill] sm:$0xff] %v7035_v24  ;;  %v2369_v61 = vmul.f32 %v7035_v24, %v2368_v31  ;;  %v7051_v19 = vld [vmem:[%s4907_s22 + $0x360] sm:$0xff]  ;;  %v7055_v24 = vld [vmem:[%s4907_s22 + $0x368] sm:$0xff] }
 0x224   : > { %9119 = vst [vmem:[#allocation94_spill] sm:$0xff] %v7039_v53  ;;  %v2370_v38 = vmul.f32 %v7039_v53, %v2368_v31  ;;  %9120 = vst [vmem:[#allocation95_spill] sm:$0xff] %v7043_v7  ;;  %v2371_v63 = vmul.f32 %v7043_v7, %v2368_v31  ;;  %v2372_v25 = vmul.f32 %v7047_v17, %v2368_v31 }
 0x225   : > { %v2361_v44 = vadd.f32 %v2357_v20, %v2349_v56  ;;  %v2362_v45 = vadd.f32 %v2358_v39, %v2350_v54  ;;  %v2363_v27 = vadd.f32 %v2359_v42, %v2351_v0  ;;  %v2364_v43 = vadd.f32 %v2360_v52, %v2352_v30  ;;  %9121 = vst [vmem:[#allocation96_spill] sm:$0xff] %v7059_v40 }
 0x226   : > { %v2381_v33 = vmul.f32 %v7051_v19, %v2380_v57  ;;  %v2382_v53 = vmul.f32 %v7055_v24, %v2380_v57  ;;  %v2383_v7 = vmul.f32 %v7059_v40, %v2380_v57  ;;  %9122 = vst [vmem:[#allocation97_spill] sm:$0xff] %v7063_v6  ;;  %v2384_v31 = vmul.f32 %v7063_v6, %v2380_v57 }
 0x227   : > { %v2373_v0 = vadd.f32 %v2369_v61, %v2361_v44  ;;  %v2374_v30 = vadd.f32 %v2370_v38, %v2362_v45  ;;  %v2375_v56 = vadd.f32 %v2371_v63, %v2363_v27  ;;  %v2376_v52 = vadd.f32 %v2372_v25, %v2364_v43  ;;  %v7073_v61 = vld [vmem:[%s4907_s22 + $0x380] sm:$0xff]  ;;  %v7077_v63 = vld [vmem:[%s4907_s22 + $0x388] sm:$0xff]  ;;  %v7081_v44 = vld [vmem:[%s4907_s22 + $0x390] sm:$0xff] }
 0x228   : > { %v2392_v20 = vrot.slane %v6628_v51, %v4871_v10  ;;  %v2404_v39 = vrot.slane %v6628_v51, %v4882_v14  ;;  %v2416_v42 = vrot.slane %v6628_v51, %v4884_v15  ;;  %9123 = vst [vmem:[#allocation98_spill] sm:$0xff] %v7077_v63  ;;  %9124 = vst [vmem:[#allocation99_spill] sm:$0xff] %v7081_v44  ;;  %v7085_v27 = vld [vmem:[%s4907_s22 + $0x398] sm:$0xff] }
 0x229   : > { %v2385_v54 = vadd.f32 %v2381_v33, %v2373_v0  ;;  %v2386_v40 = vadd.f32 %v2382_v53, %v2374_v30  ;;  %v2387_v57 = vadd.f32 %v2383_v7, %v2375_v56  ;;  %v2388_v6 = vadd.f32 %v2384_v31, %v2376_v52  ;;  %9125 = vst [vmem:[#allocation100_spill] sm:$0xff] %v7085_v27  ;;  %v7089_v53 = vld [vmem:[%s4907_s22 + $0x3a0] sm:$0xff]  ;;  %v7095_v30 = vld [vmem:[%s4907_s22 + $0x3a8] sm:$0xff] }
 0x22a   : > { %v2393_v38 = vmul.f32 %v7073_v61, %v2392_v20  ;;  %v2394_v25 = vmul.f32 %v7077_v63, %v2392_v20  ;;  %v2395_v45 = vmul.f32 %v7081_v44, %v2392_v20  ;;  %v2396_v7 = vmul.f32 %v7085_v27, %v2392_v20  ;;  %9126 = vst [vmem:[#allocation101_spill] sm:$0xff] %v7089_v53  ;;  %v7099_v44 = vld [vmem:[%s4907_s22 + $0x3b0] sm:$0xff]  ;;  %v7103_v27 = vld [vmem:[%s4907_s22 + $0x3c0] sm:$0xff] }
 0x22b   : > { %v2405_v43 = vmul.f32 %v7089_v53, %v2404_v39  ;;  %v2428_v33 = vrot.slane %v6628_v51, %v4886_v16  ;;  %9127 = vst [vmem:[#allocation102_spill] sm:$0xff] %v7095_v30  ;;  %v2406_v56 = vmul.f32 %v7095_v30, %v2404_v39  ;;  %9128 = vst [vmem:[#allocation103_spill] sm:$0xff] %v7099_v44  ;;  %v7107_v51 = vld [vmem:[%s4907_s22 + $0x3b8] sm:$0xff] }
 0x22c   : > { %v2397_v31 = vadd.f32 %v2393_v38, %v2385_v54  ;;  %v2398_v0 = vadd.f32 %v2394_v25, %v2386_v40  ;;  %v2399_v52 = vadd.f32 %v2395_v45, %v2387_v57  ;;  %v2407_v20 = vmul.f32 %v7099_v44, %v2404_v39  ;;  %9129 = vst [vmem:[#allocation104_spill] sm:$0xff] %v7103_v27  ;;  %v7111_v38 = vld [vmem:[%s4907_s22 + $0x3e0] sm:$0xff]  ;;  %v7115_v45 = vld [vmem:[%s4907_s22 + $0x3c8] sm:$0xff] }
 0x22d   : > { %v2417_v53 = vmul.f32 %v7103_v27, %v2416_v42  ;;  %v2400_v63 = vadd.f32 %v2396_v7, %v2388_v6  ;;  %9130 = vst [vmem:[#allocation105_spill] sm:$0xff] %v7107_v51  ;;  %v2408_v40 = vmul.f32 %v7107_v51, %v2404_v39  ;;  %9131 = vst [vmem:[#allocation106_spill] sm:$0xff] %v7111_v38  ;;  %v7119_v6 = vld [vmem:[%s4907_s22 + $0x3d0] sm:$0xff] }
 0x22e   : > { %v2409_v54 = vadd.f32 %v2405_v43, %v2397_v31  ;;  %v2429_v57 = vmul.f32 %v7111_v38, %v2428_v33  ;;  %v2410_v25 = vadd.f32 %v2406_v56, %v2398_v0  ;;  %9132 = vst [vmem:[#allocation107_spill] sm:$0xff] %v7115_v45  ;;  %v2418_v44 = vmul.f32 %v7115_v45, %v2416_v42  ;;  %v7123_v43 = vld [vmem:[%s4907_s22 + $0x3d8] sm:$0xff]  ;;  %v7127_v56 = vld [vmem:[%s4907_s22 + $0x3e8] sm:$0xff] }
 0x22f   : > { %v2411_v27 = vadd.f32 %v2407_v20, %v2399_v52  ;;  %9133 = vst [vmem:[#allocation108_spill] sm:$0xff] %v7119_v6  ;;  %v2419_v39 = vmul.f32 %v7119_v6, %v2416_v42  ;;  %v2412_v7 = vadd.f32 %v2408_v40, %v2400_v63  ;;  %v2420_v31 = vmul.f32 %v7123_v43, %v2416_v42  ;;  %v7135_v45 = vld [vmem:[%s4907_s22 + $0x3f8] sm:$0xff]  ;;  %v3921_v40 = vld [vmem:[%s4836_s7 + $0x5] ss:$0 sm:$0xff] }
 0x230   : > { %v2421_v30 = vadd.f32 %v2417_v53, %v2409_v54  ;;  %v2422_v0 = vadd.f32 %v2418_v44, %v2410_v25  ;;  %v2430_v51 = vmul.f32 %v7127_v56, %v2428_v33  ;;  %v7131_v54 = vld [vmem:[%s4907_s22 + $0x3f0] sm:$0xff]  ;;  %v2432_v63 = vmul.f32 %v7135_v45, %v2428_v33 }
 0x231   : > { %v2423_v53 = vadd.f32 %v2419_v39, %v2411_v27  ;;  %v2431_v52 = vmul.f32 %v7131_v54, %v2428_v33  ;;  %v2424_v20 = vadd.f32 %v2420_v31, %v2412_v7  ;;  %v2446_v44 = vmul.f32 %v6515_v36, %v3921_v40 }
 0x232   : > { %v2433_v38 = vadd.f32 %v2429_v57, %v2421_v30  ;;  %v2434_v6 = vadd.f32 %v2430_v51, %v2422_v0  ;;  %v2447_v57 = vmul.f32 %v6519_v29, %v3921_v40  ;;  %v2449_v27 = vmul.f32 %v6527_v1, %v3921_v40 }
 0x233   : > { %v2435_v42 = vadd.f32 %v2431_v52, %v2423_v53  ;;  %v2436_v30 = vadd.f32 %v2432_v63, %v2424_v20  ;;  %v2450_v25 = vadd.f32 %v6531_v46, %v2446_v44 }
 0x234   : > { %4020 = vtanh.f32 %v2433_v38  ;;  %v2448_v38 = vmul.f32 %v6523_v60, %v3921_v40  ;;  %v2451_v33 = vadd.f32 %v6535_v28, %v2447_v57  ;;  %v2453_v7 = vadd.f32 %v6543_v35, %v2449_v27 }
 0x235   : > { %4022 = vtanh.f32 %v2434_v6 }
 0x236   : > { %4024 = vtanh.f32 %v2435_v42  ;;  %v2452_v51 = vadd.f32 %v6539_v47, %v2448_v38 }
 0x237   : > { %4026 = vtanh.f32 %v2436_v30 }
 0x23e   : > { %v4021_v39 = vpop.eup %4020 }
 0x23f   : > { %v2457_v36 = vrot.slane %v4021_v39, %v4851_v2  ;;  %v2469_v29 = vrot.slane %v4021_v39, %v4853_v3  ;;  %v2481_v60 = vrot.slane %v4021_v39, %v4855_v4  ;;  %v2493_v1 = vrot.slane %v4021_v39, %v4857_v5 }
 0x240   : > { %v2505_v6 = vrot.slane %v4021_v39, %v4871_v10  ;;  %v2517_v46 = vrot.slane %v4021_v39, %v4882_v14  ;;  %v2529_v31 = vrot.slane %v4021_v39, %v4884_v15  ;;  %v2541_v28 = vrot.slane %v4021_v39, %v4886_v16  ;;  %v7167_v39 = vpop.eup %4022 }
 0x241   : > { %v2458_v47 = vmul.f32 %v6561_v41, %v2457_v36  ;;  %v2459_v35 = vmul.f32 %v6565_v62, %v2457_v36  ;;  %v2460_v0 = vmul.f32 %v6569_v37, %v2457_v36  ;;  %v2461_v53 = vmul.f32 %v6573_v32, %v2457_v36 }
 0x242   : > { %v2470_v52 = vmul.f32 %v6577_v21, %v2469_v29  ;;  %v2471_v20 = vmul.f32 %v6581_v34, %v2469_v29  ;;  %v2472_v63 = vmul.f32 %v6585_v50, %v2469_v29  ;;  %v2473_v40 = vmul.f32 %v6589_v55, %v2469_v29 }
 0x243   : > { %v2462_v42 = vadd.f32 %v2458_v47, %v2450_v25  ;;  %v2463_v44 = vadd.f32 %v2459_v35, %v2451_v33  ;;  %v2464_v30 = vadd.f32 %v2460_v0, %v2452_v51  ;;  %v2465_v57 = vadd.f32 %v2461_v53, %v2453_v7  ;;  %v7173_v33 = vpop.eup %4024  ;;  %v9136_v53 = vld [vmem:[#allocation12_spill] sm:$0xff] }
 0x244   : > { %v2482_v41 = vmul.f32 %v6593_v26, %v2481_v60  ;;  %v2483_v62 = vmul.f32 %v6597_v58, %v2481_v60  ;;  %v2484_v37 = vmul.f32 %v6601_v13, %v2481_v60  ;;  %v2485_v32 = vmul.f32 %v6605_v59, %v2481_v60  ;;  %v7175_v7 = vpop.eup %4026  ;;  %v9134_v60 = vld [vmem:[#allocation111_spill] sm:$0xff] }
 0x245   : > { %v2474_v38 = vadd.f32 %v2470_v52, %v2462_v42  ;;  %v2475_v21 = vadd.f32 %v2471_v20, %v2463_v44  ;;  %v2476_v27 = vadd.f32 %v2472_v63, %v2464_v30  ;;  %v2477_v34 = vadd.f32 %v2473_v40, %v2465_v57  ;;  %v9137_v20 = vld [vmem:[#allocation13_spill] sm:$0xff]  ;;  %v9138_v40 = vld [vmem:[#allocation14_spill] sm:$0xff]  ;;  %v9139_v57 = vld [vmem:[#allocation15_spill] sm:$0xff] }
 0x246   : > { %v2494_v50 = vmul.f32 %v6611_v23, %v2493_v1  ;;  %v2495_v55 = vmul.f32 %v6615_v48, %v2493_v1  ;;  %v2496_v25 = vmul.f32 %v6619_v22, %v2493_v1  ;;  %v2497_v26 = vmul.f32 %v6623_v8, %v2493_v1  ;;  %v9135_v1 = vld [vmem:[#allocation112_spill] sm:$0xff] }
 0x247   : > { %v2486_v58 = vadd.f32 %v2482_v41, %v2474_v38  ;;  %v2487_v13 = vadd.f32 %v2483_v62, %v2475_v21  ;;  %v2488_v51 = vadd.f32 %v2484_v37, %v2476_v27  ;;  %v2489_v59 = vadd.f32 %v2485_v32, %v2477_v34  ;;  %v9140_v41 = vld [vmem:[#allocation16_spill] sm:$0xff]  ;;  %v9141_v62 = vld [vmem:[#allocation17_spill] sm:$0xff]  ;;  %v9142_v32 = vld [vmem:[#allocation18_spill] sm:$0xff] }
 0x248   : > { %v2506_v36 = vmul.f32 %v6631_v49, %v2505_v6  ;;  %v2507_v29 = vmul.f32 %v6635_v12, %v2505_v6  ;;  %v2508_v23 = vmul.f32 %v6639_v18, %v2505_v6  ;;  %v2509_v48 = vmul.f32 %v9134_v60, %v2505_v6 }
 0x249   : > { %v2498_v47 = vadd.f32 %v2494_v50, %v2486_v58  ;;  %v2499_v22 = vadd.f32 %v2495_v55, %v2487_v13  ;;  %v2500_v35 = vadd.f32 %v2496_v25, %v2488_v51  ;;  %v2501_v8 = vadd.f32 %v2497_v26, %v2489_v59  ;;  %v9143_v55 = vld [vmem:[#allocation19_spill] sm:$0xff]  ;;  %v9144_v26 = vld [vmem:[#allocation20_spill] sm:$0xff]  ;;  %v9145_v58 = vld [vmem:[#allocation21_spill] sm:$0xff] }
 0x24a   : > { %v2518_v0 = vmul.f32 %v9135_v1, %v2517_v46  ;;  %v2519_v52 = vmul.f32 %v9136_v53, %v2517_v46  ;;  %v2520_v63 = vmul.f32 %v9137_v20, %v2517_v46  ;;  %v2521_v42 = vmul.f32 %v9138_v40, %v2517_v46  ;;  %v9146_v51 = vld [vmem:[#allocation22_spill] sm:$0xff] }
 0x24b   : > { %v2510_v44 = vadd.f32 %v2506_v36, %v2498_v47  ;;  %v2511_v49 = vadd.f32 %v2507_v29, %v2499_v22  ;;  %v2512_v30 = vadd.f32 %v2508_v23, %v2500_v35  ;;  %v2513_v12 = vadd.f32 %v2509_v48, %v2501_v8 }
 0x24c   : > { %v2530_v18 = vmul.f32 %v9139_v57, %v2529_v31  ;;  %v2531_v6 = vmul.f32 %v9140_v41, %v2529_v31  ;;  %v2532_v37 = vmul.f32 %v9141_v62, %v2529_v31  ;;  %v2533_v38 = vmul.f32 %v9142_v32, %v2529_v31 }
 0x24d   : > { %v2522_v21 = vadd.f32 %v2518_v0, %v2510_v44  ;;  %v2523_v27 = vadd.f32 %v2519_v52, %v2511_v49  ;;  %v2524_v34 = vadd.f32 %v2520_v63, %v2512_v30  ;;  %v2525_v50 = vadd.f32 %v2521_v42, %v2513_v12  ;;  %v9147_v0 = vld [vmem:[#allocation23_spill] sm:$0xff]  ;;  %v9148_v52 = vld [vmem:[#allocation24_spill] sm:$0xff]  ;;  %v9149_v63 = vld [vmem:[#allocation25_spill] sm:$0xff] }
 0x24e   : > { %v2542_v25 = vmul.f32 %v9143_v55, %v2541_v28  ;;  %v2543_v46 = vmul.f32 %v9144_v26, %v2541_v28  ;;  %v2544_v13 = vmul.f32 %v9145_v58, %v2541_v28  ;;  %v2545_v59 = vmul.f32 %v9146_v51, %v2541_v28  ;;  %v9150_v42 = vld [vmem:[#allocation26_spill] sm:$0xff]  ;;  %v9151_v49 = vld [vmem:[#allocation27_spill] sm:$0xff]  ;;  %v9152_v12 = vld [vmem:[#allocation28_spill] sm:$0xff] }
 0x24f   : > { %v2534_v36 = vadd.f32 %v2530_v18, %v2522_v21  ;;  %v2535_v29 = vadd.f32 %v2531_v6, %v2523_v27  ;;  %v2536_v23 = vadd.f32 %v2532_v37, %v2524_v34  ;;  %v2537_v60 = vadd.f32 %v2533_v38, %v2525_v50  ;;  %v9153_v18 = vld [vmem:[#allocation29_spill] sm:$0xff]  ;;  %v9154_v6 = vld [vmem:[#allocation30_spill] sm:$0xff]  ;;  %v9155_v27 = vld [vmem:[#allocation31_spill] sm:$0xff] }
 0x250   : > { %v2553_v48 = vrot.slane %v7167_v39, %v4851_v2  ;;  %v2565_v31 = vrot.slane %v7167_v39, %v4853_v3  ;;  %v2577_v47 = vrot.slane %v7167_v39, %v4855_v4  ;;  %v2589_v22 = vrot.slane %v7167_v39, %v4857_v5  ;;  %v9156_v50 = vld [vmem:[#allocation32_spill] sm:$0xff] }
 0x251   : > { %v2546_v35 = vadd.f32 %v2542_v25, %v2534_v36  ;;  %v2547_v8 = vadd.f32 %v2543_v46, %v2535_v29  ;;  %v2548_v1 = vadd.f32 %v2544_v13, %v2536_v23  ;;  %v2549_v28 = vadd.f32 %v2545_v59, %v2537_v60  ;;  %v9157_v25 = vld [vmem:[#allocation33_spill] sm:$0xff]  ;;  %v9158_v36 = vld [vmem:[#allocation34_spill] sm:$0xff]  ;;  %v9159_v23 = vld [vmem:[#allocation35_spill] sm:$0xff] }
 0x252   : > { %v2554_v53 = vmul.f32 %v9147_v0, %v2553_v48  ;;  %v2555_v20 = vmul.f32 %v9148_v52, %v2553_v48  ;;  %v2556_v40 = vmul.f32 %v9149_v63, %v2553_v48  ;;  %v2557_v44 = vmul.f32 %v9150_v42, %v2553_v48  ;;  %v9160_v48 = vld [vmem:[#allocation36_spill] sm:$0xff] }
 0x253   : > { %v2566_v30 = vmul.f32 %v9151_v49, %v2565_v31  ;;  %v2567_v57 = vmul.f32 %v9152_v12, %v2565_v31  ;;  %v2568_v41 = vmul.f32 %v9153_v18, %v2565_v31  ;;  %v2569_v62 = vmul.f32 %v9154_v6, %v2565_v31 }
 0x254   : > { %v2558_v37 = vadd.f32 %v2554_v53, %v2546_v35  ;;  %v2559_v32 = vadd.f32 %v2555_v20, %v2547_v8  ;;  %v2560_v38 = vadd.f32 %v2556_v40, %v2548_v1  ;;  %v2561_v21 = vadd.f32 %v2557_v44, %v2549_v28  ;;  %v9161_v35 = vld [vmem:[#allocation37_spill] sm:$0xff]  ;;  %v9162_v44 = vld [vmem:[#allocation38_spill] sm:$0xff] }
 0x255   : > { %v2578_v34 = vmul.f32 %v9155_v27, %v2577_v47  ;;  %v2579_v55 = vmul.f32 %v9156_v50, %v2577_v47  ;;  %v2580_v26 = vmul.f32 %v9157_v25, %v2577_v47  ;;  %v2581_v46 = vmul.f32 %v6759_v9, %v2577_v47 }
 0x256   : > { %v2570_v58 = vadd.f32 %v2566_v30, %v2558_v37  ;;  %v2571_v13 = vadd.f32 %v2567_v57, %v2559_v32  ;;  %v2572_v51 = vadd.f32 %v2568_v41, %v2560_v38  ;;  %v2573_v59 = vadd.f32 %v2569_v62, %v2561_v21  ;;  %v9163_v30 = vld [vmem:[#allocation39_spill] sm:$0xff]  ;;  %v9164_v57 = vld [vmem:[#allocation40_spill] sm:$0xff]  ;;  %v9165_v41 = vld [vmem:[#allocation41_spill] sm:$0xff] }
 0x257   : > { %v2590_v29 = vmul.f32 %v9158_v36, %v2589_v22  ;;  %v2591_v60 = vmul.f32 %v9159_v23, %v2589_v22  ;;  %v2592_v31 = vmul.f32 %v9160_v48, %v2589_v22  ;;  %v2593_v8 = vmul.f32 %v9161_v35, %v2589_v22  ;;  %v9166_v62 = vld [vmem:[#allocation42_spill] sm:$0xff]  ;;  %v9167_v32 = vld [vmem:[#allocation43_spill] sm:$0xff]  ;;  %v9168_v21 = vld [vmem:[#allocation44_spill] sm:$0xff] }
 0x258   : > { %v2582_v1 = vadd.f32 %v2578_v34, %v2570_v58  ;;  %v2583_v28 = vadd.f32 %v2579_v55, %v2571_v13  ;;  %v2584_v0 = vadd.f32 %v2580_v26, %v2572_v51  ;;  %v2585_v53 = vadd.f32 %v2581_v46, %v2573_v59  ;;  %v9169_v34 = vld [vmem:[#allocation45_spill] sm:$0xff]  ;;  %v9170_v46 = vld [vmem:[#allocation46_spill] sm:$0xff]  ;;  %v9171_v13 = vld [vmem:[#allocation47_spill] sm:$0xff] }
 0x259   : > { %v2601_v52 = vrot.slane %v7167_v39, %v4871_v10  ;;  %v2613_v9 = vrot.slane %v7167_v39, %v4882_v14  ;;  %v2625_v47 = vrot.slane %v7167_v39, %v4884_v15  ;;  %v2637_v20 = vrot.slane %v7167_v39, %v4886_v16  ;;  %v9172_v59 = vld [vmem:[#allocation48_spill] sm:$0xff] }
 0x25a   : > { %v2594_v63 = vadd.f32 %v2590_v29, %v2582_v1  ;;  %v2595_v40 = vadd.f32 %v2591_v60, %v2583_v28  ;;  %v2596_v42 = vadd.f32 %v2592_v31, %v2584_v0  ;;  %v2597_v22 = vadd.f32 %v2593_v8, %v2585_v53  ;;  %v9173_v29 = vld [vmem:[#allocation49_spill] sm:$0xff]  ;;  %v9174_v8 = vld [vmem:[#allocation50_spill] sm:$0xff]  ;;  %v9175_v28 = vld [vmem:[#allocation51_spill] sm:$0xff] }
 0x25b   : > { %v2602_v49 = vmul.f32 %v9162_v44, %v2601_v52  ;;  %v2603_v12 = vmul.f32 %v9163_v30, %v2601_v52  ;;  %v2604_v18 = vmul.f32 %v9164_v57, %v2601_v52  ;;  %v2605_v6 = vmul.f32 %v9165_v41, %v2601_v52  ;;  %v9176_v53 = vld [vmem:[#allocation52_spill] sm:$0xff] }
 0x25c   : > { %v2614_v37 = vmul.f32 %v9166_v62, %v2613_v9  ;;  %v2615_v38 = vmul.f32 %v9167_v32, %v2613_v9  ;;  %v2616_v27 = vmul.f32 %v9168_v21, %v2613_v9  ;;  %v2617_v39 = vmul.f32 %v9169_v34, %v2613_v9  ;;  %v9177_v9 = vld [vmem:[#allocation53_spill] sm:$0xff] }
 0x25d   : > { %v2606_v50 = vadd.f32 %v2602_v49, %v2594_v63  ;;  %v2607_v55 = vadd.f32 %v2603_v12, %v2595_v40  ;;  %v2608_v25 = vadd.f32 %v2604_v18, %v2596_v42  ;;  %v2609_v26 = vadd.f32 %v2605_v6, %v2597_v22  ;;  %v9178_v6 = vld [vmem:[#allocation54_spill] sm:$0xff] }
 0x25e   : > { %v2626_v58 = vmul.f32 %v9170_v46, %v2625_v47  ;;  %v2627_v51 = vmul.f32 %v9171_v13, %v2625_v47  ;;  %v2628_v36 = vmul.f32 %v9172_v59, %v2625_v47  ;;  %v2629_v23 = vmul.f32 %v9173_v29, %v2625_v47 }
 0x25f   : > { %v2618_v60 = vadd.f32 %v2614_v37, %v2606_v50  ;;  %v2619_v48 = vadd.f32 %v2615_v38, %v2607_v55  ;;  %v2620_v31 = vadd.f32 %v2616_v27, %v2608_v25  ;;  %v2621_v35 = vadd.f32 %v2617_v39, %v2609_v26  ;;  %v9179_v37 = vld [vmem:[#allocation55_spill] sm:$0xff]  ;;  %v9180_v38 = vld [vmem:[#allocation56_spill] sm:$0xff]  ;;  %v9181_v27 = vld [vmem:[#allocation57_spill] sm:$0xff] }
 0x260   : > { %v2638_v1 = vmul.f32 %v9174_v8, %v2637_v20  ;;  %v2639_v0 = vmul.f32 %v9175_v28, %v2637_v20  ;;  %v2640_v52 = vmul.f32 %v9176_v53, %v2637_v20  ;;  %v2641_v63 = vmul.f32 %v9177_v9, %v2637_v20  ;;  %v9182_v39 = vld [vmem:[#allocation58_spill] sm:$0xff]  ;;  %v9183_v55 = vld [vmem:[#allocation59_spill] sm:$0xff]  ;;  %v9184_v26 = vld [vmem:[#allocation60_spill] sm:$0xff] }
 0x261   : > { %v2630_v40 = vadd.f32 %v2626_v58, %v2618_v60  ;;  %v2631_v42 = vadd.f32 %v2627_v51, %v2619_v48  ;;  %v2632_v22 = vadd.f32 %v2628_v36, %v2620_v31  ;;  %v2633_v44 = vadd.f32 %v2629_v23, %v2621_v35  ;;  %v9185_v58 = vld [vmem:[#allocation61_spill] sm:$0xff]  ;;  %v9186_v23 = vld [vmem:[#allocation62_spill] sm:$0xff]  ;;  %v9187_v48 = vld [vmem:[#allocation63_spill] sm:$0xff] }
 0x262   : > { %v2649_v49 = vrot.slane %v7173_v33, %v4851_v2  ;;  %v2661_v47 = vrot.slane %v7173_v33, %v4853_v3  ;;  %v2673_v30 = vrot.slane %v7173_v33, %v4855_v4  ;;  %v2685_v12 = vrot.slane %v7173_v33, %v4857_v5  ;;  %v9188_v35 = vld [vmem:[#allocation64_spill] sm:$0xff]  ;;  %v9189_v9 = vld [vmem:[#allocation65_spill] sm:$0xff] }
 0x263   : > { %v2642_v57 = vadd.f32 %v2638_v1, %v2630_v40  ;;  %v2643_v18 = vadd.f32 %v2639_v0, %v2631_v42  ;;  %v2644_v41 = vadd.f32 %v2640_v52, %v2632_v22  ;;  %v2645_v20 = vadd.f32 %v2641_v63, %v2633_v44  ;;  %v9190_v40 = vld [vmem:[#allocation66_spill] sm:$0xff]  ;;  %v9191_v22 = vld [vmem:[#allocation67_spill] sm:$0xff] }
 0x264   : > { %v2650_v62 = vmul.f32 %v9178_v6, %v2649_v49  ;;  %v2651_v32 = vmul.f32 %v9179_v37, %v2649_v49  ;;  %v2652_v21 = vmul.f32 %v9180_v38, %v2649_v49  ;;  %v2653_v34 = vmul.f32 %v9181_v27, %v2649_v49  ;;  %v9192_v49 = vld [vmem:[#allocation68_spill] sm:$0xff] }
 0x265   : > { %v2662_v50 = vmul.f32 %v9182_v39, %v2661_v47  ;;  %v2663_v25 = vmul.f32 %v9183_v55, %v2661_v47  ;;  %v2664_v46 = vmul.f32 %v9184_v26, %v2661_v47  ;;  %v2665_v13 = vmul.f32 %v9185_v58, %v2661_v47 }
 0x266   : > { %v2654_v51 = vadd.f32 %v2650_v62, %v2642_v57  ;;  %v2655_v59 = vadd.f32 %v2651_v32, %v2643_v18  ;;  %v2656_v36 = vadd.f32 %v2652_v21, %v2644_v41  ;;  %v2657_v29 = vadd.f32 %v2653_v34, %v2645_v20  ;;  %v9193_v21 = vld [vmem:[#allocation69_spill] sm:$0xff]  ;;  %v9194_v34 = vld [vmem:[#allocation70_spill] sm:$0xff] }
 0x267   : > { %v2674_v60 = vmul.f32 %v9186_v23, %v2673_v30  ;;  %v2675_v31 = vmul.f32 %v9187_v48, %v2673_v30  ;;  %v2676_v8 = vmul.f32 %v9188_v35, %v2673_v30  ;;  %v2677_v1 = vmul.f32 %v6903_v11, %v2673_v30  ;;  %v9201_v35 = vld [vmem:[#allocation77_spill] sm:$0xff] }
 0x268   : > { %v2666_v28 = vadd.f32 %v2662_v50, %v2654_v51  ;;  %v2667_v0 = vadd.f32 %v2663_v25, %v2655_v59  ;;  %v2668_v53 = vadd.f32 %v2664_v46, %v2656_v36  ;;  %v2669_v52 = vadd.f32 %v2665_v13, %v2657_v29  ;;  %v9195_v50 = vld [vmem:[#allocation71_spill] sm:$0xff]  ;;  %v9196_v25 = vld [vmem:[#allocation72_spill] sm:$0xff]  ;;  %v9197_v46 = vld [vmem:[#allocation73_spill] sm:$0xff] }
 0x269   : > { %v2686_v63 = vmul.f32 %v9189_v9, %v2685_v12  ;;  %v2687_v42 = vmul.f32 %v9190_v40, %v2685_v12  ;;  %v2688_v44 = vmul.f32 %v9191_v22, %v2685_v12  ;;  %v2689_v47 = vmul.f32 %v9192_v49, %v2685_v12  ;;  %v9198_v13 = vld [vmem:[#allocation74_spill] sm:$0xff]  ;;  %v9199_v59 = vld [vmem:[#allocation75_spill] sm:$0xff]  ;;  %v9200_v29 = vld [vmem:[#allocation76_spill] sm:$0xff] }
 0x26a   : > { %v2678_v57 = vadd.f32 %v2674_v60, %v2666_v28  ;;  %v2679_v18 = vadd.f32 %v2675_v31, %v2667_v0  ;;  %v2680_v41 = vadd.f32 %v2676_v8, %v2668_v53  ;;  %v2681_v20 = vadd.f32 %v2677_v1, %v2669_v52  ;;  %v9202_v1 = vld [vmem:[#allocation78_spill] sm:$0xff]  ;;  %v9203_v0 = vld [vmem:[#allocation79_spill] sm:$0xff]  ;;  %v9204_v52 = vld [vmem:[#allocation80_spill] sm:$0xff] }
 0x26b   : > { %v2697_v6 = vrot.slane %v7173_v33, %v4871_v10  ;;  %v2709_v11 = vrot.slane %v7173_v33, %v4882_v14  ;;  %v2721_v30 = vrot.slane %v7173_v33, %v4884_v15  ;;  %v2733_v62 = vrot.slane %v7173_v33, %v4886_v16 }
 0x26c   : > { %v2690_v37 = vadd.f32 %v2686_v63, %v2678_v57  ;;  %v2691_v32 = vadd.f32 %v2687_v42, %v2679_v18  ;;  %v2692_v38 = vadd.f32 %v2688_v44, %v2680_v41  ;;  %v2693_v12 = vadd.f32 %v2689_v47, %v2681_v20  ;;  %v9205_v44 = vld [vmem:[#allocation81_spill] sm:$0xff]  ;;  %v9206_v47 = vld [vmem:[#allocation82_spill] sm:$0xff]  ;;  %v9207_v18 = vld [vmem:[#allocation83_spill] sm:$0xff] }
 0x26d   : > { %v2698_v27 = vmul.f32 %v9193_v21, %v2697_v6  ;;  %v2699_v39 = vmul.f32 %v9194_v34, %v2697_v6  ;;  %v2700_v55 = vmul.f32 %v9195_v50, %v2697_v6  ;;  %v2701_v26 = vmul.f32 %v9196_v25, %v2697_v6  ;;  %v9208_v20 = vld [vmem:[#allocation84_spill] sm:$0xff] }
 0x26e   : > { %v2710_v58 = vmul.f32 %v9197_v46, %v2709_v11  ;;  %v2711_v51 = vmul.f32 %v9198_v13, %v2709_v11  ;;  %v2712_v36 = vmul.f32 %v9199_v59, %v2709_v11  ;;  %v2713_v33 = vmul.f32 %v9200_v29, %v2709_v11 }
 0x26f   : > { %v2702_v23 = vadd.f32 %v2698_v27, %v2690_v37  ;;  %v2703_v60 = vadd.f32 %v2699_v39, %v2691_v32  ;;  %v2704_v48 = vadd.f32 %v2700_v55, %v2692_v38  ;;  %v2705_v31 = vadd.f32 %v2701_v26, %v2693_v12  ;;  %v9209_v55 = vld [vmem:[#allocation85_spill] sm:$0xff]  ;;  %v9210_v26 = vld [vmem:[#allocation86_spill] sm:$0xff] }
 0x270   : > { %v2722_v8 = vmul.f32 %v9201_v35, %v2721_v30  ;;  %v2723_v28 = vmul.f32 %v9202_v1, %v2721_v30  ;;  %v2724_v53 = vmul.f32 %v9203_v0, %v2721_v30  ;;  %v2725_v9 = vmul.f32 %v9204_v52, %v2721_v30 }
 0x271   : > { %v2714_v63 = vadd.f32 %v2710_v58, %v2702_v23  ;;  %v2715_v40 = vadd.f32 %v2711_v51, %v2703_v60  ;;  %v2716_v42 = vadd.f32 %v2712_v36, %v2704_v48  ;;  %v2717_v22 = vadd.f32 %v2713_v33, %v2705_v31  ;;  %v9211_v58 = vld [vmem:[#allocation87_spill] sm:$0xff]  ;;  %v9212_v51 = vld [vmem:[#allocation88_spill] sm:$0xff]  ;;  %v9213_v36 = vld [vmem:[#allocation89_spill] sm:$0xff] }
 0x272   : > { %v2734_v49 = vmul.f32 %v9205_v44, %v2733_v62  ;;  %v2735_v57 = vmul.f32 %v9206_v47, %v2733_v62  ;;  %v2736_v41 = vmul.f32 %v9207_v18, %v2733_v62  ;;  %v2737_v6 = vmul.f32 %v9208_v20, %v2733_v62  ;;  %v9214_v33 = vld [vmem:[#allocation90_spill] sm:$0xff]  ;;  %v9215_v60 = vld [vmem:[#allocation91_spill] sm:$0xff]  ;;  %v9216_v31 = vld [vmem:[#allocation92_spill] sm:$0xff] }
 0x273   : > { %v2726_v11 = vadd.f32 %v2722_v8, %v2714_v63  ;;  %v2727_v37 = vadd.f32 %v2723_v28, %v2715_v40  ;;  %v2728_v32 = vadd.f32 %v2724_v53, %v2716_v42  ;;  %v2729_v38 = vadd.f32 %v2725_v9, %v2717_v22  ;;  %v9217_v53 = vld [vmem:[#allocation93_spill] sm:$0xff]  ;;  %v9218_v9 = vld [vmem:[#allocation94_spill] sm:$0xff]  ;;  %v9219_v40 = vld [vmem:[#allocation95_spill] sm:$0xff] }
 0x274   : > { %v2745_v12 = vrot.slane %v7175_v7, %v4851_v2  ;;  %v2757_v30 = vrot.slane %v7175_v7, %v4853_v3  ;;  %v2769_v21 = vrot.slane %v7175_v7, %v4855_v4  ;;  %v2781_v27 = vrot.slane %v7175_v7, %v4857_v5  ;;  %v9220_v20 = vld [vmem:[#allocation96_spill] sm:$0xff] }
 0x275   : > { %v2738_v34 = vadd.f32 %v2734_v49, %v2726_v11  ;;  %v2739_v39 = vadd.f32 %v2735_v57, %v2727_v37  ;;  %v2740_v50 = vadd.f32 %v2736_v41, %v2728_v32  ;;  %v2741_v62 = vadd.f32 %v2737_v6, %v2729_v38  ;;  %v9221_v11 = vld [vmem:[#allocation97_spill] sm:$0xff] }
 0x276   : > { %v2746_v25 = vmul.f32 %v9209_v55, %v2745_v12  ;;  %v2747_v46 = vmul.f32 %v9210_v26, %v2745_v12  ;;  %v2748_v13 = vmul.f32 %v9211_v58, %v2745_v12  ;;  %v2749_v59 = vmul.f32 %v9212_v51, %v2745_v12 }
 0x277   : > { %v2758_v29 = vmul.f32 %v9213_v36, %v2757_v30  ;;  %v2759_v23 = vmul.f32 %v9214_v33, %v2757_v30  ;;  %v2760_v48 = vmul.f32 %v9215_v60, %v2757_v30  ;;  %v2761_v35 = vmul.f32 %v9216_v31, %v2757_v30  ;;  %v9226_v33 = vld [vmem:[#allocation102_spill] sm:$0xff] }
 0x278   : > { %v2750_v8 = vadd.f32 %v2746_v25, %v2738_v34  ;;  %v2751_v1 = vadd.f32 %v2747_v46, %v2739_v39  ;;  %v2752_v28 = vadd.f32 %v2748_v13, %v2740_v50  ;;  %v2753_v0 = vadd.f32 %v2749_v59, %v2741_v62  ;;  %v9223_v25 = vld [vmem:[#allocation99_spill] sm:$0xff]  ;;  %v9224_v46 = vld [vmem:[#allocation100_spill] sm:$0xff]  ;;  %v9225_v13 = vld [vmem:[#allocation101_spill] sm:$0xff] }
 0x279   : > { %v2770_v52 = vmul.f32 %v9217_v53, %v2769_v21  ;;  %v2771_v63 = vmul.f32 %v9218_v9, %v2769_v21  ;;  %v2772_v42 = vmul.f32 %v9219_v40, %v2769_v21  ;;  %v2773_v22 = vmul.f32 %v7047_v17, %v2769_v21  ;;  %v9230_v53 = vld [vmem:[#allocation106_spill] sm:$0xff] }
 0x27a   : > { %v2762_v44 = vadd.f32 %v2758_v29, %v2750_v8  ;;  %v2763_v49 = vadd.f32 %v2759_v23, %v2751_v1  ;;  %v2764_v47 = vadd.f32 %v2760_v48, %v2752_v28  ;;  %v2765_v57 = vadd.f32 %v2761_v35, %v2753_v0  ;;  %v9227_v48 = vld [vmem:[#allocation103_spill] sm:$0xff]  ;;  %v9228_v35 = vld [vmem:[#allocation104_spill] sm:$0xff]  ;;  %v9229_v1 = vld [vmem:[#allocation105_spill] sm:$0xff] }
 0x27b   : > { %v2782_v18 = vmul.f32 %v7051_v19, %v2781_v27  ;;  %v2783_v41 = vmul.f32 %v7055_v24, %v2781_v27  ;;  %v2784_v6 = vmul.f32 %v9220_v20, %v2781_v27  ;;  %v2785_v37 = vmul.f32 %v9221_v11, %v2781_v27  ;;  %v9222_v27 = vld [vmem:[#allocation98_spill] sm:$0xff] }
 0x27c   : > { %v2774_v32 = vadd.f32 %v2770_v52, %v2762_v44  ;;  %v2775_v38 = vadd.f32 %v2771_v63, %v2763_v49  ;;  %v2776_v12 = vadd.f32 %v2772_v42, %v2764_v47  ;;  %v2777_v30 = vadd.f32 %v2773_v22, %v2765_v57  ;;  %v9231_v63 = vld [vmem:[#allocation107_spill] sm:$0xff]  ;;  %v9232_v22 = vld [vmem:[#allocation108_spill] sm:$0xff] }
 0x27d   : > { %v2793_v34 = vrot.slane %v7175_v7, %v4871_v10  ;;  %v2805_v17 = vrot.slane %v7175_v7, %v4882_v14  ;;  %v2817_v21 = vrot.slane %v7175_v7, %v4884_v15  ;;  %v2829_v59 = vrot.slane %v7175_v7, %v4886_v16 }
 0x27e   : > { %v2786_v19 = vadd.f32 %v2782_v18, %v2774_v32  ;;  %v2787_v39 = vadd.f32 %v2783_v41, %v2775_v38  ;;  %v2788_v24 = vadd.f32 %v2784_v6, %v2776_v12  ;;  %v2789_v50 = vadd.f32 %v2785_v37, %v2777_v30  ;;  %v3922_v32 = vld [vmem:[%s4836_s7 + $0x6] ss:$0 sm:$0xff]  ;;  %v7339_v30 = vld [vmem:[%s4844_s29] sm:$0xff] }
 0x27f   : > { %v2794_v62 = vmul.f32 %v7073_v61, %v2793_v34  ;;  %v2795_v55 = vmul.f32 %v9222_v27, %v2793_v34  ;;  %v2796_v26 = vmul.f32 %v9223_v25, %v2793_v34  ;;  %v2797_v58 = vmul.f32 %v9224_v46, %v2793_v34 }
 0x280   : > { %v2806_v51 = vmul.f32 %v9225_v13, %v2805_v17  ;;  %v2807_v23 = vmul.f32 %v9226_v33, %v2805_v17  ;;  %v2808_v31 = vmul.f32 %v9227_v48, %v2805_v17  ;;  %v2818_v61 = vmul.f32 %v9228_v35, %v2817_v21 }
 0x281   : > { %v2798_v36 = vadd.f32 %v2794_v62, %v2786_v19  ;;  %v2799_v29 = vadd.f32 %v2795_v55, %v2787_v39  ;;  %v2800_v60 = vadd.f32 %v2796_v26, %v2788_v24  ;;  %v2801_v8 = vadd.f32 %v2797_v58, %v2789_v50  ;;  %v7355_v39 = vld [vmem:[%s4844_s29 + $0x20] sm:$0xff]  ;;  %v7359_v62 = vld [vmem:[%s4844_s29 + $0x28] sm:$0xff]  ;;  %v7363_v55 = vld [vmem:[%s4844_s29 + $0x30] sm:$0xff] }
 0x282   : > { %v2809_v28 = vmul.f32 %v9229_v1, %v2805_v17  ;;  %v2830_v52 = vmul.f32 %v9230_v53, %v2829_v59  ;;  %v2819_v40 = vmul.f32 %v9231_v63, %v2817_v21  ;;  %v2820_v44 = vmul.f32 %v9232_v22, %v2817_v21  ;;  %v7367_v26 = vld [vmem:[%s4844_s29 + $0x38] sm:$0xff]  ;;  %v7397_v1 = vld [vmem:[%s4907_s22 + $0x18] sm:$0xff] }
 0x283   : > { %v2810_v0 = vadd.f32 %v2806_v51, %v2798_v36  ;;  %v2811_v9 = vadd.f32 %v2807_v23, %v2799_v29  ;;  %v2812_v42 = vadd.f32 %v2808_v31, %v2800_v60  ;;  %v2821_v47 = vmul.f32 %v7123_v43, %v2817_v21  ;;  %v7385_v60 = vld [vmem:[%s4907_s22] sm:$0xff]  ;;  %v7389_v31 = vld [vmem:[%s4907_s22 + $0x8] sm:$0xff]  ;;  %v7409_v63 = vld [vmem:[%s4907_s22 + $0x30] sm:$0xff] }
 0x284   : > { %v2813_v49 = vadd.f32 %v2809_v28, %v2801_v8  ;;  %v2831_v41 = vmul.f32 %v7127_v56, %v2829_v59  ;;  %v2832_v6 = vmul.f32 %v7131_v54, %v2829_v59  ;;  %v2833_v37 = vmul.f32 %v7135_v45, %v2829_v59  ;;  %v7343_v56 = vld [vmem:[%s4844_s29 + $0x8] sm:$0xff]  ;;  %v7347_v54 = vld [vmem:[%s4844_s29 + $0x10] sm:$0xff]  ;;  %v7351_v45 = vld [vmem:[%s4844_s29 + $0x18] sm:$0xff] }
 0x285   : > { %v2822_v7 = vadd.f32 %v2818_v61, %v2810_v0  ;;  %v2823_v18 = vadd.f32 %v2819_v40, %v2811_v9  ;;  %v2824_v20 = vadd.f32 %v2820_v44, %v2812_v42  ;;  %v2847_v43 = vmul.f32 %v7339_v30, %v3922_v32  ;;  %v7393_v61 = vld [vmem:[%s4907_s22 + $0x10] sm:$0xff]  ;;  %v7401_v0 = vld [vmem:[%s4907_s22 + $0x20] sm:$0xff] }
 0x286   : > { %v2825_v11 = vadd.f32 %v2821_v47, %v2813_v49  ;;  %v2848_v17 = vmul.f32 %v7343_v56, %v3922_v32  ;;  %v2849_v21 = vmul.f32 %v7347_v54, %v3922_v32  ;;  %v2850_v19 = vmul.f32 %v7351_v45, %v3922_v32 }
 0x287   : > { %v2834_v57 = vadd.f32 %v2830_v52, %v2822_v7  ;;  %v2835_v38 = vadd.f32 %v2831_v41, %v2823_v18  ;;  %v2836_v12 = vadd.f32 %v2832_v6, %v2824_v20  ;;  %v2851_v24 = vadd.f32 %v7355_v39, %v2847_v43  ;;  %v7405_v52 = vld [vmem:[%s4907_s22 + $0x28] sm:$0xff]  ;;  %v7413_v7 = vld [vmem:[%s4907_s22 + $0x38] sm:$0xff]  ;;  %v7425_v6 = vld [vmem:[%s4907_s22 + $0x50] sm:$0xff] }
 0x288   : > { %v2837_v34 = vadd.f32 %v2833_v37, %v2825_v11  ;;  %v2852_v27 = vadd.f32 %v7359_v62, %v2848_v17  ;;  %v2853_v25 = vadd.f32 %v7363_v55, %v2849_v21  ;;  %v2854_v46 = vadd.f32 %v7367_v26, %v2850_v19  ;;  %v7421_v41 = vld [vmem:[%s4907_s22 + $0x48] sm:$0xff]  ;;  %v7429_v37 = vld [vmem:[%s4907_s22 + $0x58] sm:$0xff]  ;;  %v7435_v21 = vld [vmem:[%s4907_s22 + $0x60] sm:$0xff] }
 0x289   : > { %4028 = vtanh.f32 %v2834_v57  ;;  %v7417_v57 = vld [vmem:[%s4907_s22 + $0x40] sm:$0xff] }
 0x28a   : > { %4030 = vtanh.f32 %v2835_v38 }
 0x28b   : > { %4032 = vtanh.f32 %v2836_v12 }
 0x28c   : > { %4034 = vtanh.f32 %v2837_v34 }
 0x293   : > { %v4029_v50 = vpop.eup %4028 }
 0x294   : > { %v2858_v58 = vrot.slane %v4029_v50, %v4851_v2  ;;  %v2870_v13 = vrot.slane %v4029_v50, %v4853_v3  ;;  %v2882_v51 = vrot.slane %v4029_v50, %v4855_v4  ;;  %v2894_v59 = vrot.slane %v4029_v50, %v4857_v5  ;;  %v7432_v17 = vpop.eup %4030 }
 0x295   : > { %v2906_v36 = vrot.slane %v4029_v50, %v4871_v10  ;;  %v7376_v29 = vrot.slane %v4029_v50, %v4882_v14  ;;  %v7379_v33 = vrot.slane %v4029_v50, %v4884_v15  ;;  %v7382_v23 = vrot.slane %v4029_v50, %v4886_v16 }
 0x296   : > { %v2859_v48 = vmul.f32 %v7385_v60, %v2858_v58  ;;  %v2860_v35 = vmul.f32 %v7389_v31, %v2858_v58  ;;  %v2861_v8 = vmul.f32 %v7393_v61, %v2858_v58  ;;  %v2862_v28 = vmul.f32 %v7397_v1, %v2858_v58 }
 0x297   : > { %v2871_v53 = vmul.f32 %v7401_v0, %v2870_v13  ;;  %v2872_v9 = vmul.f32 %v7405_v52, %v2870_v13  ;;  %v2873_v40 = vmul.f32 %v7409_v63, %v2870_v13  ;;  %v2874_v42 = vmul.f32 %v7413_v7, %v2870_v13  ;;  %v7450_v13 = vpop.eup %4032 }
 0x298   : > { %v2863_v22 = vadd.f32 %v2859_v48, %v2851_v24  ;;  %v2864_v44 = vadd.f32 %v2860_v35, %v2852_v27  ;;  %v2865_v49 = vadd.f32 %v2861_v8, %v2853_v25  ;;  %v2866_v47 = vadd.f32 %v2862_v28, %v2854_v46  ;;  %v7439_v24 = vld [vmem:[%s4907_s22 + $0x68] sm:$0xff]  ;;  %v7443_v27 = vld [vmem:[%s4907_s22 + $0x70] sm:$0xff]  ;;  %v7447_v46 = vld [vmem:[%s4907_s22 + $0x78] sm:$0xff]  ;;  %v7452_v28 = vpop.eup %4034 }
 0x299   : > { %v2883_v18 = vmul.f32 %v7417_v57, %v2882_v51  ;;  %v2884_v20 = vmul.f32 %v7421_v41, %v2882_v51  ;;  %v2885_v11 = vmul.f32 %v7425_v6, %v2882_v51  ;;  %v2886_v32 = vmul.f32 %v7429_v37, %v2882_v51 }
 0x29a   : > { %v2875_v38 = vadd.f32 %v2871_v53, %v2863_v22  ;;  %v2876_v12 = vadd.f32 %v2872_v9, %v2864_v44  ;;  %v2877_v43 = vadd.f32 %v2873_v40, %v2865_v49  ;;  %v2878_v34 = vadd.f32 %v2874_v42, %v2866_v47  ;;  %v7455_v53 = vld [vmem:[%s4907_s22 + $0x80] sm:$0xff]  ;;  %v7459_v40 = vld [vmem:[%s4907_s22 + $0x88] sm:$0xff]  ;;  %v7463_v42 = vld [vmem:[%s4907_s22 + $0x90] sm:$0xff] }
 0x29b   : > { %v2895_v19 = vmul.f32 %v7435_v21, %v2894_v59  ;;  %v2896_v50 = vmul.f32 %v7439_v24, %v2894_v59  ;;  %v2897_v25 = vmul.f32 %v7443_v27, %v2894_v59  ;;  %v2898_v58 = vmul.f32 %v7447_v46, %v2894_v59  ;;  %v7467_v44 = vld [vmem:[%s4907_s22 + $0x98] sm:$0xff] }
 0x29c   : > { %v2887_v51 = vadd.f32 %v2883_v18, %v2875_v38  ;;  %v2888_v48 = vadd.f32 %v2884_v20, %v2876_v12  ;;  %v2889_v35 = vadd.f32 %v2885_v11, %v2877_v43  ;;  %v2890_v8 = vadd.f32 %v2886_v32, %v2878_v34  ;;  %9233 = vst [vmem:[#allocation109_spill] sm:$0xff] %v7467_v44  ;;  %v7471_v32 = vld [vmem:[%s4907_s22 + $0xa0] sm:$0xff]  ;;  %v7476_v12 = vld [vmem:[%s4907_s22 + $0xa8] sm:$0xff]  ;;  %v7481_v34 = vld [vmem:[%s4907_s22 + $0xb0] sm:$0xff] }
 0x29d   : > { %v2907_v9 = vmul.f32 %v7455_v53, %v2906_v36  ;;  %v2908_v59 = vmul.f32 %v7459_v40, %v2906_v36  ;;  %v2909_v22 = vmul.f32 %v7463_v42, %v2906_v36  ;;  %v2910_v49 = vmul.f32 %v7467_v44, %v2906_v36  ;;  %9234 = vst [vmem:[#allocation110_spill] sm:$0xff] %v7471_v32  ;;  %v7599_v44 = vld [vmem:[%s4907_s22 + $0x178] sm:$0xff] }
 0x29e   : > { %v2899_v47 = vadd.f32 %v2895_v19, %v2887_v51  ;;  %v2900_v18 = vadd.f32 %v2896_v50, %v2888_v48  ;;  %v2901_v20 = vadd.f32 %v2897_v25, %v2889_v35  ;;  %v2902_v11 = vadd.f32 %v2898_v58, %v2890_v8  ;;  %9235 = vst [vmem:[#allocation111_spill] sm:$0xff] %v7476_v12  ;;  %v7486_v19 = vld [vmem:[%s4907_s22 + $0xb8] sm:$0xff]  ;;  %v7491_v35 = vld [vmem:[%s4907_s22 + $0xc0] sm:$0xff] }
 0x29f   : > { %v2919_v38 = vmul.f32 %v7471_v32, %v7376_v29  ;;  %v2920_v43 = vmul.f32 %v7476_v12, %v7376_v29  ;;  %9236 = vst [vmem:[#allocation112_spill] sm:$0xff] %v7481_v34  ;;  %v2921_v36 = vmul.f32 %v7481_v34, %v7376_v29  ;;  %9237 = vst [vmem:[#allocation12_spill] sm:$0xff] %v7486_v19  ;;  %v7496_v12 = vld [vmem:[%s4907_s22 + $0xc8] sm:$0xff]  ;;  %v7501_v32 = vld [vmem:[%s4907_s22 + $0xd0] sm:$0xff] }
 0x2a0   : > { %v2922_v50 = vmul.f32 %v7486_v19, %v7376_v29  ;;  %v2911_v25 = vadd.f32 %v2907_v9, %v2899_v47  ;;  %v2912_v58 = vadd.f32 %v2908_v59, %v2900_v18  ;;  %v2913_v51 = vadd.f32 %v2909_v22, %v2901_v20  ;;  %9238 = vst [vmem:[#allocation13_spill] sm:$0xff] %v7491_v35  ;;  %v7506_v9 = vld [vmem:[%s4907_s22 + $0xd8] sm:$0xff]  ;;  %v7511_v20 = vld [vmem:[%s4907_s22 + $0xe0] sm:$0xff]  ;;  %v7579_v19 = vld [vmem:[%s4907_s22 + $0x150] sm:$0xff] }
 0x2a1   : > { %v2914_v48 = vadd.f32 %v2910_v49, %v2902_v11  ;;  %v2931_v8 = vmul.f32 %v7491_v35, %v7379_v33  ;;  %9239 = vst [vmem:[#allocation14_spill] sm:$0xff] %v7496_v12  ;;  %v2932_v34 = vmul.f32 %v7496_v12, %v7379_v33  ;;  %9240 = vst [vmem:[#allocation15_spill] sm:$0xff] %v7501_v32  ;;  %v7516_v12 = vld [vmem:[%s4907_s22 + $0xe8] sm:$0xff] }
 0x2a2   : > { %v2933_v29 = vmul.f32 %v7501_v32, %v7379_v33  ;;  %9241 = vst [vmem:[#allocation16_spill] sm:$0xff] %v7506_v9  ;;  %v2934_v59 = vmul.f32 %v7506_v9, %v7379_v33  ;;  %v2923_v22 = vadd.f32 %v2919_v38, %v2911_v25  ;;  %v2924_v49 = vadd.f32 %v2920_v43, %v2912_v58  ;;  %v7521_v32 = vld [vmem:[%s4907_s22 + $0xf0] sm:$0xff]  ;;  %v7526_v38 = vld [vmem:[%s4907_s22 + $0xf8] sm:$0xff] }
 0x2a3   : > { %v2925_v47 = vadd.f32 %v2921_v36, %v2913_v51  ;;  %v2926_v18 = vadd.f32 %v2922_v50, %v2914_v48  ;;  %9242 = vst [vmem:[#allocation17_spill] sm:$0xff] %v7511_v20  ;;  %v2943_v11 = vmul.f32 %v7511_v20, %v7382_v23  ;;  %9243 = vst [vmem:[#allocation18_spill] sm:$0xff] %v7516_v12  ;;  %v7551_v20 = vld [vmem:[%s4907_s22 + $0x118] sm:$0xff] }
 0x2a4   : > { %v2944_v35 = vmul.f32 %v7516_v12, %v7382_v23  ;;  %9244 = vst [vmem:[#allocation19_spill] sm:$0xff] %v7521_v32  ;;  %v2945_v33 = vmul.f32 %v7521_v32, %v7382_v23  ;;  %9245 = vst [vmem:[#allocation20_spill] sm:$0xff] %v7526_v38  ;;  %v2946_v43 = vmul.f32 %v7526_v38, %v7382_v23  ;;  %v7547_v38 = vld [vmem:[%s4907_s22 + $0x110] sm:$0xff] }
 0x2a5   : > { %v2935_v36 = vadd.f32 %v2931_v8, %v2923_v22  ;;  %v2936_v50 = vadd.f32 %v2932_v34, %v2924_v49  ;;  %v2937_v25 = vadd.f32 %v2933_v29, %v2925_v47  ;;  %v2938_v58 = vadd.f32 %v2934_v59, %v2926_v18  ;;  %v7539_v22 = vld [vmem:[%s4907_s22 + $0x100] sm:$0xff]  ;;  %v7543_v47 = vld [vmem:[%s4907_s22 + $0x108] sm:$0xff]  ;;  %9248 = vst [vmem:[#allocation23_spill] sm:$0xff] %v7547_v38 }
 0x2a6   : > { %v2954_v51 = vrot.slane %v7432_v17, %v4851_v2  ;;  %v2966_v48 = vrot.slane %v7432_v17, %v4853_v3  ;;  %v2978_v32 = vrot.slane %v7432_v17, %v4855_v4  ;;  %v2990_v23 = vrot.slane %v7432_v17, %v4857_v5  ;;  %9246 = vst [vmem:[#allocation21_spill] sm:$0xff] %v7539_v22 }
 0x2a7   : > { %v2947_v8 = vadd.f32 %v2943_v11, %v2935_v36  ;;  %v2948_v34 = vadd.f32 %v2944_v35, %v2936_v50  ;;  %v2949_v29 = vadd.f32 %v2945_v33, %v2937_v25  ;;  %v2950_v59 = vadd.f32 %v2946_v43, %v2938_v58  ;;  %9247 = vst [vmem:[#allocation22_spill] sm:$0xff] %v7543_v47  ;;  %v7555_v11 = vld [vmem:[%s4907_s22 + $0x120] sm:$0xff]  ;;  %v7559_v43 = vld [vmem:[%s4907_s22 + $0x128] sm:$0xff]  ;;  %v7563_v50 = vld [vmem:[%s4907_s22 + $0x130] sm:$0xff] }
 0x2a8   : > { %v2955_v49 = vmul.f32 %v7539_v22, %v2954_v51  ;;  %v2956_v18 = vmul.f32 %v7543_v47, %v2954_v51  ;;  %v2957_v12 = vmul.f32 %v7547_v38, %v2954_v51  ;;  %9249 = vst [vmem:[#allocation24_spill] sm:$0xff] %v7551_v20  ;;  %v2958_v35 = vmul.f32 %v7551_v20, %v2954_v51  ;;  %v7567_v58 = vld [vmem:[%s4907_s22 + $0x138] sm:$0xff] }
 0x2a9   : > { %9250 = vst [vmem:[#allocation25_spill] sm:$0xff] %v7555_v11  ;;  %v2967_v33 = vmul.f32 %v7555_v11, %v2966_v48  ;;  %9251 = vst [vmem:[#allocation26_spill] sm:$0xff] %v7559_v43  ;;  %v2968_v36 = vmul.f32 %v7559_v43, %v2966_v48  ;;  %v2969_v25 = vmul.f32 %v7563_v50, %v2966_v48  ;;  %v7571_v11 = vld [vmem:[%s4907_s22 + $0x140] sm:$0xff]  ;;  %v7575_v43 = vld [vmem:[%s4907_s22 + $0x148] sm:$0xff] }
 0x2aa   : > { %9252 = vst [vmem:[#allocation27_spill] sm:$0xff] %v7563_v50  ;;  %9253 = vst [vmem:[#allocation28_spill] sm:$0xff] %v7567_v58  ;;  %v2970_v38 = vmul.f32 %v7567_v58, %v2966_v48  ;;  %v2959_v47 = vadd.f32 %v2955_v49, %v2947_v8  ;;  %v2960_v51 = vadd.f32 %v2956_v18, %v2948_v34  ;;  %v7583_v8 = vld [vmem:[%s4907_s22 + $0x158] sm:$0xff]  ;;  %v7587_v18 = vld [vmem:[%s4907_s22 + $0x160] sm:$0xff] }
 0x2ab   : > { %v2961_v20 = vadd.f32 %v2957_v12, %v2949_v29  ;;  %v2962_v22 = vadd.f32 %v2958_v35, %v2950_v59  ;;  %9254 = vst [vmem:[#allocation29_spill] sm:$0xff] %v7571_v11  ;;  %v2979_v9 = vmul.f32 %v7571_v11, %v2978_v32  ;;  %9255 = vst [vmem:[#allocation30_spill] sm:$0xff] %v7575_v43  ;;  %v7591_v11 = vld [vmem:[%s4907_s22 + $0x168] sm:$0xff]  ;;  %v7595_v58 = vld [vmem:[%s4907_s22 + $0x170] sm:$0xff] }
 0x2ac   : > { %v2980_v50 = vmul.f32 %v7575_v43, %v2978_v32  ;;  %9256 = vst [vmem:[#allocation31_spill] sm:$0xff] %v7579_v19  ;;  %v2981_v48 = vmul.f32 %v7579_v19, %v2978_v32  ;;  %v2982_v12 = vmul.f32 %v7583_v8, %v2978_v32  ;;  %v2971_v34 = vadd.f32 %v2967_v33, %v2959_v47 }
 0x2ad   : > { %v2972_v29 = vadd.f32 %v2968_v36, %v2960_v51  ;;  %v2973_v59 = vadd.f32 %v2969_v25, %v2961_v20  ;;  %v2974_v49 = vadd.f32 %v2970_v38, %v2962_v22  ;;  %9257 = vst [vmem:[#allocation32_spill] sm:$0xff] %v7587_v18  ;;  %v2991_v35 = vmul.f32 %v7587_v18, %v2990_v23  ;;  %v7671_v18 = vld [vmem:[%s4907_s22 + $0x1f8] sm:$0xff] }
 0x2ae   : > { %9258 = vst [vmem:[#allocation33_spill] sm:$0xff] %v7591_v11  ;;  %v2992_v43 = vmul.f32 %v7591_v11, %v2990_v23  ;;  %9259 = vst [vmem:[#allocation34_spill] sm:$0xff] %v7595_v58  ;;  %v2993_v19 = vmul.f32 %v7595_v58, %v2990_v23  ;;  %v2994_v32 = vmul.f32 %v7599_v44, %v2990_v23  ;;  %v7651_v11 = vld [vmem:[%s4907_s22 + $0x1d0] sm:$0xff] }
 0x2af   : > { %9260 = vst [vmem:[#allocation35_spill] sm:$0xff] %v7599_v44  ;;  %v2983_v20 = vadd.f32 %v2979_v9, %v2971_v34  ;;  %v2984_v38 = vadd.f32 %v2980_v50, %v2972_v29  ;;  %v2985_v22 = vadd.f32 %v2981_v48, %v2973_v59  ;;  %v2986_v47 = vadd.f32 %v2982_v12, %v2974_v49  ;;  %v7611_v12 = vld [vmem:[%s4907_s22 + $0x180] sm:$0xff]  ;;  %v7615_v29 = vld [vmem:[%s4907_s22 + $0x188] sm:$0xff]  ;;  %v7619_v49 = vld [vmem:[%s4907_s22 + $0x190] sm:$0xff] }
 0x2b0   : > { %v3002_v33 = vrot.slane %v7432_v17, %v4871_v10  ;;  %v3014_v36 = vrot.slane %v7432_v17, %v4882_v14  ;;  %v3026_v25 = vrot.slane %v7432_v17, %v4884_v15  ;;  %v3038_v23 = vrot.slane %v7432_v17, %v4886_v16  ;;  %9261 = vst [vmem:[#allocation36_spill] sm:$0xff] %v7611_v12  ;;  %v7623_v17 = vld [vmem:[%s4907_s22 + $0x198] sm:$0xff] }
 0x2b1   : > { %v2995_v9 = vadd.f32 %v2991_v35, %v2983_v20  ;;  %v2996_v50 = vadd.f32 %v2992_v43, %v2984_v38  ;;  %v2997_v51 = vadd.f32 %v2993_v19, %v2985_v22  ;;  %v2998_v48 = vadd.f32 %v2994_v32, %v2986_v47  ;;  %9262 = vst [vmem:[#allocation37_spill] sm:$0xff] %v7615_v29  ;;  %v7627_v43 = vld [vmem:[%s4907_s22 + $0x1a0] sm:$0xff]  ;;  %v7631_v32 = vld [vmem:[%s4907_s22 + $0x1a8] sm:$0xff]  ;;  %v7635_v38 = vld [vmem:[%s4907_s22 + $0x1b0] sm:$0xff] }
 0x2b2   : > { %v3003_v34 = vmul.f32 %v7611_v12, %v3002_v33  ;;  %v3004_v59 = vmul.f32 %v7615_v29, %v3002_v33  ;;  %9263 = vst [vmem:[#allocation38_spill] sm:$0xff] %v7619_v49  ;;  %v3005_v44 = vmul.f32 %v7619_v49, %v3002_v33  ;;  %9264 = vst [vmem:[#allocation39_spill] sm:$0xff] %v7623_v17  ;;  %v7639_v47 = vld [vmem:[%s4907_s22 + $0x1b8] sm:$0xff] }
 0x2b3   : > { %v3006_v19 = vmul.f32 %v7623_v17, %v3002_v33  ;;  %9265 = vst [vmem:[#allocation40_spill] sm:$0xff] %v7627_v43  ;;  %v3015_v35 = vmul.f32 %v7627_v43, %v3014_v36  ;;  %9266 = vst [vmem:[#allocation41_spill] sm:$0xff] %v7631_v32  ;;  %v3016_v20 = vmul.f32 %v7631_v32, %v3014_v36  ;;  %v7643_v43 = vld [vmem:[%s4907_s22 + $0x1c0] sm:$0xff]  ;;  %v7647_v32 = vld [vmem:[%s4907_s22 + $0x1c8] sm:$0xff] }
 0x2b4   : > { %9267 = vst [vmem:[#allocation42_spill] sm:$0xff] %v7635_v38  ;;  %v3017_v22 = vmul.f32 %v7635_v38, %v3014_v36  ;;  %9268 = vst [vmem:[#allocation43_spill] sm:$0xff] %v7639_v47  ;;  %v3018_v49 = vmul.f32 %v7639_v47, %v3014_v36  ;;  %v3007_v29 = vadd.f32 %v3003_v34, %v2995_v9  ;;  %v7655_v9 = vld [vmem:[%s4907_s22 + $0x1d8] sm:$0xff]  ;;  %v7667_v47 = vld [vmem:[%s4907_s22 + $0x1f0] sm:$0xff] }
 0x2b5   : > { %v3008_v33 = vadd.f32 %v3004_v59, %v2996_v50  ;;  %v3009_v17 = vadd.f32 %v3005_v44, %v2997_v51  ;;  %v3010_v12 = vadd.f32 %v3006_v19, %v2998_v48  ;;  %9269 = vst [vmem:[#allocation44_spill] sm:$0xff] %v7643_v43  ;;  %v3027_v58 = vmul.f32 %v7643_v43, %v3026_v25  ;;  %v7659_v59 = vld [vmem:[%s4907_s22 + $0x1e0] sm:$0xff]  ;;  %v7663_v43 = vld [vmem:[%s4907_s22 + $0x1e8] sm:$0xff] }
 0x2b6   : > { %9270 = vst [vmem:[#allocation45_spill] sm:$0xff] %v7647_v32  ;;  %v3028_v38 = vmul.f32 %v7647_v32, %v3026_v25  ;;  %9271 = vst [vmem:[#allocation46_spill] sm:$0xff] %v7651_v11  ;;  %v3029_v36 = vmul.f32 %v7651_v11, %v3026_v25  ;;  %v3030_v44 = vmul.f32 %v7655_v9, %v3026_v25 }
 0x2b7   : > { %9272 = vst [vmem:[#allocation47_spill] sm:$0xff] %v7655_v9  ;;  %v3019_v50 = vadd.f32 %v3015_v35, %v3007_v29  ;;  %v3020_v51 = vadd.f32 %v3016_v20, %v3008_v33  ;;  %v3021_v48 = vadd.f32 %v3017_v22, %v3009_v17  ;;  %v3022_v34 = vadd.f32 %v3018_v49, %v3010_v12  ;;  %v7743_v9 = vld [vmem:[%s4907_s22 + $0x278] sm:$0xff] }
 0x2b8   : > { %9273 = vst [vmem:[#allocation48_spill] sm:$0xff] %v7659_v59  ;;  %v3039_v19 = vmul.f32 %v7659_v59, %v3038_v23  ;;  %9274 = vst [vmem:[#allocation49_spill] sm:$0xff] %v7663_v43  ;;  %v3040_v32 = vmul.f32 %v7663_v43, %v3038_v23  ;;  %v3041_v11 = vmul.f32 %v7667_v47, %v3038_v23  ;;  %v7723_v59 = vld [vmem:[%s4907_s22 + $0x250] sm:$0xff] }
 0x2b9   : > { %9275 = vst [vmem:[#allocation50_spill] sm:$0xff] %v7667_v47  ;;  %9276 = vst [vmem:[#allocation51_spill] sm:$0xff] %v7671_v18  ;;  %v3042_v25 = vmul.f32 %v7671_v18, %v3038_v23  ;;  %v3031_v29 = vadd.f32 %v3027_v58, %v3019_v50  ;;  %v3032_v12 = vadd.f32 %v3028_v38, %v3020_v51  ;;  %v7687_v51 = vld [vmem:[%s4907_s22 + $0x208] sm:$0xff]  ;;  %v7695_v47 = vld [vmem:[%s4907_s22 + $0x218] sm:$0xff] }
 0x2ba   : > { %v3033_v49 = vadd.f32 %v3029_v36, %v3021_v48  ;;  %v3034_v17 = vadd.f32 %v3030_v44, %v3022_v34  ;;  %v3050_v35 = vrot.slane %v7450_v13, %v4851_v2  ;;  %v3062_v20 = vrot.slane %v7450_v13, %v4853_v3  ;;  %v7683_v44 = vld [vmem:[%s4907_s22 + $0x200] sm:$0xff]  ;;  %9278 = vst [vmem:[#allocation53_spill] sm:$0xff] %v7687_v51  ;;  %v7691_v34 = vld [vmem:[%s4907_s22 + $0x210] sm:$0xff] }
 0x2bb   : > { %v3074_v22 = vrot.slane %v7450_v13, %v4855_v4  ;;  %v3086_v23 = vrot.slane %v7450_v13, %v4857_v5  ;;  %v3043_v58 = vadd.f32 %v3039_v19, %v3031_v29  ;;  %v3044_v38 = vadd.f32 %v3040_v32, %v3032_v12  ;;  %9277 = vst [vmem:[#allocation52_spill] sm:$0xff] %v7683_v44  ;;  %v7699_v32 = vld [vmem:[%s4907_s22 + $0x220] sm:$0xff]  ;;  %v7707_v12 = vld [vmem:[%s4907_s22 + $0x230] sm:$0xff] }
 0x2bc   : > { %v3045_v33 = vadd.f32 %v3041_v11, %v3033_v49  ;;  %v3046_v36 = vadd.f32 %v3042_v25, %v3034_v17  ;;  %v3051_v50 = vmul.f32 %v7683_v44, %v3050_v35  ;;  %v3052_v48 = vmul.f32 %v7687_v51, %v3050_v35  ;;  %9279 = vst [vmem:[#allocation54_spill] sm:$0xff] %v7691_v34  ;;  %v7703_v25 = vld [vmem:[%s4907_s22 + $0x228] sm:$0xff]  ;;  %v7711_v17 = vld [vmem:[%s4907_s22 + $0x238] sm:$0xff] }
 0x2bd   : > { %v3053_v18 = vmul.f32 %v7691_v34, %v3050_v35  ;;  %9280 = vst [vmem:[#allocation55_spill] sm:$0xff] %v7695_v47  ;;  %v3054_v11 = vmul.f32 %v7695_v47, %v3050_v35  ;;  %9281 = vst [vmem:[#allocation56_spill] sm:$0xff] %v7699_v32  ;;  %v3063_v19 = vmul.f32 %v7699_v32, %v3062_v20  ;;  %v7715_v32 = vld [vmem:[%s4907_s22 + $0x240] sm:$0xff] }
 0x2be   : > { %9282 = vst [vmem:[#allocation57_spill] sm:$0xff] %v7703_v25  ;;  %v3064_v29 = vmul.f32 %v7703_v25, %v3062_v20  ;;  %9283 = vst [vmem:[#allocation58_spill] sm:$0xff] %v7707_v12  ;;  %v3065_v49 = vmul.f32 %v7707_v12, %v3062_v20  ;;  %v3066_v34 = vmul.f32 %v7711_v17, %v3062_v20  ;;  %v7719_v25 = vld [vmem:[%s4907_s22 + $0x248] sm:$0xff] }
 0x2bf   : > { %9284 = vst [vmem:[#allocation59_spill] sm:$0xff] %v7711_v17  ;;  %v3055_v51 = vadd.f32 %v3051_v50, %v3043_v58  ;;  %v3056_v35 = vadd.f32 %v3052_v48, %v3044_v38  ;;  %v3057_v47 = vadd.f32 %v3053_v18, %v3045_v33  ;;  %v3058_v44 = vadd.f32 %v3054_v11, %v3046_v36  ;;  %v7727_v58 = vld [vmem:[%s4907_s22 + $0x258] sm:$0xff]  ;;  %v7731_v48 = vld [vmem:[%s4907_s22 + $0x260] sm:$0xff]  ;;  %v7739_v17 = vld [vmem:[%s4907_s22 + $0x270] sm:$0xff] }
 0x2c0   : > { %9285 = vst [vmem:[#allocation60_spill] sm:$0xff] %v7715_v32  ;;  %v3075_v43 = vmul.f32 %v7715_v32, %v3074_v22  ;;  %9286 = vst [vmem:[#allocation61_spill] sm:$0xff] %v7719_v25  ;;  %v3076_v12 = vmul.f32 %v7719_v25, %v3074_v22  ;;  %v3077_v20 = vmul.f32 %v7723_v59, %v3074_v22  ;;  %v7735_v32 = vld [vmem:[%s4907_s22 + $0x268] sm:$0xff] }
 0x2c1   : > { %9287 = vst [vmem:[#allocation62_spill] sm:$0xff] %v7723_v59  ;;  %v3078_v18 = vmul.f32 %v7727_v58, %v3074_v22  ;;  %v3067_v38 = vadd.f32 %v3063_v19, %v3055_v51  ;;  %v3068_v33 = vadd.f32 %v3064_v29, %v3056_v35  ;;  %v3069_v36 = vadd.f32 %v3065_v49, %v3057_v47 }
 0x2c2   : > { %v3070_v50 = vadd.f32 %v3066_v34, %v3058_v44  ;;  %9288 = vst [vmem:[#allocation63_spill] sm:$0xff] %v7731_v48  ;;  %v3087_v11 = vmul.f32 %v7731_v48, %v3086_v23  ;;  %9289 = vst [vmem:[#allocation64_spill] sm:$0xff] %v7735_v32  ;;  %v3088_v25 = vmul.f32 %v7735_v32, %v3086_v23  ;;  %v7795_v32 = vld [vmem:[%s4907_s22 + $0x2d0] sm:$0xff]  ;;  %v7815_v48 = vld [vmem:[%s4907_s22 + $0x2f8] sm:$0xff] }
 0x2c3   : > { %9290 = vst [vmem:[#allocation65_spill] sm:$0xff] %v7739_v17  ;;  %v3089_v59 = vmul.f32 %v7739_v17, %v3086_v23  ;;  %9291 = vst [vmem:[#allocation66_spill] sm:$0xff] %v7743_v9  ;;  %v3090_v22 = vmul.f32 %v7743_v9, %v3086_v23  ;;  %v3079_v47 = vadd.f32 %v3075_v43, %v3067_v38 }
 0x2c4   : > { %v3080_v44 = vadd.f32 %v3076_v12, %v3068_v33  ;;  %v3081_v51 = vadd.f32 %v3077_v20, %v3069_v36  ;;  %v3082_v34 = vadd.f32 %v3078_v18, %v3070_v50  ;;  %v3098_v19 = vrot.slane %v7450_v13, %v4871_v10  ;;  %v7755_v18 = vld [vmem:[%s4907_s22 + $0x280] sm:$0xff]  ;;  %v7759_v33 = vld [vmem:[%s4907_s22 + $0x288] sm:$0xff]  ;;  %v7763_v50 = vld [vmem:[%s4907_s22 + $0x290] sm:$0xff]  ;;  %9302 = vst [vmem:[#allocation77_spill] sm:$0xff] %v7795_v32 }
 0x2c5   : > { %v3110_v29 = vrot.slane %v7450_v13, %v4882_v14  ;;  %v3122_v49 = vrot.slane %v7450_v13, %v4884_v15  ;;  %v3134_v23 = vrot.slane %v7450_v13, %v4886_v16  ;;  %v3091_v43 = vadd.f32 %v3087_v11, %v3079_v47  ;;  %9292 = vst [vmem:[#allocation67_spill] sm:$0xff] %v7755_v18  ;;  %v7767_v13 = vld [vmem:[%s4907_s22 + $0x298] sm:$0xff] }
 0x2c6   : > { %v3092_v12 = vadd.f32 %v3088_v25, %v3080_v44  ;;  %v3093_v35 = vadd.f32 %v3089_v59, %v3081_v51  ;;  %v3094_v20 = vadd.f32 %v3090_v22, %v3082_v34  ;;  %v3099_v38 = vmul.f32 %v7755_v18, %v3098_v19  ;;  %9293 = vst [vmem:[#allocation68_spill] sm:$0xff] %v7759_v33  ;;  %v7771_v25 = vld [vmem:[%s4907_s22 + $0x2a0] sm:$0xff]  ;;  %v7775_v22 = vld [vmem:[%s4907_s22 + $0x2a8] sm:$0xff]  ;;  %v7779_v44 = vld [vmem:[%s4907_s22 + $0x2b0] sm:$0xff] }
 0x2c7   : > { %v3100_v36 = vmul.f32 %v7759_v33, %v3098_v19  ;;  %9294 = vst [vmem:[#allocation69_spill] sm:$0xff] %v7763_v50  ;;  %v3101_v9 = vmul.f32 %v7763_v50, %v3098_v19  ;;  %9295 = vst [vmem:[#allocation70_spill] sm:$0xff] %v7767_v13  ;;  %v3102_v59 = vmul.f32 %v7767_v13, %v3098_v19  ;;  %v7783_v34 = vld [vmem:[%s4907_s22 + $0x2b8] sm:$0xff] }
 0x2c8   : > { %9296 = vst [vmem:[#allocation71_spill] sm:$0xff] %v7771_v25  ;;  %v3111_v11 = vmul.f32 %v7771_v25, %v3110_v29  ;;  %9297 = vst [vmem:[#allocation72_spill] sm:$0xff] %v7775_v22  ;;  %v3112_v47 = vmul.f32 %v7775_v22, %v3110_v29  ;;  %v3113_v51 = vmul.f32 %v7779_v44, %v3110_v29  ;;  %v7787_v25 = vld [vmem:[%s4907_s22 + $0x2c0] sm:$0xff]  ;;  %v7791_v22 = vld [vmem:[%s4907_s22 + $0x2c8] sm:$0xff] }
 0x2c9   : > { %9298 = vst [vmem:[#allocation73_spill] sm:$0xff] %v7779_v44  ;;  %9299 = vst [vmem:[#allocation74_spill] sm:$0xff] %v7783_v34  ;;  %v3114_v50 = vmul.f32 %v7783_v34, %v3110_v29  ;;  %v3103_v33 = vadd.f32 %v3099_v38, %v3091_v43  ;;  %v3104_v19 = vadd.f32 %v3100_v36, %v3092_v12  ;;  %v7799_v43 = vld [vmem:[%s4907_s22 + $0x2d8] sm:$0xff]  ;;  %v7803_v36 = vld [vmem:[%s4907_s22 + $0x2e0] sm:$0xff] }
 0x2ca   : > { %v3105_v13 = vadd.f32 %v3101_v9, %v3093_v35  ;;  %v3106_v18 = vadd.f32 %v3102_v59, %v3094_v20  ;;  %9300 = vst [vmem:[#allocation75_spill] sm:$0xff] %v7787_v25  ;;  %v3123_v17 = vmul.f32 %v7787_v25, %v3122_v49  ;;  %9301 = vst [vmem:[#allocation76_spill] sm:$0xff] %v7791_v22  ;;  %v7807_v25 = vld [vmem:[%s4907_s22 + $0x2e8] sm:$0xff]  ;;  %v7811_v34 = vld [vmem:[%s4907_s22 + $0x2f0] sm:$0xff] }
 0x2cb   : > { %v3124_v44 = vmul.f32 %v7791_v22, %v3122_v49  ;;  %v3125_v29 = vmul.f32 %v7795_v32, %v3122_v49  ;;  %9303 = vst [vmem:[#allocation78_spill] sm:$0xff] %v7799_v43  ;;  %v3126_v9 = vmul.f32 %v7799_v43, %v3122_v49  ;;  %v3115_v12 = vadd.f32 %v3111_v11, %v3103_v33  ;;  %v7887_v43 = vld [vmem:[%s4907_s22 + $0x378] sm:$0xff] }
 0x2cc   : > { %v3116_v35 = vadd.f32 %v3112_v47, %v3104_v19  ;;  %v3117_v20 = vadd.f32 %v3113_v51, %v3105_v13  ;;  %v3118_v38 = vadd.f32 %v3114_v50, %v3106_v18  ;;  %9304 = vst [vmem:[#allocation79_spill] sm:$0xff] %v7803_v36  ;;  %v3135_v59 = vmul.f32 %v7803_v36, %v3134_v23  ;;  %v7867_v36 = vld [vmem:[%s4907_s22 + $0x350] sm:$0xff] }
 0x2cd   : > { %9305 = vst [vmem:[#allocation80_spill] sm:$0xff] %v7807_v25  ;;  %v3136_v22 = vmul.f32 %v7807_v25, %v3134_v23  ;;  %9306 = vst [vmem:[#allocation81_spill] sm:$0xff] %v7811_v34  ;;  %v3137_v32 = vmul.f32 %v7811_v34, %v3134_v23  ;;  %v3138_v49 = vmul.f32 %v7815_v48, %v3134_v23  ;;  %v7839_v34 = vld [vmem:[%s4907_s22 + $0x318] sm:$0xff] }
 0x2ce   : > { %9307 = vst [vmem:[#allocation82_spill] sm:$0xff] %v7815_v48  ;;  %v3127_v33 = vadd.f32 %v3123_v17, %v3115_v12  ;;  %v3128_v18 = vadd.f32 %v3124_v44, %v3116_v35  ;;  %v3129_v50 = vadd.f32 %v3125_v29, %v3117_v20  ;;  %v3130_v13 = vadd.f32 %v3126_v9, %v3118_v38  ;;  %v7827_v9 = vld [vmem:[%s4907_s22 + $0x300] sm:$0xff]  ;;  %v7831_v35 = vld [vmem:[%s4907_s22 + $0x308] sm:$0xff]  ;;  %v7835_v38 = vld [vmem:[%s4907_s22 + $0x310] sm:$0xff] }
 0x2cf   : > { %v3146_v11 = vrot.slane %v7452_v28, %v4851_v2  ;;  %v3158_v47 = vrot.slane %v7452_v28, %v4853_v3  ;;  %v3170_v51 = vrot.slane %v7452_v28, %v4855_v4  ;;  %v3182_v23 = vrot.slane %v7452_v28, %v4857_v5  ;;  %9308 = vst [vmem:[#allocation83_spill] sm:$0xff] %v7827_v9 }
 0x2d0   : > { %v3139_v17 = vadd.f32 %v3135_v59, %v3127_v33  ;;  %v3140_v44 = vadd.f32 %v3136_v22, %v3128_v18  ;;  %v3141_v19 = vadd.f32 %v3137_v32, %v3129_v50  ;;  %v3142_v29 = vadd.f32 %v3138_v49, %v3130_v13  ;;  %9309 = vst [vmem:[#allocation84_spill] sm:$0xff] %v7831_v35  ;;  %v7843_v22 = vld [vmem:[%s4907_s22 + $0x320] sm:$0xff]  ;;  %v7847_v49 = vld [vmem:[%s4907_s22 + $0x328] sm:$0xff]  ;;  %v7851_v18 = vld [vmem:[%s4907_s22 + $0x330] sm:$0xff] }
 0x2d1   : > { %v3147_v12 = vmul.f32 %v7827_v9, %v3146_v11  ;;  %v3148_v20 = vmul.f32 %v7831_v35, %v3146_v11  ;;  %9310 = vst [vmem:[#allocation85_spill] sm:$0xff] %v7835_v38  ;;  %v3149_v48 = vmul.f32 %v7835_v38, %v3146_v11  ;;  %9311 = vst [vmem:[#allocation86_spill] sm:$0xff] %v7839_v34  ;;  %v7855_v13 = vld [vmem:[%s4907_s22 + $0x338] sm:$0xff] }
 0x2d2   : > { %v3150_v32 = vmul.f32 %v7839_v34, %v3146_v11  ;;  %9312 = vst [vmem:[#allocation87_spill] sm:$0xff] %v7843_v22  ;;  %v3159_v59 = vmul.f32 %v7843_v22, %v3158_v47  ;;  %9313 = vst [vmem:[#allocation88_spill] sm:$0xff] %v7847_v49  ;;  %v3160_v33 = vmul.f32 %v7847_v49, %v3158_v47  ;;  %v7859_v22 = vld [vmem:[%s4907_s22 + $0x340] sm:$0xff]  ;;  %v7863_v49 = vld [vmem:[%s4907_s22 + $0x348] sm:$0xff] }
 0x2d3   : > { %9314 = vst [vmem:[#allocation89_spill] sm:$0xff] %v7851_v18  ;;  %v3161_v50 = vmul.f32 %v7851_v18, %v3158_v47  ;;  %9315 = vst [vmem:[#allocation90_spill] sm:$0xff] %v7855_v13  ;;  %v3162_v38 = vmul.f32 %v7855_v13, %v3158_v47  ;;  %v3151_v35 = vadd.f32 %v3147_v12, %v3139_v17  ;;  %v7871_v17 = vld [vmem:[%s4907_s22 + $0x358] sm:$0xff]  ;;  %v7883_v13 = vld [vmem:[%s4907_s22 + $0x370] sm:$0xff] }
 0x2d4   : > { %v3152_v11 = vadd.f32 %v3148_v20, %v3140_v44  ;;  %v3153_v34 = vadd.f32 %v3149_v48, %v3141_v19  ;;  %v3154_v9 = vadd.f32 %v3150_v32, %v3142_v29  ;;  %9316 = vst [vmem:[#allocation91_spill] sm:$0xff] %v7859_v22  ;;  %v3171_v25 = vmul.f32 %v7859_v22, %v3170_v51  ;;  %v7875_v20 = vld [vmem:[%s4907_s22 + $0x360] sm:$0xff]  ;;  %v7879_v22 = vld [vmem:[%s4907_s22 + $0x368] sm:$0xff] }
 0x2d5   : > { %9317 = vst [vmem:[#allocation92_spill] sm:$0xff] %v7863_v49  ;;  %v3172_v18 = vmul.f32 %v7863_v49, %v3170_v51  ;;  %9318 = vst [vmem:[#allocation93_spill] sm:$0xff] %v7867_v36  ;;  %v3173_v47 = vmul.f32 %v7867_v36, %v3170_v51  ;;  %v3174_v48 = vmul.f32 %v7871_v17, %v3170_v51 }
 0x2d6   : > { %v3163_v44 = vadd.f32 %v3159_v59, %v3151_v35  ;;  %v3164_v19 = vadd.f32 %v3160_v33, %v3152_v11  ;;  %v3165_v29 = vadd.f32 %v3161_v50, %v3153_v34  ;;  %v3166_v12 = vadd.f32 %v3162_v38, %v3154_v9  ;;  %9319 = vst [vmem:[#allocation94_spill] sm:$0xff] %v7883_v13 }
 0x2d7   : > { %v3183_v32 = vmul.f32 %v7875_v20, %v3182_v23  ;;  %v3184_v49 = vmul.f32 %v7879_v22, %v3182_v23  ;;  %v3185_v36 = vmul.f32 %v7883_v13, %v3182_v23  ;;  %9320 = vst [vmem:[#allocation95_spill] sm:$0xff] %v7887_v43  ;;  %v3186_v51 = vmul.f32 %v7887_v43, %v3182_v23 }
 0x2d8   : > { %v3175_v34 = vadd.f32 %v3171_v25, %v3163_v44  ;;  %v3176_v9 = vadd.f32 %v3172_v18, %v3164_v19  ;;  %v3177_v35 = vadd.f32 %v3173_v47, %v3165_v29  ;;  %v3178_v38 = vadd.f32 %v3174_v48, %v3166_v12  ;;  %v7897_v25 = vld [vmem:[%s4907_s22 + $0x380] sm:$0xff]  ;;  %v7901_v47 = vld [vmem:[%s4907_s22 + $0x388] sm:$0xff]  ;;  %v7905_v44 = vld [vmem:[%s4907_s22 + $0x390] sm:$0xff] }
 0x2d9   : > { %v3194_v59 = vrot.slane %v7452_v28, %v4871_v10  ;;  %v3206_v33 = vrot.slane %v7452_v28, %v4882_v14  ;;  %v3218_v50 = vrot.slane %v7452_v28, %v4884_v15  ;;  %9321 = vst [vmem:[#allocation96_spill] sm:$0xff] %v7901_v47  ;;  %9322 = vst [vmem:[#allocation97_spill] sm:$0xff] %v7905_v44  ;;  %v7909_v29 = vld [vmem:[%s4907_s22 + $0x398] sm:$0xff] }
 0x2da   : > { %v3187_v11 = vadd.f32 %v3183_v32, %v3175_v34  ;;  %v3188_v13 = vadd.f32 %v3184_v49, %v3176_v9  ;;  %v3189_v23 = vadd.f32 %v3185_v36, %v3177_v35  ;;  %v3190_v43 = vadd.f32 %v3186_v51, %v3178_v38  ;;  %9323 = vst [vmem:[#allocation98_spill] sm:$0xff] %v7909_v29  ;;  %v7913_v49 = vld [vmem:[%s4907_s22 + $0x3a0] sm:$0xff]  ;;  %v7919_v9 = vld [vmem:[%s4907_s22 + $0x3a8] sm:$0xff] }
 0x2db   : > { %v3195_v18 = vmul.f32 %v7897_v25, %v3194_v59  ;;  %v3196_v48 = vmul.f32 %v7901_v47, %v3194_v59  ;;  %v3197_v19 = vmul.f32 %v7905_v44, %v3194_v59  ;;  %v3198_v36 = vmul.f32 %v7909_v29, %v3194_v59  ;;  %9324 = vst [vmem:[#allocation99_spill] sm:$0xff] %v7913_v49  ;;  %v7923_v44 = vld [vmem:[%s4907_s22 + $0x3b0] sm:$0xff]  ;;  %v7927_v29 = vld [vmem:[%s4907_s22 + $0x3c0] sm:$0xff] }
 0x2dc   : > { %v3207_v12 = vmul.f32 %v7913_v49, %v3206_v33  ;;  %v3230_v32 = vrot.slane %v7452_v28, %v4886_v16  ;;  %9325 = vst [vmem:[#allocation100_spill] sm:$0xff] %v7919_v9  ;;  %v3208_v35 = vmul.f32 %v7919_v9, %v3206_v33  ;;  %9326 = vst [vmem:[#allocation101_spill] sm:$0xff] %v7923_v44  ;;  %v7931_v28 = vld [vmem:[%s4907_s22 + $0x3b8] sm:$0xff] }
 0x2dd   : > { %v3199_v51 = vadd.f32 %v3195_v18, %v3187_v11  ;;  %v3200_v34 = vadd.f32 %v3196_v48, %v3188_v13  ;;  %v3201_v38 = vadd.f32 %v3197_v19, %v3189_v23  ;;  %v3209_v59 = vmul.f32 %v7923_v44, %v3206_v33  ;;  %9327 = vst [vmem:[#allocation102_spill] sm:$0xff] %v7927_v29  ;;  %v7935_v18 = vld [vmem:[%s4907_s22 + $0x3e0] sm:$0xff]  ;;  %v7939_v19 = vld [vmem:[%s4907_s22 + $0x3c8] sm:$0xff] }
 0x2de   : > { %v3219_v49 = vmul.f32 %v7927_v29, %v3218_v50  ;;  %v3202_v47 = vadd.f32 %v3198_v36, %v3190_v43  ;;  %9328 = vst [vmem:[#allocation103_spill] sm:$0xff] %v7931_v28  ;;  %v3210_v13 = vmul.f32 %v7931_v28, %v3206_v33  ;;  %9329 = vst [vmem:[#allocation104_spill] sm:$0xff] %v7935_v18  ;;  %v7943_v43 = vld [vmem:[%s4907_s22 + $0x3d0] sm:$0xff] }
 0x2df   : > { %v3211_v11 = vadd.f32 %v3207_v12, %v3199_v51  ;;  %v3231_v23 = vmul.f32 %v7935_v18, %v3230_v32  ;;  %v3212_v48 = vadd.f32 %v3208_v35, %v3200_v34  ;;  %9330 = vst [vmem:[#allocation105_spill] sm:$0xff] %v7939_v19  ;;  %v3220_v44 = vmul.f32 %v7939_v19, %v3218_v50  ;;  %v7947_v12 = vld [vmem:[%s4907_s22 + $0x3d8] sm:$0xff]  ;;  %v7951_v35 = vld [vmem:[%s4907_s22 + $0x3e8] sm:$0xff] }
 0x2e0   : > { %v3213_v29 = vadd.f32 %v3209_v59, %v3201_v38  ;;  %9331 = vst [vmem:[#allocation106_spill] sm:$0xff] %v7943_v43  ;;  %v3221_v33 = vmul.f32 %v7943_v43, %v3218_v50  ;;  %v3214_v36 = vadd.f32 %v3210_v13, %v3202_v47  ;;  %v3222_v51 = vmul.f32 %v7947_v12, %v3218_v50  ;;  %v7959_v19 = vld [vmem:[%s4907_s22 + $0x3f8] sm:$0xff]  ;;  %v3923_v13 = vld [vmem:[%s4836_s7 + $0x7] ss:$0 sm:$0xff] }
 0x2e1   : > { %v3223_v9 = vadd.f32 %v3219_v49, %v3211_v11  ;;  %v3224_v34 = vadd.f32 %v3220_v44, %v3212_v48  ;;  %v3232_v28 = vmul.f32 %v7951_v35, %v3230_v32  ;;  %v7955_v11 = vld [vmem:[%s4907_s22 + $0x3f0] sm:$0xff]  ;;  %v3234_v47 = vmul.f32 %v7959_v19, %v3230_v32 }
 0x2e2   : > { %v3225_v49 = vadd.f32 %v3221_v33, %v3213_v29  ;;  %v3233_v38 = vmul.f32 %v7955_v11, %v3230_v32  ;;  %v3226_v59 = vadd.f32 %v3222_v51, %v3214_v36  ;;  %v3248_v44 = vmul.f32 %v7339_v30, %v3923_v13 }
 0x2e3   : > { %v3235_v18 = vadd.f32 %v3231_v23, %v3223_v9  ;;  %v3236_v43 = vadd.f32 %v3232_v28, %v3224_v34  ;;  %v3249_v23 = vmul.f32 %v7343_v56, %v3923_v13  ;;  %v3251_v29 = vmul.f32 %v7351_v45, %v3923_v13 }
 0x2e4   : > { %v3237_v50 = vadd.f32 %v3233_v38, %v3225_v49  ;;  %v3238_v9 = vadd.f32 %v3234_v47, %v3226_v59  ;;  %v3252_v48 = vadd.f32 %v7355_v39, %v3248_v44 }
 0x2e5   : > { %4036 = vtanh.f32 %v3235_v18  ;;  %v3250_v18 = vmul.f32 %v7347_v54, %v3923_v13  ;;  %v3253_v32 = vadd.f32 %v7359_v62, %v3249_v23  ;;  %v3255_v36 = vadd.f32 %v7367_v26, %v3251_v29 }
 0x2e6   : > { %4038 = vtanh.f32 %v3236_v43 }
 0x2e7   : > { %4040 = vtanh.f32 %v3237_v50  ;;  %v3254_v28 = vadd.f32 %v7363_v55, %v3250_v18 }
 0x2e8   : > { %4042 = vtanh.f32 %v3238_v9 }
 0x2ef   : > { %v4037_v33 = vpop.eup %4036 }
 0x2f0   : > { %v3259_v30 = vrot.slane %v4037_v33, %v4851_v2  ;;  %v3271_v56 = vrot.slane %v4037_v33, %v4853_v3  ;;  %v3283_v54 = vrot.slane %v4037_v33, %v4855_v4  ;;  %v3295_v45 = vrot.slane %v4037_v33, %v4857_v5 }
 0x2f1   : > { %v3307_v43 = vrot.slane %v4037_v33, %v4871_v10  ;;  %v3319_v39 = vrot.slane %v4037_v33, %v4882_v14  ;;  %v3331_v51 = vrot.slane %v4037_v33, %v4884_v15  ;;  %v3343_v62 = vrot.slane %v4037_v33, %v4886_v16  ;;  %v7991_v33 = vpop.eup %4038 }
 0x2f2   : > { %v3260_v55 = vmul.f32 %v7385_v60, %v3259_v30  ;;  %v3261_v26 = vmul.f32 %v7389_v31, %v3259_v30  ;;  %v3262_v34 = vmul.f32 %v7393_v61, %v3259_v30  ;;  %v3263_v49 = vmul.f32 %v7397_v1, %v3259_v30 }
 0x2f3   : > { %v3272_v38 = vmul.f32 %v7401_v0, %v3271_v56  ;;  %v3273_v59 = vmul.f32 %v7405_v52, %v3271_v56  ;;  %v3274_v47 = vmul.f32 %v7409_v63, %v3271_v56  ;;  %v3275_v13 = vmul.f32 %v7413_v7, %v3271_v56 }
 0x2f4   : > { %v3264_v50 = vadd.f32 %v3260_v55, %v3252_v48  ;;  %v3265_v44 = vadd.f32 %v3261_v26, %v3253_v32  ;;  %v3266_v9 = vadd.f32 %v3262_v34, %v3254_v28  ;;  %v3267_v23 = vadd.f32 %v3263_v49, %v3255_v36  ;;  %v7997_v32 = vpop.eup %4040  ;;  %v9334_v49 = vld [vmem:[#allocation111_spill] sm:$0xff] }
 0x2f5   : > { %v3284_v60 = vmul.f32 %v7417_v57, %v3283_v54  ;;  %v3285_v31 = vmul.f32 %v7421_v41, %v3283_v54  ;;  %v3286_v61 = vmul.f32 %v7425_v6, %v3283_v54  ;;  %v3287_v1 = vmul.f32 %v7429_v37, %v3283_v54  ;;  %v7999_v36 = vpop.eup %4042  ;;  %v9332_v54 = vld [vmem:[#allocation109_spill] sm:$0xff] }
 0x2f6   : > { %v3276_v18 = vadd.f32 %v3272_v38, %v3264_v50  ;;  %v3277_v0 = vadd.f32 %v3273_v59, %v3265_v44  ;;  %v3278_v29 = vadd.f32 %v3274_v47, %v3266_v9  ;;  %v3279_v52 = vadd.f32 %v3275_v13, %v3267_v23  ;;  %v9335_v59 = vld [vmem:[#allocation112_spill] sm:$0xff]  ;;  %v9337_v23 = vld [vmem:[#allocation13_spill] sm:$0xff] }
 0x2f7   : > { %v3296_v63 = vmul.f32 %v7435_v21, %v3295_v45  ;;  %v3297_v7 = vmul.f32 %v7439_v24, %v3295_v45  ;;  %v3298_v48 = vmul.f32 %v7443_v27, %v3295_v45  ;;  %v3299_v57 = vmul.f32 %v7447_v46, %v3295_v45  ;;  %v9333_v45 = vld [vmem:[#allocation110_spill] sm:$0xff]  ;;  %v9336_v13 = vld [vmem:[#allocation12_spill] sm:$0xff] }
 0x2f8   : > { %v3288_v41 = vadd.f32 %v3284_v60, %v3276_v18  ;;  %v3289_v6 = vadd.f32 %v3285_v31, %v3277_v0  ;;  %v3290_v28 = vadd.f32 %v3286_v61, %v3278_v29  ;;  %v3291_v37 = vadd.f32 %v3287_v1, %v3279_v52  ;;  %v9338_v60 = vld [vmem:[#allocation14_spill] sm:$0xff]  ;;  %v9339_v31 = vld [vmem:[#allocation15_spill] sm:$0xff]  ;;  %v9340_v1 = vld [vmem:[#allocation16_spill] sm:$0xff] }
 0x2f9   : > { %v3308_v30 = vmul.f32 %v7455_v53, %v3307_v43  ;;  %v3309_v56 = vmul.f32 %v7459_v40, %v3307_v43  ;;  %v3310_v21 = vmul.f32 %v7463_v42, %v3307_v43  ;;  %v3311_v24 = vmul.f32 %v9332_v54, %v3307_v43 }
 0x2fa   : > { %v3300_v55 = vadd.f32 %v3296_v63, %v3288_v41  ;;  %v3301_v27 = vadd.f32 %v3297_v7, %v3289_v6  ;;  %v3302_v26 = vadd.f32 %v3298_v48, %v3290_v28  ;;  %v3303_v46 = vadd.f32 %v3299_v57, %v3291_v37  ;;  %v9341_v7 = vld [vmem:[#allocation17_spill] sm:$0xff]  ;;  %v9342_v57 = vld [vmem:[#allocation18_spill] sm:$0xff]  ;;  %v9343_v41 = vld [vmem:[#allocation19_spill] sm:$0xff] }
 0x2fb   : > { %v3320_v34 = vmul.f32 %v9333_v45, %v3319_v39  ;;  %v3321_v38 = vmul.f32 %v9334_v49, %v3319_v39  ;;  %v3322_v47 = vmul.f32 %v9335_v59, %v3319_v39  ;;  %v3323_v50 = vmul.f32 %v9336_v13, %v3319_v39  ;;  %v9344_v28 = vld [vmem:[#allocation20_spill] sm:$0xff] }
 0x2fc   : > { %v3312_v44 = vadd.f32 %v3308_v30, %v3300_v55  ;;  %v3313_v53 = vadd.f32 %v3309_v56, %v3301_v27  ;;  %v3314_v9 = vadd.f32 %v3310_v21, %v3302_v26  ;;  %v3315_v40 = vadd.f32 %v3311_v24, %v3303_v46 }
 0x2fd   : > { %v3332_v42 = vmul.f32 %v9337_v23, %v3331_v51  ;;  %v3333_v43 = vmul.f32 %v9338_v60, %v3331_v51  ;;  %v3334_v61 = vmul.f32 %v9339_v31, %v3331_v51  ;;  %v3335_v18 = vmul.f32 %v9340_v1, %v3331_v51 }
 0x2fe   : > { %v3324_v0 = vadd.f32 %v3320_v34, %v3312_v44  ;;  %v3325_v29 = vadd.f32 %v3321_v38, %v3313_v53  ;;  %v3326_v52 = vadd.f32 %v3322_v47, %v3314_v9  ;;  %v3327_v63 = vadd.f32 %v3323_v50, %v3315_v40  ;;  %v9345_v34 = vld [vmem:[#allocation21_spill] sm:$0xff]  ;;  %v9346_v38 = vld [vmem:[#allocation22_spill] sm:$0xff]  ;;  %v9347_v47 = vld [vmem:[#allocation23_spill] sm:$0xff] }
 0x2ff   : > { %v3344_v48 = vmul.f32 %v9341_v7, %v3343_v62  ;;  %v3345_v39 = vmul.f32 %v9342_v57, %v3343_v62  ;;  %v3346_v6 = vmul.f32 %v9343_v41, %v3343_v62  ;;  %v3347_v37 = vmul.f32 %v9344_v28, %v3343_v62  ;;  %v9348_v50 = vld [vmem:[#allocation24_spill] sm:$0xff]  ;;  %v9349_v53 = vld [vmem:[#allocation25_spill] sm:$0xff]  ;;  %v9350_v40 = vld [vmem:[#allocation26_spill] sm:$0xff] }
 0x300   : > { %v3336_v30 = vadd.f32 %v3332_v42, %v3324_v0  ;;  %v3337_v56 = vadd.f32 %v3333_v43, %v3325_v29  ;;  %v3338_v21 = vadd.f32 %v3334_v61, %v3326_v52  ;;  %v3339_v54 = vadd.f32 %v3335_v18, %v3327_v63  ;;  %v9351_v42 = vld [vmem:[#allocation27_spill] sm:$0xff]  ;;  %v9352_v43 = vld [vmem:[#allocation28_spill] sm:$0xff]  ;;  %v9353_v29 = vld [vmem:[#allocation29_spill] sm:$0xff] }
 0x301   : > { %v3355_v24 = vrot.slane %v7991_v33, %v4851_v2  ;;  %v3367_v51 = vrot.slane %v7991_v33, %v4853_v3  ;;  %v3379_v55 = vrot.slane %v7991_v33, %v4855_v4  ;;  %v3391_v27 = vrot.slane %v7991_v33, %v4857_v5  ;;  %v9354_v63 = vld [vmem:[#allocation30_spill] sm:$0xff] }
 0x302   : > { %v3348_v26 = vadd.f32 %v3344_v48, %v3336_v30  ;;  %v3349_v46 = vadd.f32 %v3345_v39, %v3337_v56  ;;  %v3350_v45 = vadd.f32 %v3346_v6, %v3338_v21  ;;  %v3351_v62 = vadd.f32 %v3347_v37, %v3339_v54  ;;  %v9355_v48 = vld [vmem:[#allocation31_spill] sm:$0xff]  ;;  %v9356_v30 = vld [vmem:[#allocation32_spill] sm:$0xff]  ;;  %v9357_v21 = vld [vmem:[#allocation33_spill] sm:$0xff] }
 0x303   : > { %v3356_v49 = vmul.f32 %v9345_v34, %v3355_v24  ;;  %v3357_v59 = vmul.f32 %v9346_v38, %v3355_v24  ;;  %v3358_v13 = vmul.f32 %v9347_v47, %v3355_v24  ;;  %v3359_v44 = vmul.f32 %v9348_v50, %v3355_v24  ;;  %v9358_v24 = vld [vmem:[#allocation34_spill] sm:$0xff] }
 0x304   : > { %v3368_v9 = vmul.f32 %v9349_v53, %v3367_v51  ;;  %v3369_v23 = vmul.f32 %v9350_v40, %v3367_v51  ;;  %v3370_v60 = vmul.f32 %v9351_v42, %v3367_v51  ;;  %v3371_v31 = vmul.f32 %v9352_v43, %v3367_v51 }
 0x305   : > { %v3360_v61 = vadd.f32 %v3356_v49, %v3348_v26  ;;  %v3361_v1 = vadd.f32 %v3357_v59, %v3349_v46  ;;  %v3362_v18 = vadd.f32 %v3358_v13, %v3350_v45  ;;  %v3363_v0 = vadd.f32 %v3359_v44, %v3351_v62  ;;  %v9359_v26 = vld [vmem:[#allocation35_spill] sm:$0xff]  ;;  %v9360_v44 = vld [vmem:[#allocation36_spill] sm:$0xff] }
 0x306   : > { %v3380_v52 = vmul.f32 %v9353_v29, %v3379_v55  ;;  %v3381_v7 = vmul.f32 %v9354_v63, %v3379_v55  ;;  %v3382_v57 = vmul.f32 %v9355_v48, %v3379_v55  ;;  %v3383_v39 = vmul.f32 %v7583_v8, %v3379_v55 }
 0x307   : > { %v3372_v41 = vadd.f32 %v3368_v9, %v3360_v61  ;;  %v3373_v6 = vadd.f32 %v3369_v23, %v3361_v1  ;;  %v3374_v28 = vadd.f32 %v3370_v60, %v3362_v18  ;;  %v3375_v37 = vadd.f32 %v3371_v31, %v3363_v0  ;;  %v9361_v9 = vld [vmem:[#allocation37_spill] sm:$0xff]  ;;  %v9362_v23 = vld [vmem:[#allocation38_spill] sm:$0xff]  ;;  %v9363_v60 = vld [vmem:[#allocation39_spill] sm:$0xff] }
 0x308   : > { %v3392_v56 = vmul.f32 %v9356_v30, %v3391_v27  ;;  %v3393_v54 = vmul.f32 %v9357_v21, %v3391_v27  ;;  %v3394_v51 = vmul.f32 %v9358_v24, %v3391_v27  ;;  %v3395_v46 = vmul.f32 %v9359_v26, %v3391_v27  ;;  %v9364_v31 = vld [vmem:[#allocation40_spill] sm:$0xff]  ;;  %v9365_v1 = vld [vmem:[#allocation41_spill] sm:$0xff]  ;;  %v9366_v0 = vld [vmem:[#allocation42_spill] sm:$0xff] }
 0x309   : > { %v3384_v45 = vadd.f32 %v3380_v52, %v3372_v41  ;;  %v3385_v62 = vadd.f32 %v3381_v7, %v3373_v6  ;;  %v3386_v34 = vadd.f32 %v3382_v57, %v3374_v28  ;;  %v3387_v49 = vadd.f32 %v3383_v39, %v3375_v37  ;;  %v9367_v52 = vld [vmem:[#allocation43_spill] sm:$0xff]  ;;  %v9368_v39 = vld [vmem:[#allocation44_spill] sm:$0xff]  ;;  %v9369_v6 = vld [vmem:[#allocation45_spill] sm:$0xff] }
 0x30a   : > { %v3403_v38 = vrot.slane %v7991_v33, %v4871_v10  ;;  %v3415_v8 = vrot.slane %v7991_v33, %v4882_v14  ;;  %v3427_v55 = vrot.slane %v7991_v33, %v4884_v15  ;;  %v3439_v59 = vrot.slane %v7991_v33, %v4886_v16  ;;  %v9370_v37 = vld [vmem:[#allocation46_spill] sm:$0xff] }
 0x30b   : > { %v3396_v47 = vadd.f32 %v3392_v56, %v3384_v45  ;;  %v3397_v13 = vadd.f32 %v3393_v54, %v3385_v62  ;;  %v3398_v50 = vadd.f32 %v3394_v51, %v3386_v34  ;;  %v3399_v27 = vadd.f32 %v3395_v46, %v3387_v49  ;;  %v9371_v56 = vld [vmem:[#allocation47_spill] sm:$0xff]  ;;  %v9372_v46 = vld [vmem:[#allocation48_spill] sm:$0xff]  ;;  %v9373_v62 = vld [vmem:[#allocation49_spill] sm:$0xff] }
 0x30c   : > { %v3404_v53 = vmul.f32 %v9360_v44, %v3403_v38  ;;  %v3405_v40 = vmul.f32 %v9361_v9, %v3403_v38  ;;  %v3406_v42 = vmul.f32 %v9362_v23, %v3403_v38  ;;  %v3407_v43 = vmul.f32 %v9363_v60, %v3403_v38  ;;  %v9374_v49 = vld [vmem:[#allocation50_spill] sm:$0xff] }
 0x30d   : > { %v3416_v61 = vmul.f32 %v9364_v31, %v3415_v8  ;;  %v3417_v18 = vmul.f32 %v9365_v1, %v3415_v8  ;;  %v3418_v29 = vmul.f32 %v9366_v0, %v3415_v8  ;;  %v3419_v33 = vmul.f32 %v9367_v52, %v3415_v8  ;;  %v9375_v8 = vld [vmem:[#allocation51_spill] sm:$0xff] }
 0x30e   : > { %v3408_v63 = vadd.f32 %v3404_v53, %v3396_v47  ;;  %v3409_v7 = vadd.f32 %v3405_v40, %v3397_v13  ;;  %v3410_v48 = vadd.f32 %v3406_v42, %v3398_v50  ;;  %v3411_v57 = vadd.f32 %v3407_v43, %v3399_v27  ;;  %v9376_v43 = vld [vmem:[#allocation52_spill] sm:$0xff] }
 0x30f   : > { %v3428_v41 = vmul.f32 %v9368_v39, %v3427_v55  ;;  %v3429_v28 = vmul.f32 %v9369_v6, %v3427_v55  ;;  %v3430_v30 = vmul.f32 %v9370_v37, %v3427_v55  ;;  %v3431_v21 = vmul.f32 %v9371_v56, %v3427_v55 }
 0x310   : > { %v3420_v54 = vadd.f32 %v3416_v61, %v3408_v63  ;;  %v3421_v24 = vadd.f32 %v3417_v18, %v3409_v7  ;;  %v3422_v51 = vadd.f32 %v3418_v29, %v3410_v48  ;;  %v3423_v26 = vadd.f32 %v3419_v33, %v3411_v57  ;;  %v9377_v61 = vld [vmem:[#allocation53_spill] sm:$0xff]  ;;  %v9378_v18 = vld [vmem:[#allocation54_spill] sm:$0xff]  ;;  %v9379_v29 = vld [vmem:[#allocation55_spill] sm:$0xff] }
 0x311   : > { %v3440_v45 = vmul.f32 %v9372_v46, %v3439_v59  ;;  %v3441_v34 = vmul.f32 %v9373_v62, %v3439_v59  ;;  %v3442_v38 = vmul.f32 %v9374_v49, %v3439_v59  ;;  %v3443_v47 = vmul.f32 %v9375_v8, %v3439_v59  ;;  %v9380_v33 = vld [vmem:[#allocation56_spill] sm:$0xff]  ;;  %v9381_v7 = vld [vmem:[#allocation57_spill] sm:$0xff]  ;;  %v9382_v57 = vld [vmem:[#allocation58_spill] sm:$0xff] }
 0x312   : > { %v3432_v13 = vadd.f32 %v3428_v41, %v3420_v54  ;;  %v3433_v50 = vadd.f32 %v3429_v28, %v3421_v24  ;;  %v3434_v27 = vadd.f32 %v3430_v30, %v3422_v51  ;;  %v3435_v44 = vadd.f32 %v3431_v21, %v3423_v26  ;;  %v9383_v41 = vld [vmem:[#allocation59_spill] sm:$0xff]  ;;  %v9384_v21 = vld [vmem:[#allocation60_spill] sm:$0xff]  ;;  %v9385_v24 = vld [vmem:[#allocation61_spill] sm:$0xff] }
 0x313   : > { %v3451_v53 = vrot.slane %v7997_v32, %v4851_v2  ;;  %v3463_v55 = vrot.slane %v7997_v32, %v4853_v3  ;;  %v3475_v9 = vrot.slane %v7997_v32, %v4855_v4  ;;  %v3487_v40 = vrot.slane %v7997_v32, %v4857_v5  ;;  %v9386_v26 = vld [vmem:[#allocation62_spill] sm:$0xff]  ;;  %v9387_v8 = vld [vmem:[#allocation63_spill] sm:$0xff] }
 0x314   : > { %v3444_v23 = vadd.f32 %v3440_v45, %v3432_v13  ;;  %v3445_v42 = vadd.f32 %v3441_v34, %v3433_v50  ;;  %v3446_v60 = vadd.f32 %v3442_v38, %v3434_v27  ;;  %v3447_v59 = vadd.f32 %v3443_v47, %v3435_v44  ;;  %v9388_v13 = vld [vmem:[#allocation64_spill] sm:$0xff]  ;;  %v9389_v27 = vld [vmem:[#allocation65_spill] sm:$0xff] }
 0x315   : > { %v3452_v31 = vmul.f32 %v9376_v43, %v3451_v53  ;;  %v3453_v1 = vmul.f32 %v9377_v61, %v3451_v53  ;;  %v3454_v0 = vmul.f32 %v9378_v18, %v3451_v53  ;;  %v3455_v52 = vmul.f32 %v9379_v29, %v3451_v53  ;;  %v9390_v53 = vld [vmem:[#allocation66_spill] sm:$0xff] }
 0x316   : > { %v3464_v63 = vmul.f32 %v9380_v33, %v3463_v55  ;;  %v3465_v48 = vmul.f32 %v9381_v7, %v3463_v55  ;;  %v3466_v39 = vmul.f32 %v9382_v57, %v3463_v55  ;;  %v3467_v6 = vmul.f32 %v9383_v41, %v3463_v55 }
 0x317   : > { %v3456_v28 = vadd.f32 %v3452_v31, %v3444_v23  ;;  %v3457_v37 = vadd.f32 %v3453_v1, %v3445_v42  ;;  %v3458_v30 = vadd.f32 %v3454_v0, %v3446_v60  ;;  %v3459_v56 = vadd.f32 %v3455_v52, %v3447_v59  ;;  %v9391_v0 = vld [vmem:[#allocation67_spill] sm:$0xff]  ;;  %v9392_v52 = vld [vmem:[#allocation68_spill] sm:$0xff] }
 0x318   : > { %v3476_v54 = vmul.f32 %v9384_v21, %v3475_v9  ;;  %v3477_v51 = vmul.f32 %v9385_v24, %v3475_v9  ;;  %v3478_v46 = vmul.f32 %v9386_v26, %v3475_v9  ;;  %v3479_v45 = vmul.f32 %v7727_v58, %v3475_v9  ;;  %v9399_v26 = vld [vmem:[#allocation75_spill] sm:$0xff] }
 0x319   : > { %v3468_v62 = vadd.f32 %v3464_v63, %v3456_v28  ;;  %v3469_v34 = vadd.f32 %v3465_v48, %v3457_v37  ;;  %v3470_v49 = vadd.f32 %v3466_v39, %v3458_v30  ;;  %v3471_v38 = vadd.f32 %v3467_v6, %v3459_v56  ;;  %v9393_v63 = vld [vmem:[#allocation69_spill] sm:$0xff]  ;;  %v9394_v48 = vld [vmem:[#allocation70_spill] sm:$0xff]  ;;  %v9395_v39 = vld [vmem:[#allocation71_spill] sm:$0xff] }
 0x31a   : > { %v3488_v47 = vmul.f32 %v9387_v8, %v3487_v40  ;;  %v3489_v50 = vmul.f32 %v9388_v13, %v3487_v40  ;;  %v3490_v44 = vmul.f32 %v9389_v27, %v3487_v40  ;;  %v3491_v55 = vmul.f32 %v9390_v53, %v3487_v40  ;;  %v9396_v6 = vld [vmem:[#allocation72_spill] sm:$0xff]  ;;  %v9397_v37 = vld [vmem:[#allocation73_spill] sm:$0xff]  ;;  %v9398_v56 = vld [vmem:[#allocation74_spill] sm:$0xff] }
 0x31b   : > { %v3480_v23 = vadd.f32 %v3476_v54, %v3468_v62  ;;  %v3481_v42 = vadd.f32 %v3477_v51, %v3469_v34  ;;  %v3482_v60 = vadd.f32 %v3478_v46, %v3470_v49  ;;  %v3483_v59 = vadd.f32 %v3479_v45, %v3471_v38  ;;  %v9400_v45 = vld [vmem:[#allocation76_spill] sm:$0xff]  ;;  %v9401_v34 = vld [vmem:[#allocation77_spill] sm:$0xff]  ;;  %v9402_v38 = vld [vmem:[#allocation78_spill] sm:$0xff] }
 0x31c   : > { %v3499_v43 = vrot.slane %v7997_v32, %v4871_v10  ;;  %v3511_v58 = vrot.slane %v7997_v32, %v4882_v14  ;;  %v3523_v9 = vrot.slane %v7997_v32, %v4884_v15  ;;  %v3535_v31 = vrot.slane %v7997_v32, %v4886_v16 }
 0x31d   : > { %v3492_v61 = vadd.f32 %v3488_v47, %v3480_v23  ;;  %v3493_v1 = vadd.f32 %v3489_v50, %v3481_v42  ;;  %v3494_v18 = vadd.f32 %v3490_v44, %v3482_v60  ;;  %v3495_v40 = vadd.f32 %v3491_v55, %v3483_v59  ;;  %v9403_v44 = vld [vmem:[#allocation79_spill] sm:$0xff]  ;;  %v9404_v55 = vld [vmem:[#allocation80_spill] sm:$0xff]  ;;  %v9405_v42 = vld [vmem:[#allocation81_spill] sm:$0xff] }
 0x31e   : > { %v3500_v29 = vmul.f32 %v9391_v0, %v3499_v43  ;;  %v3501_v33 = vmul.f32 %v9392_v52, %v3499_v43  ;;  %v3502_v7 = vmul.f32 %v9393_v63, %v3499_v43  ;;  %v3503_v57 = vmul.f32 %v9394_v48, %v3499_v43  ;;  %v9406_v59 = vld [vmem:[#allocation82_spill] sm:$0xff] }
 0x31f   : > { %v3512_v41 = vmul.f32 %v9395_v39, %v3511_v58  ;;  %v3513_v28 = vmul.f32 %v9396_v6, %v3511_v58  ;;  %v3514_v30 = vmul.f32 %v9397_v37, %v3511_v58  ;;  %v3515_v32 = vmul.f32 %v9398_v56, %v3511_v58  ;;  %v9411_v37 = vld [vmem:[#allocation87_spill] sm:$0xff] }
 0x320   : > { %v3504_v21 = vadd.f32 %v3500_v29, %v3492_v61  ;;  %v3505_v54 = vadd.f32 %v3501_v33, %v3493_v1  ;;  %v3506_v24 = vadd.f32 %v3502_v7, %v3494_v18  ;;  %v3507_v51 = vadd.f32 %v3503_v57, %v3495_v40  ;;  %v9407_v7 = vld [vmem:[#allocation83_spill] sm:$0xff]  ;;  %v9408_v57 = vld [vmem:[#allocation84_spill] sm:$0xff] }
 0x321   : > { %v3524_v46 = vmul.f32 %v9399_v26, %v3523_v9  ;;  %v3525_v62 = vmul.f32 %v9400_v45, %v3523_v9  ;;  %v3526_v49 = vmul.f32 %v9401_v34, %v3523_v9  ;;  %v3527_v8 = vmul.f32 %v9402_v38, %v3523_v9 }
 0x322   : > { %v3516_v47 = vadd.f32 %v3512_v41, %v3504_v21  ;;  %v3517_v13 = vadd.f32 %v3513_v28, %v3505_v54  ;;  %v3518_v50 = vadd.f32 %v3514_v30, %v3506_v24  ;;  %v3519_v27 = vadd.f32 %v3515_v32, %v3507_v51  ;;  %v9409_v41 = vld [vmem:[#allocation85_spill] sm:$0xff]  ;;  %v9412_v30 = vld [vmem:[#allocation88_spill] sm:$0xff]  ;;  %v9414_v21 = vld [vmem:[#allocation90_spill] sm:$0xff] }
 0x323   : > { %v3536_v53 = vmul.f32 %v9403_v44, %v3535_v31  ;;  %v3537_v23 = vmul.f32 %v9404_v55, %v3535_v31  ;;  %v3538_v60 = vmul.f32 %v9405_v42, %v3535_v31  ;;  %v3539_v43 = vmul.f32 %v9406_v59, %v3535_v31  ;;  %v9418_v55 = vld [vmem:[#allocation94_spill] sm:$0xff]  ;;  %v9419_v42 = vld [vmem:[#allocation95_spill] sm:$0xff] }
 0x324   : > { %v3528_v58 = vadd.f32 %v3524_v46, %v3516_v47  ;;  %v3529_v61 = vadd.f32 %v3525_v62, %v3517_v13  ;;  %v3530_v1 = vadd.f32 %v3526_v49, %v3518_v50  ;;  %v3531_v18 = vadd.f32 %v3527_v8, %v3519_v27  ;;  %v9415_v46 = vld [vmem:[#allocation91_spill] sm:$0xff]  ;;  %v9416_v62 = vld [vmem:[#allocation92_spill] sm:$0xff]  ;;  %v9417_v49 = vld [vmem:[#allocation93_spill] sm:$0xff] }
 0x325   : > { %v3547_v40 = vrot.slane %v7999_v36, %v4851_v2  ;;  %v3559_v9 = vrot.slane %v7999_v36, %v4853_v3  ;;  %v3571_v0 = vrot.slane %v7999_v36, %v4855_v4  ;;  %v3583_v29 = vrot.slane %v7999_v36, %v4857_v5  ;;  %v9410_v2 = vld [vmem:[#allocation86_spill] sm:$0xff]  ;;  %v9413_v4 = vld [vmem:[#allocation89_spill] sm:$0xff] }
 0x326   : > { %v3540_v52 = vadd.f32 %v3536_v53, %v3528_v58  ;;  %v3541_v33 = vadd.f32 %v3537_v23, %v3529_v61  ;;  %v3542_v63 = vadd.f32 %v3538_v60, %v3530_v1  ;;  %v3543_v31 = vadd.f32 %v3539_v43, %v3531_v18 }
 0x327   : > { %v3548_v48 = vmul.f32 %v9407_v7, %v3547_v40  ;;  %v3549_v39 = vmul.f32 %v9408_v57, %v3547_v40  ;;  %v3550_v6 = vmul.f32 %v9409_v41, %v3547_v40  ;;  %v3551_v28 = vmul.f32 %v9410_v2, %v3547_v40  ;;  %v9424_v57 = vld [vmem:[#allocation100_spill] sm:$0xff] }
 0x328   : > { %v3560_v3 = vmul.f32 %v9411_v37, %v3559_v9  ;;  %v3561_v56 = vmul.f32 %v9412_v30, %v3559_v9  ;;  %v3562_v32 = vmul.f32 %v9413_v4, %v3559_v9  ;;  %v3563_v5 = vmul.f32 %v9414_v21, %v3559_v9  ;;  %v9428_v30 = vld [vmem:[#allocation105_spill] sm:$0xff]  ;;  %v9429_v4 = vld [vmem:[#allocation106_spill] sm:$0xff] }
 0x329   : > { %v3552_v54 = vadd.f32 %v3548_v48, %v3540_v52  ;;  %v3553_v24 = vadd.f32 %v3549_v39, %v3541_v33  ;;  %v3554_v51 = vadd.f32 %v3550_v6, %v3542_v63  ;;  %v3555_v26 = vadd.f32 %v3551_v28, %v3543_v31  ;;  %v9420_v52 = vld [vmem:[#allocation96_spill] sm:$0xff]  ;;  %v9421_v63 = vld [vmem:[#allocation97_spill] sm:$0xff]  ;;  %v9423_v48 = vld [vmem:[#allocation99_spill] sm:$0xff] }
 0x32a   : > { %v3572_v45 = vmul.f32 %v9415_v46, %v3571_v0  ;;  %v3573_v34 = vmul.f32 %v9416_v62, %v3571_v0  ;;  %v3574_v38 = vmul.f32 %v9417_v49, %v3571_v0  ;;  %v3575_v8 = vmul.f32 %v7871_v17, %v3571_v0  ;;  %v9426_v6 = vld [vmem:[#allocation103_spill] sm:$0xff] }
 0x32b   : > { %v3564_v47 = vadd.f32 %v3560_v3, %v3552_v54  ;;  %v3565_v13 = vadd.f32 %v3561_v56, %v3553_v24  ;;  %v3566_v50 = vadd.f32 %v3562_v32, %v3554_v51  ;;  %v3567_v27 = vadd.f32 %v3563_v5, %v3555_v26  ;;  %v9427_v3 = vld [vmem:[#allocation102_spill] sm:$0xff]  ;;  %v9430_v26 = vld [vmem:[#allocation104_spill] sm:$0xff] }
 0x32c   : > { %v3584_v44 = vmul.f32 %v7875_v20, %v3583_v29  ;;  %v3585_v53 = vmul.f32 %v7879_v22, %v3583_v29  ;;  %v3586_v23 = vmul.f32 %v9418_v55, %v3583_v29  ;;  %v3587_v60 = vmul.f32 %v9419_v42, %v3583_v29 }
 0x32d   : > { %v3576_v59 = vadd.f32 %v3572_v45, %v3564_v47  ;;  %v3577_v43 = vadd.f32 %v3573_v34, %v3565_v13  ;;  %v3578_v58 = vadd.f32 %v3574_v38, %v3566_v50  ;;  %v3579_v61 = vadd.f32 %v3575_v8, %v3567_v27 }
 0x32e   : > { %v3595_v1 = vrot.slane %v7999_v36, %v4871_v10  ;;  %v3607_v17 = vrot.slane %v7999_v36, %v4882_v14  ;;  %v3619_v18 = vrot.slane %v7999_v36, %v4884_v15  ;;  %v3631_v22 = vrot.slane %v7999_v36, %v4886_v16  ;;  %v9422_v10 = vld [vmem:[#allocation98_spill] sm:$0xff]  ;;  %v9425_v15 = vld [vmem:[#allocation101_spill] sm:$0xff] }
 0x32f   : > { %v3588_v20 = vadd.f32 %v3584_v44, %v3576_v59  ;;  %v3589_v40 = vadd.f32 %v3585_v53, %v3577_v43  ;;  %v3590_v9 = vadd.f32 %v3586_v23, %v3578_v58  ;;  %v3591_v0 = vadd.f32 %v3587_v60, %v3579_v61  ;;  %v269_v44 = vld [vmem:[%s4844_s29 + $0x48] sm:$0xff] }
 0x330   : > { %v3596_v29 = vmul.f32 %v7897_v25, %v3595_v1  ;;  %v3597_v33 = vmul.f32 %v9420_v52, %v3595_v1  ;;  %v3598_v31 = vmul.f32 %v9421_v63, %v3595_v1  ;;  %v3599_v7 = vmul.f32 %v9422_v10, %v3595_v1 }
 0x331   : > { %v3608_v14 = vmul.f32 %v9423_v48, %v3607_v17  ;;  %v3609_v39 = vmul.f32 %v9424_v57, %v3607_v17  ;;  %v3610_v41 = vmul.f32 %v9425_v15, %v3607_v17  ;;  %v3611_v16 = vmul.f32 %v9426_v6, %v3607_v17 }
 0x332   : > { %v3600_v36 = vadd.f32 %v3596_v29, %v3588_v20  ;;  %v3601_v2 = vadd.f32 %v3597_v33, %v3589_v40  ;;  %v3602_v28 = vadd.f32 %v3598_v31, %v3590_v9  ;;  %v3603_v37 = vadd.f32 %v3599_v7, %v3591_v0  ;;  %v276_v0 = vld [vmem:[%s4844_s29 + $0x80] sm:$0x1] }
 0x333   : > { %v3620_v25 = vmul.f32 %v9427_v3, %v3619_v18  ;;  %v3621_v56 = vmul.f32 %v9428_v30, %v3619_v18  ;;  %v3622_v32 = vmul.f32 %v9429_v4, %v3619_v18  ;;  %v3623_v21 = vmul.f32 %v7947_v12, %v3619_v18 }
 0x334   : > { %v3612_v5 = vadd.f32 %v3608_v14, %v3600_v36  ;;  %v3613_v54 = vadd.f32 %v3609_v39, %v3601_v2  ;;  %v3614_v24 = vadd.f32 %v3610_v41, %v3602_v28  ;;  %v3615_v51 = vadd.f32 %v3611_v16, %v3603_v37 }
 0x335   : > { %v3632_v46 = vmul.f32 %v9430_v26, %v3631_v22  ;;  %v3633_v45 = vmul.f32 %v7951_v35, %v3631_v22  ;;  %v3634_v62 = vmul.f32 %v7955_v11, %v3631_v22  ;;  %v3635_v34 = vmul.f32 %v7959_v19, %v3631_v22  ;;  %v268_v35 = vld [vmem:[%s4844_s29 + $0x40] sm:$0xff]  ;;  %v270_v11 = vld [vmem:[%s4844_s29 + $0x50] sm:$0xff]  ;;  %v271_v19 = vld [vmem:[%s4844_s29 + $0x58] sm:$0xff] }
 0x336   : > { %v3624_v49 = vadd.f32 %v3620_v25, %v3612_v5  ;;  %v3625_v38 = vadd.f32 %v3621_v56, %v3613_v54  ;;  %v3626_v8 = vadd.f32 %v3622_v32, %v3614_v24  ;;  %v3627_v12 = vadd.f32 %v3623_v21, %v3615_v51 }
 0x338   : > { %v3636_v47 = vadd.f32 %v3632_v46, %v3624_v49  ;;  %v3637_v13 = vadd.f32 %v3633_v45, %v3625_v38  ;;  %v3638_v50 = vadd.f32 %v3634_v62, %v3626_v8  ;;  %v3639_v27 = vadd.f32 %v3635_v34, %v3627_v12 }
 0x33a   : > { %4044 = vtanh.f32 %v3636_v47 }
 0x33b   : > { %4046 = vtanh.f32 %v3637_v13 }
 0x33c   : > { %4048 = vtanh.f32 %v3638_v50 }
 0x33d   : > { %4050 = vtanh.f32 %v3639_v27 }
 0x344   : > { %v4045_v53 = vpop.eup %4044 }
 0x345   : > { %v4047_v55 = vpop.eup %4046  ;;  %v3644_v23 = vmul.f32 %v4045_v53, %v268_v35 }
 0x346   : > { %v4049_v42 = vpop.eup %4048  ;;  %v3645_v60 = vmul.f32 %v4047_v55, %v269_v44 }
 0x347   : > { %v4051_v59 = vpop.eup %4050  ;;  %v3646_v43 = vmul.f32 %v4049_v42, %v270_v11 }
 0x348   : > { %v3647_v58 = vmul.f32 %v4051_v59, %v271_v19  ;;  %v3648_v61 = vadd.f32 %v3645_v60, %v3644_v23 }
 0x34a   : > { %v3649_v1 = vadd.f32 %v3648_v61, %v3646_v43 }
 0x34c   : > { %v3650_v17 = vadd.f32 %v3649_v1, %v3647_v58 }
 0x34e   : > { %v3651_v18 = vrot.slane %v3650_v17, 4 }
 0x350   : > { %v3652_v22 = vadd.f32 %v3651_v18, %v3650_v17 }
 0x352   : > { %v3653_v20 = vrot.slane %v3652_v22, 2 }
 0x354   : > { %v3654_v40 = vadd.f32 %v3653_v20, %v3652_v22 }
 0x356   : > { %v3655_v9 = vrot.slane %v3654_v40, 1 }
 0x358   : > { %v3656_v29 = vadd.f32 %v3655_v9, %v3654_v40 }
 0x35a   : > { %v3657_v52 = vadd.f32 %v3656_v29, %v276_v0 }
 0x35c   : > { %3658 = vst [vmem:[%s259_s17] sm:$0x1] %v3657_v52 }
 0x35d   : > { %4563 = shalt.err (!%p4560_p10)
}
 0x35e   : > { %s4564_s10 = scalar_lea.hbm %s8171_s9, 16  ;;  %s4568_s27 = scalar_lea.hbm %s8218_s3, 32 }
 0x35f   : > { %p4565_p11 = scmp.ne.s32.totalorder %s8171_s9, %s4564_s10  ;;  %p4569_p4 = scmp.lt.u32.totalorder %s8171_s9, %s8218_s3 }
 0x360   : > { %p4570_p1 = scmp.lt.u32.totalorder %s4568_s27, %s4564_s10  ;;  %p4572_p13 = scmp.lt.u32.totalorder %s4564_s10, %s8171_s9 }
 0x361   : > { %p4566_p7 = pnand %p4565_p11, %p9431_p5 }
 0x362   : > { %p4571_p0 = por %p4570_p1, %p4569_p4 }
 0x363   : > { %p4567_p2 = pneg %p4566_p7 }
 0x364   : > { %p4573_p6 = por %p4572_p13, %p4571_p0 }
 0x366   : > { %p4574_p9 = pnand %p4573_p6, %p4567_p2 }
 0x368   : > { %4577 = shalt.err (!%p4574_p9)
}
 0x369   : > { %3935 = dma.vmem_to_hbm [thread:$0]  (%p9431_p5), %s8173_s25, 16, %s8171_s9, %s3660_s4  }
 0x36a PF: > { %s3684_s29 = sand.u32 1, %s4608_s12   ;;  %p9432_p12 = scmp.ne.s32.totalorder %s8625_s24, 0 }
 0x36b   : > { %p9433_p3 = scmp.ge.s32.totalorder %s4620_s15, 2  ;;  %s3685_s19 = scalar_lea.sflag [#allocation4], %s3684_s29 }
 0x36d   : > { %p3948_p8 = pnand %p9433_p3, %p9432_p12 }
 0x36f   : > { %4603 = dma.done.wait (!%p3948_p8), %s3685_s19, 16  }
 0x370   : > { %4605 = vsyncadd (!%p3948_p8), %s3685_s19, 4294967280  ;;  %p19_p10 = scmp.ge.s32.totalorder %s4674_s18, 4   ;;  %s9434_s12 = smov %s4612_s13 }
 0x371   : > { %s9435_s13 = smov %s4616_s14  ;;  %s9436_s14 = smov %s4686_s21 }
 0x372   : > { %s9437_s15 = smov %s4674_s18  ;;  %21 = sbr.rel (!%p19_p10) target bundleno = 9 (0x9), region = 132 }
 0x379   :  { %3689 = vsyncpa [#allocation3], 1 }
 0x37a   :  { %3691 = vsyncpa [#allocation3 + $0x1], 1 }
 0x37b   :  { %3692 = vsyncpa [#allocation6], 1 }
 0x37c   :  { %3694 = vsyncpa [#allocation6 + $0x1], 1 }
 0x37d   :  { %3695 = vsyncpa [#allocation4], 1 }
 0x37e   :  { %3697 = vsyncpa [#allocation4 + $0x1], 1 }

</bundles_post_ra>
